<compile_context>
chip_gen: v7x
topology: tpu7x:2x2x1
jax: 0.10.0
libtpu: 0.0.40
codegen_flags: <defaults>
</compile_context>

<pallas_src>
import functools

import jax
import jax.numpy as jnp
from jax import lax
from jax.experimental import pallas as pl
from jax.experimental.pallas import tpu as pltpu

_VMEM_LIMIT = 32 * 1024 * 1024


def _round_up(a, b):
    return (a + b - 1) // b * b


def _tile_rows(m, max_tile):
    """Row-tile size: multiple of 8, capped at max_tile."""
    return min(max_tile, _round_up(m, 8))


# ----------------------------- Pallas kernels ------------------------------


def _proj_mse_kernel(x_ref, p_ref, y_ref, o_ref, *, m_rows, tm):
    """Px = x @ P^T (f32 MXU) fused with the squared-error reduction against y;
    emits one partial SSE per M-tile (Px never hits HBM).  Ragged last tile is
    masked in-kernel instead of padding in HBM."""
    i = pl.program_id(0)
    px = lax.dot_general(
        x_ref[...], p_ref[...],
        dimension_numbers=(((1,), (1,)), ((), ())),   # contract p axis of P
        preferred_element_type=jnp.float32,
        precision=lax.Precision.HIGHEST)
    d = px - y_ref[...]
    row = i * tm + lax.broadcasted_iota(jnp.int32, (tm, 1), 0)
    d = jnp.where(row < m_rows, d, 0.0)               # mask ragged tail rows
    s = jnp.sum(d * d, axis=1, keepdims=True)
    o_ref[...] = jnp.sum(s, axis=0, keepdims=True)    # (1, 1)


def _mse_kernel(x_ref, y_ref, o_ref, *, m_rows, tm):
    """Per-tile squared error for the P-is-None path (Px = x)."""
    i = pl.program_id(0)
    d = x_ref[...] - y_ref[...]
    row = i * tm + lax.broadcasted_iota(jnp.int32, (tm, 1), 0)
    d = jnp.where(row < m_rows, d, 0.0)
    s = jnp.sum(d * d, axis=1, keepdims=True)
    o_ref[...] = jnp.sum(s, axis=0, keepdims=True)


def _p_update_kernel(gamma_ref, y_ref, x_ref, p_ref, o_ref, *, m_rows, tk):
    """Accumulate S = y^T @ x over batch tiles directly into the output-resident
    (q, p) block; at the last step fuse the Frobenius normalisation and the
    (1-gamma)/gamma blend with the old P in place."""
    k = pl.program_id(0)

    @pl.when(k == 0)
    def _():
        o_ref[...] = jnp.zeros_like(o_ref)

    row = k * tk + lax.broadcasted_iota(jnp.int32, (tk, 1), 0)
    valid = row < m_rows
    yv = jnp.where(valid, y_ref[...], 0.0)             # zero ragged-tail rows
    xv = jnp.where(valid, x_ref[...], 0.0)
    o_ref[...] += lax.dot_general(
        yv, xv,
        dimension_numbers=(((0,), (0,)), ((), ())),     # contract batch axis
        preferred_element_type=jnp.float32,
        precision=lax.Precision.HIGHEST)

    @pl.when(k == pl.num_programs(0) - 1)
    def _():
        s = o_ref[...]
        ssq = jnp.sum(s * s, axis=1, keepdims=True)
        ssq = jnp.sum(ssq, axis=0, keepdims=True)       # (1, 1)
        inv_norm = lax.rsqrt(ssq)                       # 1 / ||y^T x||_F
        g = gamma_ref[0]
        o_ref[...] = (1.0 - g) * p_ref[...] + g * (s * inv_norm)


# ----------------------------- Pallas wrappers ------------------------------


def projected_mse_pallas(x2, P, y2, *, max_tile=1024):
    """mean((x @ P^T - y)^2) with the matmul + reduction fused per M-tile."""
    m, p = x2.shape
    q = y2.shape[1]
    tm = _tile_rows(m, max_tile)
    nt = pl.cdiv(m, tm)
    kern = functools.partial(_proj_mse_kernel, m_rows=m, tm=tm)
    partials = pl.pallas_call(
        kern,
        out_shape=jax.ShapeDtypeStruct((nt, 1, 1), jnp.float32),
        grid_spec=pltpu.PrefetchScalarGridSpec(
            num_scalar_prefetch=0,
            grid=(nt,),
            in_specs=[
                pl.BlockSpec((tm, p), lambda i: (i, 0)),   # x batch tile
                pl.BlockSpec((q, p), lambda i: (0, 0)),    # P, VMEM-resident
                pl.BlockSpec((tm, q), lambda i: (i, 0)),   # y batch tile
            ],
            out_specs=pl.BlockSpec((None, 1, 1), lambda i: (i, 0, 0)),
        ),
        compiler_params=pltpu.CompilerParams(
            dimension_semantics=("parallel",),
            vmem_limit_bytes=_VMEM_LIMIT),
    )(x2, P.astype(jnp.float32), y2)
    return jnp.sum(partials) / (m * q)


def mse_pallas(x2, y2, *, max_tile=1024):
    """mean((x - y)^2), tiled over rows (P is None path)."""
    m, q = y2.shape
    tm = _tile_rows(m, max_tile)
    nt = pl.cdiv(m, tm)
    kern = functools.partial(_mse_kernel, m_rows=m, tm=tm)
    partials = pl.pallas_call(
        kern,
        out_shape=jax.ShapeDtypeStruct((nt, 1, 1), jnp.float32),
        grid_spec=pltpu.PrefetchScalarGridSpec(
            num_scalar_prefetch=0,
            grid=(nt,),
            in_specs=[pl.BlockSpec((tm, q), lambda i: (i, 0)),
                      pl.BlockSpec((tm, q), lambda i: (i, 0))],
            out_specs=pl.BlockSpec((None, 1, 1), lambda i: (i, 0, 0)),
        ),
        compiler_params=pltpu.CompilerParams(
            dimension_semantics=("parallel",),
            vmem_limit_bytes=_VMEM_LIMIT),
    )(x2, y2)
    return jnp.sum(partials) / (m * q)


def p_update_pallas(P, x2, y2, gamma, *, max_tile=256):
    """P <- (1-gamma)*P + gamma * (y^T x)/||y^T x||_F, fully inside Pallas.
    gamma is a runtime SMEM scalar; no transposed copies of y are made."""
    m, p = x2.shape
    q = y2.shape[1]
    tk = _tile_rows(m, max_tile)
    nk = pl.cdiv(m, tk)
    kern = functools.partial(_p_update_kernel, m_rows=m, tk=tk)
    gamma_arr = jnp.full((1,), gamma, jnp.float32)
    return pl.pallas_call(
        kern,
        out_shape=jax.ShapeDtypeStruct((q, p), jnp.float32),
        grid_spec=pltpu.PrefetchScalarGridSpec(
            num_scalar_prefetch=0,
            grid=(nk,),
            in_specs=[
                pl.BlockSpec(memory_space=pltpu.MemorySpace.SMEM),  # gamma
                pl.BlockSpec((tk, q), lambda k: (k, 0)),   # y batch tile
                pl.BlockSpec((tk, p), lambda k: (k, 0)),   # x batch tile
                pl.BlockSpec((q, p), lambda k: (0, 0)),    # old P, resident
            ],
            out_specs=pl.BlockSpec((q, p), lambda k: (0, 0)),  # resident acc
        ),
        compiler_params=pltpu.CompilerParams(
            dimension_semantics=("arbitrary",),
            vmem_limit_bytes=_VMEM_LIMIT),
    )(gamma_arr, y2, x2, P.astype(jnp.float32))


# -------------------------------- forward -----------------------------------


def inner_gw_forward(P, x, y, gamma=None):
    """JAX/Pallas equivalent of InnerGW.forward.  Returns (loss, new_P)
    (the in-place torch update of self.P is returned functionally)."""
    x2 = x.reshape(x.shape[0], -1).astype(jnp.float32)
    y2 = y.reshape(y.shape[0], -1).astype(jnp.float32)
    if gamma is not None and P is not None:     # torch would crash if P is None
        P = p_update_pallas(P, x2, y2, gamma)
    if P is not None:
        loss = projected_mse_pallas(x2, P, y2)
    else:
        loss = mse_pallas(x2, y2)
    return loss, P


if __name__ == "__main__":
    key = jax.random.PRNGKey(0)
    kx, ky, kxs = jax.random.split(key, 3)

    # InnerGW(p, q) with p != q  ->  P = eye(q, p)  (PyTorch default init)
    batch = 8
    x = jax.random.normal(kx, (batch, 3, 16, 16), jnp.float32)    # p = 768
    y = jax.random.uniform(ky, (batch, 2, 16, 16), jnp.float32)   # q = 512
    p_dim, q_dim = 3 * 16 * 16, 2 * 16 * 16
    P0 = jnp.eye(q_dim, p_dim, dtype=jnp.float32)

    fwd = jax.jit(inner_gw_forward, static_argnames=("gamma",))

    loss1, _ = fwd(P0, x, y)                     # gamma = None
    loss2, P_new = fwd(P0, x, y, gamma=0.1)      # stateful P-update path
    # InnerGW(p, p)  ->  P is None  ->  Px = x
    x_sq = jax.random.normal(kxs, (batch, 2, 16, 16), jnp.float32)
    loss3, _ = fwd(None, x_sq, y)

    loss1, loss2, P_new, loss3 = jax.block_until_ready(
        (loss1, loss2, P_new, loss3))

    # pure-JAX f32 reference (HIGHEST precision so the TPU ref is also f32)
    def ref(P, xx, yy, gamma=None):
        fx = xx.reshape(xx.shape[0], -1)
        fy = yy.reshape(yy.shape[0], -1)
        if gamma is not None and P is not None:
            upd = jnp.matmul(fy.T, fx, precision=lax.Precision.HIGHEST)
            P = (1.0 - gamma) * P + gamma * upd / jnp.linalg.norm(upd)
        px = (jnp.matmul(fx, P.T, precision=lax.Precision.HIGHEST)
              if P is not None else fx)
        return jnp.mean((px - fy) ** 2), P

    r1, _ = ref(P0, x, y)
    r2, P_ref = ref(P0, x, y, gamma=0.1)
    r3, _ = ref(None, x_sq, y)

    assert loss1.shape == () and bool(jnp.isfinite(loss1))
    assert loss2.shape == () and bool(jnp.isfinite(loss2))
    assert loss3.shape == () and bool(jnp.isfinite(loss3))
    assert jnp.allclose(loss1, r1, rtol=1e-3, atol=1e-5), (loss1, r1)
    assert jnp.allclose(loss2, r2, rtol=1e-3, atol=1e-5), (loss2, r2)
    assert jnp.allclose(loss3, r3, rtol=1e-5, atol=1e-6), (loss3, r3)
    assert jnp.allclose(P_new, P_ref, rtol=1e-3, atol=1e-5)

    print("KERNEL_OK")
</pallas_src>

<mosaic_0001>
module attributes {stable_mosaic.version = 11 : i64} {
  func.func @_proj_mse_kernel(%arg0: i32, %arg1: memref<8x768xf32, #tpu.memory_space<vmem>>, %arg2: memref<512x768xf32, #tpu.memory_space<vmem>>, %arg3: memref<8x512xf32, #tpu.memory_space<vmem>>, %arg4: memref<1x1x1xf32, #tpu.memory_space<vmem>>) attributes {dimension_semantics = [#tpu.dimension_semantics<parallel>], iteration_bounds = array<i64: 1>, scalar_prefetch = 0 : i64, scratch_operands = 0 : i64, tpu.core_type = #tpu.core_type<tc>, window_params = [{transform_indices = @transform_0, window_bounds = array<i64: 8, 768>}, {pipeline_mode = #tpu.pipeline_mode<synchronous>, transform_indices = @transform_1, window_bounds = array<i64: 512, 768>}, {transform_indices = @transform_2, window_bounds = array<i64: 8, 512>}, {transform_indices = @transform_3, window_bounds = array<i64: 1, 1, 1>}]} {
    %c0 = arith.constant 0 : index
    %c0_0 = arith.constant 0 : index
    %0 = vector.load %arg1[%c0, %c0_0] : memref<8x768xf32, #tpu.memory_space<vmem>>, vector<8x768xf32>
    %c0_1 = arith.constant 0 : index
    %c0_2 = arith.constant 0 : index
    %1 = vector.load %arg2[%c0_1, %c0_2] : memref<512x768xf32, #tpu.memory_space<vmem>>, vector<512x768xf32>
    %cst = arith.constant dense<0.000000e+00> : vector<8x512xf32>
    %2 = tpu.matmul %0, %1, %cst {dimension_numbers = #tpu.dot_dimension_numbers<[1], [1], [0], [0], [0, 0, 1, 0], [], []>, precision = #tpu.contract_precision<fp32>} : vector<8x768xf32>, vector<512x768xf32>, vector<8x512xf32> -> vector<8x512xf32>
    %c0_3 = arith.constant 0 : index
    %c0_4 = arith.constant 0 : index
    %3 = vector.load %arg3[%c0_3, %c0_4] : memref<8x512xf32, #tpu.memory_space<vmem>>, vector<8x512xf32>
    %4 = arith.subf %2, %3 : vector<8x512xf32>
    %c8_i32 = arith.constant 8 : i32
    %5 = arith.muli %arg0, %c8_i32 : i32
    %6 = tpu.iota {dimensions = array<i32: 0>} : vector<8x1xi32>
    %7 = vector.broadcast %5 : i32 to vector<8x1xi32>
    %8 = arith.addi %7, %6 : vector<8x1xi32>
    %c8_i32_5 = arith.constant 8 : i32
    %9 = vector.broadcast %c8_i32_5 : i32 to vector<8x1xi32>
    %10 = arith.cmpi slt, %8, %9 : vector<8x1xi32>
    %cst_6 = arith.constant 0.000000e+00 : f32
    %11 = vector.shape_cast %10 : vector<8x1xi1> to vector<8x1xi1>
    %12 = vector.broadcast %11 : vector<8x1xi1> to vector<8x512xi1>
    %13 = vector.broadcast %cst_6 : f32 to vector<8x512xf32>
    %14 = arith.select %12, %4, %13 : vector<8x512xi1>, vector<8x512xf32>
    %15 = arith.mulf %14, %14 : vector<8x512xf32>
    %cst_7 = arith.constant dense<0.000000e+00> : vector<8xf32>
    %16 = vector.multi_reduction <add>, %15, %cst_7 [1] : vector<8x512xf32> to vector<8xf32>
    %17 = vector.shape_cast %16 : vector<8xf32> to vector<8x1xf32>
    %cst_8 = arith.constant dense<0.000000e+00> : vector<1xf32>
    %18 = vector.multi_reduction <add>, %17, %cst_8 [0] : vector<8x1xf32> to vector<1xf32>
    %19 = vector.shape_cast %18 : vector<1xf32> to vector<1x1xf32>
    %c0_9 = arith.constant 0 : index
    %c0_10 = arith.constant 0 : index
    %c0_11 = arith.constant 0 : index
    %20 = vector.load %arg4[%c0_9, %c0_10, %c0_11] : memref<1x1x1xf32, #tpu.memory_space<vmem>>, vector<1x1x1xf32>
    %21 = vector.shape_cast %20 : vector<1x1x1xf32> to vector<1x1xf32>
    %22 = vector.shape_cast %19 : vector<1x1xf32> to vector<1x1x1xf32>
    tpu.vector_store %arg4[%c0_9, %c0_10, %c0_11], %22 {strides = array<i32>} : memref<1x1x1xf32, #tpu.memory_space<vmem>>, vector<1x1x1xf32>,
    return
  }
  func.func @transform_0(%arg0: i32) -> (i32, i32) {
    %c0_i32 = arith.constant 0 : i32
    %c0_i32_0 = arith.constant 0 : i32
    return %arg0, %c0_i32 : i32, i32
  }
  func.func @transform_1(%arg0: i32) -> (i32, i32) {
    %c0_i32 = arith.constant 0 : i32
    %c0_i32_0 = arith.constant 0 : i32
    %c0_i32_1 = arith.constant 0 : i32
    return %c0_i32, %c0_i32_0 : i32, i32
  }
  func.func @transform_2(%arg0: i32) -> (i32, i32) {
    %c0_i32 = arith.constant 0 : i32
    %c0_i32_0 = arith.constant 0 : i32
    return %arg0, %c0_i32 : i32, i32
  }
  func.func @transform_3(%arg0: i32) -> (i32, i32, i32) {
    %c0_i32 = arith.constant 0 : i32
    %c0_i32_0 = arith.constant 0 : i32
    %c0_i32_1 = arith.constant 0 : i32
    return %arg0, %c0_i32, %c0_i32_0 : i32, i32, i32
  }
}

</mosaic_0001>

<bundles_post_ra>
// kernel: inner_gw_forward.1
= control target key start
LH: loop header
LB: loop body
LE: loop exit
PB: predicated region body
PF: predicated region fallthrough
CT: control target
= control target key end

     0   :  { %8 = vsyncpa [#allocation3], 0  ;;  %s17538_s0 = inlined_call_operand.vmem [shape: f32[8,768], index: 0, kind: input, shape index: {}]   ;;  %s17539_s1 = inlined_call_operand.hbm [shape: f32[512,768], index: 1, kind: input, shape index: {}]   ;;  %s17540_s2 = inlined_call_operand.vmem [shape: f32[8,512], index: 2, kind: input, shape index: {}]   ;;  %s17541_s3 = inlined_call_operand.hbm [shape: f32[1,1,1], index: 3, kind: output, shape index: {}]  }
   0x1   :  { %9 = vsyncpa [#allocation4], 0  ;;  %s10599_s12 = smov [#allocation2]   ;;  %s10551_s16 = scalar_lea.hbm %s17539_s1, 49152 }
   0x2   :  { %s17_s13 = sshll.u32 %s10599_s12, 4  ;;  %p10552_p0 = scmp.ne.s32.totalorder %s17539_s1, %s10551_s16  ;;  %s18_s13 = int_to_ptr.vmem [resolvable:$true] %s17_s13 }
   0x3   :  { %p10555_p1 = scmp.lt.u32.totalorder %s10551_s16, %s17539_s1 }
   0x5   :  { %p10557_p2 = pnand %p10555_p1, %p10552_p0 }
   0x7   :  { %10560 = shalt.err (!%p10557_p2)
}
   0x8   :  { %s10561_s21 = scalar_lea.vmem %s18_s13, 49152  ;;  %p10566_p4 = scmp.lt.s32.totalorder %s18_s13, %s18_s13 }
   0x9   :  { %p10562_p3 = scmp.ne.s32.totalorder %s18_s13, %s10561_s21  ;;  %p10567_p5 = scmp.lt.s32.totalorder %s10561_s21, %s10561_s21 }
   0xb   :  { %p10568_p6 = por %p10567_p5, %p10566_p4 }
   0xd   :  { %p10569_p7 = pnand %p10568_p6, %p10562_p3 }
   0xf   :  { %10572 = shalt.err (!%p10569_p7)
}
  0x10   :  { %s10600_s22 = smov 768   ;;  %s10601_s23 = smov 48  }
  0x11   :  { %23 = dma.hbm_to_vmem [thread:$0]  %s17539_s1, 49152, %s18_s13, [#allocation3], %s10600_s22, %s10600_s22, %s10601_s23  }
  0x12   :  { %10595 = dma.done.wait [#allocation3], 49152  }
  0x13   :  { %10596 = vsyncadd [#allocation3], 4294918144  ;;  %v36_v0 = vld [vmem:[#allocation2 + $0x8] sm:$0xff]  ;;  %v42_v1 = vld [vmem:[#allocation2 + $0x38] sm:$0xff]  ;;  %s10602_s17 = smov [#allocation5]   ;;  %vm8158_vm0 = vcmask 0  }
  0x14   :  { %v228_v2 = vld [vmem:[#allocation2 + $0x608] sm:$0xff]  ;;  %v419_v3 = vand.u32 4294901760, %v36_v0  ;;  %v423_v4 = vand.u32 4294901760, %v42_v1  ;;  %v234_v5 = vld [vmem:[#allocation2 + $0x638] sm:$0xff]  ;;  %v35_v7 = vld [vmem:[#allocation2] sm:$0xff]  ;;  %s8166_s18 = sshll.u32 %s10602_s17, 4  ;;  %s8167_s18 = int_to_ptr.vmem [resolvable:$true] %s8166_s18 }
  0x15   :  { %v4271_v6 = vand.u32 4294901760, %v228_v2  ;;  %v41_v8 = vld [vmem:[#allocation2 + $0x30] sm:$0xff]  ;;  %v4275_v9 = vand.u32 4294901760, %v234_v5  ;;  %v421_v10 = vand.u32 4294901760, %v35_v7  ;;  %v227_v12 = vld [vmem:[#allocation2 + $0x600] sm:$0xff]  ;;  %v48_v14 = vld [vmem:[#allocation2 + $0x68] sm:$0xff]  ;;  %p10578_p9 = scmp.lt.s32.totalorder %s8167_s18, %s8167_s18 }
  0x16   :  { %v425_v11 = vand.u32 4294901760, %v41_v8  ;;  %v233_v13 = vld [vmem:[#allocation2 + $0x630] sm:$0xff]  ;;  %v10635_v15 = vpack.c.bf16 %v423_v4, %v419_v3  ;;  %v10637_v16 = vsub.f32 %v36_v0, %v419_v3  ;;  %v10639_v17 = vsub.f32 %v42_v1, %v423_v4  ;;  %v54_v19 = vld [vmem:[#allocation2 + $0x98] sm:$0xff]  ;;  %v240_v20 = vld [vmem:[#allocation2 + $0x668] sm:$0xff]  ;;  %s10577_s19 = scalar_lea.vmem %s8167_s18, 32 }
  0x17   :  { %v10641_v18 = vsub.f32 %v228_v2, %v4271_v6  ;;  %v246_v21 = vld [vmem:[#allocation2 + $0x698] sm:$0xff]  ;;  %v10643_v22 = vpack.c.bf16 %v4275_v9, %v4271_v6  ;;  %v10645_v23 = vsub.f32 %v234_v5, %v4275_v9  ;;  %v10649_v25 = vsub.f32 %v35_v7, %v421_v10  ;;  %v47_v26 = vld [vmem:[#allocation2 + $0x60] sm:$0xff]  ;;  %v53_v31 = vld [vmem:[#allocation2 + $0x90] sm:$0xff] }
  0x18   :  { %19261 = vst [vmem:[#allocation8_spill] sm:$0xff] %v10635_v15  ;;  %19262 = vst [vmem:[#allocation9_spill] sm:$0xff] %v10637_v16  ;;  %v10647_v24 = vpack.c.bf16 %v425_v11, %v421_v10  ;;  %8176 = vmatprep.subr.bf16.mxu0 %v10635_v15  ;;  %v10652_v27 = vsub.f32 %v41_v8, %v425_v11  ;;  %v4273_v28 = vand.u32 4294901760, %v227_v12  ;;  %v4277_v29 = vand.u32 4294901760, %v233_v13  ;;  %v239_v36 = vld [vmem:[#allocation2 + $0x660] sm:$0xff]  ;;  %v245_v37 = vld [vmem:[#allocation2 + $0x690] sm:$0xff] }
  0x19   :  { %19263 = vst [vmem:[#allocation10_spill] sm:$0xff] %v10639_v17  ;;  %19264 = vst [vmem:[#allocation11_spill] sm:$0xff] %v10641_v18  ;;  %v427_v30 = vand.u32 4294901760, %v48_v14  ;;  %9328 = vmatprep.subr.bf16.mxu1 %v10643_v22  ;;  %v431_v32 = vand.u32 4294901760, %v54_v19  ;;  %v4279_v33 = vand.u32 4294901760, %v240_v20  ;;  %v4283_v34 = vand.u32 4294901760, %v246_v21 }
  0x1a   :  { %19265 = vst [vmem:[#allocation12_spill] sm:$0xff] %v10643_v22  ;;  %19266 = vst [vmem:[#allocation13_spill] sm:$0xff] %v10645_v23  ;;  %8178 = vmatpush1.bf16.xpose.msra.mxu0 %v10647_v24  ;;  %v429_v35 = vand.u32 4294901760, %v47_v26  ;;  %v10656_v38 = vpack.c.bf16 %v4277_v29, %v4273_v28  ;;  %v10658_v39 = vsub.f32 %v227_v12, %v4273_v28  ;;  %v60_v42 = vld [vmem:[#allocation2 + $0xc8] sm:$0xff]  ;;  %v66_v43 = vld [vmem:[#allocation2 + $0xf8] sm:$0xff]  ;;  %v433_v51 = vand.u32 4294901760, %v53_v31 }
  0x1b   :  { %19267 = vst [vmem:[#allocation14_spill] sm:$0xff] %v10647_v24  ;;  %19268 = vst [vmem:[#allocation15_spill] sm:$0xff] %v10649_v25  ;;  %v10660_v40 = vsub.f32 %v233_v13, %v4277_v29  ;;  %v10662_v41 = vsub.f32 %v48_v14, %v427_v30  ;;  %v252_v44 = vld [vmem:[#allocation2 + $0x6c8] sm:$0xff]  ;;  %v10664_v45 = vpack.c.bf16 %v431_v32, %v427_v30  ;;  %v258_v49 = vld [vmem:[#allocation2 + $0x6f8] sm:$0xff]  ;;  %v4281_v53 = vand.u32 4294901760, %v239_v36 }
  0x1c   :  { %19269 = vst [vmem:[#allocation16_spill] sm:$0xff] %v10652_v27  ;;  %19270 = vst [vmem:[#allocation17_spill] sm:$0xff] %v10656_v38  ;;  %v10666_v46 = vsub.f32 %v54_v19, %v431_v32  ;;  %v10668_v47 = vpack.c.bf16 %v4283_v34, %v4279_v33  ;;  %v10670_v48 = vsub.f32 %v240_v20, %v4279_v33  ;;  %9330 = vmatpush1.bf16.xpose.msra.mxu1 %v10656_v38  ;;  %v59_v58 = vld [vmem:[#allocation2 + $0xc0] sm:$0xff]  ;;  %v65_v59 = vld [vmem:[#allocation2 + $0xf0] sm:$0xff] }
  0x1d   :  { %19271 = vst [vmem:[#allocation18_spill] sm:$0xff] %v10658_v39  ;;  %19272 = vst [vmem:[#allocation19_spill] sm:$0xff] %v10660_v40  ;;  %v10673_v50 = vsub.f32 %v246_v21, %v4283_v34  ;;  %v10675_v52 = vsub.f32 %v47_v26, %v429_v35  ;;  %8180 = vmatprep.subr.bf16.mxu0 %v10664_v45  ;;  %v4285_v54 = vand.u32 4294901760, %v245_v37  ;;  %v435_v55 = vand.u32 4294901760, %v60_v42  ;;  %v251_v0 = vld [vmem:[#allocation2 + $0x6c0] sm:$0xff]  ;;  %v257_v1 = vld [vmem:[#allocation2 + $0x6f0] sm:$0xff] }
  0x1e   :  { %19273 = vst [vmem:[#allocation20_spill] sm:$0xff] %v10662_v41  ;;  %19274 = vst [vmem:[#allocation21_spill] sm:$0xff] %v10664_v45  ;;  %9332 = vmatprep.subr.bf16.mxu1 %v10668_v47  ;;  %v439_v56 = vand.u32 4294901760, %v66_v43  ;;  %v4287_v57 = vand.u32 4294901760, %v252_v44  ;;  %v10679_v60 = vpack.c.bf16 %v433_v51, %v429_v35  ;;  %v10681_v61 = vsub.f32 %v53_v31, %v433_v51  ;;  %v72_v2 = vld [vmem:[#allocation2 + $0x128] sm:$0xff]  ;;  %v78_v7 = vld [vmem:[#allocation2 + $0x158] sm:$0xff] }
  0x1f   :  { %19275 = vst [vmem:[#allocation22_spill] sm:$0xff] %v10666_v46  ;;  %19276 = vst [vmem:[#allocation23_spill] sm:$0xff] %v10668_v47  ;;  %v10683_v62 = vsub.f32 %v239_v36, %v4281_v53  ;;  %v4291_v63 = vand.u32 4294901760, %v258_v49  ;;  %v10685_v3 = vpack.c.bf16 %v4285_v54, %v4281_v53  ;;  %v10687_v4 = vsub.f32 %v245_v37, %v4285_v54  ;;  %v264_v8 = vld [vmem:[#allocation2 + $0x728] sm:$0xff]  ;;  %v270_v9 = vld [vmem:[#allocation2 + $0x758] sm:$0xff] }
  0x20   :  { %19277 = vst [vmem:[#allocation24_spill] sm:$0xff] %v10670_v48  ;;  %19278 = vst [vmem:[#allocation25_spill] sm:$0xff] %v10673_v50  ;;  %v10689_v5 = vpack.c.bf16 %v439_v56, %v435_v55  ;;  %v10691_v6 = vsub.f32 %v60_v42, %v435_v55  ;;  %v10693_v10 = vsub.f32 %v66_v43, %v439_v56  ;;  %v437_v14 = vand.u32 4294901760, %v59_v58  ;;  %v71_v31 = vld [vmem:[#allocation2 + $0x120] sm:$0xff]  ;;  %v77_v32 = vld [vmem:[#allocation2 + $0x150] sm:$0xff] }
  0x21   :  { %19279 = vst [vmem:[#allocation26_spill] sm:$0xff] %v10675_v52  ;;  %19280 = vst [vmem:[#allocation27_spill] sm:$0xff] %v10679_v60  ;;  %v10695_v11 = vpack.c.bf16 %v4291_v63, %v4287_v57  ;;  %v10697_v12 = vsub.f32 %v252_v44, %v4287_v57  ;;  %v10699_v13 = vsub.f32 %v258_v49, %v4291_v63  ;;  %v441_v19 = vand.u32 4294901760, %v65_v59  ;;  %v263_v37 = vld [vmem:[#allocation2 + $0x720] sm:$0xff]  ;;  %v269_v42 = vld [vmem:[#allocation2 + $0x750] sm:$0xff] }
  0x22   :  { %19281 = vst [vmem:[#allocation28_spill] sm:$0xff] %v10681_v61  ;;  %19282 = vst [vmem:[#allocation29_spill] sm:$0xff] %v10683_v62  ;;  %8182 = vmatpush1.bf16.xpose.msra.mxu0 %v10679_v60  ;;  %v4289_v20 = vand.u32 4294901760, %v251_v0  ;;  %v4293_v21 = vand.u32 4294901760, %v257_v1  ;;  %v443_v26 = vand.u32 4294901760, %v72_v2  ;;  %v447_v28 = vand.u32 4294901760, %v78_v7 }
  0x23   :  { %19283 = vst [vmem:[#allocation30_spill] sm:$0xff] %v10685_v3  ;;  %19284 = vst [vmem:[#allocation31_spill] sm:$0xff] %v10687_v4  ;;  %8184 = vmatprep.subr.bf16.mxu0 %v10689_v5  ;;  %v4295_v29 = vand.u32 4294901760, %v264_v8  ;;  %v4299_v30 = vand.u32 4294901760, %v270_v9  ;;  %v10703_v33 = vpack.c.bf16 %v441_v19, %v437_v14  ;;  %v10705_v34 = vsub.f32 %v59_v58, %v437_v14  ;;  %v84_v43 = vld [vmem:[#allocation2 + $0x188] sm:$0xff]  ;;  %v90_v54 = vld [vmem:[#allocation2 + $0x1b8] sm:$0xff] }
  0x24   :  { %19285 = vst [vmem:[#allocation32_spill] sm:$0xff] %v10689_v5  ;;  %19286 = vst [vmem:[#allocation33_spill] sm:$0xff] %v10691_v6  ;;  %v10707_v35 = vsub.f32 %v65_v59, %v441_v19  ;;  %v10709_v36 = vpack.c.bf16 %v4293_v21, %v4289_v20  ;;  %9334 = vmatpush1.bf16.xpose.msra.mxu1 %v10685_v3  ;;  %v10712_v44 = vsub.f32 %v251_v0, %v4289_v20  ;;  %v276_v55 = vld [vmem:[#allocation2 + $0x788] sm:$0xff]  ;;  %v282_v56 = vld [vmem:[#allocation2 + $0x7b8] sm:$0xff] }
  0x25   :  { %19287 = vst [vmem:[#allocation34_spill] sm:$0xff] %v10693_v10  ;;  %19288 = vst [vmem:[#allocation35_spill] sm:$0xff] %v10695_v11  ;;  %v10714_v49 = vsub.f32 %v257_v1, %v4293_v21  ;;  %v10716_v51 = vpack.c.bf16 %v447_v28, %v443_v26  ;;  %v10718_v53 = vsub.f32 %v72_v2, %v443_v26  ;;  %9336 = vmatprep.subr.bf16.mxu1 %v10695_v11  ;;  %v83_v3 = vld [vmem:[#allocation2 + $0x180] sm:$0xff]  ;;  %v89_v5 = vld [vmem:[#allocation2 + $0x1b0] sm:$0xff] }
  0x26   :  { %19289 = vst [vmem:[#allocation36_spill] sm:$0xff] %v10697_v12  ;;  %19290 = vst [vmem:[#allocation37_spill] sm:$0xff] %v10699_v13  ;;  %v10721_v57 = vsub.f32 %v78_v7, %v447_v28  ;;  %v10723_v58 = vpack.c.bf16 %v4299_v30, %v4295_v29  ;;  %v10725_v59 = vsub.f32 %v264_v8, %v4295_v29  ;;  %v445_v0 = vand.u32 4294901760, %v71_v31  ;;  %v281_v29 = vld [vmem:[#allocation2 + $0x7b0] sm:$0xff]  ;;  %v102_v24 = vld [vmem:[#allocation2 + $0x218] sm:$0xff] }
  0x27   :  { %19291 = vst [vmem:[#allocation38_spill] sm:$0xff] %v10703_v33  ;;  %19292 = vst [vmem:[#allocation39_spill] sm:$0xff] %v10705_v34  ;;  %v10727_v63 = vsub.f32 %v270_v9, %v4299_v30  ;;  %v449_v1 = vand.u32 4294901760, %v77_v32  ;;  %v4297_v14 = vand.u32 4294901760, %v263_v37  ;;  %v4301_v19 = vand.u32 4294901760, %v269_v42  ;;  %v275_v9 = vld [vmem:[#allocation2 + $0x780] sm:$0xff] }
  0x28   :  { %19293 = vst [vmem:[#allocation40_spill] sm:$0xff] %v10707_v35  ;;  %19294 = vst [vmem:[#allocation41_spill] sm:$0xff] %v10709_v36  ;;  %v451_v20 = vand.u32 4294901760, %v84_v43  ;;  %v455_v2 = vand.u32 4294901760, %v90_v54  ;;  %v4303_v21 = vand.u32 4294901760, %v276_v55  ;;  %v4307_v26 = vand.u32 4294901760, %v282_v56 }
  0x29   :  { %19295 = vst [vmem:[#allocation42_spill] sm:$0xff] %v10712_v44  ;;  %19296 = vst [vmem:[#allocation43_spill] sm:$0xff] %v10714_v49  ;;  %v10729_v60 = vpack.c.bf16 %v449_v1, %v445_v0  ;;  %v10731_v7 = vsub.f32 %v71_v31, %v445_v0  ;;  %v10733_v28 = vsub.f32 %v77_v32, %v449_v1  ;;  %v96_v30 = vld [vmem:[#allocation2 + $0x1e8] sm:$0xff]  ;;  %v294_v0 = vld [vmem:[#allocation2 + $0x818] sm:$0xff] }
  0x2a   :  { %19297 = vst [vmem:[#allocation44_spill] sm:$0xff] %v10716_v51  ;;  %19298 = vst [vmem:[#allocation45_spill] sm:$0xff] %v10718_v53  ;;  %v10735_v8 = vpack.c.bf16 %v4301_v19, %v4297_v14  ;;  %8186 = vmatpush1.bf16.xpose.msra.mxu0 %v10703_v33  ;;  %v10738_v11 = vsub.f32 %v263_v37, %v4297_v14  ;;  %v10740_v47 = vsub.f32 %v269_v42, %v4301_v19  ;;  %v288_v31 = vld [vmem:[#allocation2 + $0x7e8] sm:$0xff]  ;;  %v330_v53 = vld [vmem:[#allocation2 + $0x938] sm:$0xff] }
  0x2b   :  { %19299 = vst [vmem:[#allocation46_spill] sm:$0xff] %v10721_v57  ;;  %19300 = vst [vmem:[#allocation47_spill] sm:$0xff] %v10723_v58  ;;  %v10742_v38 = vpack.c.bf16 %v455_v2, %v451_v20  ;;  %v10744_v45 = vsub.f32 %v84_v43, %v451_v20  ;;  %8188 = vmatprep.subr.bf16.mxu0 %v10716_v51  ;;  %v10747_v32 = vsub.f32 %v90_v54, %v455_v2  ;;  %v101_v51 = vld [vmem:[#allocation2 + $0x210] sm:$0xff]  ;;  %v324_v57 = vld [vmem:[#allocation2 + $0x908] sm:$0xff] }
  0x2c   :  { %19301 = vst [vmem:[#allocation48_spill] sm:$0xff] %v10725_v59  ;;  %19302 = vst [vmem:[#allocation49_spill] sm:$0xff] %v10727_v63  ;;  %v10749_v1 = vpack.c.bf16 %v4307_v26, %v4303_v21  ;;  %v10751_v22 = vsub.f32 %v276_v55, %v4303_v21  ;;  %v10753_v33 = vsub.f32 %v282_v56, %v4307_v26  ;;  %v453_v37 = vand.u32 4294901760, %v83_v3  ;;  %v287_v21 = vld [vmem:[#allocation2 + $0x7e0] sm:$0xff]  ;;  %v293_v26 = vld [vmem:[#allocation2 + $0x810] sm:$0xff] }
  0x2d   :  { %19303 = vst [vmem:[#allocation50_spill] sm:$0xff] %v10729_v60  ;;  %19304 = vst [vmem:[#allocation51_spill] sm:$0xff] %v10731_v7  ;;  %v457_v42 = vand.u32 4294901760, %v89_v5  ;;  %v4305_v14 = vand.u32 4294901760, %v275_v9  ;;  %v4309_v19 = vand.u32 4294901760, %v281_v29  ;;  %9338 = vmatpush1.bf16.xpose.msra.mxu1 %v10709_v36  ;;  %v459_v43 = vand.u32 4294901760, %v96_v30 }
  0x2e   :  { %19305 = vst [vmem:[#allocation52_spill] sm:$0xff] %v10733_v28  ;;  %19306 = vst [vmem:[#allocation53_spill] sm:$0xff] %v10735_v8  ;;  %v463_v20 = vand.u32 4294901760, %v102_v24  ;;  %v4311_v15 = vand.u32 4294901760, %v288_v31  ;;  %9340 = vmatprep.subr.bf16.mxu1 %v10723_v58  ;;  %v10759_v55 = vsub.f32 %v83_v3, %v453_v37  ;;  %v114_v58 = vld [vmem:[#allocation2 + $0x278] sm:$0xff]  ;;  %v300_v28 = vld [vmem:[#allocation2 + $0x848] sm:$0xff] }
  0x2f   :  { %19307 = vst [vmem:[#allocation54_spill] sm:$0xff] %v10738_v11  ;;  %19308 = vst [vmem:[#allocation55_spill] sm:$0xff] %v10740_v47  ;;  %v95_v47 = vld [vmem:[#allocation2 + $0x1e0] sm:$0xff]  ;;  %v10757_v54 = vpack.c.bf16 %v457_v42, %v453_v37  ;;  %v10761_v56 = vsub.f32 %v89_v5, %v457_v42  ;;  %v10763_v2 = vpack.c.bf16 %v4309_v19, %v4305_v14  ;;  %v306_v7 = vld [vmem:[#allocation2 + $0x878] sm:$0xff] }
  0x30   :  { %19309 = vst [vmem:[#allocation56_spill] sm:$0xff] %v10742_v38  ;;  %19310 = vst [vmem:[#allocation57_spill] sm:$0xff] %v10744_v45  ;;  %v4315_v45 = vand.u32 4294901760, %v294_v0  ;;  %v10765_v36 = vsub.f32 %v275_v9, %v4305_v14  ;;  %v10771_v11 = vsub.f32 %v96_v30, %v459_v43  ;;  %v10773_v3 = vsub.f32 %v102_v24, %v463_v20  ;;  %v312_v63 = vld [vmem:[#allocation2 + $0x8a8] sm:$0xff]  ;;  %v318_v59 = vld [vmem:[#allocation2 + $0x8d8] sm:$0xff] }
  0x31   :  { %19311 = vst [vmem:[#allocation58_spill] sm:$0xff] %v10747_v32  ;;  %19312 = vst [vmem:[#allocation59_spill] sm:$0xff] %v10749_v1  ;;  %v10769_v32 = vpack.c.bf16 %v463_v20, %v459_v43  ;;  %v10777_v37 = vsub.f32 %v288_v31, %v4311_v15  ;;  %v465_v9 = vand.u32 4294901760, %v101_v51  ;;  %v4313_v14 = vand.u32 4294901760, %v287_v21  ;;  %v305_v20 = vld [vmem:[#allocation2 + $0x870] sm:$0xff]  ;;  %v162_v49 = vld [vmem:[#allocation2 + $0x3f8] sm:$0xff] }
  0x32   :  { %19313 = vst [vmem:[#allocation60_spill] sm:$0xff] %v10751_v22  ;;  %19314 = vst [vmem:[#allocation61_spill] sm:$0xff] %v10753_v33  ;;  %v108_v33 = vld [vmem:[#allocation2 + $0x248] sm:$0xff]  ;;  %v10767_v22 = vsub.f32 %v281_v29, %v4309_v19  ;;  %v10775_v5 = vpack.c.bf16 %v4315_v45, %v4311_v15  ;;  %v10779_v42 = vsub.f32 %v294_v0, %v4315_v45  ;;  %v4317_v29 = vand.u32 4294901760, %v293_v26  ;;  %v299_v0 = vld [vmem:[#allocation2 + $0x840] sm:$0xff] }
  0x33   :  { %19315 = vst [vmem:[#allocation62_spill] sm:$0xff] %v10757_v54  ;;  %19316 = vst [vmem:[#allocation63_spill] sm:$0xff] %v10759_v55  ;;  %8190 = vmatpush1.bf16.xpose.msra.mxu0 %v10729_v60  ;;  %v467_v19 = vand.u32 4294901760, %v108_v33  ;;  %v471_v30 = vand.u32 4294901760, %v114_v58  ;;  %v4319_v43 = vand.u32 4294901760, %v300_v28  ;;  %v10787_v45 = vsub.f32 %v101_v51, %v465_v9  ;;  %v174_v44 = vld [vmem:[#allocation2 + $0x458] sm:$0xff] }
  0x34   :  { %19317 = vst [vmem:[#allocation64_spill] sm:$0xff] %v10761_v56  ;;  %19318 = vst [vmem:[#allocation65_spill] sm:$0xff] %v10763_v2  ;;  %v461_v56 = vand.u32 4294901760, %v95_v47  ;;  %8192 = vmatprep.subr.bf16.mxu0 %v10742_v38  ;;  %v10789_v31 = vpack.c.bf16 %v4317_v29, %v4313_v14  ;;  %v10791_v60 = vsub.f32 %v287_v21, %v4313_v14  ;;  %v126_v38 = vld [vmem:[#allocation2 + $0x2d8] sm:$0xff]  ;;  %v4321_v14 = vand.u32 4294901760, %v299_v0  ;;  %v360_v35 = vld [vmem:[#allocation2 + $0xa28] sm:$0xff] }
  0x35   :  { %19319 = vst [vmem:[#allocation66_spill] sm:$0xff] %v10765_v36  ;;  %19320 = vst [vmem:[#allocation67_spill] sm:$0xff] %v10767_v22  ;;  %v107_v22 = vld [vmem:[#allocation2 + $0x240] sm:$0xff]  ;;  %v113_v36 = vld [vmem:[#allocation2 + $0x270] sm:$0xff]  ;;  %v10797_v55 = vsub.f32 %v108_v33, %v467_v19  ;;  %9342 = vmatpush1.bf16.xpose.msra.mxu1 %v10735_v8  ;;  %v4325_v33 = vand.u32 4294901760, %v305_v20 }
  0x36   :  { %19321 = vst [vmem:[#allocation68_spill] sm:$0xff] %v10769_v32  ;;  %19322 = vst [vmem:[#allocation69_spill] sm:$0xff] %v10771_v11  ;;  %v4323_v11 = vand.u32 4294901760, %v306_v7  ;;  %v10783_v24 = vpack.c.bf16 %v465_v9, %v461_v56  ;;  %v10785_v15 = vsub.f32 %v95_v47, %v461_v56  ;;  %v10800_v47 = vsub.f32 %v114_v58, %v471_v30  ;;  %v125_v8 = vld [vmem:[#allocation2 + $0x2d0] sm:$0xff]  ;;  %v366_v34 = vld [vmem:[#allocation2 + $0xa58] sm:$0xff] }
  0x37   :  { %19323 = vst [vmem:[#allocation70_spill] sm:$0xff] %v10773_v3  ;;  %19324 = vst [vmem:[#allocation71_spill] sm:$0xff] %v10775_v5  ;;  %v10795_v3 = vpack.c.bf16 %v471_v30, %v467_v19  ;;  %v10804_v56 = vsub.f32 %v300_v28, %v4319_v43  ;;  %9344 = vmatprep.subr.bf16.mxu1 %v10749_v1  ;;  %v469_v21 = vand.u32 4294901760, %v107_v22  ;;  %v479_v19 = vand.u32 4294901760, %v126_v38  ;;  %v132_v1 = vld [vmem:[#allocation2 + $0x308] sm:$0xff]  ;;  %v198_v12 = vld [vmem:[#allocation2 + $0x518] sm:$0xff] }
  0x38   :  { %19325 = vst [vmem:[#allocation72_spill] sm:$0xff] %v10777_v37  ;;  %19326 = vst [vmem:[#allocation73_spill] sm:$0xff] %v10779_v42  ;;  %v120_v42 = vld [vmem:[#allocation2 + $0x2a8] sm:$0xff]  ;;  %v10793_v37 = vsub.f32 %v293_v26, %v4317_v29  ;;  %v10802_v51 = vpack.c.bf16 %v4323_v11, %v4319_v43  ;;  %v10806_v9 = vsub.f32 %v306_v7, %v4323_v11  ;;  %v473_v26 = vand.u32 4294901760, %v113_v36  ;;  %v311_v7 = vld [vmem:[#allocation2 + $0x8a0] sm:$0xff] }
  0x39   :  { %19327 = vst [vmem:[#allocation74_spill] sm:$0xff] %v10783_v24  ;;  %19328 = vst [vmem:[#allocation75_spill] sm:$0xff] %v10785_v15  ;;  %v475_v29 = vand.u32 4294901760, %v120_v42  ;;  %v10811_v30 = vsub.f32 %v107_v22, %v469_v21  ;;  %v10815_v11 = vpack.c.bf16 %v4325_v33, %v4321_v14  ;;  %v317_v43 = vld [vmem:[#allocation2 + $0x8d0] sm:$0xff]  ;;  %v138_v15 = vld [vmem:[#allocation2 + $0x338] sm:$0xff]  ;;  %v10826_v22 = vsub.f32 %v126_v38, %v479_v19 }
  0x3a   :  { %19329 = vst [vmem:[#allocation76_spill] sm:$0xff] %v10787_v45  ;;  %19330 = vst [vmem:[#allocation77_spill] sm:$0xff] %v10789_v31  ;;  %v10809_v58 = vpack.c.bf16 %v473_v26, %v469_v21  ;;  %v10813_v28 = vsub.f32 %v113_v36, %v473_v26 }
  0x3b   :  { %19331 = vst [vmem:[#allocation78_spill] sm:$0xff] %v10791_v60  ;;  %19332 = vst [vmem:[#allocation79_spill] sm:$0xff] %v10793_v37  ;;  %v4331_v37 = vand.u32 4294901760, %v318_v59  ;;  %v119_v60 = vld [vmem:[#allocation2 + $0x2a0] sm:$0xff]  ;;  %v10823_v45 = vsub.f32 %v120_v42, %v475_v29  ;;  %8194 = vmatpush1.bf16.xpose.msra.mxu0 %v10757_v54  ;;  %v4333_v42 = vand.u32 4294901760, %v317_v43  ;;  %v137_v54 = vld [vmem:[#allocation2 + $0x330] sm:$0xff] }
  0x3c   :  { %19333 = vst [vmem:[#allocation80_spill] sm:$0xff] %v10795_v3  ;;  %19334 = vst [vmem:[#allocation81_spill] sm:$0xff] %v10797_v55  ;;  %v4327_v55 = vand.u32 4294901760, %v312_v63  ;;  %8196 = vmatprep.subr.bf16.mxu0 %v10769_v32  ;;  %v144_v32 = vld [vmem:[#allocation2 + $0x368] sm:$0xff] }
  0x3d   :  { %19335 = vst [vmem:[#allocation82_spill] sm:$0xff] %v10800_v47  ;;  %19336 = vst [vmem:[#allocation83_spill] sm:$0xff] %v10802_v51  ;;  %v10821_v47 = vpack.c.bf16 %v479_v19, %v475_v29  ;;  %v10832_v26 = vsub.f32 %v318_v59, %v4331_v37  ;;  %v487_v29 = vand.u32 4294901760, %v138_v15  ;;  %9346 = vmatpush1.bf16.xpose.msra.mxu1 %v10763_v2  ;;  %v329_v19 = vld [vmem:[#allocation2 + $0x930] sm:$0xff] }
  0x3e   :  { %19337 = vst [vmem:[#allocation84_spill] sm:$0xff] %v10804_v56  ;;  %19338 = vst [vmem:[#allocation85_spill] sm:$0xff] %v10806_v9  ;;  %v10817_v9 = vsub.f32 %v299_v0, %v4321_v14  ;;  %v10819_v56 = vsub.f32 %v305_v20, %v4325_v33  ;;  %v10828_v36 = vpack.c.bf16 %v4331_v37, %v4327_v55  ;;  %v477_v0 = vand.u32 4294901760, %v119_v60  ;;  %v323_v37 = vld [vmem:[#allocation2 + $0x900] sm:$0xff] }
  0x3f   :  { %19339 = vst [vmem:[#allocation86_spill] sm:$0xff] %v10809_v58  ;;  %19340 = vst [vmem:[#allocation87_spill] sm:$0xff] %v10811_v30  ;;  %v10830_v21 = vsub.f32 %v312_v63, %v4327_v55  ;;  %v481_v20 = vand.u32 4294901760, %v125_v8  ;;  %v4329_v14 = vand.u32 4294901760, %v311_v7  ;;  %v483_v33 = vand.u32 4294901760, %v132_v1  ;;  %9348 = vmatprep.subr.bf16.mxu1 %v10775_v5 }
  0x40   :  { %19341 = vst [vmem:[#allocation88_spill] sm:$0xff] %v10813_v28  ;;  %19342 = vst [vmem:[#allocation89_spill] sm:$0xff] %v10815_v11  ;;  %v10838_v63 = vsub.f32 %v119_v60, %v477_v0  ;;  %v150_v28 = vld [vmem:[#allocation2 + $0x398] sm:$0xff]  ;;  %v336_v60 = vld [vmem:[#allocation2 + $0x968] sm:$0xff] }
  0x41   :  { %19343 = vst [vmem:[#allocation90_spill] sm:$0xff] %v10817_v9  ;;  %19344 = vst [vmem:[#allocation91_spill] sm:$0xff] %v10819_v56  ;;  %v4339_v56 = vand.u32 4294901760, %v330_v53  ;;  %v131_v9 = vld [vmem:[#allocation2 + $0x300] sm:$0xff]  ;;  %v10836_v38 = vpack.c.bf16 %v481_v20, %v477_v0  ;;  %v10840_v59 = vsub.f32 %v125_v8, %v481_v20  ;;  %v10842_v55 = vpack.c.bf16 %v4333_v42, %v4329_v14  ;;  %v342_v0 = vld [vmem:[#allocation2 + $0x998] sm:$0xff] }
  0x42   :  { %19345 = vst [vmem:[#allocation92_spill] sm:$0xff] %v10821_v47  ;;  %19346 = vst [vmem:[#allocation93_spill] sm:$0xff] %v10823_v45  ;;  %v4335_v45 = vand.u32 4294901760, %v324_v57  ;;  %v10851_v2 = vsub.f32 %v132_v1, %v483_v33  ;;  %v10853_v8 = vsub.f32 %v138_v15, %v487_v29  ;;  %v485_v5 = vand.u32 4294901760, %v131_v9 }
  0x43   :  { %19347 = vst [vmem:[#allocation94_spill] sm:$0xff] %v10826_v22  ;;  %19348 = vst [vmem:[#allocation95_spill] sm:$0xff] %v10828_v36  ;;  %v10849_v22 = vpack.c.bf16 %v487_v29, %v483_v33  ;;  %v4347_v1 = vand.u32 4294901760, %v342_v0  ;;  %v143_v33 = vld [vmem:[#allocation2 + $0x360] sm:$0xff]  ;;  %8198 = vmatpush1.bf16.xpose.msra.mxu0 %v10783_v24 }
  0x44   :  { %19349 = vst [vmem:[#allocation96_spill] sm:$0xff] %v10830_v21  ;;  %19350 = vst [vmem:[#allocation97_spill] sm:$0xff] %v10832_v26  ;;  %v10845_v26 = vsub.f32 %v311_v7, %v4329_v14  ;;  %v10847_v21 = vsub.f32 %v317_v43, %v4333_v42  ;;  %v10855_v20 = vpack.c.bf16 %v4339_v56, %v4335_v45  ;;  %v489_v7 = vand.u32 4294901760, %v137_v54 }
  0x45   :  { %19351 = vst [vmem:[#allocation98_spill] sm:$0xff] %v10836_v38  ;;  %19352 = vst [vmem:[#allocation99_spill] sm:$0xff] %v10838_v63  ;;  %v10859_v63 = vsub.f32 %v330_v53, %v4339_v56  ;;  %v4337_v14 = vand.u32 4294901760, %v323_v37  ;;  %v4341_v43 = vand.u32 4294901760, %v329_v19  ;;  %v491_v42 = vand.u32 4294901760, %v144_v32  ;;  %v341_v56 = vld [vmem:[#allocation2 + $0x990] sm:$0xff]  ;;  %8200 = vmatprep.subr.bf16.mxu0 %v10795_v3  ;;  %9350 = vmatpush1.bf16.xpose.msra.mxu1 %v10789_v31 }
  0x46   :  { %19353 = vst [vmem:[#allocation100_spill] sm:$0xff] %v10840_v59  ;;  %19354 = vst [vmem:[#allocation101_spill] sm:$0xff] %v10842_v55  ;;  %v10857_v59 = vsub.f32 %v324_v57, %v4335_v45  ;;  %v10862_v15 = vpack.c.bf16 %v489_v7, %v485_v5  ;;  %v10864_v29 = vsub.f32 %v131_v9, %v485_v5  ;;  %v335_v45 = vld [vmem:[#allocation2 + $0x960] sm:$0xff]  ;;  %v348_v5 = vld [vmem:[#allocation2 + $0x9c8] sm:$0xff]  ;;  %9352 = vmatprep.subr.bf16.mxu1 %v10802_v51 }
  0x47   :  { %19355 = vst [vmem:[#allocation102_spill] sm:$0xff] %v10845_v26  ;;  %19356 = vst [vmem:[#allocation103_spill] sm:$0xff] %v10847_v21  ;;  %v495_v21 = vand.u32 4294901760, %v150_v28  ;;  %v4343_v26 = vand.u32 4294901760, %v336_v60  ;;  %v10866_v57 = vsub.f32 %v137_v54, %v489_v7  ;;  %v10868_v53 = vpack.c.bf16 %v4341_v43, %v4337_v14  ;;  %v354_v9 = vld [vmem:[#allocation2 + $0x9f8] sm:$0xff]  ;;  %v353_v31 = vld [vmem:[#allocation2 + $0x9f0] sm:$0xff] }
  0x48   :  { %19357 = vst [vmem:[#allocation104_spill] sm:$0xff] %v10849_v22  ;;  %19358 = vst [vmem:[#allocation105_spill] sm:$0xff] %v10851_v2  ;;  %v149_v2 = vld [vmem:[#allocation2 + $0x390] sm:$0xff]  ;;  %v10877_v24 = vsub.f32 %v144_v32, %v491_v42  ;;  %v4351_v3 = vand.u32 4294901760, %v348_v5 }
  0x49   :  { %19359 = vst [vmem:[#allocation106_spill] sm:$0xff] %v10853_v8  ;;  %19360 = vst [vmem:[#allocation107_spill] sm:$0xff] %v10855_v20  ;;  %v10873_v8 = vsub.f32 %v329_v19, %v4341_v43  ;;  %v10875_v30 = vpack.c.bf16 %v495_v21, %v491_v42  ;;  %v10879_v54 = vsub.f32 %v150_v28, %v495_v21  ;;  %v497_v19 = vand.u32 4294901760, %v149_v2  ;;  %v155_v28 = vld [vmem:[#allocation2 + $0x3c0] sm:$0xff]  ;;  %v161_v21 = vld [vmem:[#allocation2 + $0x3f0] sm:$0xff] }
  0x4a   :  { %19361 = vst [vmem:[#allocation108_spill] sm:$0xff] %v10857_v59  ;;  %19362 = vst [vmem:[#allocation109_spill] sm:$0xff] %v10859_v63  ;;  %v156_v63 = vld [vmem:[#allocation2 + $0x3c8] sm:$0xff]  ;;  %v10871_v59 = vsub.f32 %v323_v37, %v4337_v14  ;;  %v10881_v7 = vpack.c.bf16 %v4347_v1, %v4343_v26  ;;  %v493_v37 = vand.u32 4294901760, %v143_v33  ;;  %v4345_v14 = vand.u32 4294901760, %v335_v45 }
  0x4b   :  { %19363 = vst [vmem:[#allocation110_spill] sm:$0xff] %v10862_v15  ;;  %19364 = vst [vmem:[#allocation111_spill] sm:$0xff] %v10864_v29  ;;  %v10885_v29 = vsub.f32 %v342_v0, %v4347_v1  ;;  %v4349_v43 = vand.u32 4294901760, %v341_v56  ;;  %v499_v32 = vand.u32 4294901760, %v156_v63  ;;  %v503_v42 = vand.u32 4294901760, %v162_v49  ;;  %v347_v1 = vld [vmem:[#allocation2 + $0x9c0] sm:$0xff]  ;;  %8202 = vmatpush1.bf16.xpose.msra.mxu0 %v10809_v58 }
  0x4c   :  { %19365 = vst [vmem:[#allocation112_spill] sm:$0xff] %v10866_v57  ;;  %19366 = vst [vmem:[#allocation113_spill] sm:$0xff] %v10868_v53  ;;  %v10883_v57 = vsub.f32 %v336_v60, %v4343_v26  ;;  %v10891_v26 = vsub.f32 %v143_v33, %v493_v37  ;;  %v10893_v60 = vsub.f32 %v149_v2, %v497_v19  ;;  %8204 = vmatprep.subr.bf16.mxu0 %v10821_v47  ;;  %v365_v58 = vld [vmem:[#allocation2 + $0xa50] sm:$0xff] }
  0x4d   :  { %19367 = vst [vmem:[#allocation114_spill] sm:$0xff] %v10871_v59  ;;  %19368 = vst [vmem:[#allocation115_spill] sm:$0xff] %v10873_v8  ;;  %v10895_v0 = vpack.c.bf16 %v4349_v43, %v4345_v14  ;;  %v10899_v51 = vsub.f32 %v341_v56, %v4349_v43  ;;  %v10901_v8 = vpack.c.bf16 %v503_v42, %v499_v32  ;;  %v505_v56 = vand.u32 4294901760, %v161_v21 }
  0x4e   :  { %19369 = vst [vmem:[#allocation116_spill] sm:$0xff] %v10875_v30  ;;  %19370 = vst [vmem:[#allocation117_spill] sm:$0xff] %v10877_v24  ;;  %v4355_v24 = vand.u32 4294901760, %v354_v9  ;;  %v10903_v59 = vsub.f32 %v156_v63, %v499_v32  ;;  %v10905_v33 = vsub.f32 %v162_v49, %v503_v42  ;;  %v4357_v43 = vand.u32 4294901760, %v353_v31  ;;  %v167_v49 = vld [vmem:[#allocation2 + $0x420] sm:$0xff]  ;;  %v173_v42 = vld [vmem:[#allocation2 + $0x450] sm:$0xff]  ;;  %9354 = vmatpush1.bf16.xpose.msra.mxu1 %v10815_v11 }
  0x4f   :  { %19371 = vst [vmem:[#allocation118_spill] sm:$0xff] %v10879_v54  ;;  %19372 = vst [vmem:[#allocation119_spill] sm:$0xff] %v10881_v7  ;;  %v10889_v54 = vpack.c.bf16 %v497_v19, %v493_v37  ;;  %v10909_v37 = vsub.f32 %v348_v5, %v4351_v3  ;;  %v511_v32 = vand.u32 4294901760, %v174_v44  ;;  %9356 = vmatprep.subr.bf16.mxu1 %v10828_v36 }
  0x50   :  { %19373 = vst [vmem:[#allocation120_spill] sm:$0xff] %v10883_v57  ;;  %19374 = vst [vmem:[#allocation121_spill] sm:$0xff] %v10885_v29  ;;  %v168_v29 = vld [vmem:[#allocation2 + $0x428] sm:$0xff]  ;;  %v10897_v57 = vsub.f32 %v335_v45, %v4345_v14  ;;  %v10907_v2 = vpack.c.bf16 %v4355_v24, %v4351_v3  ;;  %v10911_v19 = vsub.f32 %v354_v9, %v4355_v24  ;;  %v501_v45 = vand.u32 4294901760, %v155_v28  ;;  %v359_v9 = vld [vmem:[#allocation2 + $0xa20] sm:$0xff] }
  0x51   :  { %19375 = vst [vmem:[#allocation122_spill] sm:$0xff] %v10889_v54  ;;  %19376 = vst [vmem:[#allocation123_spill] sm:$0xff] %v10891_v26  ;;  %v4353_v14 = vand.u32 4294901760, %v347_v1  ;;  %v507_v63 = vand.u32 4294901760, %v168_v29  ;;  %v10919_v24 = vsub.f32 %v161_v21, %v505_v56  ;;  %v186_v26 = vld [vmem:[#allocation2 + $0x4b8] sm:$0xff]  ;;  %v10933_v21 = vsub.f32 %v174_v44, %v511_v32 }
  0x52   :  { %19377 = vst [vmem:[#allocation124_spill] sm:$0xff] %v10893_v60  ;;  %19378 = vst [vmem:[#allocation125_spill] sm:$0xff] %v10895_v0  ;;  %v10917_v3 = vsub.f32 %v155_v28, %v501_v45  ;;  %v372_v28 = vld [vmem:[#allocation2 + $0xa88] sm:$0xff] }
  0x53   :  { %19379 = vst [vmem:[#allocation126_spill] sm:$0xff] %v10897_v57  ;;  %19380 = vst [vmem:[#allocation127_spill] sm:$0xff] %v10899_v51  ;;  %v4363_v51 = vand.u32 4294901760, %v366_v34  ;;  %v10921_v5 = vpack.c.bf16 %v4357_v43, %v4353_v14  ;;  %v10924_v47 = vsub.f32 %v347_v1, %v4353_v14  ;;  %v10928_v57 = vpack.c.bf16 %v511_v32, %v507_v63 }
  0x54   :  { %19381 = vst [vmem:[#allocation128_spill] sm:$0xff] %v10901_v8  ;;  %19382 = vst [vmem:[#allocation129_spill] sm:$0xff] %v10903_v59  ;;  %v4359_v59 = vand.u32 4294901760, %v360_v35  ;;  %v10930_v60 = vsub.f32 %v168_v29, %v507_v63  ;;  %v509_v1 = vand.u32 4294901760, %v167_v49  ;;  %v4361_v14 = vand.u32 4294901760, %v359_v9  ;;  %8206 = vmatpush1.bf16.xpose.msra.mxu0 %v10836_v38 }
  0x55   :  { %19383 = vst [vmem:[#allocation130_spill] sm:$0xff] %v10905_v33  ;;  %19384 = vst [vmem:[#allocation131_spill] sm:$0xff] %v10907_v2  ;;  %v10915_v33 = vpack.c.bf16 %v505_v56, %v501_v45  ;;  %v378_v45 = vld [vmem:[#allocation2 + $0xab8] sm:$0xff]  ;;  %v10939_v11 = vsub.f32 %v366_v34, %v4363_v51  ;;  %v519_v29 = vand.u32 4294901760, %v186_v26  ;;  %v4367_v63 = vand.u32 4294901760, %v372_v28  ;;  %v371_v34 = vld [vmem:[#allocation2 + $0xa80] sm:$0xff]  ;;  %8208 = vmatprep.subr.bf16.mxu0 %v10849_v22 }
  0x56   :  { %19385 = vst [vmem:[#allocation132_spill] sm:$0xff] %v10909_v37  ;;  %19386 = vst [vmem:[#allocation133_spill] sm:$0xff] %v10911_v19  ;;  %v180_v19 = vld [vmem:[#allocation2 + $0x488] sm:$0xff]  ;;  %v10926_v37 = vsub.f32 %v353_v31, %v4357_v43  ;;  %v10935_v56 = vpack.c.bf16 %v4363_v51, %v4359_v59  ;;  %v513_v31 = vand.u32 4294901760, %v173_v42  ;;  %v4365_v43 = vand.u32 4294901760, %v365_v58  ;;  %v377_v51 = vld [vmem:[#allocation2 + $0xab0] sm:$0xff]  ;;  %9358 = vmatpush1.bf16.xpose.msra.mxu1 %v10842_v55 }
  0x57   :  { %19387 = vst [vmem:[#allocation134_spill] sm:$0xff] %v10915_v33  ;;  %19388 = vst [vmem:[#allocation135_spill] sm:$0xff] %v10917_v3  ;;  %v185_v3 = vld [vmem:[#allocation2 + $0x4b0] sm:$0xff]  ;;  %v10943_v44 = vsub.f32 %v167_v49, %v509_v1  ;;  %v10950_v36 = vsub.f32 %v359_v9, %v4361_v14  ;;  %v384_v49 = vld [vmem:[#allocation2 + $0xae8] sm:$0xff]  ;;  %9360 = vmatprep.subr.bf16.mxu1 %v10855_v20 }
  0x58   :  { %19389 = vst [vmem:[#allocation136_spill] sm:$0xff] %v10919_v24  ;;  %19390 = vst [vmem:[#allocation137_spill] sm:$0xff] %v10921_v5  ;;  %v10937_v24 = vsub.f32 %v360_v35, %v4359_v59  ;;  %v10941_v13 = vpack.c.bf16 %v513_v31, %v509_v1  ;;  %v10945_v32 = vsub.f32 %v173_v42, %v513_v31  ;;  %v192_v59 = vld [vmem:[#allocation2 + $0x4e8] sm:$0xff]  ;;  %v390_v1 = vld [vmem:[#allocation2 + $0xb18] sm:$0xff] }
  0x59   :  { %19391 = vst [vmem:[#allocation138_spill] sm:$0xff] %v10924_v47  ;;  %19392 = vst [vmem:[#allocation139_spill] sm:$0xff] %v10926_v37  ;;  %v515_v37 = vand.u32 4294901760, %v180_v19  ;;  %v179_v47 = vld [vmem:[#allocation2 + $0x480] sm:$0xff]  ;;  %v10947_v35 = vpack.c.bf16 %v4365_v43, %v4361_v14  ;;  %v10959_v42 = vsub.f32 %v186_v26, %v519_v29  ;;  %v4369_v14 = vand.u32 4294901760, %v371_v34  ;;  %v197_v22 = vld [vmem:[#allocation2 + $0x510] sm:$0xff] }
  0x5a   :  { %19393 = vst [vmem:[#allocation140_spill] sm:$0xff] %v10928_v57  ;;  %19394 = vst [vmem:[#allocation141_spill] sm:$0xff] %v10930_v60  ;;  %v4371_v60 = vand.u32 4294901760, %v378_v45  ;;  %v517_v9 = vand.u32 4294901760, %v179_v47  ;;  %v210_v20 = vld [vmem:[#allocation2 + $0x578] sm:$0xff] }
  0x5b   :  { %19395 = vst [vmem:[#allocation142_spill] sm:$0xff] %v10933_v21  ;;  %19396 = vst [vmem:[#allocation143_spill] sm:$0xff] %v10935_v56  ;;  %v10956_v21 = vsub.f32 %v180_v19, %v515_v37  ;;  %v527_v19 = vand.u32 4294901760, %v198_v12  ;;  %v10977_v55 = vsub.f32 %v371_v34, %v4369_v14  ;;  %v529_v34 = vand.u32 4294901760, %v197_v22 }
  0x5c   :  { %19397 = vst [vmem:[#allocation144_spill] sm:$0xff] %v10937_v24  ;;  %19398 = vst [vmem:[#allocation145_spill] sm:$0xff] %v10939_v11  ;;  %v10952_v11 = vsub.f32 %v365_v58, %v4365_v43  ;;  %v10954_v24 = vpack.c.bf16 %v519_v29, %v515_v37  ;;  %v10961_v31 = vpack.c.bf16 %v4371_v60, %v4367_v63  ;;  %v521_v58 = vand.u32 4294901760, %v185_v3  ;;  %v383_v29 = vld [vmem:[#allocation2 + $0xae0] sm:$0xff] }
  0x5d   :  { %19399 = vst [vmem:[#allocation146_spill] sm:$0xff] %v10941_v13  ;;  %19400 = vst [vmem:[#allocation147_spill] sm:$0xff] %v10943_v44  ;;  %v10965_v38 = vsub.f32 %v378_v45, %v4371_v60  ;;  %v4373_v43 = vand.u32 4294901760, %v377_v51  ;;  %v523_v37 = vand.u32 4294901760, %v192_v59  ;;  %8210 = vmatpush1.bf16.xpose.msra.mxu0 %v10862_v15 }
  0x5e   :  { %19401 = vst [vmem:[#allocation148_spill] sm:$0xff] %v10945_v32  ;;  %19402 = vst [vmem:[#allocation149_spill] sm:$0xff] %v10947_v35  ;;  %v10963_v32 = vsub.f32 %v372_v28, %v4367_v63  ;;  %v10969_v26 = vpack.c.bf16 %v521_v58, %v517_v9  ;;  %v10971_v28 = vsub.f32 %v179_v47, %v517_v9  ;;  %v389_v63 = vld [vmem:[#allocation2 + $0xb10] sm:$0xff]  ;;  %8212 = vmatprep.subr.bf16.mxu0 %v10875_v30  ;;  %v222_v30 = vld [vmem:[#allocation2 + $0x5d8] sm:$0xff] }
  0x5f   :  { %19403 = vst [vmem:[#allocation150_spill] sm:$0xff] %v10950_v36  ;;  %19404 = vst [vmem:[#allocation151_spill] sm:$0xff] %v10952_v11  ;;  %v4379_v11 = vand.u32 4294901760, %v390_v1  ;;  %v191_v36 = vld [vmem:[#allocation2 + $0x4e0] sm:$0xff]  ;;  %v10973_v60 = vsub.f32 %v185_v3, %v521_v58  ;;  %v10975_v45 = vpack.c.bf16 %v4373_v43, %v4369_v14  ;;  %v10983_v44 = vsub.f32 %v192_v59, %v523_v37 }
  0x60   :  { %19405 = vst [vmem:[#allocation152_spill] sm:$0xff] %v10954_v24  ;;  %19406 = vst [vmem:[#allocation153_spill] sm:$0xff] %v10956_v21  ;;  %v4375_v21 = vand.u32 4294901760, %v384_v49  ;;  %v10985_v47 = vsub.f32 %v198_v12, %v527_v19  ;;  %v4377_v14 = vand.u32 4294901760, %v383_v29  ;;  %v535_v59 = vand.u32 4294901760, %v210_v20  ;;  %9362 = vmatpush1.bf16.xpose.msra.mxu1 %v10868_v53 }
  0x61   :  { %19407 = vst [vmem:[#allocation154_spill] sm:$0xff] %v10959_v42  ;;  %19408 = vst [vmem:[#allocation155_spill] sm:$0xff] %v10961_v31  ;;  %v10981_v42 = vpack.c.bf16 %v527_v19, %v523_v37  ;;  %v396_v31 = vld [vmem:[#allocation2 + $0xb48] sm:$0xff]  ;;  %v10991_v58 = vsub.f32 %v390_v1, %v4379_v11  ;;  %v395_v1 = vld [vmem:[#allocation2 + $0xb40] sm:$0xff]  ;;  %9364 = vmatprep.subr.bf16.mxu1 %v10881_v7 }
  0x62   :  { %19409 = vst [vmem:[#allocation156_spill] sm:$0xff] %v10963_v32  ;;  %19410 = vst [vmem:[#allocation157_spill] sm:$0xff] %v10965_v38  ;;  %v204_v38 = vld [vmem:[#allocation2 + $0x548] sm:$0xff]  ;;  %v10979_v32 = vsub.f32 %v377_v51, %v4373_v43  ;;  %v10987_v3 = vpack.c.bf16 %v4379_v11, %v4375_v21  ;;  %v10989_v9 = vsub.f32 %v384_v49, %v4375_v21  ;;  %v4381_v51 = vand.u32 4294901760, %v389_v63  ;;  %v401_v19 = vld [vmem:[#allocation2 + $0xb70] sm:$0xff] }
  0x63   :  { %19411 = vst [vmem:[#allocation158_spill] sm:$0xff] %v10969_v26  ;;  %19412 = vst [vmem:[#allocation159_spill] sm:$0xff] %v10971_v28  ;;  %v402_v26 = vld [vmem:[#allocation2 + $0xb78] sm:$0xff]  ;;  %v531_v43 = vand.u32 4294901760, %v204_v38  ;;  %v4383_v37 = vand.u32 4294901760, %v396_v31  ;;  %v10999_v11 = vsub.f32 %v197_v22, %v529_v34  ;;  %v11003_v15 = vsub.f32 %v383_v29, %v4377_v14 }
  0x64   :  { %19413 = vst [vmem:[#allocation160_spill] sm:$0xff] %v10973_v60  ;;  %19414 = vst [vmem:[#allocation161_spill] sm:$0xff] %v10975_v45  ;;  %v525_v60 = vand.u32 4294901760, %v191_v36  ;;  %v11001_v49 = vpack.c.bf16 %v4381_v51, %v4377_v14  ;;  %v11012_v22 = vsub.f32 %v210_v20, %v535_v59  ;;  %v4385_v14 = vand.u32 4294901760, %v395_v1 }
  0x65   :  { %19415 = vst [vmem:[#allocation162_spill] sm:$0xff] %v10977_v55  ;;  %19416 = vst [vmem:[#allocation163_spill] sm:$0xff] %v10979_v32  ;;  %v203_v32 = vld [vmem:[#allocation2 + $0x540] sm:$0xff]  ;;  %v209_v55 = vld [vmem:[#allocation2 + $0x570] sm:$0xff]  ;;  %v11009_v28 = vsub.f32 %v204_v38, %v531_v43  ;;  %v4389_v38 = vand.u32 4294901760, %v401_v19  ;;  %8214 = vmatpush1.bf16.xpose.msra.mxu0 %v10889_v54 }
  0x66   :  { %19417 = vst [vmem:[#allocation164_spill] sm:$0xff] %v10981_v42  ;;  %19418 = vst [vmem:[#allocation165_spill] sm:$0xff] %v10983_v44  ;;  %v4387_v44 = vand.u32 4294901760, %v402_v26  ;;  %v10995_v12 = vpack.c.bf16 %v529_v34, %v525_v60  ;;  %v10997_v21 = vsub.f32 %v191_v36, %v525_v60  ;;  %v11016_v60 = vsub.f32 %v396_v31, %v4383_v37 }
  0x67   :  { %19419 = vst [vmem:[#allocation166_spill] sm:$0xff] %v10985_v47  ;;  %19420 = vst [vmem:[#allocation167_spill] sm:$0xff] %v10987_v3  ;;  %v11007_v47 = vpack.c.bf16 %v535_v59, %v531_v43  ;;  %v408_v3 = vld [vmem:[#allocation2 + $0xba8] sm:$0xff]  ;;  %v533_v29 = vand.u32 4294901760, %v203_v32  ;;  %v543_v43 = vand.u32 4294901760, %v222_v30  ;;  %v11027_v31 = vpack.c.bf16 %v4389_v38, %v4385_v14  ;;  %8216 = vmatprep.subr.bf16.mxu0 %v10901_v8 }
  0x68   :  { %19421 = vst [vmem:[#allocation168_spill] sm:$0xff] %v10989_v9  ;;  %19422 = vst [vmem:[#allocation169_spill] sm:$0xff] %v10991_v58  ;;  %v216_v58 = vld [vmem:[#allocation2 + $0x5a8] sm:$0xff]  ;;  %v11005_v9 = vsub.f32 %v389_v63, %v4381_v51  ;;  %v11014_v36 = vpack.c.bf16 %v4387_v44, %v4383_v37  ;;  %v11018_v34 = vsub.f32 %v402_v26, %v4387_v44  ;;  %v537_v63 = vand.u32 4294901760, %v209_v55  ;;  %v221_v44 = vld [vmem:[#allocation2 + $0x5d0] sm:$0xff] }
  0x69   :  { %19423 = vst [vmem:[#allocation170_spill] sm:$0xff] %v10995_v12  ;;  %19424 = vst [vmem:[#allocation171_spill] sm:$0xff] %v10997_v21  ;;  %v414_v12 = vld [vmem:[#allocation2 + $0xbd8] sm:$0xff]  ;;  %v539_v51 = vand.u32 4294901760, %v216_v58  ;;  %v11023_v20 = vsub.f32 %v203_v32, %v533_v29  ;;  %v407_v26 = vld [vmem:[#allocation2 + $0xba0] sm:$0xff]  ;;  %v11029_v7 = vsub.f32 %v395_v1, %v4385_v14  ;;  %v545_v14 = vand.u32 4294901760, %v221_v44  ;;  %9366 = vmatpush1.bf16.xpose.msra.mxu1 %v10895_v0 }
  0x6a   :  { %19425 = vst [vmem:[#allocation172_spill] sm:$0xff] %v10999_v11  ;;  %19426 = vst [vmem:[#allocation173_spill] sm:$0xff] %v11001_v49  ;;  %v11021_v53 = vpack.c.bf16 %v537_v63, %v533_v29  ;;  %v11025_v59 = vsub.f32 %v209_v55, %v537_v63  ;;  %v413_v37 = vld [vmem:[#allocation2 + $0xbd0] sm:$0xff]  ;;  %v30_v32 = vld [vmem:[%s17538_s0 + $0x8] sm:$0xff]  ;;  %v11041_v55 = vsub.f32 %v222_v30, %v543_v43  ;;  %9368 = vmatprep.subr.bf16.mxu1 %v10907_v2 }
  0x6b   :  { %19427 = vst [vmem:[#allocation174_spill] sm:$0xff] %v11003_v15  ;;  %19428 = vst [vmem:[#allocation175_spill] sm:$0xff] %v11005_v9  ;;  %v4395_v9 = vand.u32 4294901760, %v414_v12  ;;  %v215_v15 = vld [vmem:[#allocation2 + $0x5a0] sm:$0xff]  ;;  %v19455_v8 = vand.u32 4294901760, %v10637_v16 }
  0x6c   :  { %19429 = vst [vmem:[#allocation176_spill] sm:$0xff] %v11007_v47  ;;  %19430 = vst [vmem:[#allocation177_spill] sm:$0xff] %v11009_v28  ;;  %v4391_v28 = vand.u32 4294901760, %v408_v3 }
  0x6d   :  { %19431 = vst [vmem:[#allocation178_spill] sm:$0xff] %v11012_v22  ;;  %19432 = vst [vmem:[#allocation179_spill] sm:$0xff] %v11014_v36  ;;  %v11035_v22 = vsub.f32 %v216_v58, %v539_v51  ;;  %v11047_v1 = vsub.f32 %v414_v12, %v4395_v9  ;;  %v4393_v58 = vand.u32 4294901760, %v407_v26  ;;  %v11063_v12 = vsub.f32 %v221_v44, %v545_v14 }
  0x6e   :  { %19433 = vst [vmem:[#allocation180_spill] sm:$0xff] %v11016_v60  ;;  %19434 = vst [vmem:[#allocation181_spill] sm:$0xff] %v11018_v34  ;;  %v11031_v34 = vsub.f32 %v401_v19, %v4389_v38  ;;  %v11033_v60 = vpack.c.bf16 %v543_v43, %v539_v51  ;;  %v11043_v29 = vpack.c.bf16 %v4395_v9, %v4391_v28  ;;  %v541_v19 = vand.u32 4294901760, %v215_v15 }
  0x6f   :  { %19435 = vst [vmem:[#allocation182_spill] sm:$0xff] %v11021_v53  ;;  %19436 = vst [vmem:[#allocation183_spill] sm:$0xff] %v11023_v20  ;;  %v11045_v63 = vsub.f32 %v408_v3, %v4391_v28  ;;  %v4397_v38 = vand.u32 4294901760, %v413_v37  ;;  %v11050_v51 = vand.u32 4294901760, %v30_v32  ;;  %v29_v28 = vld [vmem:[%s17538_s0] sm:$0xff]  ;;  %v567_v0 = vsub.f32 %v10637_v16, %v19455_v8  ;;  %8218 = vmatpush1.bf16.xpose.msra.mxu0 %v10915_v33 }
  0x70   :  { %19437 = vst [vmem:[#allocation184_spill] sm:$0xff] %v11025_v59  ;;  %19438 = vst [vmem:[#allocation185_spill] sm:$0xff] %v11027_v31  ;;  %v11059_v3 = vpack.c.bf16 %v545_v14, %v541_v19  ;;  %v11061_v9 = vsub.f32 %v215_v15, %v541_v19  ;;  %v19456_v15 = vand.u32 4294901760, %v10639_v17  ;;  %v19457_v19 = vand.u32 4294901760, %v10641_v18  ;;  %8220 = vmatprep.subr.bf16.mxu0 %v10928_v57 }
  0x71   :  { %19439 = vst [vmem:[#allocation186_spill] sm:$0xff] %v11029_v7  ;;  %19440 = vst [vmem:[#allocation187_spill] sm:$0xff] %v11031_v34  ;;  %v11065_v43 = vpack.c.bf16 %v4397_v38, %v4393_v58  ;;  %v11070_v54 = vsub.f32 %v413_v37, %v4397_v38  ;;  %v11073_v30 = vsub.f32 %v30_v32, %v11050_v51  ;;  %v568_v32 = vand.u32 4294901760, %v567_v0 }
  0x72   :  { %19441 = vst [vmem:[#allocation188_spill] sm:$0xff] %v11033_v60  ;;  %19442 = vst [vmem:[#allocation189_spill] sm:$0xff] %v11035_v22  ;;  %v11068_v22 = vsub.f32 %v407_v26, %v4393_v58  ;;  %v579_v44 = vsub.f32 %v10639_v17, %v19456_v15  ;;  %v4419_v14 = vsub.f32 %v10641_v18, %v19457_v19  ;;  %v17731_v26 = vand.u32 4294901760, %v10645_v23  ;;  %v19529_v17 = vld [vmem:[#allocation126_spill] sm:$0xff] }
  0x73   :  { %19443 = vst [vmem:[#allocation190_spill] sm:$0xff] %v11041_v55  ;;  %19444 = vst [vmem:[#allocation191_spill] sm:$0xff] %v11043_v29  ;;  %v11085_v58 = vand.u32 4294901760, %v29_v28  ;;  %v11088_v37 = vand.u32 4294901760, %v11073_v30  ;;  %v17742_v38 = vand.u32 4294901760, %v10649_v25  ;;  %v17743_v8 = vand.u32 4294901760, %v10652_v27  ;;  %9370 = vmatpush1.bf16.xpose.msra.mxu1 %v10921_v5 }
  0x74   :  { %19445 = vst [vmem:[#allocation192_spill] sm:$0xff] %v11045_v63  ;;  %19446 = vst [vmem:[#allocation193_spill] sm:$0xff] %v11047_v1  ;;  %v580_v2 = vand.u32 4294901760, %v579_v44  ;;  %v4420_v16 = vand.u32 4294901760, %v4419_v14  ;;  %v4431_v15 = vsub.f32 %v10645_v23, %v17731_v26  ;;  %v17744_v14 = vand.u32 4294901760, %v10658_v39  ;;  %9372 = vmatprep.subr.bf16.mxu1 %v10935_v56 }
  0x75   :  { %19447 = vst [vmem:[#allocation194_spill] sm:$0xff] %v11050_v51  ;;  %19448 = vst [vmem:[#allocation195_spill] sm:$0xff] %v11059_v3  ;;  %v11096_v19 = vsub.f32 %v29_v28, %v11085_v58  ;;  %v550_v18 = vsub.f32 %v11073_v30, %v11088_v37  ;;  %v573_v0 = vsub.f32 %v10649_v25, %v17742_v38  ;;  %v17764_v56 = vand.u32 4294901760, %v10683_v62  ;;  %v19528_v25 = vld [vmem:[#allocation124_spill] sm:$0xff] }
  0x76   :  { %19449 = vst [vmem:[#allocation196_spill] sm:$0xff] %v11061_v9  ;;  %19450 = vst [vmem:[#allocation197_spill] sm:$0xff] %v11063_v12  ;;  %v585_v44 = vsub.f32 %v10652_v27, %v17743_v8  ;;  %v11109_v26 = vpack.c.bf16 %v580_v2, %v568_v32  ;;  %v4432_v28 = vand.u32 4294901760, %v4431_v15  ;;  %v4425_v38 = vsub.f32 %v10658_v39, %v17744_v14  ;;  %v19497_v39 = vld [vmem:[#allocation82_spill] sm:$0xff] }
  0x77   :  { %19451 = vst [vmem:[#allocation198_spill] sm:$0xff] %v11065_v43  ;;  %19452 = vst [vmem:[#allocation199_spill] sm:$0xff] %v11068_v22  ;;  %v11112_v33 = vand.u32 4294901760, %v11096_v19  ;;  %v17748_v15 = vand.u32 4294901760, %v10662_v41  ;;  %8222 = vmatpush1.bf16.xpose.msra.mxu0 %v10941_v13 }
  0x78   :  { %19453 = vst [vmem:[#allocation200_spill] sm:$0xff] %v11070_v54  ;;  %19454 = vst [vmem:[#allocation201_spill] sm:$0xff] %v11073_v30  ;;  %v551_v30 = vand.u32 4294901760, %v550_v18  ;;  %v586_v23 = vand.u32 4294901760, %v585_v44  ;;  %v11119_v8 = vpack.c.bf16 %v4432_v28, %v4420_v16  ;;  %v17751_v44 = vand.u32 4294901760, %v10666_v46  ;;  %8224 = vmatprep.subr.bf16.mxu0 %v10954_v24 }
  0x79   :  { %19458 = vst [vmem:[#allocation202_spill] sm:$0xff] %v11085_v58  ;;  %19459 = vst [vmem:[#allocation203_spill] sm:$0xff] %v11088_v37  ;;  %v17745_v37 = vand.u32 4294901760, %v10660_v40  ;;  %v574_v58 = vand.u32 4294901760, %v573_v0  ;;  %v556_v2 = vsub.f32 %v11096_v19, %v11112_v33  ;;  %v4426_v0 = vand.u32 4294901760, %v4425_v38 }
  0x7a   :  { %19460 = vst [vmem:[#allocation204_spill] sm:$0xff] %v11096_v19  ;;  %19461 = vst [vmem:[#allocation205_spill] sm:$0xff] %v11112_v33  ;;  %552 = vmatprep.mubr.f32.mxu0 %v551_v30  ;;  %v17754_v16 = vand.u32 4294901760, %v10670_v48  ;;  %4404 = vmatprep.mubr.f32.mxu1 %v551_v30  ;;  %v17755_v33 = vand.u32 4294901760, %v10673_v50  ;;  %v17760_v38 = vand.u32 4294901760, %v10675_v52  ;;  %v17761_v30 = vand.u32 4294901760, %v10681_v61 }
  0x7b   :  { %v4437_v32 = vsub.f32 %v10660_v40, %v17745_v37  ;;  %v11128_v18 = vpack.c.bf16 %v586_v23, %v574_v58  ;;  %v11132_v28 = vand.u32 4294901760, %v556_v2  ;;  %v591_v37 = vsub.f32 %v10662_v41, %v17748_v15  ;;  %9374 = vmatpush1.bf16.xpose.msra.mxu1 %v10947_v35  ;;  %v19462_v19 = vld [vmem:[#allocation155_spill] sm:$0xff]  ;;  %v19525_v41 = vld [vmem:[#allocation120_spill] sm:$0xff] }
  0x7c   :  { %v603_v23 = vsub.f32 %v10666_v46, %v17751_v44  ;;  %v4443_v58 = vsub.f32 %v10670_v48, %v17754_v16  ;;  %v4455_v15 = vsub.f32 %v10673_v50, %v17755_v33  ;;  %v597_v16 = vsub.f32 %v10675_v52, %v17760_v38  ;;  %9376 = vmatprep.subr.bf16.mxu1 %v19462_v19 }
  0x7d   :  { %v4438_v14 = vand.u32 4294901760, %v4437_v32  ;;  %v592_v32 = vand.u32 4294901760, %v591_v37  ;;  %v17771_v33 = vand.u32 4294901760, %v10687_v4  ;;  %v17778_v38 = vand.u32 4294901760, %v10693_v10 }
  0x7e   :  { %v604_v44 = vand.u32 4294901760, %v603_v23  ;;  %v4444_v5 = vand.u32 4294901760, %v4443_v58  ;;  %v4456_v37 = vand.u32 4294901760, %v4455_v15  ;;  %v17779_v23 = vand.u32 4294901760, %v10691_v6 }
  0x7f   :  { %v11146_v2 = vpack.c.bf16 %v4438_v14, %v4426_v0  ;;  %v609_v14 = vsub.f32 %v10681_v61, %v17761_v30  ;;  %v4449_v0 = vsub.f32 %v10683_v62, %v17764_v56  ;;  %v598_v13 = vand.u32 4294901760, %v597_v16  ;;  %v19465_v62 = vld [vmem:[#allocation39_spill] sm:$0xff] }
  0x80   :  { %v11165_v58 = vpack.c.bf16 %v604_v44, %v592_v32  ;;  %v11169_v30 = vpack.c.bf16 %v4456_v37, %v4444_v5  ;;  %v4461_v15 = vsub.f32 %v10687_v4, %v17771_v33  ;;  %v615_v56 = vsub.f32 %v10691_v6, %v17779_v23  ;;  %v19463_v32 = vld [vmem:[#allocation36_spill] sm:$0xff]  ;;  %v19469_v6 = vld [vmem:[#allocation158_spill] sm:$0xff] }
  0x81   :  { %v610_v57 = vand.u32 4294901760, %v609_v14  ;;  %v4450_v24 = vand.u32 4294901760, %v4449_v0  ;;  %v627_v16 = vsub.f32 %v10693_v10, %v17778_v38  ;;  %v17784_v5 = vand.u32 4294901760, %v19463_v32  ;;  %v19464_v14 = vld [vmem:[#allocation37_spill] sm:$0xff]  ;;  %v19466_v4 = vld [vmem:[#allocation40_spill] sm:$0xff]  ;;  %v19467_v38 = vld [vmem:[#allocation42_spill] sm:$0xff]  ;;  %8226 = vmatpush1.bf16.xpose.msra.mxu0 %v19469_v6 }
  0x82   :  { %v17786_v37 = vand.u32 4294901760, %v19464_v14  ;;  %v4462_v0 = vand.u32 4294901760, %v4461_v15  ;;  %v616_v35 = vand.u32 4294901760, %v615_v56  ;;  %v17787_v33 = vand.u32 4294901760, %v19465_v62  ;;  %8228 = vmatprep.subr.bf16.mxu0 %v10981_v42 }
  0x83   :  { %v11178_v44 = vpack.c.bf16 %v610_v57, %v598_v13  ;;  %v17788_v61 = vand.u32 4294901760, %v19466_v4  ;;  %v628_v52 = vand.u32 4294901760, %v627_v16  ;;  %v4467_v13 = vsub.f32 %v19463_v32, %v17784_v5  ;;  %v19468_v16 = vld [vmem:[#allocation43_spill] sm:$0xff]  ;;  %9378 = vmatpush1.bf16.xpose.msra.mxu1 %v10975_v45 }
  0x84   :  { %v4479_v57 = vsub.f32 %v19464_v14, %v17786_v37  ;;  %v17792_v23 = vand.u32 4294901760, %v19467_v38  ;;  %v11194_v19 = vpack.c.bf16 %v4462_v0, %v4450_v24  ;;  %v621_v56 = vsub.f32 %v19465_v62, %v17787_v33 }
  0x85   :  { %v633_v15 = vsub.f32 %v19466_v4, %v17788_v61  ;;  %v17795_v10 = vand.u32 4294901760, %v19468_v16  ;;  %v11204_v5 = vpack.c.bf16 %v628_v52, %v616_v35  ;;  %v4468_v32 = vand.u32 4294901760, %v4467_v13  ;;  %v19470_v4 = vld [vmem:[#allocation45_spill] sm:$0xff]  ;;  %v19471_v35 = vld [vmem:[#allocation46_spill] sm:$0xff] }
  0x86   :  { %v4480_v37 = vand.u32 4294901760, %v4479_v57  ;;  %v4473_v24 = vsub.f32 %v19467_v38, %v17792_v23  ;;  %v622_v0 = vand.u32 4294901760, %v621_v56  ;;  %v17800_v62 = vand.u32 4294901760, %v19470_v4  ;;  %v19472_v57 = vld [vmem:[#allocation48_spill] sm:$0xff] }
  0x87   :  { %v634_v33 = vand.u32 4294901760, %v633_v15  ;;  %v4485_v61 = vsub.f32 %v19468_v16, %v17795_v10  ;;  %v17806_v13 = vand.u32 4294901760, %v19471_v35  ;;  %v17807_v6 = vand.u32 4294901760, %v19472_v57  ;;  %v19473_v15 = vld [vmem:[#allocation49_spill] sm:$0xff]  ;;  %v19474_v16 = vld [vmem:[#allocation167_spill] sm:$0xff] }
  0x88   :  { %v11214_v14 = vpack.c.bf16 %v4480_v37, %v4468_v32  ;;  %v4474_v52 = vand.u32 4294901760, %v4473_v24  ;;  %v639_v56 = vsub.f32 %v19470_v4, %v17800_v62  ;;  %v17809_v10 = vand.u32 4294901760, %v19473_v15  ;;  %9380 = vmatprep.subr.bf16.mxu1 %v19474_v16  ;;  %v19475_v24 = vld [vmem:[#allocation51_spill] sm:$0xff]  ;;  %v19477_v16 = vld [vmem:[#allocation54_spill] sm:$0xff] }
  0x89   :  { %v11219_v23 = vpack.c.bf16 %v634_v33, %v622_v0  ;;  %v4486_v42 = vand.u32 4294901760, %v4485_v61  ;;  %v651_v32 = vsub.f32 %v19471_v35, %v17806_v13  ;;  %v4491_v37 = vsub.f32 %v19472_v57, %v17807_v6  ;;  %v19476_v0 = vld [vmem:[#allocation52_spill] sm:$0xff]  ;;  %v19480_v35 = vld [vmem:[#allocation170_spill] sm:$0xff] }
  0x8a   :  { %v17814_v33 = vand.u32 4294901760, %v19475_v24  ;;  %v17816_v61 = vand.u32 4294901760, %v19476_v0  ;;  %v640_v38 = vand.u32 4294901760, %v639_v56  ;;  %v4503_v62 = vsub.f32 %v19473_v15, %v17809_v10  ;;  %v19479_v10 = vld [vmem:[#allocation57_spill] sm:$0xff]  ;;  %8230 = vmatpush1.bf16.xpose.msra.mxu0 %v19480_v35 }
  0x8b   :  { %v11234_v45 = vpack.c.bf16 %v4486_v42, %v4474_v52  ;;  %v17817_v4 = vand.u32 4294901760, %v19477_v16  ;;  %v652_v50 = vand.u32 4294901760, %v651_v32  ;;  %v4492_v48 = vand.u32 4294901760, %v4491_v37  ;;  %v19478_v52 = vld [vmem:[#allocation55_spill] sm:$0xff]  ;;  %8232 = vmatprep.subr.bf16.mxu0 %v11007_v47  ;;  %9382 = vmatpush1.bf16.xpose.msra.mxu1 %v11001_v49 }
  0x8c   :  { %v645_v13 = vsub.f32 %v19475_v24, %v17814_v33  ;;  %v657_v6 = vsub.f32 %v19476_v0, %v17816_v61  ;;  %v4504_v57 = vand.u32 4294901760, %v4503_v62  ;;  %v17821_v56 = vand.u32 4294901760, %v19478_v52  ;;  %v19481_v33 = vld [vmem:[#allocation58_spill] sm:$0xff]  ;;  %v19484_v47 = vld [vmem:[#allocation63_spill] sm:$0xff]  ;;  %9384 = vmatprep.subr.bf16.mxu1 %v11014_v36 }
  0x8d   :  { %v4497_v42 = vsub.f32 %v19477_v16, %v17817_v4  ;;  %v17825_v15 = vand.u32 4294901760, %v19479_v10  ;;  %v11252_v32 = vpack.c.bf16 %v652_v50, %v640_v38  ;;  %v17824_v24 = vand.u32 4294901760, %v19481_v33 }
  0x8e   :  { %v646_v37 = vand.u32 4294901760, %v645_v13  ;;  %v658_v40 = vand.u32 4294901760, %v657_v6  ;;  %v11256_v61 = vpack.c.bf16 %v4504_v57, %v4492_v48  ;;  %v4509_v4 = vsub.f32 %v19478_v52, %v17821_v56  ;;  %v19482_v6 = vld [vmem:[#allocation60_spill] sm:$0xff]  ;;  %v19483_v13 = vld [vmem:[#allocation61_spill] sm:$0xff] }
  0x8f   :  { %v4498_v62 = vand.u32 4294901760, %v4497_v42  ;;  %v663_v16 = vsub.f32 %v19479_v10, %v17825_v15  ;;  %v675_v50 = vsub.f32 %v19481_v33, %v17824_v24  ;;  %v17832_v38 = vand.u32 4294901760, %v19482_v6  ;;  %v19485_v52 = vld [vmem:[#allocation64_spill] sm:$0xff]  ;;  %v19486_v15 = vld [vmem:[#allocation66_spill] sm:$0xff] }
  0x90   :  { %v11264_v35 = vpack.c.bf16 %v658_v40, %v646_v37  ;;  %v17834_v48 = vand.u32 4294901760, %v19483_v13  ;;  %v4510_v57 = vand.u32 4294901760, %v4509_v4  ;;  %v17835_v56 = vand.u32 4294901760, %v19484_v47 }
  0x91   :  { %v664_v42 = vand.u32 4294901760, %v663_v16  ;;  %v17838_v0 = vand.u32 4294901760, %v19485_v52  ;;  %v676_v40 = vand.u32 4294901760, %v675_v50  ;;  %v4515_v37 = vsub.f32 %v19482_v6, %v17832_v38  ;;  %v19487_v50 = vld [vmem:[#allocation67_spill] sm:$0xff] }
  0x92   :  { %v4527_v24 = vsub.f32 %v19483_v13, %v17834_v48  ;;  %v17840_v33 = vand.u32 4294901760, %v19486_v15  ;;  %v11282_v49 = vpack.c.bf16 %v4510_v57, %v4498_v62  ;;  %v669_v4 = vsub.f32 %v19484_v47, %v17835_v56  ;;  %v19488_v47 = vld [vmem:[#allocation69_spill] sm:$0xff]  ;;  %8234 = vmatpush1.bf16.xpose.msra.mxu0 %v11021_v53 }
  0x93   :  { %v681_v16 = vsub.f32 %v19485_v52, %v17838_v0  ;;  %v17841_v36 = vand.u32 4294901760, %v19487_v50  ;;  %v11291_v10 = vpack.c.bf16 %v676_v40, %v664_v42  ;;  %v4516_v38 = vand.u32 4294901760, %v4515_v37  ;;  %v19489_v40 = vld [vmem:[#allocation70_spill] sm:$0xff]  ;;  %8236 = vmatprep.subr.bf16.mxu0 %v11033_v60  ;;  %v19493_v60 = vld [vmem:[#allocation76_spill] sm:$0xff]  ;;  %9386 = vmatpush1.bf16.xpose.msra.mxu1 %v11027_v31 }
  0x94   :  { %v4528_v6 = vand.u32 4294901760, %v4527_v24  ;;  %v4521_v48 = vsub.f32 %v19486_v15, %v17840_v33  ;;  %v670_v62 = vand.u32 4294901760, %v669_v4  ;;  %v17847_v13 = vand.u32 4294901760, %v19488_v47  ;;  %v19490_v24 = vld [vmem:[#allocation72_spill] sm:$0xff]  ;;  %v19494_v15 = vld [vmem:[#allocation78_spill] sm:$0xff]  ;;  %9388 = vmatprep.subr.bf16.mxu1 %v11043_v29 }
  0x95   :  { %v682_v57 = vand.u32 4294901760, %v681_v16  ;;  %v4533_v56 = vsub.f32 %v19487_v50, %v17841_v36  ;;  %v17850_v37 = vand.u32 4294901760, %v19489_v40  ;;  %v17852_v52 = vand.u32 4294901760, %v19490_v24  ;;  %v19491_v36 = vld [vmem:[#allocation73_spill] sm:$0xff] }
  0x96   :  { %v11301_v0 = vpack.c.bf16 %v4528_v6, %v4516_v38  ;;  %v4522_v42 = vand.u32 4294901760, %v4521_v48  ;;  %v687_v16 = vsub.f32 %v19488_v47, %v17847_v13  ;;  %v17853_v50 = vand.u32 4294901760, %v19491_v36  ;;  %v19492_v48 = vld [vmem:[#allocation75_spill] sm:$0xff] }
  0x97   :  { %v11306_v33 = vpack.c.bf16 %v682_v57, %v670_v62  ;;  %v4534_v4 = vand.u32 4294901760, %v4533_v56  ;;  %v699_v6 = vsub.f32 %v19489_v40, %v17850_v37  ;;  %v4539_v38 = vsub.f32 %v19490_v24, %v17852_v52 }
  0x98   :  { %v17864_v53 = vand.u32 4294901760, %v19492_v48  ;;  %v17867_v62 = vand.u32 4294901760, %v19493_v60  ;;  %v688_v57 = vand.u32 4294901760, %v687_v16  ;;  %v4551_v13 = vsub.f32 %v19491_v36, %v17853_v50  ;;  %v19495_v50 = vld [vmem:[#allocation79_spill] sm:$0xff]  ;;  %v19496_v36 = vld [vmem:[#allocation81_spill] sm:$0xff] }
  0x99   :  { %v11321_v56 = vpack.c.bf16 %v4534_v4, %v4522_v42  ;;  %v17866_v47 = vand.u32 4294901760, %v19494_v15  ;;  %v700_v37 = vand.u32 4294901760, %v699_v6  ;;  %v4540_v40 = vand.u32 4294901760, %v4539_v38 }
  0x9a   :  { %v693_v52 = vsub.f32 %v19492_v48, %v17864_v53  ;;  %v705_v42 = vsub.f32 %v19493_v60, %v17867_v62  ;;  %v4552_v4 = vand.u32 4294901760, %v4551_v13  ;;  %v17868_v31 = vand.u32 4294901760, %v19495_v50  ;;  %8238 = vmatpush1.bf16.xpose.msra.mxu0 %v11059_v3  ;;  %v19523_v60 = vld [vmem:[#allocation117_spill] sm:$0xff] }
  0x9b   :  { %v4545_v16 = vsub.f32 %v19494_v15, %v17866_v47  ;;  %v17871_v24 = vand.u32 4294901760, %v19496_v36  ;;  %v11339_v29 = vpack.c.bf16 %v700_v37, %v688_v57  ;;  %v17873_v46 = vand.u32 4294901760, %v19497_v39  ;;  %v19498_v37 = vld [vmem:[#allocation84_spill] sm:$0xff]  ;;  %v19499_v57 = vld [vmem:[#allocation85_spill] sm:$0xff]  ;;  %8240 = vmatprep.subr.bf16.mxu0 %v11109_v26  ;;  %9390 = vmatpush1.bf16.xpose.msra.mxu1 %v11065_v43 }
  0x9c   :  { %v694_v6 = vand.u32 4294901760, %v693_v52  ;;  %v706_v38 = vand.u32 4294901760, %v705_v42  ;;  %v11342_v53 = vpack.c.bf16 %v4552_v4, %v4540_v40  ;;  %v4557_v13 = vsub.f32 %v19495_v50, %v17868_v31  ;;  %v19500_v31 = vld [vmem:[#allocation87_spill] sm:$0xff]  ;;  %v19501_v15 = vld [vmem:[#allocation88_spill] sm:$0xff]  ;;  %9392 = vmatprep.subr.bf16.mxu1 %v11119_v8  ;;  %v19506_v8 = vld [vmem:[#allocation94_spill] sm:$0xff] }
  0x9d   :  { %v4546_v48 = vand.u32 4294901760, %v4545_v16  ;;  %v711_v47 = vsub.f32 %v19496_v36, %v17871_v24  ;;  %v723_v52 = vsub.f32 %v19497_v39, %v17873_v46  ;;  %v17876_v40 = vand.u32 4294901760, %v19498_v37  ;;  %v19502_v46 = vld [vmem:[#allocation90_spill] sm:$0xff] }
  0x9e   :  { %v11351_v62 = vpack.c.bf16 %v706_v38, %v694_v6  ;;  %v17878_v42 = vand.u32 4294901760, %v19499_v57  ;;  %v4558_v4 = vand.u32 4294901760, %v4557_v13  ;;  %v17882_v50 = vand.u32 4294901760, %v19500_v31 }
  0x9f   :  { %v712_v16 = vand.u32 4294901760, %v711_v47  ;;  %v17884_v24 = vand.u32 4294901760, %v19501_v15  ;;  %v724_v36 = vand.u32 4294901760, %v723_v52  ;;  %v4563_v6 = vsub.f32 %v19498_v37, %v17876_v40  ;;  %v19503_v52 = vld [vmem:[#allocation91_spill] sm:$0xff] }
  0xa0   :  { %v4575_v38 = vsub.f32 %v19499_v57, %v17878_v42  ;;  %v11369_v26 = vpack.c.bf16 %v4558_v4, %v4546_v48  ;;  %v717_v47 = vsub.f32 %v19500_v31, %v17882_v50  ;;  %v17887_v40 = vand.u32 4294901760, %v19503_v52  ;;  %v19505_v31 = vld [vmem:[#allocation93_spill] sm:$0xff] }
  0xa1   :  { %v729_v13 = vsub.f32 %v19501_v15, %v17884_v24  ;;  %v11379_v37 = vpack.c.bf16 %v724_v36, %v712_v16  ;;  %v4564_v42 = vand.u32 4294901760, %v4563_v6  ;;  %v19504_v43 = vand.u32 4294901760, %v19502_v46  ;;  %v19507_v16 = vld [vmem:[#allocation96_spill] sm:$0xff]  ;;  %558 = vmatmul.mubr.f32.vlgmr.msra.gmra.mrb[0].mxu0 %v11132_v28 }
  0xa2   :  { %v4576_v3 = vand.u32 4294901760, %v4575_v38  ;;  %v718_v4 = vand.u32 4294901760, %v717_v47  ;;  %v4581_v50 = vsub.f32 %v19503_v52, %v17887_v40  ;;  %v17888_v24 = vand.u32 4294901760, %v19505_v31  ;;  %8242 = vmatpush1.bf16.xpose.msra.mxu0 %v11128_v18  ;;  %949 = vmatprep.mubr.f32.mxu0 %v11050_v51 }
  0xa3   :  { %v4569_v48 = vsub.f32 %v19502_v46, %v19504_v43  ;;  %v730_v57 = vand.u32 4294901760, %v729_v13  ;;  %v17890_v36 = vand.u32 4294901760, %v19506_v8  ;;  %v17892_v6 = vand.u32 4294901760, %v19507_v16  ;;  %v19508_v13 = vld [vmem:[#allocation97_spill] sm:$0xff]  ;;  %8244 = vmatprep.subr.bf16.mxu0 %v11165_v58  ;;  %4410 = vmatmul.mubr.f32.vlgmr.msra.gmra.mrb[0].mxu1 %v11132_v28 }
  0xa4   :  { %v11388_v15 = vpack.c.bf16 %v4576_v3, %v4564_v42  ;;  %v4582_v43 = vand.u32 4294901760, %v4581_v50  ;;  %v735_v47 = vsub.f32 %v19505_v31, %v17888_v24  ;;  %v19511_v18 = vand.u32 4294901760, %v19508_v13  ;;  %9394 = vmatpush1.bf16.xpose.msra.mxu1 %v11146_v2  ;;  %v19515_v28 = vld [vmem:[#allocation105_spill] sm:$0xff]  ;;  %4801 = vmatprep.mubr.f32.mxu1 %v11050_v51  ;;  %v19520_v31 = vld [vmem:[#allocation112_spill] sm:$0xff] }
  0xa5   :  { %v4570_v39 = vand.u32 4294901760, %v4569_v48  ;;  %v11393_v38 = vpack.c.bf16 %v730_v57, %v718_v4  ;;  %v747_v3 = vsub.f32 %v19506_v8, %v17890_v36  ;;  %v4587_v42 = vsub.f32 %v19507_v16, %v17892_v6  ;;  %v19509_v48 = vld [vmem:[#allocation99_spill] sm:$0xff]  ;;  %v19510_v4 = vld [vmem:[#allocation100_spill] sm:$0xff]  ;;  %v19512_v36 = vld [vmem:[#allocation102_spill] sm:$0xff]  ;;  %9396 = vmatprep.subr.bf16.mxu1 %v11169_v30 }
  0xa6   :  { %v17895_v57 = vand.u32 4294901760, %v19509_v48  ;;  %v736_v40 = vand.u32 4294901760, %v735_v47  ;;  %v4599_v52 = vsub.f32 %v19508_v13, %v19511_v18  ;;  %v17898_v46 = vand.u32 4294901760, %v19512_v36  ;;  %v19514_v47 = vld [vmem:[#allocation103_spill] sm:$0xff] }
  0xa7   :  { %v11410_v24 = vpack.c.bf16 %v4582_v43, %v4570_v39  ;;  %v748_v6 = vand.u32 4294901760, %v747_v3  ;;  %v4588_v16 = vand.u32 4294901760, %v4587_v42  ;;  %v19513_v8 = vand.u32 4294901760, %v19510_v4 }
  0xa8   :  { %v741_v50 = vsub.f32 %v19509_v48, %v17895_v57  ;;  %v4600_v58 = vand.u32 4294901760, %v4599_v52  ;;  %v4593_v43 = vsub.f32 %v19512_v36, %v17898_v46  ;;  %v17904_v18 = vand.u32 4294901760, %v19514_v47 }
  0xa9   :  { %v753_v39 = vsub.f32 %v19510_v4, %v19513_v8  ;;  %v17907_v3 = vand.u32 4294901760, %v19515_v28  ;;  %v11431_v42 = vpack.c.bf16 %v748_v6, %v736_v40  ;;  %v19516_v8 = vld [vmem:[#allocation106_spill] sm:$0xff]  ;;  %v19517_v40 = vld [vmem:[#allocation108_spill] sm:$0xff]  ;;  %v17929_v27 = vand.u32 4294901760, %v19525_v41 }
  0xaa   :  { %v742_v57 = vand.u32 4294901760, %v741_v50  ;;  %v17906_v4 = vand.u32 4294901760, %v19516_v8  ;;  %v11434_v2 = vpack.c.bf16 %v4600_v58, %v4588_v16  ;;  %v4594_v52 = vand.u32 4294901760, %v4593_v43  ;;  %v19518_v50 = vld [vmem:[#allocation109_spill] sm:$0xff]  ;;  %v19519_v43 = vld [vmem:[#allocation111_spill] sm:$0xff]  ;;  %8246 = vmatpush1.bf16.xpose.msra.mxu0 %v11178_v44 }
  0xab   :  { %v754_v48 = vand.u32 4294901760, %v753_v39  ;;  %v4605_v46 = vsub.f32 %v19514_v47, %v17904_v18  ;;  %v759_v36 = vsub.f32 %v19515_v28, %v17907_v3  ;;  %v17908_v6 = vand.u32 4294901760, %v19517_v40  ;;  %8248 = vmatprep.subr.bf16.mxu0 %v11204_v5 }
  0xac   :  { %v771_v30 = vsub.f32 %v19516_v8, %v17906_v4  ;;  %v17911_v16 = vand.u32 4294901760, %v19518_v50  ;;  %v17912_v13 = vand.u32 4294901760, %v19519_v43  ;;  %v17914_v18 = vand.u32 4294901760, %v19520_v31  ;;  %v19521_v4 = vld [vmem:[#allocation114_spill] sm:$0xff]  ;;  %9398 = vmatpush1.bf16.xpose.msra.mxu1 %v11194_v19 }
  0xad   :  { %v11442_v51 = vpack.c.bf16 %v754_v48, %v742_v57  ;;  %v4606_v39 = vand.u32 4294901760, %v4605_v46  ;;  %v760_v58 = vand.u32 4294901760, %v759_v36  ;;  %v4611_v48 = vsub.f32 %v19517_v40, %v17908_v6  ;;  %9400 = vmatprep.subr.bf16.mxu1 %v11214_v14 }
  0xae   :  { %v772_v47 = vand.u32 4294901760, %v771_v30  ;;  %v4623_v57 = vsub.f32 %v19518_v50, %v17911_v16  ;;  %v17919_v3 = vand.u32 4294901760, %v19521_v4  ;;  %v765_v36 = vsub.f32 %v19519_v43, %v17912_v13  ;;  %v19522_v30 = vld [vmem:[#allocation115_spill] sm:$0xff] }
  0xaf   :  { %v11460_v46 = vpack.c.bf16 %v4606_v39, %v4594_v52  ;;  %v777_v44 = vsub.f32 %v19520_v31, %v17914_v18  ;;  %v17920_v6 = vand.u32 4294901760, %v19522_v30  ;;  %v4612_v28 = vand.u32 4294901760, %v4611_v48  ;;  %v19524_v48 = vld [vmem:[#allocation118_spill] sm:$0xff] }
  0xb0   :  { %v11469_v8 = vpack.c.bf16 %v772_v47, %v760_v58  ;;  %v4624_v16 = vand.u32 4294901760, %v4623_v57  ;;  %v4617_v5 = vsub.f32 %v19521_v4, %v17919_v3  ;;  %v766_v52 = vand.u32 4294901760, %v765_v36 }
  0xb1   :  { %v778_v39 = vand.u32 4294901760, %v777_v44  ;;  %v4629_v13 = vsub.f32 %v19522_v30, %v17920_v6  ;;  %v17923_v18 = vand.u32 4294901760, %v19523_v60  ;;  %v17927_v57 = vand.u32 4294901760, %v19524_v48  ;;  %v19526_v44 = vld [vmem:[#allocation121_spill] sm:$0xff] }
  0xb2   :  { %v11480_v47 = vpack.c.bf16 %v4624_v16, %v4612_v28  ;;  %v4618_v58 = vand.u32 4294901760, %v4617_v5  ;;  %v17930_v6 = vand.u32 4294901760, %v19526_v44  ;;  %v4635_v28 = vsub.f32 %v19525_v41, %v17929_v27  ;;  %v19527_v16 = vld [vmem:[#allocation123_spill] sm:$0xff]  ;;  %8250 = vmatpush1.bf16.xpose.msra.mxu0 %v11219_v23  ;;  %v19531_v23 = vld [vmem:[#allocation129_spill] sm:$0xff] }
  0xb3   :  { %v11484_v3 = vpack.c.bf16 %v778_v39, %v766_v52  ;;  %v4630_v19 = vand.u32 4294901760, %v4629_v13  ;;  %v783_v36 = vsub.f32 %v19523_v60, %v17923_v18  ;;  %v795_v14 = vsub.f32 %v19524_v48, %v17927_v57  ;;  %8252 = vmatprep.subr.bf16.mxu0 %v11252_v32 }
  0xb4   :  { %v17934_v5 = vand.u32 4294901760, %v19527_v16  ;;  %v17936_v52 = vand.u32 4294901760, %v19528_v25  ;;  %v4647_v18 = vsub.f32 %v19526_v44, %v17930_v6  ;;  %v17937_v60 = vand.u32 4294901760, %v19529_v17  ;;  %v19530_v6 = vld [vmem:[#allocation127_spill] sm:$0xff]  ;;  %9402 = vmatpush1.bf16.xpose.msra.mxu1 %v11234_v45  ;;  %v19533_v45 = vld [vmem:[#allocation132_spill] sm:$0xff] }
  0xb5   :  { %v11498_v39 = vpack.c.bf16 %v4630_v19, %v4618_v58  ;;  %v784_v13 = vand.u32 4294901760, %v783_v36  ;;  %v796_v57 = vand.u32 4294901760, %v795_v14  ;;  %v4636_v48 = vand.u32 4294901760, %v4635_v28  ;;  %9404 = vmatprep.subr.bf16.mxu1 %v11256_v61 }
  0xb6   :  { %v789_v27 = vsub.f32 %v19527_v16, %v17934_v5  ;;  %v801_v58 = vsub.f32 %v19528_v25, %v17936_v52  ;;  %v4648_v19 = vand.u32 4294901760, %v4647_v18  ;;  %v4641_v36 = vsub.f32 %v19529_v17, %v17937_v60  ;;  %v19532_v5 = vld [vmem:[#allocation130_spill] sm:$0xff]  ;;  %v19535_v17 = vld [vmem:[#allocation135_spill] sm:$0xff] }
  0xb7   :  { %v17939_v44 = vand.u32 4294901760, %v19530_v6  ;;  %v17944_v14 = vand.u32 4294901760, %v19531_v23  ;;  %v11517_v28 = vpack.c.bf16 %v796_v57, %v784_v13  ;;  %v17943_v16 = vand.u32 4294901760, %v19532_v5  ;;  %v19534_v13 = vld [vmem:[#allocation133_spill] sm:$0xff] }
  0xb8   :  { %v790_v41 = vand.u32 4294901760, %v789_v27  ;;  %v802_v30 = vand.u32 4294901760, %v801_v58  ;;  %v11521_v52 = vpack.c.bf16 %v4648_v19, %v4636_v48  ;;  %v4642_v32 = vand.u32 4294901760, %v4641_v36 }
  0xb9   :  { %v4653_v18 = vsub.f32 %v19530_v6, %v17939_v44  ;;  %v807_v60 = vsub.f32 %v19531_v23, %v17944_v14  ;;  %v819_v27 = vsub.f32 %v19532_v5, %v17943_v16  ;;  %v17946_v48 = vand.u32 4294901760, %v19533_v45  ;;  %v19536_v6 = vld [vmem:[#allocation136_spill] sm:$0xff] }
  0xba   :  { %v11530_v57 = vpack.c.bf16 %v802_v30, %v790_v41  ;;  %v17948_v58 = vand.u32 4294901760, %v19534_v13  ;;  %v17949_v44 = vand.u32 4294901760, %v19535_v17  ;;  %v17950_v25 = vand.u32 4294901760, %v19536_v6  ;;  %v19537_v30 = vld [vmem:[#allocation138_spill] sm:$0xff]  ;;  %8254 = vmatpush1.bf16.xpose.msra.mxu0 %v11264_v35 }
  0xbb   :  { %v4654_v19 = vand.u32 4294901760, %v4653_v18  ;;  %v808_v36 = vand.u32 4294901760, %v807_v60  ;;  %v820_v4 = vand.u32 4294901760, %v819_v27  ;;  %v4659_v41 = vsub.f32 %v19533_v45, %v17946_v48  ;;  %v19538_v27 = vld [vmem:[#allocation139_spill] sm:$0xff]  ;;  %8256 = vmatprep.subr.bf16.mxu0 %v11291_v10 }
  0xbc   :  { %v4671_v61 = vsub.f32 %v19534_v13, %v17948_v58  ;;  %v17954_v16 = vand.u32 4294901760, %v19537_v30  ;;  %v813_v60 = vsub.f32 %v19535_v17, %v17949_v44  ;;  %v825_v18 = vsub.f32 %v19536_v6, %v17950_v25  ;;  %v19539_v6 = vld [vmem:[#allocation141_spill] sm:$0xff]  ;;  %9406 = vmatpush1.bf16.xpose.msra.mxu1 %v11282_v49  ;;  %v19544_v49 = vld [vmem:[#allocation147_spill] sm:$0xff] }
  0xbd   :  { %v11546_v14 = vpack.c.bf16 %v4654_v19, %v4642_v32  ;;  %v17955_v5 = vand.u32 4294901760, %v19538_v27  ;;  %v11556_v48 = vpack.c.bf16 %v820_v4, %v808_v36  ;;  %v4660_v45 = vand.u32 4294901760, %v4659_v41  ;;  %v19540_v4 = vld [vmem:[#allocation142_spill] sm:$0xff]  ;;  %v19541_v41 = vld [vmem:[#allocation144_spill] sm:$0xff]  ;;  %9408 = vmatprep.subr.bf16.mxu1 %v11301_v0 }
  0xbe   :  { %v4672_v58 = vand.u32 4294901760, %v4671_v61  ;;  %v4665_v32 = vsub.f32 %v19537_v30, %v17954_v16  ;;  %v814_v19 = vand.u32 4294901760, %v813_v60  ;;  %v826_v44 = vand.u32 4294901760, %v825_v18  ;;  %v19543_v18 = vld [vmem:[#allocation145_spill] sm:$0xff]  ;;  %v19546_v0 = vld [vmem:[#allocation150_spill] sm:$0xff] }
  0xbf   :  { %v4677_v25 = vsub.f32 %v19538_v27, %v17955_v5  ;;  %v17957_v17 = vand.u32 4294901760, %v19539_v6  ;;  %v17960_v36 = vand.u32 4294901760, %v19540_v4  ;;  %v17961_v61 = vand.u32 4294901760, %v19541_v41 }
  0xc0   :  { %v11566_v13 = vpack.c.bf16 %v4672_v58, %v4660_v45  ;;  %v4666_v35 = vand.u32 4294901760, %v4665_v32  ;;  %v11571_v16 = vpack.c.bf16 %v826_v44, %v814_v19  ;;  %v17963_v5 = vand.u32 4294901760, %v19543_v18  ;;  %v19545_v32 = vld [vmem:[#allocation148_spill] sm:$0xff] }
  0xc1   :  { %v4678_v10 = vand.u32 4294901760, %v4677_v25  ;;  %v831_v60 = vsub.f32 %v19539_v6, %v17957_v17  ;;  %v843_v45 = vsub.f32 %v19540_v4, %v17960_v36  ;;  %v4683_v58 = vsub.f32 %v19541_v41, %v17961_v61 }
  0xc2   :  { %19542 = vst [vmem:[#allocation108_spill] sm:$0xff] %v11571_v16  ;;  %v17966_v44 = vand.u32 4294901760, %v19544_v49  ;;  %v17968_v25 = vand.u32 4294901760, %v19545_v32  ;;  %v4695_v17 = vsub.f32 %v19543_v18, %v17963_v5  ;;  %v17969_v6 = vand.u32 4294901760, %v19546_v0  ;;  %v19548_v5 = vld [vmem:[#allocation153_spill] sm:$0xff]  ;;  %8258 = vmatpush1.bf16.xpose.msra.mxu0 %v11306_v33 }
  0xc3   :  { %v11586_v19 = vpack.c.bf16 %v4678_v10, %v4666_v35  ;;  %v832_v27 = vand.u32 4294901760, %v831_v60  ;;  %v844_v30 = vand.u32 4294901760, %v843_v45  ;;  %v4684_v16 = vand.u32 4294901760, %v4683_v58  ;;  %v19547_v10 = vld [vmem:[#allocation151_spill] sm:$0xff]  ;;  %8260 = vmatprep.subr.bf16.mxu0 %v11339_v29  ;;  %v19551_v29 = vld [vmem:[#allocation157_spill] sm:$0xff] }
  0xc4   :  { %v837_v36 = vsub.f32 %v19544_v49, %v17966_v44  ;;  %v849_v61 = vsub.f32 %v19545_v32, %v17968_v25  ;;  %v4696_v41 = vand.u32 4294901760, %v4695_v17  ;;  %v4689_v35 = vsub.f32 %v19546_v0, %v17969_v6  ;;  %v19549_v44 = vld [vmem:[#allocation154_spill] sm:$0xff]  ;;  %9410 = vmatpush1.bf16.xpose.msra.mxu1 %v11321_v56 }
  0xc5   :  { %v17971_v60 = vand.u32 4294901760, %v19547_v10  ;;  %v17975_v18 = vand.u32 4294901760, %v19548_v5  ;;  %v11604_v45 = vpack.c.bf16 %v844_v30, %v832_v27  ;;  %v17974_v49 = vand.u32 4294901760, %v19549_v44  ;;  %v19550_v27 = vld [vmem:[#allocation156_spill] sm:$0xff]  ;;  %9412 = vmatprep.subr.bf16.mxu1 %v11342_v53 }
  0xc6   :  { %v838_v58 = vand.u32 4294901760, %v837_v36  ;;  %v850_v4 = vand.u32 4294901760, %v849_v61  ;;  %v11608_v25 = vpack.c.bf16 %v4696_v41, %v4684_v16  ;;  %v4690_v17 = vand.u32 4294901760, %v4689_v35  ;;  %v19552_v35 = vld [vmem:[#allocation159_spill] sm:$0xff] }
  0xc7   :  { %v4701_v6 = vsub.f32 %v19547_v10, %v17971_v60  ;;  %v855_v0 = vsub.f32 %v19548_v5, %v17975_v18  ;;  %v867_v30 = vsub.f32 %v19549_v44, %v17974_v49  ;;  %v17978_v36 = vand.u32 4294901760, %v19550_v27  ;;  %v19553_v10 = vld [vmem:[#allocation160_spill] sm:$0xff]  ;;  %v19554_v18 = vld [vmem:[#allocation162_spill] sm:$0xff] }
  0xc8   :  { %v11616_v33 = vpack.c.bf16 %v850_v4, %v838_v58  ;;  %v17980_v16 = vand.u32 4294901760, %v19551_v29  ;;  %v17981_v60 = vand.u32 4294901760, %v19552_v35  ;;  %v17984_v32 = vand.u32 4294901760, %v19553_v10 }
  0xc9   :  { %v4702_v41 = vand.u32 4294901760, %v4701_v6  ;;  %v856_v61 = vand.u32 4294901760, %v855_v0  ;;  %v868_v4 = vand.u32 4294901760, %v867_v30  ;;  %v4707_v58 = vsub.f32 %v19550_v27, %v17978_v36  ;;  %v19555_v0 = vld [vmem:[#allocation163_spill] sm:$0xff] }
  0xca   :  { %v4719_v49 = vsub.f32 %v19551_v29, %v17980_v16  ;;  %v17986_v44 = vand.u32 4294901760, %v19554_v18  ;;  %v861_v6 = vsub.f32 %v19552_v35, %v17981_v60  ;;  %v873_v53 = vsub.f32 %v19553_v10, %v17984_v32  ;;  %v19556_v35 = vld [vmem:[#allocation165_spill] sm:$0xff]  ;;  %8262 = vmatpush1.bf16.xpose.msra.mxu0 %v11351_v62 }
  0xcb   :  { %v11634_v56 = vpack.c.bf16 %v4702_v41, %v4690_v17  ;;  %v17987_v30 = vand.u32 4294901760, %v19555_v0  ;;  %v11643_v5 = vpack.c.bf16 %v868_v4, %v856_v61  ;;  %v4708_v36 = vand.u32 4294901760, %v4707_v58  ;;  %v19557_v4 = vld [vmem:[#allocation166_spill] sm:$0xff]  ;;  %8264 = vmatprep.subr.bf16.mxu0 %v11379_v37 }
  0xcc   :  { %v4720_v27 = vand.u32 4294901760, %v4719_v49  ;;  %v4713_v16 = vsub.f32 %v19554_v18, %v17986_v44  ;;  %v862_v17 = vand.u32 4294901760, %v861_v6  ;;  %v874_v41 = vand.u32 4294901760, %v873_v53  ;;  %v19558_v49 = vld [vmem:[#allocation168_spill] sm:$0xff]  ;;  %9414 = vmatpush1.bf16.xpose.msra.mxu1 %v11369_v26 }
  0xcd   :  { %v4725_v60 = vsub.f32 %v19555_v0, %v17987_v30  ;;  %v17989_v29 = vand.u32 4294901760, %v19556_v35  ;;  %v17990_v58 = vand.u32 4294901760, %v19557_v4  ;;  %v17992_v10 = vand.u32 4294901760, %v19558_v49  ;;  %v19559_v30 = vld [vmem:[#allocation169_spill] sm:$0xff]  ;;  %9416 = vmatprep.subr.bf16.mxu1 %v11388_v15 }
  0xce   :  { %v11653_v32 = vpack.c.bf16 %v4720_v27, %v4708_v36  ;;  %v4714_v61 = vand.u32 4294901760, %v4713_v16  ;;  %v11658_v44 = vpack.c.bf16 %v874_v41, %v862_v17  ;;  %v17993_v0 = vand.u32 4294901760, %v19559_v30  ;;  %v19561_v41 = vld [vmem:[#allocation174_spill] sm:$0xff] }
  0xcf   :  { %v4726_v6 = vand.u32 4294901760, %v4725_v60  ;;  %v879_v53 = vsub.f32 %v19556_v35, %v17989_v29  ;;  %v891_v62 = vsub.f32 %v19557_v4, %v17990_v58  ;;  %v4731_v27 = vsub.f32 %v19558_v49, %v17992_v10  ;;  %v19564_v35 = vld [vmem:[#allocation178_spill] sm:$0xff] }
  0xd0   :  { %v17997_v36 = vand.u32 4294901760, %v10997_v21  ;;  %v18001_v37 = vand.u32 4294901760, %v10999_v11  ;;  %v4743_v17 = vsub.f32 %v19559_v30, %v17993_v0  ;;  %v18000_v29 = vand.u32 4294901760, %v19561_v41  ;;  %v19563_v30 = vld [vmem:[#allocation177_spill] sm:$0xff] }
  0xd1   :  { %v11673_v60 = vpack.c.bf16 %v4726_v6, %v4714_v61  ;;  %v880_v16 = vand.u32 4294901760, %v879_v53  ;;  %v892_v58 = vand.u32 4294901760, %v891_v62  ;;  %v4732_v4 = vand.u32 4294901760, %v4731_v27  ;;  %v19562_v53 = vld [vmem:[#allocation175_spill] sm:$0xff] }
  0xd2   :  { %v885_v10 = vsub.f32 %v10997_v21, %v17997_v36  ;;  %v897_v26 = vsub.f32 %v10999_v11, %v18001_v37  ;;  %v4744_v61 = vand.u32 4294901760, %v4743_v17  ;;  %v4737_v6 = vsub.f32 %v19561_v41, %v18000_v29  ;;  %8266 = vmatpush1.bf16.xpose.msra.mxu0 %v11393_v38 }
  0xd3   :  { %19560 = vst [vmem:[#allocation111_spill] sm:$0xff] %v11673_v60  ;;  %v18002_v0 = vand.u32 4294901760, %v19562_v53  ;;  %v18003_v49 = vand.u32 4294901760, %v19563_v30  ;;  %v11691_v15 = vpack.c.bf16 %v892_v58, %v880_v16  ;;  %v18007_v60 = vand.u32 4294901760, %v19564_v35  ;;  %v19565_v58 = vld [vmem:[#allocation180_spill] sm:$0xff]  ;;  %v19566_v16 = vld [vmem:[#allocation181_spill] sm:$0xff]  ;;  %8268 = vmatprep.subr.bf16.mxu0 %v11431_v42 }
  0xd4   :  { %v886_v62 = vand.u32 4294901760, %v885_v10  ;;  %v898_v27 = vand.u32 4294901760, %v897_v26  ;;  %v11694_v36 = vpack.c.bf16 %v4744_v61, %v4732_v4  ;;  %v4738_v21 = vand.u32 4294901760, %v4737_v6  ;;  %9418 = vmatpush1.bf16.xpose.msra.mxu1 %v11410_v24 }
  0xd5   :  { %v4749_v17 = vsub.f32 %v19562_v53, %v18002_v0  ;;  %v903_v29 = vsub.f32 %v19563_v30, %v18003_v49  ;;  %v915_v10 = vsub.f32 %v19564_v35, %v18007_v60  ;;  %v18005_v4 = vand.u32 4294901760, %v19565_v58  ;;  %9420 = vmatprep.subr.bf16.mxu1 %v11434_v2 }
  0xd6   :  { %v11703_v37 = vpack.c.bf16 %v898_v27, %v886_v62  ;;  %v18006_v26 = vand.u32 4294901760, %v19566_v16  ;;  %v18008_v0 = vand.u32 4294901760, %v11023_v20  ;;  %v18011_v49 = vand.u32 4294901760, %v11025_v59 }
  0xd7   :  { %v4750_v61 = vand.u32 4294901760, %v4749_v17  ;;  %v904_v6 = vand.u32 4294901760, %v903_v29  ;;  %v916_v30 = vand.u32 4294901760, %v915_v10  ;;  %v4755_v38 = vsub.f32 %v19565_v58, %v18005_v4 }
  0xd8   :  { %v4767_v62 = vsub.f32 %v19566_v16, %v18006_v26  ;;  %v18016_v27 = vand.u32 4294901760, %v11029_v7  ;;  %v909_v29 = vsub.f32 %v11023_v20, %v18008_v0  ;;  %v921_v17 = vsub.f32 %v11025_v59, %v18011_v49  ;;  %v19567_v20 = vld [vmem:[#allocation189_spill] sm:$0xff] }
  0xd9   :  { %v11721_v42 = vpack.c.bf16 %v4750_v61, %v4738_v21  ;;  %v18015_v10 = vand.u32 4294901760, %v11031_v34  ;;  %v11731_v4 = vpack.c.bf16 %v916_v30, %v904_v6  ;;  %v4756_v26 = vand.u32 4294901760, %v4755_v38 }
  0xda   :  { %v4768_v60 = vand.u32 4294901760, %v4767_v62  ;;  %v4761_v21 = vsub.f32 %v11029_v7, %v18016_v27  ;;  %v910_v24 = vand.u32 4294901760, %v909_v29  ;;  %v922_v61 = vand.u32 4294901760, %v921_v17  ;;  %8270 = vmatpush1.bf16.xpose.msra.mxu0 %v11442_v51 }
  0xdb   :  { %v4773_v0 = vsub.f32 %v11031_v34, %v18015_v10  ;;  %v18022_v49 = vand.u32 4294901760, %v19567_v20  ;;  %v18018_v2 = vand.u32 4294901760, %v11041_v55  ;;  %v18017_v30 = vand.u32 4294901760, %v11045_v63  ;;  %8272 = vmatprep.subr.bf16.mxu0 %v11469_v8 }
  0xdc   :  { %v11740_v59 = vpack.c.bf16 %v4768_v60, %v4756_v26  ;;  %v4762_v16 = vand.u32 4294901760, %v4761_v21  ;;  %v11744_v6 = vpack.c.bf16 %v922_v61, %v910_v24  ;;  %v18019_v29 = vand.u32 4294901760, %v11047_v1  ;;  %9422 = vmatpush1.bf16.xpose.msra.mxu1 %v11460_v46 }
  0xdd   :  { %v4774_v38 = vand.u32 4294901760, %v4773_v0  ;;  %v927_v62 = vsub.f32 %v19567_v20, %v18022_v49  ;;  %v939_v60 = vsub.f32 %v11041_v55, %v18018_v2  ;;  %v4779_v26 = vsub.f32 %v11045_v63, %v18017_v30  ;;  %9424 = vmatprep.subr.bf16.mxu1 %v11480_v47  ;;  %v19582_v47 = vld [vmem:[#allocation136_spill] sm:$0xff]  ;;  %v19618_v63 = vld [vmem:[#allocation22_spill] sm:$0xff] }
  0xde   :  { %v18020_v17 = vand.u32 4294901760, %v11061_v9  ;;  %v18021_v0 = vand.u32 4294901760, %v11063_v12  ;;  %v4791_v51 = vsub.f32 %v11047_v1, %v18019_v29  ;;  %v18024_v61 = vand.u32 4294901760, %v11068_v22 }
  0xdf   :  { %v11760_v21 = vpack.c.bf16 %v4774_v38, %v4762_v16  ;;  %v928_v24 = vand.u32 4294901760, %v927_v62  ;;  %v940_v10 = vand.u32 4294901760, %v939_v60  ;;  %v4780_v27 = vand.u32 4294901760, %v4779_v26 }
  0xe0   :  { %v933_v30 = vsub.f32 %v11061_v9, %v18020_v17  ;;  %v945_v2 = vsub.f32 %v11063_v12, %v18021_v0  ;;  %v4792_v8 = vand.u32 4294901760, %v4791_v51  ;;  %v4785_v16 = vsub.f32 %v11068_v22, %v18024_v61  ;;  %v19610_v61 = vld [vmem:[#allocation184_spill] sm:$0xff]  ;;  %v19620_v9 = vld [vmem:[#allocation18_spill] sm:$0xff]  ;;  %v19624_v12 = vld [vmem:[#allocation201_spill] sm:$0xff] }
  0xe1   :  { %v18023_v38 = vand.u32 4294901760, %v11070_v54  ;;  %v8299_v62 = vpack.c.bf16 %v940_v10, %v928_v24  ;;  %v19568_v10 = vld [vmem:[#allocation114_spill] sm:$0xff]  ;;  %v19570_v24 = vld [vmem:[#allocation117_spill] sm:$0xff] }
  0xe2   :  { %v934_v60 = vand.u32 4294901760, %v933_v30  ;;  %v946_v26 = vand.u32 4294901760, %v945_v2  ;;  %v9451_v29 = vpack.c.bf16 %v4792_v8, %v4780_v27  ;;  %v4786_v17 = vand.u32 4294901760, %v4785_v16  ;;  %8274 = vmatpush1.bf16.xpose.msra.mxu0 %v11484_v3  ;;  %v19569_v2 = vld [vmem:[#allocation115_spill] sm:$0xff]  ;;  %v19572_v3 = vld [vmem:[#allocation120_spill] sm:$0xff]  ;;  %v19573_v16 = vld [vmem:[#allocation121_spill] sm:$0xff] }
  0xe3   :  { %v4797_v0 = vsub.f32 %v11070_v54, %v18023_v38  ;;  %8276 = vmatprep.subr.bf16.mxu0 %v11517_v28  ;;  %v19578_v38 = vld [vmem:[#allocation130_spill] sm:$0xff]  ;;  %v19580_v8 = vld [vmem:[#allocation133_spill] sm:$0xff]  ;;  %v19591_v30 = vld [vmem:[#allocation148_spill] sm:$0xff] }
  0xe4   :  { %v8301_v49 = vpack.c.bf16 %v946_v26, %v934_v60  ;;  %9426 = vmatpush1.bf16.xpose.msra.mxu1 %v11498_v39  ;;  %v19589_v26 = vld [vmem:[#allocation145_spill] sm:$0xff]  ;;  %v19604_v28 = vld [vmem:[#allocation168_spill] sm:$0xff]  ;;  %v19612_v39 = vld [vmem:[#allocation10_spill] sm:$0xff] }
  0xe5   :  { %v4798_v46 = vand.u32 4294901760, %v4797_v0  ;;  %9428 = vmatprep.subr.bf16.mxu1 %v11521_v52  ;;  %v19571_v0 = vld [vmem:[#allocation118_spill] sm:$0xff]  ;;  %v19597_v60 = vld [vmem:[#allocation157_spill] sm:$0xff]  ;;  %v19599_v52 = vld [vmem:[#allocation160_spill] sm:$0xff] }
  0xe6   :  { %v19611_v27 = vld [vmem:[#allocation9_spill] sm:$0xff] }
  0xe7   :  { %v9453_v51 = vpack.c.bf16 %v4798_v46, %v4786_v17  ;;  %v19583_v17 = vld [vmem:[#allocation108_spill] sm:$0xff]  ;;  %v19608_v46 = vld [vmem:[#allocation181_spill] sm:$0xff] }
  0xea   :  { %8278 = vmatpush1.bf16.xpose.msra.mxu0 %v11530_v57  ;;  %v19596_v57 = vld [vmem:[#allocation156_spill] sm:$0xff] }
  0xeb   :  { %8280 = vmatprep.subr.bf16.mxu0 %v11556_v48  ;;  %v19587_v48 = vld [vmem:[#allocation142_spill] sm:$0xff] }
  0xec   :  { %9430 = vmatpush1.bf16.xpose.msra.mxu1 %v11546_v14  ;;  %v19586_v14 = vld [vmem:[#allocation141_spill] sm:$0xff] }
  0xed   :  { %9432 = vmatprep.subr.bf16.mxu1 %v11566_v13  ;;  %v19590_v13 = vld [vmem:[#allocation147_spill] sm:$0xff] }
  0xf2   :  { %8282 = vmatpush1.bf16.xpose.msra.mxu0 %v19583_v17  ;;  %v19603_v17 = vld [vmem:[#allocation166_spill] sm:$0xff] }
  0xf3   :  { %8284 = vmatprep.subr.bf16.mxu0 %v11604_v45  ;;  %v19595_v45 = vld [vmem:[#allocation154_spill] sm:$0xff] }
  0xf4   :  { %9434 = vmatpush1.bf16.xpose.msra.mxu1 %v11586_v19  ;;  %v19605_v19 = vld [vmem:[#allocation169_spill] sm:$0xff] }
  0xf5   :  { %9436 = vmatprep.subr.bf16.mxu1 %v11608_v25  ;;  %v19598_v25 = vld [vmem:[#allocation159_spill] sm:$0xff] }
  0xfa   :  { %8286 = vmatpush1.bf16.xpose.msra.mxu0 %v11616_v33  ;;  %v19600_v33 = vld [vmem:[#allocation163_spill] sm:$0xff] }
  0xfb   :  { %8288 = vmatprep.subr.bf16.mxu0 %v11643_v5  ;;  %v19601_v5 = vld [vmem:[#allocation111_spill] sm:$0xff] }
  0xfc   :  { %9438 = vmatpush1.bf16.xpose.msra.mxu1 %v11634_v56  ;;  %v19602_v56 = vld [vmem:[#allocation165_spill] sm:$0xff] }
  0xfd   :  { %9440 = vmatprep.subr.bf16.mxu1 %v11653_v32  ;;  %v19606_v32 = vld [vmem:[#allocation171_spill] sm:$0xff] }
 0x102   :  { %8290 = vmatpush1.bf16.xpose.msra.mxu0 %v11658_v44  ;;  %v8303_v44 = vpack.c.bf16 %v19612_v39, %v19611_v27  ;;  %v19621_v39 = vld [vmem:[#allocation19_spill] sm:$0xff]  ;;  %v19622_v27 = vld [vmem:[#allocation24_spill] sm:$0xff] }
 0x103   :  { %8292 = vmatprep.subr.bf16.mxu0 %v11691_v15  ;;  %v19607_v15 = vld [vmem:[#allocation177_spill] sm:$0xff] }
 0x104   :  { %9442 = vmatpush1.bf16.xpose.msra.mxu1 %v19601_v5  ;;  %v19614_v5 = vld [vmem:[#allocation13_spill] sm:$0xff] }
 0x105   :  { %9444 = vmatprep.subr.bf16.mxu1 %v11694_v36  ;;  %v19609_v36 = vld [vmem:[#allocation183_spill] sm:$0xff] }
 0x10a   :  { %8294 = vmatpush1.bf16.xpose.msra.mxu0 %v11703_v37 }
 0x10b   :  { %8296 = vmatprep.subr.bf16.mxu0 %v11731_v4  ;;  %v19616_v4 = vld [vmem:[#allocation16_spill] sm:$0xff] }
 0x10c   :  { %9446 = vmatpush1.bf16.xpose.msra.mxu1 %v11721_v42 }
 0x10d   :  { %9448 = vmatprep.subr.bf16.mxu1 %v11740_v59  ;;  %v19619_v59 = vld [vmem:[#allocation202_spill] sm:$0xff] }
 0x112   :  { %8298 = vmatpush1.bf16.xpose.msra.mxu0 %v11744_v6  ;;  %v19613_v6 = vld [vmem:[#allocation11_spill] sm:$0xff] }
 0x113   :  { %8300 = vmatprep.subr.bf16.mxu0 %v8299_v62  ;;  %v9455_v37 = vpack.c.bf16 %v19614_v5, %v19613_v6  ;;  %v19615_v62 = vld [vmem:[#allocation15_spill] sm:$0xff]  ;;  %v19623_v5 = vld [vmem:[#allocation25_spill] sm:$0xff] }
 0x114   :  { %9450 = vmatpush1.bf16.xpose.msra.mxu1 %v11760_v21  ;;  %v8305_v42 = vpack.c.bf16 %v19616_v4, %v19615_v62  ;;  %v9459_v6 = vpack.c.bf16 %v19623_v5, %v19622_v27  ;;  %v19627_v21 = vld [vmem:[#allocation33_spill] sm:$0xff]  ;;  %v19631_v5 = vld [vmem:[#allocation36_spill] sm:$0xff] }
 0x115   :  { %9452 = vmatprep.subr.bf16.mxu1 %v9451_v29  ;;  %v19617_v29 = vld [vmem:[#allocation20_spill] sm:$0xff]  ;;  %v19632_v27 = vld [vmem:[#allocation37_spill] sm:$0xff] }
 0x116   :  { %v8307_v1 = vpack.c.bf16 %v19618_v63, %v19617_v29  ;;  %v19628_v63 = vld [vmem:[#allocation34_spill] sm:$0xff]  ;;  %v9463_v4 = vpack.c.bf16 %v19632_v27, %v19631_v5 }
 0x117   :  { %v8311_v29 = vpack.c.bf16 %v19628_v63, %v19627_v21  ;;  %v19639_v63 = vld [vmem:[#allocation48_spill] sm:$0xff]  ;;  %v19640_v21 = vld [vmem:[#allocation49_spill] sm:$0xff]  ;;  %v19644_v27 = vld [vmem:[#allocation58_spill] sm:$0xff] }
 0x11a   :  { %8302 = vmatpush1.bf16.xpose.msra.mxu0 %v8301_v49  ;;  %v9457_v49 = vpack.c.bf16 %v19621_v39, %v19620_v9  ;;  %v19629_v39 = vld [vmem:[#allocation29_spill] sm:$0xff] }
 0x11b   :  { %8304 = vmatprep.subr.bf16.mxu0 %v8303_v44  ;;  %v19626_v44 = vld [vmem:[#allocation28_spill] sm:$0xff] }
 0x11c   :  { %9454 = vmatpush1.bf16.xpose.msra.mxu1 %v9453_v51  ;;  %v19625_v51 = vld [vmem:[#allocation26_spill] sm:$0xff] }
 0x11d   :  { %9456 = vmatprep.subr.bf16.mxu1 %v9455_v37  ;;  %v8309_v37 = vpack.c.bf16 %v19626_v44, %v19625_v51  ;;  %v19637_v44 = vld [vmem:[#allocation42_spill] sm:$0xff]  ;;  %v19638_v51 = vld [vmem:[#allocation43_spill] sm:$0xff] }
 0x11e   :  { %v9465_v22 = vpack.c.bf16 %v19638_v51, %v19637_v44 }
 0x121   :  { %951 = vmatmul.mubr.f32.vlgmr.msra.gmra.mrb[0].mxu0 %v19619_v59 }
 0x122   :  { %8306 = vmatpush1.bf16.xpose.msra.mxu0 %v8305_v42  ;;  %1151 = vmatprep.mubr.f32.mxu0 %v19624_v12  ;;  %v19630_v42 = vld [vmem:[#allocation31_spill] sm:$0xff] }
 0x123   :  { %8308 = vmatprep.subr.bf16.mxu0 %v8307_v1  ;;  %4803 = vmatmul.mubr.f32.vlgmr.msra.gmra.mrb[0].mxu1 %v19619_v59  ;;  %v9461_v9 = vpack.c.bf16 %v19630_v42, %v19629_v39  ;;  %v19633_v1 = vld [vmem:[#allocation39_spill] sm:$0xff]  ;;  %v19636_v59 = vld [vmem:[#allocation46_spill] sm:$0xff]  ;;  %v9467_v42 = vpack.c.bf16 %v19640_v21, %v19639_v63 }
 0x124   :  { %9458 = vmatpush1.bf16.xpose.msra.mxu1 %v9457_v49  ;;  %5003 = vmatprep.mubr.f32.mxu1 %v19624_v12  ;;  %v19634_v49 = vld [vmem:[#allocation40_spill] sm:$0xff]  ;;  %v19652_v21 = vld [vmem:[#allocation70_spill] sm:$0xff] }
 0x125   :  { %9460 = vmatprep.subr.bf16.mxu1 %v9459_v6  ;;  %v8313_v12 = vpack.c.bf16 %v19634_v49, %v19633_v1  ;;  %v19635_v6 = vld [vmem:[#allocation45_spill] sm:$0xff]  ;;  %v19645_v49 = vld [vmem:[#allocation54_spill] sm:$0xff]  ;;  %v19646_v1 = vld [vmem:[#allocation55_spill] sm:$0xff] }
 0x126   :  { %v8315_v62 = vpack.c.bf16 %v19636_v59, %v19635_v6  ;;  %v9469_v39 = vpack.c.bf16 %v19646_v1, %v19645_v49  ;;  %v19647_v59 = vld [vmem:[#allocation60_spill] sm:$0xff]  ;;  %v19648_v6 = vld [vmem:[#allocation61_spill] sm:$0xff] }
 0x127   :  { %v9471_v51 = vpack.c.bf16 %v19648_v6, %v19647_v59  ;;  %v19660_v6 = vld [vmem:[#allocation82_spill] sm:$0xff] }
 0x12a   :  { %8310 = vmatpush1.bf16.xpose.msra.mxu0 %v8309_v37  ;;  %v19641_v37 = vld [vmem:[#allocation51_spill] sm:$0xff] }
 0x12b   :  { %8312 = vmatprep.subr.bf16.mxu0 %v8311_v29  ;;  %v19642_v29 = vld [vmem:[#allocation52_spill] sm:$0xff] }
 0x12c   :  { %9462 = vmatpush1.bf16.xpose.msra.mxu1 %v9461_v9  ;;  %v8317_v9 = vpack.c.bf16 %v19642_v29, %v19641_v37  ;;  %v19653_v29 = vld [vmem:[#allocation66_spill] sm:$0xff]  ;;  %v19654_v37 = vld [vmem:[#allocation67_spill] sm:$0xff] }
 0x12d   :  { %9464 = vmatprep.subr.bf16.mxu1 %v9463_v4  ;;  %v19643_v4 = vld [vmem:[#allocation57_spill] sm:$0xff]  ;;  %v9473_v44 = vpack.c.bf16 %v19654_v37, %v19653_v29 }
 0x12e   :  { %v8319_v5 = vpack.c.bf16 %v19644_v27, %v19643_v4  ;;  %v19655_v27 = vld [vmem:[#allocation72_spill] sm:$0xff]  ;;  %v19656_v4 = vld [vmem:[#allocation73_spill] sm:$0xff] }
 0x12f   :  { %v9475_v1 = vpack.c.bf16 %v19656_v4, %v19655_v27  ;;  %v19668_v4 = vld [vmem:[#allocation94_spill] sm:$0xff] }
 0x132   :  { %8314 = vmatpush1.bf16.xpose.msra.mxu0 %v8313_v12  ;;  %v19649_v12 = vld [vmem:[#allocation63_spill] sm:$0xff] }
 0x133   :  { %8316 = vmatprep.subr.bf16.mxu0 %v8315_v62  ;;  %v19650_v62 = vld [vmem:[#allocation64_spill] sm:$0xff] }
 0x134   :  { %9466 = vmatpush1.bf16.xpose.msra.mxu1 %v9465_v22  ;;  %v8321_v22 = vpack.c.bf16 %v19650_v62, %v19649_v12  ;;  %v19661_v62 = vld [vmem:[#allocation78_spill] sm:$0xff]  ;;  %v19662_v12 = vld [vmem:[#allocation79_spill] sm:$0xff] }
 0x135   :  { %9468 = vmatprep.subr.bf16.mxu1 %v9467_v42  ;;  %v19651_v42 = vld [vmem:[#allocation69_spill] sm:$0xff]  ;;  %v9477_v49 = vpack.c.bf16 %v19662_v12, %v19661_v62 }
 0x136   :  { %v8323_v63 = vpack.c.bf16 %v19652_v21, %v19651_v42  ;;  %v19663_v21 = vld [vmem:[#allocation84_spill] sm:$0xff]  ;;  %v19664_v42 = vld [vmem:[#allocation85_spill] sm:$0xff] }
 0x137   :  { %v9479_v37 = vpack.c.bf16 %v19664_v42, %v19663_v21  ;;  %v19676_v42 = vld [vmem:[#allocation106_spill] sm:$0xff] }
 0x13a   :  { %8318 = vmatpush1.bf16.xpose.msra.mxu0 %v8317_v9  ;;  %v19657_v9 = vld [vmem:[#allocation75_spill] sm:$0xff] }
 0x13b   :  { %8320 = vmatprep.subr.bf16.mxu0 %v8319_v5  ;;  %v19658_v5 = vld [vmem:[#allocation76_spill] sm:$0xff] }
 0x13c   :  { %9470 = vmatpush1.bf16.xpose.msra.mxu1 %v9469_v39  ;;  %v8325_v39 = vpack.c.bf16 %v19658_v5, %v19657_v9  ;;  %v19669_v5 = vld [vmem:[#allocation90_spill] sm:$0xff]  ;;  %v19670_v9 = vld [vmem:[#allocation91_spill] sm:$0xff] }
 0x13d   :  { %9472 = vmatprep.subr.bf16.mxu1 %v9471_v51  ;;  %v19659_v51 = vld [vmem:[#allocation81_spill] sm:$0xff]  ;;  %v9481_v29 = vpack.c.bf16 %v19670_v9, %v19669_v5 }
 0x13e   :  { %v8327_v59 = vpack.c.bf16 %v19660_v6, %v19659_v51  ;;  %v19671_v6 = vld [vmem:[#allocation96_spill] sm:$0xff]  ;;  %v19672_v51 = vld [vmem:[#allocation97_spill] sm:$0xff] }
 0x13f   :  { %v9483_v12 = vpack.c.bf16 %v19672_v51, %v19671_v6 }
 0x142   :  { %8322 = vmatpush1.bf16.xpose.msra.mxu0 %v8321_v22  ;;  %v19665_v22 = vld [vmem:[#allocation87_spill] sm:$0xff] }
 0x143   :  { %8324 = vmatprep.subr.bf16.mxu0 %v8323_v63  ;;  %v19666_v63 = vld [vmem:[#allocation88_spill] sm:$0xff] }
 0x144   :  { %9474 = vmatpush1.bf16.xpose.msra.mxu1 %v9473_v44  ;;  %v8329_v44 = vpack.c.bf16 %v19666_v63, %v19665_v22  ;;  %v19677_v63 = vld [vmem:[#allocation102_spill] sm:$0xff]  ;;  %v19678_v22 = vld [vmem:[#allocation103_spill] sm:$0xff] }
 0x145   :  { %9476 = vmatprep.subr.bf16.mxu1 %v9475_v1  ;;  %v19667_v1 = vld [vmem:[#allocation93_spill] sm:$0xff]  ;;  %v9485_v62 = vpack.c.bf16 %v19678_v22, %v19677_v63 }
 0x146   :  { %v8331_v27 = vpack.c.bf16 %v19668_v4, %v19667_v1 }
 0x14a   :  { %8326 = vmatpush1.bf16.xpose.msra.mxu0 %v8325_v39  ;;  %v19673_v39 = vld [vmem:[#allocation99_spill] sm:$0xff] }
 0x14b   :  { %8328 = vmatprep.subr.bf16.mxu0 %v8327_v59  ;;  %v19674_v59 = vld [vmem:[#allocation100_spill] sm:$0xff] }
 0x14c   :  { %9478 = vmatpush1.bf16.xpose.msra.mxu1 %v9477_v49  ;;  %v8333_v49 = vpack.c.bf16 %v19674_v59, %v19673_v39 }
 0x14d   :  { %9480 = vmatprep.subr.bf16.mxu1 %v9479_v37  ;;  %v19675_v37 = vld [vmem:[#allocation105_spill] sm:$0xff] }
 0x14e   :  { %v8335_v21 = vpack.c.bf16 %v19676_v42, %v19675_v37 }
 0x152   :  { %8330 = vmatpush1.bf16.xpose.msra.mxu0 %v8329_v44  ;;  %v19679_v44 = vpack.c.bf16 %v19518_v50, %v19517_v40 }
 0x153   :  { %8332 = vmatprep.subr.bf16.mxu0 %v8331_v27  ;;  %v19680_v27 = vpack.c.bf16 %v19520_v31, %v19519_v43  ;;  %v19689_v31 = vld [vmem:[#allocation126_spill] sm:$0xff] }
 0x154   :  { %9482 = vmatpush1.bf16.xpose.msra.mxu1 %v9481_v29  ;;  %v19681_v29 = vpack.c.bf16 %v19571_v0, %v19570_v24 }
 0x155   :  { %9484 = vmatprep.subr.bf16.mxu1 %v9483_v12  ;;  %v19682_v12 = vpack.c.bf16 %v19569_v2, %v19568_v10 }
 0x15a   :  { %8334 = vmatpush1.bf16.xpose.msra.mxu0 %v8333_v49  ;;  %v19685_v49 = vld [vmem:[#allocation123_spill] sm:$0xff] }
 0x15b   :  { %8336 = vmatprep.subr.bf16.mxu0 %v8335_v21  ;;  %v19683_v21 = vpack.c.bf16 %v19573_v16, %v19572_v3 }
 0x15c   :  { %9486 = vmatpush1.bf16.xpose.msra.mxu1 %v9485_v62  ;;  %v19684_v62 = vld [vmem:[#allocation124_spill] sm:$0xff] }
 0x15d   :  { %9488 = vmatprep.subr.bf16.mxu1 %v19679_v44  ;;  %v19686_v50 = vpack.c.bf16 %v19684_v62, %v19685_v49  ;;  %v19687_v44 = vpack.c.bf16 %v19578_v38, %v19531_v23  ;;  %v19697_v62 = vld [vmem:[#allocation138_spill] sm:$0xff] }
 0x162   :  { %8338 = vmatpush1.bf16.xpose.msra.mxu0 %v19680_v27  ;;  %v19688_v27 = vld [vmem:[#allocation127_spill] sm:$0xff] }
 0x163   :  { %8340 = vmatprep.subr.bf16.mxu0 %v19681_v29  ;;  %v19690_v0 = vpack.c.bf16 %v19688_v27, %v19689_v31  ;;  %v19691_v29 = vld [vmem:[#allocation132_spill] sm:$0xff] }
 0x164   :  { %9490 = vmatpush1.bf16.xpose.msra.mxu1 %v19682_v12  ;;  %v19692_v2 = vpack.c.bf16 %v19580_v8, %v19691_v29  ;;  %v19693_v12 = vld [vmem:[#allocation135_spill] sm:$0xff] }
 0x165   :  { %9492 = vmatprep.subr.bf16.mxu1 %v19683_v21  ;;  %v19694_v16 = vpack.c.bf16 %v19582_v47, %v19693_v12  ;;  %v19695_v21 = vpack.c.bf16 %v19587_v48, %v19586_v14  ;;  %v19705_v12 = vld [vmem:[#allocation150_spill] sm:$0xff] }
 0x16a   :  { %8342 = vmatpush1.bf16.xpose.msra.mxu0 %v19686_v50  ;;  %v19696_v50 = vld [vmem:[#allocation139_spill] sm:$0xff] }
 0x16b   :  { %8344 = vmatprep.subr.bf16.mxu0 %v19687_v44  ;;  %v19698_v38 = vpack.c.bf16 %v19696_v50, %v19697_v62  ;;  %v19699_v44 = vld [vmem:[#allocation144_spill] sm:$0xff] }
 0x16c   :  { %9494 = vmatpush1.bf16.xpose.msra.mxu1 %v19690_v0  ;;  %v19700_v27 = vpack.c.bf16 %v19589_v26, %v19699_v44  ;;  %v19701_v0 = vpack.c.bf16 %v19591_v30, %v19590_v13 }
 0x16d   :  { %9496 = vmatprep.subr.bf16.mxu1 %v19692_v2  ;;  %v19702_v2 = vld [vmem:[#allocation153_spill] sm:$0xff] }
 0x16e   :  { %v19703_v47 = vpack.c.bf16 %v19595_v45, %v19702_v2 }
 0x172   :  { %8346 = vmatpush1.bf16.xpose.msra.mxu0 %v19694_v16  ;;  %v19704_v16 = vld [vmem:[#allocation151_spill] sm:$0xff] }
 0x173   :  { %8348 = vmatprep.subr.bf16.mxu0 %v19695_v21  ;;  %v19706_v48 = vpack.c.bf16 %v19704_v16, %v19705_v12  ;;  %v19707_v21 = vpack.c.bf16 %v19597_v60, %v19596_v57 }
 0x174   :  { %9498 = vmatpush1.bf16.xpose.msra.mxu1 %v19698_v38  ;;  %v19708_v38 = vpack.c.bf16 %v19599_v52, %v19598_v25 }
 0x175   :  { %9500 = vmatprep.subr.bf16.mxu1 %v19700_v27  ;;  %v19709_v27 = vpack.c.bf16 %v19603_v17, %v19602_v56 }
 0x17a   :  { %8350 = vmatpush1.bf16.xpose.msra.mxu0 %v19701_v0  ;;  %v19710_v0 = vpack.c.bf16 %v19600_v33, %v19554_v18 }
 0x17b   :  { %8352 = vmatprep.subr.bf16.mxu0 %v19703_v47  ;;  %v19711_v47 = vpack.c.bf16 %v19605_v19, %v19604_v28 }
 0x17c   :  { %9502 = vmatpush1.bf16.xpose.msra.mxu1 %v19706_v48  ;;  %v19712_v48 = vpack.c.bf16 %v10999_v11, %v19606_v32 }
 0x17d   :  { %9504 = vmatprep.subr.bf16.mxu1 %v19707_v21  ;;  %v19713_v21 = vpack.c.bf16 %v19564_v35, %v19607_v15  ;;  %v19720_v35 = vld [vmem:[#allocation192_spill] sm:$0xff] }
 0x182   :  { %8354 = vmatpush1.bf16.xpose.msra.mxu0 %v19708_v38  ;;  %v19714_v38 = vpack.c.bf16 %v19562_v53, %v19561_v41  ;;  %v19723_v41 = vld [vmem:[#allocation196_spill] sm:$0xff] }
 0x183   :  { %8356 = vmatprep.subr.bf16.mxu0 %v19709_v27  ;;  %v19715_v27 = vpack.c.bf16 %v19608_v46, %v19565_v58 }
 0x184   :  { %9506 = vmatpush1.bf16.xpose.msra.mxu1 %v19710_v0  ;;  %v19716_v0 = vpack.c.bf16 %v19610_v61, %v19609_v36 }
 0x185   :  { %9508 = vmatprep.subr.bf16.mxu1 %v19711_v47  ;;  %v19717_v47 = vpack.c.bf16 %v11041_v55, %v19567_v20  ;;  %v19728_v55 = vld [vmem:[#allocation12_spill] sm:$0xff] }
 0x186   :  { %v19803_v20 = vld [vmem:[#allocation16_spill] sm:$0xff] }
 0x18a   :  { %8358 = vmatpush1.bf16.xpose.msra.mxu0 %v19712_v48  ;;  %v19718_v48 = vpack.c.bf16 %v11031_v34, %v11029_v7  ;;  %v19730_v34 = vld [vmem:[#allocation14_spill] sm:$0xff] }
 0x18b   :  { %8360 = vmatprep.subr.bf16.mxu0 %v19713_v21  ;;  %v19719_v21 = vld [vmem:[#allocation193_spill] sm:$0xff] }
 0x18c   :  { %9510 = vmatpush1.bf16.xpose.msra.mxu1 %v19714_v38  ;;  %v19721_v53 = vpack.c.bf16 %v19719_v21, %v19720_v35  ;;  %v19722_v38 = vld [vmem:[#allocation197_spill] sm:$0xff] }
 0x18d   :  { %9512 = vmatprep.subr.bf16.mxu1 %v19715_v27  ;;  %v19724_v46 = vpack.c.bf16 %v19722_v38, %v19723_v41  ;;  %v19725_v27 = vld [vmem:[#allocation8_spill] sm:$0xff]  ;;  %v19732_v21 = vld [vmem:[#allocation21_spill] sm:$0xff]  ;;  %v19793_v38 = vld [vmem:[#allocation10_spill] sm:$0xff] }
 0x192   :  { %8362 = vmatpush1.bf16.xpose.msra.mxu0 %v19716_v0  ;;  %v19726_v0 = vld [vmem:[#allocation199_spill] sm:$0xff] }
 0x193   :  { %8364 = vmatprep.subr.bf16.mxu0 %v19717_v47  ;;  %v19727_v61 = vpack.c.bf16 %v11070_v54, %v19726_v0  ;;  %v19729_v47 = vld [vmem:[#allocation204_spill] sm:$0xff]  ;;  %v19738_v54 = vld [vmem:[#allocation35_spill] sm:$0xff] }
 0x194   :  { %9514 = vmatpush1.bf16.xpose.msra.mxu1 %v19718_v48  ;;  %v19731_v48 = vld [vmem:[#allocation203_spill] sm:$0xff]  ;;  %v19740_v0 = vld [vmem:[#allocation44_spill] sm:$0xff] }
 0x195   :  { %9516 = vmatprep.subr.bf16.mxu1 %v19721_v53  ;;  %v19733_v53 = vld [vmem:[#allocation17_spill] sm:$0xff] }
 0x19a   :  { %8366 = vmatpush1.bf16.xpose.msra.mxu0 %v19724_v46  ;;  %v19734_v46 = vld [vmem:[#allocation23_spill] sm:$0xff] }
 0x19b   :  { %8368 = vmatprep.subr.bf16.mxu0 %v19725_v27  ;;  %v19735_v27 = vld [vmem:[#allocation27_spill] sm:$0xff] }
 0x19c   :  { %9518 = vmatpush1.bf16.xpose.msra.mxu1 %v19727_v61  ;;  %v19736_v61 = vld [vmem:[#allocation32_spill] sm:$0xff] }
 0x19d   :  { %9520 = vmatprep.subr.bf16.mxu1 %v19728_v55  ;;  %v19737_v55 = vld [vmem:[#allocation30_spill] sm:$0xff] }
 0x1a1   :  { %1154 = vmatmul.mubr.f32.vlgmr.msra.gmra.mrb[0].mxu0 %v19729_v47 }
 0x1a2   :  { %8370 = vmatpush1.bf16.xpose.msra.mxu0 %v19730_v34  ;;  %1291 = vmatprep.mubr.f32.mxu0 %v19731_v48  ;;  %v19739_v34 = vld [vmem:[#allocation38_spill] sm:$0xff] }
 0x1a3   :  { %8372 = vmatprep.subr.bf16.mxu0 %v19732_v21  ;;  %5006 = vmatmul.mubr.f32.vlgmr.msra.gmra.mrb[0].mxu1 %v19729_v47  ;;  %v19741_v21 = vld [vmem:[#allocation41_spill] sm:$0xff]  ;;  %v19742_v47 = vld [vmem:[#allocation47_spill] sm:$0xff] }
 0x1a4   :  { %9522 = vmatpush1.bf16.xpose.msra.mxu1 %v19733_v53  ;;  %5143 = vmatprep.mubr.f32.mxu1 %v19731_v48  ;;  %v19743_v53 = vld [vmem:[#allocation50_spill] sm:$0xff]  ;;  %v19744_v48 = vld [vmem:[#allocation56_spill] sm:$0xff] }
 0x1a5   :  { %9524 = vmatprep.subr.bf16.mxu1 %v19734_v46  ;;  %v19745_v46 = vld [vmem:[#allocation53_spill] sm:$0xff] }
 0x1aa   :  { %8374 = vmatpush1.bf16.xpose.msra.mxu0 %v19735_v27  ;;  %v19746_v27 = vld [vmem:[#allocation59_spill] sm:$0xff] }
 0x1ab   :  { %8376 = vmatprep.subr.bf16.mxu0 %v19736_v61  ;;  %v19747_v61 = vld [vmem:[#allocation62_spill] sm:$0xff] }
 0x1ac   :  { %9526 = vmatpush1.bf16.xpose.msra.mxu1 %v19737_v55  ;;  %v19748_v55 = vld [vmem:[#allocation68_spill] sm:$0xff] }
 0x1ad   :  { %9528 = vmatprep.subr.bf16.mxu1 %v19738_v54  ;;  %v19749_v54 = vld [vmem:[#allocation65_spill] sm:$0xff] }
 0x1b2   :  { %8378 = vmatpush1.bf16.xpose.msra.mxu0 %v19739_v34  ;;  %v19750_v34 = vld [vmem:[#allocation71_spill] sm:$0xff] }
 0x1b3   :  { %8380 = vmatprep.subr.bf16.mxu0 %v19740_v0  ;;  %v19751_v0 = vld [vmem:[#allocation74_spill] sm:$0xff] }
 0x1b4   :  { %9530 = vmatpush1.bf16.xpose.msra.mxu1 %v19741_v21  ;;  %v19752_v21 = vld [vmem:[#allocation80_spill] sm:$0xff] }
 0x1b5   :  { %9532 = vmatprep.subr.bf16.mxu1 %v19742_v47  ;;  %v19753_v47 = vld [vmem:[#allocation77_spill] sm:$0xff] }
 0x1ba   :  { %8382 = vmatpush1.bf16.xpose.msra.mxu0 %v19743_v53  ;;  %v19754_v53 = vld [vmem:[#allocation83_spill] sm:$0xff] }
 0x1bb   :  { %8384 = vmatprep.subr.bf16.mxu0 %v19744_v48  ;;  %v19755_v48 = vld [vmem:[#allocation86_spill] sm:$0xff] }
 0x1bc   :  { %9534 = vmatpush1.bf16.xpose.msra.mxu1 %v19745_v46  ;;  %v19756_v46 = vld [vmem:[#allocation92_spill] sm:$0xff] }
 0x1bd   :  { %9536 = vmatprep.subr.bf16.mxu1 %v19746_v27  ;;  %v19757_v27 = vld [vmem:[#allocation89_spill] sm:$0xff] }
 0x1c2   :  { %8386 = vmatpush1.bf16.xpose.msra.mxu0 %v19747_v61  ;;  %v19758_v61 = vld [vmem:[#allocation95_spill] sm:$0xff] }
 0x1c3   :  { %8388 = vmatprep.subr.bf16.mxu0 %v19748_v55  ;;  %v19759_v55 = vld [vmem:[#allocation98_spill] sm:$0xff] }
 0x1c4   :  { %9538 = vmatpush1.bf16.xpose.msra.mxu1 %v19749_v54  ;;  %v19760_v54 = vld [vmem:[#allocation104_spill] sm:$0xff] }
 0x1c5   :  { %9540 = vmatprep.subr.bf16.mxu1 %v19750_v34  ;;  %v19761_v34 = vld [vmem:[#allocation101_spill] sm:$0xff] }
 0x1ca   :  { %8390 = vmatpush1.bf16.xpose.msra.mxu0 %v19751_v0  ;;  %v19762_v0 = vld [vmem:[#allocation107_spill] sm:$0xff] }
 0x1cb   :  { %8392 = vmatprep.subr.bf16.mxu0 %v19752_v21  ;;  %v19763_v21 = vld [vmem:[#allocation110_spill] sm:$0xff] }
 0x1cc   :  { %9542 = vmatpush1.bf16.xpose.msra.mxu1 %v19753_v47  ;;  %v19764_v47 = vld [vmem:[#allocation116_spill] sm:$0xff] }
 0x1cd   :  { %9544 = vmatprep.subr.bf16.mxu1 %v19754_v53  ;;  %v19765_v53 = vld [vmem:[#allocation113_spill] sm:$0xff] }
 0x1d2   :  { %8394 = vmatpush1.bf16.xpose.msra.mxu0 %v19755_v48  ;;  %v19766_v48 = vld [vmem:[#allocation119_spill] sm:$0xff] }
 0x1d3   :  { %8396 = vmatprep.subr.bf16.mxu0 %v19756_v46  ;;  %v19767_v46 = vld [vmem:[#allocation122_spill] sm:$0xff] }
 0x1d4   :  { %9546 = vmatpush1.bf16.xpose.msra.mxu1 %v19757_v27  ;;  %v19768_v27 = vld [vmem:[#allocation128_spill] sm:$0xff] }
 0x1d5   :  { %9548 = vmatprep.subr.bf16.mxu1 %v19758_v61  ;;  %v19769_v61 = vld [vmem:[#allocation125_spill] sm:$0xff] }
 0x1da   :  { %8398 = vmatpush1.bf16.xpose.msra.mxu0 %v19759_v55  ;;  %v19770_v55 = vld [vmem:[#allocation131_spill] sm:$0xff] }
 0x1db   :  { %8400 = vmatprep.subr.bf16.mxu0 %v19760_v54  ;;  %v19771_v54 = vld [vmem:[#allocation134_spill] sm:$0xff] }
 0x1dc   :  { %9550 = vmatpush1.bf16.xpose.msra.mxu1 %v19761_v34  ;;  %v19772_v34 = vld [vmem:[#allocation140_spill] sm:$0xff] }
 0x1dd   :  { %9552 = vmatprep.subr.bf16.mxu1 %v19762_v0  ;;  %v19773_v0 = vld [vmem:[#allocation137_spill] sm:$0xff] }
 0x1e2   :  { %8402 = vmatpush1.bf16.xpose.msra.mxu0 %v19763_v21  ;;  %v19774_v21 = vld [vmem:[#allocation143_spill] sm:$0xff] }
 0x1e3   :  { %8404 = vmatprep.subr.bf16.mxu0 %v19764_v47  ;;  %v19775_v47 = vld [vmem:[#allocation146_spill] sm:$0xff] }
 0x1e4   :  { %9554 = vmatpush1.bf16.xpose.msra.mxu1 %v19765_v53  ;;  %v19776_v53 = vld [vmem:[#allocation152_spill] sm:$0xff] }
 0x1e5   :  { %9556 = vmatprep.subr.bf16.mxu1 %v19766_v48  ;;  %v19777_v48 = vld [vmem:[#allocation149_spill] sm:$0xff] }
 0x1ea   :  { %8406 = vmatpush1.bf16.xpose.msra.mxu0 %v19767_v46  ;;  %v19778_v46 = vld [vmem:[#allocation155_spill] sm:$0xff] }
 0x1eb   :  { %8408 = vmatprep.subr.bf16.mxu0 %v19768_v27  ;;  %v19779_v27 = vld [vmem:[#allocation158_spill] sm:$0xff] }
 0x1ec   :  { %9558 = vmatpush1.bf16.xpose.msra.mxu1 %v19769_v61  ;;  %v19780_v61 = vld [vmem:[#allocation164_spill] sm:$0xff] }
 0x1ed   :  { %9560 = vmatprep.subr.bf16.mxu1 %v19770_v55  ;;  %v19781_v55 = vld [vmem:[#allocation161_spill] sm:$0xff] }
 0x1f2   :  { %8410 = vmatpush1.bf16.xpose.msra.mxu0 %v19771_v54  ;;  %v19782_v54 = vld [vmem:[#allocation167_spill] sm:$0xff] }
 0x1f3   :  { %8412 = vmatprep.subr.bf16.mxu0 %v19772_v34  ;;  %v19783_v34 = vld [vmem:[#allocation170_spill] sm:$0xff] }
 0x1f4   :  { %9562 = vmatpush1.bf16.xpose.msra.mxu1 %v19773_v0  ;;  %v19784_v0 = vld [vmem:[#allocation176_spill] sm:$0xff] }
 0x1f5   :  { %9564 = vmatprep.subr.bf16.mxu1 %v19774_v21  ;;  %v19785_v21 = vld [vmem:[#allocation173_spill] sm:$0xff] }
 0x1fa   :  { %8414 = vmatpush1.bf16.xpose.msra.mxu0 %v19775_v47  ;;  %v19786_v47 = vld [vmem:[#allocation179_spill] sm:$0xff] }
 0x1fb   :  { %8416 = vmatprep.subr.bf16.mxu0 %v19776_v53  ;;  %v19787_v53 = vld [vmem:[#allocation182_spill] sm:$0xff] }
 0x1fc   :  { %9566 = vmatpush1.bf16.xpose.msra.mxu1 %v19777_v48  ;;  %v19788_v48 = vld [vmem:[#allocation188_spill] sm:$0xff] }
 0x1fd   :  { %9568 = vmatprep.subr.bf16.mxu1 %v19778_v46  ;;  %v19789_v46 = vld [vmem:[#allocation185_spill] sm:$0xff] }
 0x202   :  { %8418 = vmatpush1.bf16.xpose.msra.mxu0 %v19779_v27  ;;  %v19790_v27 = vld [vmem:[#allocation191_spill] sm:$0xff] }
 0x203   :  { %8420 = vmatprep.subr.bf16.mxu0 %v19780_v61  ;;  %v19791_v61 = vld [vmem:[#allocation9_spill] sm:$0xff] }
 0x204   :  { %9570 = vmatpush1.bf16.xpose.msra.mxu1 %v19781_v55  ;;  %v19792_v55 = vand.u32 4294901760, %v19791_v61  ;;  %v19805_v61 = vld [vmem:[#allocation20_spill] sm:$0xff] }
 0x205   :  { %9572 = vmatprep.subr.bf16.mxu1 %v19782_v54  ;;  %v19794_v54 = vand.u32 4294901760, %v19793_v38  ;;  %v19806_v58 = vand.u32 4294901760, %v19805_v61  ;;  %v19807_v38 = vld [vmem:[#allocation22_spill] sm:$0xff] }
 0x207   :  { %v8431_v41 = vpack.c.bf16 %v19794_v54, %v19792_v55  ;;  %v19808_v54 = vand.u32 4294901760, %v19807_v38 }
 0x209   :  { %v8435_v55 = vpack.c.bf16 %v19808_v54, %v19806_v58  ;;  %v19819_v58 = vld [vmem:[#allocation26_spill] sm:$0xff] }
 0x20a   :  { %8422 = vmatpush1.bf16.xpose.msra.mxu0 %v19783_v34  ;;  %v19795_v34 = vld [vmem:[#allocation195_spill] sm:$0xff]  ;;  %v19825_v54 = vld [vmem:[#allocation34_spill] sm:$0xff] }
 0x20b   :  { %8424 = vmatprep.subr.bf16.mxu0 %v19784_v0  ;;  %v19796_v0 = vld [vmem:[#allocation11_spill] sm:$0xff] }
 0x20c   :  { %9574 = vmatpush1.bf16.xpose.msra.mxu1 %v19785_v21  ;;  %v19797_v35 = vand.u32 4294901760, %v19796_v0  ;;  %v19798_v21 = vld [vmem:[#allocation13_spill] sm:$0xff]  ;;  %v19810_v0 = vld [vmem:[#allocation18_spill] sm:$0xff] }
 0x20d   :  { %9576 = vmatprep.subr.bf16.mxu1 %v19786_v47  ;;  %v19799_v7 = vand.u32 4294901760, %v19798_v21  ;;  %v19811_v15 = vand.u32 4294901760, %v19810_v0  ;;  %v19812_v21 = vld [vmem:[#allocation19_spill] sm:$0xff]  ;;  %v19826_v0 = vand.u32 4294901760, %v19825_v54 }
 0x20f   :  { %v9583_v47 = vpack.c.bf16 %v19799_v7, %v19797_v35  ;;  %v19813_v7 = vand.u32 4294901760, %v19812_v21  ;;  %v19827_v21 = vld [vmem:[#allocation29_spill] sm:$0xff] }
 0x211   :  { %v9585_v35 = vpack.c.bf16 %v19813_v7, %v19811_v15  ;;  %v19828_v7 = vand.u32 4294901760, %v19827_v21 }
 0x212   :  { %8426 = vmatpush1.bf16.xpose.msra.mxu0 %v19787_v53  ;;  %v19800_v53 = vld [vmem:[#allocation198_spill] sm:$0xff] }
 0x213   :  { %8428 = vmatprep.subr.bf16.mxu0 %v19788_v48  ;;  %v19801_v48 = vld [vmem:[#allocation15_spill] sm:$0xff] }
 0x214   :  { %9578 = vmatpush1.bf16.xpose.msra.mxu1 %v19789_v46  ;;  %v19802_v46 = vand.u32 4294901760, %v19801_v48 }
 0x215   :  { %9580 = vmatprep.subr.bf16.mxu1 %v19790_v27  ;;  %v19804_v27 = vand.u32 4294901760, %v19803_v20  ;;  %v19818_v20 = vld [vmem:[#allocation194_spill] sm:$0xff] }
 0x217   :  { %v8433_v36 = vpack.c.bf16 %v19804_v27, %v19802_v46  ;;  %v19820_v27 = vand.u32 4294901760, %v19819_v58  ;;  %v19821_v46 = vld [vmem:[#allocation28_spill] sm:$0xff]  ;;  %v19835_v58 = vld [vmem:[#allocation39_spill] sm:$0xff] }
 0x218   :  { %v19822_v61 = vand.u32 4294901760, %v19821_v46  ;;  %v19837_v46 = vld [vmem:[#allocation40_spill] sm:$0xff] }
 0x21a   :  { %8430 = vmatpush1.bf16.xpose.msra.mxu0 %v19795_v34  ;;  %v19809_v34 = vld [vmem:[#allocation205_spill] sm:$0xff]  ;;  %v8437_v15 = vpack.c.bf16 %v19822_v61, %v19820_v27  ;;  %v19836_v27 = vand.u32 4294901760, %v19835_v58  ;;  %v19838_v61 = vand.u32 4294901760, %v19837_v46 }
 0x21b   :  { %8432 = vmatprep.subr.bf16.mxu0 %v8431_v41  ;;  %v19814_v41 = vld [vmem:[#allocation24_spill] sm:$0xff] }
 0x21c   :  { %9582 = vmatpush1.bf16.xpose.msra.mxu1 %v19800_v53  ;;  %v19816_v53 = vld [vmem:[#allocation25_spill] sm:$0xff] }
 0x21d   :  { %9584 = vmatprep.subr.bf16.mxu1 %v9583_v47  ;;  %v19815_v47 = vand.u32 4294901760, %v19814_v41  ;;  %v19817_v48 = vand.u32 4294901760, %v19816_v53  ;;  %v19829_v41 = vld [vmem:[#allocation31_spill] sm:$0xff] }
 0x21f   :  { %v9587_v11 = vpack.c.bf16 %v19817_v48, %v19815_v47  ;;  %v19833_v48 = vld [vmem:[#allocation37_spill] sm:$0xff] }
 0x221   :  { %1295 = vmatmul.mubr.f32.vlgmr.msra.gmra.mrb[0].mxu0 %v19809_v34 }
 0x222   :  { %8434 = vmatpush1.bf16.xpose.msra.mxu0 %v8433_v36  ;;  %1558 = vmatprep.mubr.f32.mxu0 %v19818_v20  ;;  %v19823_v36 = vld [vmem:[#allocation33_spill] sm:$0xff] }
 0x223   :  { %8436 = vmatprep.subr.bf16.mxu0 %v8435_v55  ;;  %5147 = vmatmul.mubr.f32.vlgmr.msra.gmra.mrb[0].mxu1 %v19809_v34  ;;  %v19824_v38 = vand.u32 4294901760, %v19823_v36  ;;  %v19830_v55 = vand.u32 4294901760, %v19829_v41  ;;  %v19831_v34 = vld [vmem:[#allocation36_spill] sm:$0xff]  ;;  %v8441_v36 = vpack.c.bf16 %v19838_v61, %v19836_v27 }
 0x224   :  { %9586 = vmatpush1.bf16.xpose.msra.mxu1 %v9585_v35  ;;  %5410 = vmatprep.mubr.f32.mxu1 %v19818_v20  ;;  %v19832_v35 = vand.u32 4294901760, %v19831_v34  ;;  %v19853_v27 = vld [vmem:[#allocation52_spill] sm:$0xff] }
 0x225   :  { %9588 = vmatprep.subr.bf16.mxu1 %v9587_v11  ;;  %v8439_v53 = vpack.c.bf16 %v19826_v0, %v19824_v38  ;;  %v9589_v47 = vpack.c.bf16 %v19830_v55, %v19828_v7  ;;  %v19834_v11 = vand.u32 4294901760, %v19833_v48  ;;  %v19839_v38 = vld [vmem:[#allocation45_spill] sm:$0xff]  ;;  %v19841_v0 = vld [vmem:[#allocation46_spill] sm:$0xff]  ;;  %v19845_v55 = vld [vmem:[#allocation43_spill] sm:$0xff]  ;;  %v19854_v46 = vand.u32 4294901760, %v19853_v27 }
 0x226   :  { %v19840_v54 = vand.u32 4294901760, %v19839_v38  ;;  %v19842_v21 = vand.u32 4294901760, %v19841_v0  ;;  %v19843_v7 = vld [vmem:[#allocation42_spill] sm:$0xff]  ;;  %v19846_v34 = vand.u32 4294901760, %v19845_v55  ;;  %v19855_v38 = vld [vmem:[#allocation57_spill] sm:$0xff]  ;;  %v19861_v55 = vld [vmem:[#allocation55_spill] sm:$0xff] }
 0x227   :  { %v9591_v20 = vpack.c.bf16 %v19834_v11, %v19832_v35  ;;  %v19847_v35 = vld [vmem:[#allocation48_spill] sm:$0xff]  ;;  %v19851_v11 = vld [vmem:[#allocation51_spill] sm:$0xff]  ;;  %v19857_v0 = vld [vmem:[#allocation58_spill] sm:$0xff] }
 0x228   :  { %v8443_v41 = vpack.c.bf16 %v19842_v21, %v19840_v54  ;;  %v19852_v58 = vand.u32 4294901760, %v19851_v11  ;;  %v19856_v54 = vand.u32 4294901760, %v19855_v38  ;;  %v19858_v21 = vand.u32 4294901760, %v19857_v0  ;;  %v19871_v38 = vld [vmem:[#allocation69_spill] sm:$0xff]  ;;  %v19873_v0 = vld [vmem:[#allocation70_spill] sm:$0xff] }
 0x22a   :  { %8438 = vmatpush1.bf16.xpose.msra.mxu0 %v8437_v15  ;;  %v19844_v15 = vand.u32 4294901760, %v19843_v7  ;;  %v8445_v61 = vpack.c.bf16 %v19854_v46, %v19852_v58  ;;  %v8447_v7 = vpack.c.bf16 %v19858_v21, %v19856_v54  ;;  %v19869_v58 = vld [vmem:[#allocation64_spill] sm:$0xff]  ;;  %v19872_v54 = vand.u32 4294901760, %v19871_v38  ;;  %v19887_v38 = vld [vmem:[#allocation81_spill] sm:$0xff] }
 0x22b   :  { %8440 = vmatprep.subr.bf16.mxu0 %v8439_v53  ;;  %v19848_v53 = vand.u32 4294901760, %v19847_v35  ;;  %v19870_v27 = vand.u32 4294901760, %v19869_v58  ;;  %v19874_v21 = vand.u32 4294901760, %v19873_v0  ;;  %v19889_v0 = vld [vmem:[#allocation82_spill] sm:$0xff] }
 0x22c   :  { %9590 = vmatpush1.bf16.xpose.msra.mxu1 %v9589_v47  ;;  %v9593_v32 = vpack.c.bf16 %v19846_v34, %v19844_v15  ;;  %v19849_v47 = vld [vmem:[#allocation49_spill] sm:$0xff]  ;;  %v19859_v15 = vld [vmem:[#allocation54_spill] sm:$0xff]  ;;  %v19862_v34 = vand.u32 4294901760, %v19861_v55  ;;  %v19877_v55 = vld [vmem:[#allocation67_spill] sm:$0xff] }
 0x22d   :  { %9592 = vmatprep.subr.bf16.mxu1 %v9591_v20  ;;  %v19850_v20 = vand.u32 4294901760, %v19849_v47 }
 0x22f   :  { %v9595_v48 = vpack.c.bf16 %v19850_v20, %v19848_v53  ;;  %v19863_v53 = vld [vmem:[#allocation60_spill] sm:$0xff] }
 0x232   :  { %8442 = vmatpush1.bf16.xpose.msra.mxu0 %v8441_v36  ;;  %v19860_v36 = vand.u32 4294901760, %v19859_v15  ;;  %v8451_v15 = vpack.c.bf16 %v19874_v21, %v19872_v54  ;;  %v19888_v54 = vand.u32 4294901760, %v19887_v38  ;;  %v19890_v21 = vand.u32 4294901760, %v19889_v0 }
 0x233   :  { %8444 = vmatprep.subr.bf16.mxu0 %v8443_v41  ;;  %v19864_v41 = vand.u32 4294901760, %v19863_v53  ;;  %v19903_v38 = vand.u32 4294901760, %v19667_v1  ;;  %v19910_v1 = vand.u32 4294901760, %v19674_v59  ;;  %v19919_v59 = vld [vmem:[#allocation112_spill] sm:$0xff] }
 0x234   :  { %9594 = vmatpush1.bf16.xpose.msra.mxu1 %v9593_v32  ;;  %v9597_v35 = vpack.c.bf16 %v19862_v34, %v19860_v36  ;;  %v19865_v32 = vld [vmem:[#allocation61_spill] sm:$0xff]  ;;  %v19875_v36 = vld [vmem:[#allocation66_spill] sm:$0xff]  ;;  %v19878_v34 = vand.u32 4294901760, %v19877_v55  ;;  %v19893_v55 = vld [vmem:[#allocation79_spill] sm:$0xff] }
 0x235   :  { %9596 = vmatprep.subr.bf16.mxu1 %v9595_v48  ;;  %v19866_v47 = vand.u32 4294901760, %v19865_v32  ;;  %v19867_v48 = vld [vmem:[#allocation63_spill] sm:$0xff] }
 0x236   :  { %v19868_v11 = vand.u32 4294901760, %v19867_v48 }
 0x237   :  { %v9599_v20 = vpack.c.bf16 %v19866_v47, %v19864_v41  ;;  %v19879_v41 = vld [vmem:[#allocation72_spill] sm:$0xff] }
 0x238   :  { %v8449_v46 = vpack.c.bf16 %v19870_v27, %v19868_v11  ;;  %v19885_v11 = vld [vmem:[#allocation76_spill] sm:$0xff] }
 0x239   :  { %v19886_v58 = vand.u32 4294901760, %v19885_v11 }
 0x23a   :  { %8446 = vmatpush1.bf16.xpose.msra.mxu0 %v8445_v61  ;;  %v19876_v61 = vand.u32 4294901760, %v19875_v36  ;;  %v8455_v36 = vpack.c.bf16 %v19890_v21, %v19888_v54  ;;  %v19904_v54 = vand.u32 4294901760, %v19668_v4  ;;  %v19906_v21 = vand.u32 4294901760, %v19670_v9 }
 0x23b   :  { %8448 = vmatprep.subr.bf16.mxu0 %v8447_v7  ;;  %v19880_v7 = vand.u32 4294901760, %v19879_v41 }
 0x23c   :  { %9598 = vmatpush1.bf16.xpose.msra.mxu1 %v9597_v35  ;;  %v9601_v53 = vpack.c.bf16 %v19878_v34, %v19876_v61  ;;  %v19881_v35 = vld [vmem:[#allocation73_spill] sm:$0xff]  ;;  %v19891_v61 = vld [vmem:[#allocation78_spill] sm:$0xff]  ;;  %v19894_v34 = vand.u32 4294901760, %v19893_v55  ;;  %v8459_v0 = vpack.c.bf16 %v19904_v54, %v19903_v38  ;;  %v19927_v38 = vand.u32 4294901760, %v19572_v3 }
 0x23d   :  { %9600 = vmatprep.subr.bf16.mxu1 %v9599_v20  ;;  %v19882_v32 = vand.u32 4294901760, %v19881_v35  ;;  %v19883_v20 = vld [vmem:[#allocation75_spill] sm:$0xff]  ;;  %v19928_v54 = vld [vmem:[#allocation121_spill] sm:$0xff] }
 0x23e   :  { %v19884_v48 = vand.u32 4294901760, %v19883_v20 }
 0x23f   :  { %v9603_v47 = vpack.c.bf16 %v19882_v32, %v19880_v7  ;;  %v19895_v7 = vld [vmem:[#allocation84_spill] sm:$0xff] }
 0x240   :  { %v8453_v27 = vpack.c.bf16 %v19886_v58, %v19884_v48  ;;  %v19901_v48 = vld [vmem:[#allocation88_spill] sm:$0xff] }
 0x241   :  { %v19902_v11 = vand.u32 4294901760, %v19901_v48  ;;  %v19924_v48 = vand.u32 4294901760, %v19568_v10  ;;  %v19934_v10 = vld [vmem:[#allocation130_spill] sm:$0xff] }
 0x242   :  { %8450 = vmatpush1.bf16.xpose.msra.mxu0 %v8449_v46  ;;  %v19892_v46 = vand.u32 4294901760, %v19891_v61 }
 0x243   :  { %8452 = vmatprep.subr.bf16.mxu0 %v8451_v15  ;;  %v19896_v15 = vand.u32 4294901760, %v19895_v7  ;;  %v19913_v7 = vand.u32 4294901760, %v19677_v63  ;;  %v19922_v63 = vld [vmem:[#allocation118_spill] sm:$0xff] }
 0x244   :  { %9602 = vmatpush1.bf16.xpose.msra.mxu1 %v9601_v53  ;;  %v9605_v41 = vpack.c.bf16 %v19894_v34, %v19892_v46  ;;  %v19897_v53 = vld [vmem:[#allocation85_spill] sm:$0xff]  ;;  %v19908_v46 = vand.u32 4294901760, %v19672_v51  ;;  %v19909_v34 = vand.u32 4294901760, %v19673_v39  ;;  %v19915_v51 = vand.u32 4294901760, %v19517_v40 }
 0x245   :  { %9604 = vmatprep.subr.bf16.mxu1 %v9603_v47  ;;  %v19898_v35 = vand.u32 4294901760, %v19897_v53  ;;  %v19899_v47 = vld [vmem:[#allocation87_spill] sm:$0xff]  ;;  %v19916_v53 = vld [vmem:[#allocation109_spill] sm:$0xff]  ;;  %v19918_v39 = vand.u32 4294901760, %v19519_v43  ;;  %v19930_v43 = vand.u32 4294901760, %v19685_v49 }
 0x246   :  { %v19900_v20 = vand.u32 4294901760, %v19899_v47  ;;  %v8461_v4 = vpack.c.bf16 %v19910_v1, %v19909_v34  ;;  %v19921_v47 = vand.u32 4294901760, %v19570_v24  ;;  %v19931_v24 = vld [vmem:[#allocation124_spill] sm:$0xff]  ;;  %v19936_v34 = vand.u32 4294901760, %v19689_v31  ;;  %v19937_v1 = vld [vmem:[#allocation127_spill] sm:$0xff]  ;;  %v19946_v31 = vld [vmem:[#allocation142_spill] sm:$0xff] }
 0x247   :  { %v9607_v32 = vpack.c.bf16 %v19898_v35, %v19896_v15  ;;  %v19917_v35 = vand.u32 4294901760, %v19916_v53  ;;  %v19938_v3 = vand.u32 4294901760, %v19937_v1  ;;  %v19941_v49 = vld [vmem:[#allocation135_spill] sm:$0xff]  ;;  %v19947_v53 = vand.u32 4294901760, %v19946_v31 }
 0x248   :  { %v8457_v58 = vpack.c.bf16 %v19902_v11, %v19900_v20  ;;  %v19923_v20 = vand.u32 4294901760, %v19922_v63  ;;  %v19925_v11 = vld [vmem:[#allocation115_spill] sm:$0xff]  ;;  %v19954_v63 = vand.u32 4294901760, %v19702_v2  ;;  %v19962_v2 = vand.u32 4294901760, %v19602_v56  ;;  %v19970_v56 = vld [vmem:[#allocation172_spill] sm:$0xff] }
 0x249   :  { %v19926_v40 = vand.u32 4294901760, %v19925_v11 }
 0x24a   :  { %8454 = vmatpush1.bf16.xpose.msra.mxu0 %v8453_v27  ;;  %v19905_v27 = vand.u32 4294901760, %v19669_v5  ;;  %v19912_v5 = vand.u32 4294901760, %v19676_v42 }
 0x24b   :  { %8456 = vmatprep.subr.bf16.mxu0 %v8455_v36  ;;  %v19907_v36 = vand.u32 4294901760, %v19671_v6  ;;  %v19914_v6 = vand.u32 4294901760, %v19678_v22  ;;  %v8467_v22 = vpack.c.bf16 %v19923_v20, %v19921_v47  ;;  %v19956_v20 = vand.u32 4294901760, %v19705_v12 }
 0x24c   :  { %9606 = vmatpush1.bf16.xpose.msra.mxu1 %v9605_v41  ;;  %v9609_v61 = vpack.c.bf16 %v19906_v21, %v19905_v27  ;;  %v19911_v41 = vand.u32 4294901760, %v19675_v37  ;;  %v19920_v37 = vand.u32 4294901760, %v19919_v59  ;;  %v19932_v21 = vand.u32 4294901760, %v19931_v24 }
 0x24d   :  { %9608 = vmatprep.subr.bf16.mxu1 %v9607_v32  ;;  %v9611_v55 = vpack.c.bf16 %v19908_v46, %v19907_v36  ;;  %v9613_v15 = vpack.c.bf16 %v19914_v6, %v19913_v7  ;;  %v9615_v32 = vpack.c.bf16 %v19917_v35, %v19915_v51  ;;  %v19933_v36 = vand.u32 4294901760, %v19531_v23  ;;  %v19943_v23 = vld [vmem:[#allocation136_spill] sm:$0xff] }
 0x24e   :  { %v8463_v9 = vpack.c.bf16 %v19912_v5, %v19911_v41  ;;  %v8465_v42 = vpack.c.bf16 %v19920_v37, %v19918_v39  ;;  %v19935_v46 = vand.u32 4294901760, %v19934_v10  ;;  %v19939_v41 = vand.u32 4294901760, %v19691_v29 }
 0x24f   :  { %v19940_v5 = vand.u32 4294901760, %v19580_v8  ;;  %v19942_v7 = vand.u32 4294901760, %v19941_v49  ;;  %v19944_v6 = vand.u32 4294901760, %v19943_v23  ;;  %v19945_v51 = vand.u32 4294901760, %v19586_v14  ;;  %v19988_v49 = vld [vmem:[#allocation189_spill] sm:$0xff]  ;;  %v19990_v23 = vld [vmem:[#allocation190_spill] sm:$0xff] }
 0x250   :  { %v19949_v29 = vand.u32 4294901760, %v19696_v50  ;;  %v19950_v8 = vand.u32 4294901760, %v19699_v44  ;;  %v19951_v59 = vand.u32 4294901760, %v19589_v26  ;;  %v19953_v14 = vand.u32 4294901760, %v19591_v30 }
 0x251   :  { %v8475_v35 = vpack.c.bf16 %v19947_v53, %v19945_v51  ;;  %v19957_v44 = vand.u32 4294901760, %v19704_v16  ;;  %v19958_v26 = vand.u32 4294901760, %v19596_v57  ;;  %v19960_v30 = vand.u32 4294901760, %v19598_v25  ;;  %v19992_v51 = vld [vmem:[#allocation186_spill] sm:$0xff]  ;;  %v19994_v53 = vld [vmem:[#allocation187_spill] sm:$0xff] }
 0x252   :  { %8458 = vmatpush1.bf16.xpose.msra.mxu0 %v8457_v58  ;;  %v9617_v58 = vpack.c.bf16 %v19926_v40, %v19924_v48  ;;  %v9627_v37 = vpack.c.bf16 %v19951_v59, %v19950_v8  ;;  %v19959_v48 = vand.u32 4294901760, %v19597_v60  ;;  %v19963_v12 = vand.u32 4294901760, %v19603_v17  ;;  %v19998_v8 = vld [vmem:[#allocation193_spill] sm:$0xff] }
 0x253   :  { %8460 = vmatprep.subr.bf16.mxu0 %v8459_v0  ;;  %v19929_v0 = vand.u32 4294901760, %v19928_v54  ;;  %v19964_v40 = vand.u32 4294901760, %v19554_v18  ;;  %v19965_v57 = vand.u32 4294901760, %v19600_v33  ;;  %v19966_v60 = vand.u32 4294901760, %v19604_v28  ;;  %v19974_v18 = vld [vmem:[#allocation178_spill] sm:$0xff] }
 0x254   :  { %9610 = vmatpush1.bf16.xpose.msra.mxu1 %v9609_v61  ;;  %v8469_v61 = vpack.c.bf16 %v19932_v21, %v19930_v43  ;;  %v9631_v11 = vpack.c.bf16 %v19959_v48, %v19958_v26  ;;  %v8483_v16 = vpack.c.bf16 %v19963_v12, %v19962_v2  ;;  %v19975_v24 = vand.u32 4294901760, %v19974_v18  ;;  %v19976_v21 = vld [vmem:[#allocation174_spill] sm:$0xff]  ;;  %v20008_v48 = vld [vmem:[#allocation8_spill] sm:$0xff] }
 0x255   :  { %9612 = vmatprep.subr.bf16.mxu1 %v9611_v55  ;;  %v9619_v27 = vpack.c.bf16 %v19929_v0, %v19927_v38  ;;  %v8471_v55 = vpack.c.bf16 %v19935_v46, %v19933_v36  ;;  %v19967_v38 = vand.u32 4294901760, %v19605_v19  ;;  %v19971_v0 = vand.u32 4294901760, %v19970_v56  ;;  %v19978_v36 = vld [vmem:[#allocation175_spill] sm:$0xff]  ;;  %v19980_v19 = vld [vmem:[#allocation180_spill] sm:$0xff]  ;;  %v20013_v56 = vld [vmem:[#allocation202_spill] sm:$0xff] }
 0x256   :  { %v19979_v28 = vand.u32 4294901760, %v19978_v36  ;;  %v19981_v46 = vand.u32 4294901760, %v19980_v19  ;;  %v19993_v31 = vand.u32 4294901760, %v19992_v51  ;;  %v19999_v59 = vand.u32 4294901760, %v19998_v8  ;;  %v20015_v18 = vld [vmem:[#allocation14_spill] sm:$0xff] }
 0x257   :  { %v9635_v54 = vpack.c.bf16 %v19967_v38, %v19966_v60 }
 0x25a   :  { %8462 = vmatpush1.bf16.xpose.msra.mxu0 %v8461_v4  ;;  %v9621_v4 = vpack.c.bf16 %v19938_v3, %v19936_v34  ;;  %v19984_v3 = vld [vmem:[#allocation183_spill] sm:$0xff] }
 0x25b   :  { %8464 = vmatprep.subr.bf16.mxu0 %v8463_v9  ;;  %v9623_v9 = vpack.c.bf16 %v19940_v5, %v19939_v41  ;;  %v19986_v41 = vld [vmem:[#allocation184_spill] sm:$0xff] }
 0x25c   :  { %9614 = vmatpush1.bf16.xpose.msra.mxu1 %v9613_v15  ;;  %v8473_v15 = vpack.c.bf16 %v19944_v6, %v19942_v7  ;;  %v19987_v5 = vand.u32 4294901760, %v19986_v41  ;;  %v19989_v7 = vand.u32 4294901760, %v19988_v49  ;;  %v19991_v6 = vand.u32 4294901760, %v19990_v23  ;;  %v12445_v49 = vld [vmem:[#allocation2 + $0x70] sm:$0xff] }
 0x25d   :  { %9616 = vmatprep.subr.bf16.mxu1 %v9615_v32  ;;  %v19948_v32 = vand.u32 4294901760, %v19697_v62  ;;  %v19955_v62 = vand.u32 4294901760, %v19595_v45 }
 0x25f   :  { %v9625_v39 = vpack.c.bf16 %v19949_v29, %v19948_v32  ;;  %v8479_v50 = vpack.c.bf16 %v19955_v62, %v19954_v63  ;;  %v19996_v29 = vld [vmem:[#allocation192_spill] sm:$0xff] }
 0x262   :  { %8466 = vmatpush1.bf16.xpose.msra.mxu0 %v8465_v42  ;;  %v19952_v42 = vand.u32 4294901760, %v19590_v13  ;;  %v19961_v13 = vand.u32 4294901760, %v19599_v52  ;;  %v19968_v52 = vld [vmem:[#allocation171_spill] sm:$0xff] }
 0x263   :  { %8468 = vmatprep.subr.bf16.mxu0 %v8467_v22  ;;  %v9629_v22 = vpack.c.bf16 %v19957_v44, %v19956_v20  ;;  %v19969_v25 = vand.u32 4294901760, %v19968_v52  ;;  %v20006_v44 = vld [vmem:[#allocation200_spill] sm:$0xff] }
 0x264   :  { %9618 = vmatpush1.bf16.xpose.msra.mxu1 %v9617_v58  ;;  %v8477_v47 = vpack.c.bf16 %v19953_v14, %v19952_v42  ;;  %v8481_v45 = vpack.c.bf16 %v19961_v13, %v19960_v30  ;;  %v9633_v58 = vpack.c.bf16 %v19965_v57, %v19964_v40  ;;  %v20000_v42 = vld [vmem:[#allocation196_spill] sm:$0xff]  ;;  %v12365_v13 = vld [vmem:[#allocation2 + $0x618] sm:$0xff] }
 0x265   :  { %9620 = vmatprep.subr.bf16.mxu1 %v9619_v27  ;;  %v8485_v17 = vpack.c.bf16 %v19971_v0, %v19969_v25  ;;  %v19972_v27 = vld [vmem:[#allocation177_spill] sm:$0xff]  ;;  %v20001_v14 = vand.u32 4294901760, %v20000_v42  ;;  %v18081_v40 = vand.u32 4294901760, %v12365_v13  ;;  %v12391_v52 = vld [vmem:[#allocation2 + $0x40] sm:$0xff] }
 0x266   :  { %v19973_v43 = vand.u32 4294901760, %v19972_v27  ;;  %v12363_v30 = vld [vmem:[#allocation2 + $0x48] sm:$0xff]  ;;  %v12393_v25 = vld [vmem:[#allocation2 + $0x610] sm:$0xff]  ;;  %v18077_v27 = vand.u32 4294901760, %v12391_v52 }
 0x267   :  { %v18082_v12 = vand.u32 4294901760, %v12363_v30  ;;  %v12387_v38 = vsub.f32 %v12365_v13, %v18081_v40  ;;  %v18073_v36 = vand.u32 4294901760, %v12393_v25 }
 0x268   :  { %v8487_v33 = vpack.c.bf16 %v19975_v24, %v19973_v43  ;;  %v12403_v43 = vld [vmem:[#allocation2 + $0x640] sm:$0xff]  ;;  %v20016_v24 = vld [vmem:[#allocation194_spill] sm:$0xff] }
 0x269   :  { %v12382_v60 = vsub.f32 %v12363_v30, %v18082_v12  ;;  %20012 = vst [vmem:[#allocation114_spill] sm:$0xff] %v12387_v38  ;;  %v12426_v19 = vsub.f32 %v12393_v25, %v18073_v36  ;;  %v20047_v36 = vld [vmem:[#allocation47_spill] sm:$0xff] }
 0x26a   :  { %8470 = vmatpush1.bf16.xpose.msra.mxu0 %v8469_v61  ;;  %v19977_v61 = vand.u32 4294901760, %v19976_v21 }
 0x26b   :  { %8472 = vmatprep.subr.bf16.mxu0 %v8471_v55  ;;  %v19982_v55 = vld [vmem:[#allocation181_spill] sm:$0xff]  ;;  %20011 = vst [vmem:[#allocation162_spill] sm:$0xff] %v12382_v60  ;;  %20021 = vst [vmem:[#allocation108_spill] sm:$0xff] %v12426_v19 }
 0x26c   :  { %9622 = vmatpush1.bf16.xpose.msra.mxu1 %v9621_v4  ;;  %v9637_v10 = vpack.c.bf16 %v19979_v28, %v19977_v61  ;;  %v19983_v34 = vand.u32 4294901760, %v19982_v55  ;;  %v19985_v4 = vand.u32 4294901760, %v19984_v3  ;;  %v12416_v61 = vsub.f32 %v12391_v52, %v18077_v27  ;;  %v12433_v55 = vld [vmem:[#allocation2 + $0x78] sm:$0xff]  ;;  %v12581_v27 = vld [vmem:[#allocation2 + $0x130] sm:$0xff] }
 0x26d   :  { %9624 = vmatprep.subr.bf16.mxu1 %v9623_v9  ;;  %v18072_v28 = vand.u32 4294901760, %v12403_v43  ;;  %v20023_v3 = vld [vmem:[#allocation23_spill] sm:$0xff] }
 0x26e   :  { %v9639_v1 = vpack.c.bf16 %v19983_v34, %v19981_v46  ;;  %v8489_v9 = vpack.c.bf16 %v19987_v5, %v19985_v4  ;;  %20019 = vst [vmem:[#allocation133_spill] sm:$0xff] %v12416_v61  ;;  %v12435_v34 = vld [vmem:[#allocation2 + $0xa8] sm:$0xff]  ;;  %v18075_v4 = vand.u32 4294901760, %v12433_v55 }
 0x26f   :  { %v12431_v46 = vsub.f32 %v12403_v43, %v18072_v28  ;;  %v18074_v41 = vand.u32 4294901760, %v12435_v34  ;;  %v12442_v5 = vld [vmem:[#allocation2 + $0x6a8] sm:$0xff] }
 0x270   :  { %v18067_v23 = vand.u32 4294901760, %v12442_v5  ;;  %v12571_v28 = vld [vmem:[#allocation2 + $0x168] sm:$0xff] }
 0x271   :  { %20022 = vst [vmem:[#allocation141_spill] sm:$0xff] %v12431_v46  ;;  %v12459_v51 = vsub.f32 %v12435_v34, %v18074_v41  ;;  %v18087_v41 = vand.u32 4294901760, %v12571_v28 }
 0x272   :  { %8474 = vmatpush1.bf16.xpose.msra.mxu0 %v8473_v15  ;;  %v8491_v15 = vpack.c.bf16 %v19991_v6, %v19989_v7  ;;  %v12447_v7 = vld [vmem:[#allocation2 + $0xa0] sm:$0xff]  ;;  %v18066_v6 = vand.u32 4294901760, %v12445_v49 }
 0x273   :  { %8476 = vmatprep.subr.bf16.mxu0 %v8475_v35  ;;  %v19995_v35 = vand.u32 4294901760, %v19994_v53  ;;  %20025 = vst [vmem:[#allocation147_spill] sm:$0xff] %v12459_v51  ;;  %v18063_v53 = vand.u32 4294901760, %v12447_v7  ;;  %v12595_v40 = vsub.f32 %v12571_v28, %v18087_v41  ;;  %v20054_v41 = vand.u32 4294901760, %v12581_v27 }
 0x274   :  { %9626 = vmatpush1.bf16.xpose.msra.mxu1 %v9625_v39  ;;  %v19997_v39 = vand.u32 4294901760, %v19996_v29  ;;  %v12474_v29 = vsub.f32 %v12442_v5, %v18067_v23  ;;  %v12480_v8 = vsub.f32 %v12445_v49, %v18066_v6  ;;  %v20043_v6 = vld [vmem:[#allocation44_spill] sm:$0xff] }
 0x275   :  { %9628 = vmatprep.subr.bf16.mxu1 %v9627_v37  ;;  %v9641_v32 = vpack.c.bf16 %v19995_v35, %v19993_v31  ;;  %v12467_v35 = vld [vmem:[#allocation2 + $0x670] sm:$0xff]  ;;  %20049 = vst [vmem:[#allocation90_spill] sm:$0xff] %v12595_v40  ;;  %v12616_v40 = vsub.f32 %v12581_v27, %v20054_v41 }
 0x276   :  { %v9643_v37 = vpack.c.bf16 %v19999_v59, %v19997_v39  ;;  %20027 = vst [vmem:[#allocation154_spill] sm:$0xff] %v12474_v29  ;;  %v20028_v39 = vld [vmem:[#allocation27_spill] sm:$0xff]  ;;  %20029 = vst [vmem:[#allocation156_spill] sm:$0xff] %v12480_v8  ;;  %v12485_v59 = vsub.f32 %v12447_v7, %v18063_v53  ;;  %v18061_v42 = vand.u32 4294901760, %v12467_v35  ;;  %v20040_v53 = vld [vmem:[#allocation38_spill] sm:$0xff] }
 0x277   :  { %20055 = vst [vmem:[#allocation97_spill] sm:$0xff] %v12616_v40  ;;  %v20061_v40 = vld [vmem:[#allocation59_spill] sm:$0xff]  ;;  %v12714_v8 = vld [vmem:[#allocation2 + $0x828] sm:$0xff] }
 0x278   :  { %20030 = vst [vmem:[#allocation157_spill] sm:$0xff] %v12485_v59  ;;  %v12741_v29 = vld [vmem:[#allocation2 + $0x820] sm:$0xff]  ;;  %v20081_v51 = vand.u32 4294901760, %v12714_v8 }
 0x279   :  { %20080 = vst [vmem:[#allocation204_spill] sm:$0xff] %v12741_v29  ;;  %v18144_v61 = vand.u32 4294901760, %v12741_v29 }
 0x27a   :  { %8478 = vmatpush1.bf16.xpose.msra.mxu0 %v8477_v47  ;;  %v20002_v47 = vld [vmem:[#allocation197_spill] sm:$0xff] }
 0x27b   :  { %8480 = vmatprep.subr.bf16.mxu0 %v8479_v50  ;;  %v20003_v63 = vand.u32 4294901760, %v20002_v47  ;;  %v20004_v50 = vld [vmem:[#allocation199_spill] sm:$0xff]  ;;  %v20032_v47 = vld [vmem:[#allocation30_spill] sm:$0xff] }
 0x27c   :  { %9630 = vmatpush1.bf16.xpose.msra.mxu1 %v9629_v22  ;;  %v20005_v20 = vand.u32 4294901760, %v20004_v50  ;;  %v20007_v22 = vand.u32 4294901760, %v20006_v44  ;;  %v12501_v50 = vld [vmem:[#allocation2 + $0xd8] sm:$0xff] }
 0x27d   :  { %9632 = vmatprep.subr.bf16.mxu1 %v9631_v11  ;;  %v8493_v62 = vpack.c.bf16 %v20003_v63, %v20001_v14  ;;  %v12361_v11 = vld [vmem:[#allocation2 + $0x18] sm:$0xff]  ;;  %v12494_v63 = vsub.f32 %v12467_v35, %v18061_v42  ;;  %v12537_v42 = vld [vmem:[#allocation2 + $0x700] sm:$0xff] }
 0x27e   :  { %v9645_v26 = vpack.c.bf16 %v20007_v22, %v20005_v20  ;;  %v18083_v2 = vand.u32 4294901760, %v12361_v11  ;;  %v12503_v20 = vld [vmem:[#allocation2 + $0x108] sm:$0xff]  ;;  %v12505_v44 = vld [vmem:[#allocation2 + $0x6d8] sm:$0xff] }
 0x27f   :  { %20033 = vst [vmem:[#allocation159_spill] sm:$0xff] %v12494_v63  ;;  %v20035_v22 = vld [vmem:[#allocation35_spill] sm:$0xff] }
 0x282   :  { %8482 = vmatpush1.bf16.xpose.msra.mxu0 %v8481_v45  ;;  %v20009_v45 = vld [vmem:[#allocation12_spill] sm:$0xff] }
 0x283   :  { %8484 = vmatprep.subr.bf16.mxu0 %v8483_v16  ;;  %v12370_v16 = vld [vmem:[#allocation2 + $0x648] sm:$0xff] }
 0x284   :  { %9634 = vmatpush1.bf16.xpose.msra.mxu1 %v9633_v58  ;;  %v18080_v57 = vand.u32 4294901760, %v12370_v16  ;;  %v12377_v58 = vsub.f32 %v12361_v11, %v18083_v2 }
 0x285   :  { %9636 = vmatprep.subr.bf16.mxu1 %v9635_v54  ;;  %v12389_v54 = vld [vmem:[#allocation2 + $0x10] sm:$0xff] }
 0x286   :  { %20010 = vst [vmem:[#allocation129_spill] sm:$0xff] %v12377_v58  ;;  %v12399_v0 = vsub.f32 %v12370_v16, %v18080_v57  ;;  %v12605_v57 = vld [vmem:[#allocation2 + $0x760] sm:$0xff] }
 0x288   :  { %20014 = vst [vmem:[#allocation117_spill] sm:$0xff] %v12399_v0  ;;  %v12809_v0 = vld [vmem:[#allocation2 + $0x880] sm:$0xff] }
 0x289   :  { %20101 = vst [vmem:[#allocation26_spill] sm:$0xff] %v12809_v0 }
 0x28a   :  { %8486 = vmatpush1.bf16.xpose.msra.mxu0 %v8485_v17  ;;  %v18079_v17 = vand.u32 4294901760, %v12389_v54 }
 0x28b   :  { %8488 = vmatprep.subr.bf16.mxu0 %v8487_v33  ;;  %v20017_v33 = vld [vmem:[#allocation21_spill] sm:$0xff] }
 0x28c   :  { %9638 = vmatpush1.bf16.xpose.msra.mxu1 %v9637_v10  ;;  %v12411_v21 = vsub.f32 %v12389_v54, %v18079_v17  ;;  %v20020_v10 = vld [vmem:[#allocation17_spill] sm:$0xff] }
 0x28d   :  { %9640 = vmatprep.subr.bf16.mxu1 %v9639_v1  ;;  %v12437_v1 = vld [vmem:[#allocation2 + $0x678] sm:$0xff]  ;;  %v12603_v17 = vld [vmem:[#allocation2 + $0x730] sm:$0xff] }
 0x28e   :  { %20018 = vst [vmem:[#allocation120_spill] sm:$0xff] %v12411_v21  ;;  %v12782_v21 = vld [vmem:[#allocation2 + $0x888] sm:$0xff] }
 0x28f   :  { %20094 = vst [vmem:[#allocation20_spill] sm:$0xff] %v12782_v21 }
 0x292   :  { %8490 = vmatpush1.bf16.xpose.msra.mxu0 %v8489_v9  ;;  %v18068_v9 = vand.u32 4294901760, %v12437_v1 }
 0x293   :  { %8492 = vmatprep.subr.bf16.mxu0 %v8491_v15  ;;  %v12454_v15 = vsub.f32 %v12433_v55, %v18075_v4  ;;  %v12578_v4 = vld [vmem:[#allocation2 + $0x768] sm:$0xff] }
 0x294   :  { %9642 = vmatpush1.bf16.xpose.msra.mxu1 %v9641_v32  ;;  %v12464_v31 = vsub.f32 %v12437_v1, %v18068_v9  ;;  %v12469_v32 = vld [vmem:[#allocation2 + $0x6a0] sm:$0xff]  ;;  %v18078_v9 = vand.u32 4294901760, %v12537_v42 }
 0x295   :  { %9644 = vmatprep.subr.bf16.mxu1 %v9643_v37  ;;  %20024 = vst [vmem:[#allocation145_spill] sm:$0xff] %v12454_v15  ;;  %v20031_v37 = vld [vmem:[#allocation32_spill] sm:$0xff]  ;;  %v18060_v14 = vand.u32 4294901760, %v12469_v32 }
 0x296   :  { %20026 = vst [vmem:[#allocation148_spill] sm:$0xff] %v12464_v31 }
 0x29a   :  { %8494 = vmatpush1.bf16.xpose.msra.mxu0 %v8493_v62  ;;  %v12499_v62 = vsub.f32 %v12469_v32, %v18060_v14  ;;  %v12535_v14 = vld [vmem:[#allocation2 + $0x6d0] sm:$0xff] }
 0x29b   :  { %8496 = vmatprep.subr.bf16.mxu0 %v20008_v48  ;;  %v18064_v48 = vand.u32 4294901760, %v12503_v20  ;;  %v18076_v23 = vand.u32 4294901760, %v12535_v14 }
 0x29c   :  { %9646 = vmatpush1.bf16.xpose.msra.mxu1 %v9645_v26  ;;  %20034 = vst [vmem:[#allocation160_spill] sm:$0xff] %v12499_v62  ;;  %v18062_v26 = vand.u32 4294901760, %v12501_v50 }
 0x29d   :  { %9648 = vmatprep.subr.bf16.mxu1 %v20009_v45  ;;  %v12510_v45 = vld [vmem:[#allocation2 + $0x708] sm:$0xff] }
 0x2a1   :  { %1560 = vmatmul.mubr.f32.vlgmr.msra.gmra.mrb[0].mxu0 %v20013_v56 }
 0x2a2   :  { %8498 = vmatpush1.bf16.xpose.msra.mxu0 %v20015_v18  ;;  %1695 = vmatprep.mubr.f32.mxu0 %v20016_v24  ;;  %v18065_v18 = vand.u32 4294901760, %v12505_v44 }
 0x2a3   :  { %8500 = vmatprep.subr.bf16.mxu0 %v20017_v33  ;;  %5412 = vmatmul.mubr.f32.vlgmr.msra.gmra.mrb[0].mxu1 %v20013_v56  ;;  %v12515_v33 = vld [vmem:[#allocation2 + $0x100] sm:$0xff] }
 0x2a4   :  { %9650 = vmatpush1.bf16.xpose.msra.mxu1 %v20020_v10  ;;  %5547 = vmatprep.mubr.f32.mxu1 %v20016_v24  ;;  %v12513_v24 = vld [vmem:[#allocation2 + $0xd0] sm:$0xff]  ;;  %v18069_v10 = vand.u32 4294901760, %v12510_v45 }
 0x2a5   :  { %9652 = vmatprep.subr.bf16.mxu1 %v20023_v3  ;;  %v18070_v3 = vand.u32 4294901760, %v12513_v24 }
 0x2aa   :  { %8502 = vmatpush1.bf16.xpose.msra.mxu0 %v20028_v39  ;;  %v12522_v39 = vsub.f32 %v12501_v50, %v18062_v26  ;;  %v12542_v26 = vsub.f32 %v12510_v45, %v18069_v10  ;;  %v20044_v10 = vld [vmem:[#allocation41_spill] sm:$0xff] }
 0x2ab   :  { %8504 = vmatprep.subr.bf16.mxu0 %v20031_v37  ;;  %v12527_v37 = vsub.f32 %v12503_v20, %v18064_v48  ;;  %v12548_v48 = vsub.f32 %v12513_v24, %v18070_v3  ;;  %v12567_v3 = vsub.f32 %v12537_v42, %v18078_v9  ;;  %v12583_v9 = vld [vmem:[#allocation2 + $0x160] sm:$0xff] }
 0x2ac   :  { %9654 = vmatpush1.bf16.xpose.msra.mxu1 %v20032_v47  ;;  %20036 = vst [vmem:[#allocation163_spill] sm:$0xff] %v12522_v39  ;;  %v12532_v47 = vsub.f32 %v12505_v44, %v18065_v18  ;;  %20039 = vst [vmem:[#allocation166_spill] sm:$0xff] %v12542_v26  ;;  %v18093_v2 = vand.u32 4294901760, %v12583_v9  ;;  %v12673_v26 = vld [vmem:[#allocation2 + $0x7c0] sm:$0xff] }
 0x2ad   :  { %9656 = vmatprep.subr.bf16.mxu1 %v20035_v22  ;;  %20037 = vst [vmem:[#allocation111_spill] sm:$0xff] %v12527_v37  ;;  %v18071_v22 = vand.u32 4294901760, %v12515_v33  ;;  %20041 = vst [vmem:[#allocation168_spill] sm:$0xff] %v12548_v48  ;;  %v12646_v48 = vld [vmem:[#allocation2 + $0x7c8] sm:$0xff]  ;;  %v18122_v59 = vand.u32 4294901760, %v12673_v26 }
 0x2ae   :  { %20038 = vst [vmem:[#allocation165_spill] sm:$0xff] %v12532_v47  ;;  %20046 = vst [vmem:[#allocation93_spill] sm:$0xff] %v12567_v3  ;;  %v20051_v3 = vand.u32 4294901760, %v12578_v4  ;;  %v20065_v37 = vand.u32 4294901760, %v12646_v48 }
 0x2af   :  { %v12553_v18 = vsub.f32 %v12515_v33, %v18071_v22  ;;  %v12569_v22 = vld [vmem:[#allocation2 + $0x138] sm:$0xff] }
 0x2b1   :  { %20042 = vst [vmem:[#allocation169_spill] sm:$0xff] %v12553_v18  ;;  %v18100_v18 = vand.u32 4294901760, %v12605_v57 }
 0x2b2   :  { %8506 = vmatpush1.bf16.xpose.msra.mxu0 %v20040_v53  ;;  %v12562_v53 = vsub.f32 %v12535_v14, %v18076_v23 }
 0x2b3   :  { %8508 = vmatprep.subr.bf16.mxu0 %v20043_v6  ;;  %v12573_v6 = vld [vmem:[#allocation2 + $0x738] sm:$0xff]  ;;  %v12635_v41 = vsub.f32 %v12605_v57, %v18100_v18  ;;  %v12651_v18 = vld [vmem:[#allocation2 + $0x1c0] sm:$0xff] }
 0x2b4   :  { %9658 = vmatpush1.bf16.xpose.msra.mxu1 %v20044_v10  ;;  %20045 = vst [vmem:[#allocation201_spill] sm:$0xff] %v12562_v53  ;;  %v18085_v10 = vand.u32 4294901760, %v12569_v22  ;;  %v18089_v23 = vand.u32 4294901760, %v12573_v6  ;;  %v20053_v53 = vld [vmem:[#allocation50_spill] sm:$0xff]  ;;  %v18115_v63 = vand.u32 4294901760, %v12651_v18 }
 0x2b5   :  { %9660 = vmatprep.subr.bf16.mxu1 %v20047_v36  ;;  %20060 = vst [vmem:[#allocation105_spill] sm:$0xff] %v12635_v41  ;;  %v12671_v41 = vld [vmem:[#allocation2 + $0x790] sm:$0xff] }
 0x2b6   :  { %v12590_v36 = vsub.f32 %v12569_v22, %v18085_v10  ;;  %v12600_v12 = vsub.f32 %v12573_v6, %v18089_v23  ;;  %v12610_v10 = vsub.f32 %v12578_v4, %v20051_v3  ;;  %v12621_v23 = vsub.f32 %v12583_v9, %v18093_v2  ;;  %v20058_v3 = vld [vmem:[#allocation53_spill] sm:$0xff]  ;;  %v12637_v2 = vld [vmem:[#allocation2 + $0x198] sm:$0xff] }
 0x2b7   :  { %v18120_v39 = vand.u32 4294901760, %v12671_v41 }
 0x2b8   :  { %20048 = vst [vmem:[#allocation94_spill] sm:$0xff] %v12590_v36  ;;  %20050 = vst [vmem:[#allocation91_spill] sm:$0xff] %v12600_v12  ;;  %v20057_v12 = vld [vmem:[#allocation56_spill] sm:$0xff]  ;;  %v18098_v36 = vand.u32 4294901760, %v12603_v17 }
 0x2b9   :  { %20052 = vst [vmem:[#allocation96_spill] sm:$0xff] %v12610_v10  ;;  %20056 = vst [vmem:[#allocation99_spill] sm:$0xff] %v12621_v23  ;;  %v12639_v23 = vld [vmem:[#allocation2 + $0x1c8] sm:$0xff] }
 0x2ba   :  { %8510 = vmatpush1.bf16.xpose.msra.mxu0 %v20053_v53  ;;  %v12630_v53 = vsub.f32 %v12603_v17, %v18098_v36  ;;  %v18109_v10 = vand.u32 4294901760, %v12639_v23 }
 0x2bb   :  { %8512 = vmatprep.subr.bf16.mxu0 %v20057_v12  ;;  %v12641_v12 = vld [vmem:[#allocation2 + $0x798] sm:$0xff] }
 0x2bc   :  { %9662 = vmatpush1.bf16.xpose.msra.mxu1 %v20058_v3  ;;  %20059 = vst [vmem:[#allocation100_spill] sm:$0xff] %v12630_v53  ;;  %v18107_v3 = vand.u32 4294901760, %v12637_v2  ;;  %v18111_v36 = vand.u32 4294901760, %v12641_v12  ;;  %v12649_v53 = vld [vmem:[#allocation2 + $0x190] sm:$0xff]  ;;  %v12663_v47 = vsub.f32 %v12639_v23, %v18109_v10 }
 0x2bd   :  { %9664 = vmatprep.subr.bf16.mxu1 %v20061_v40  ;;  %v20068_v10 = vand.u32 4294901760, %v12649_v53 }
 0x2be   :  { %v12658_v40 = vsub.f32 %v12637_v2, %v18107_v3  ;;  %20063 = vst [vmem:[#allocation102_spill] sm:$0xff] %v12663_v47  ;;  %v12668_v62 = vsub.f32 %v12641_v12, %v18111_v36  ;;  %v12678_v3 = vsub.f32 %v12646_v48, %v20065_v37  ;;  %v12689_v36 = vsub.f32 %v12651_v18, %v18115_v63  ;;  %v20072_v37 = vld [vmem:[#allocation65_spill] sm:$0xff]  ;;  %v12705_v63 = vld [vmem:[#allocation2 + $0x1f8] sm:$0xff] }
 0x2bf   :  { %v12684_v47 = vsub.f32 %v12649_v53, %v20068_v10  ;;  %v12703_v10 = vsub.f32 %v12673_v26, %v18122_v59  ;;  %v12719_v59 = vld [vmem:[#allocation2 + $0x220] sm:$0xff] }
 0x2c0   :  { %20062 = vst [vmem:[#allocation106_spill] sm:$0xff] %v12658_v40  ;;  %20064 = vst [vmem:[#allocation103_spill] sm:$0xff] %v12668_v62  ;;  %v20067_v40 = vld [vmem:[#allocation62_spill] sm:$0xff]  ;;  %v20071_v62 = vld [vmem:[#allocation68_spill] sm:$0xff]  ;;  %v18137_v19 = vand.u32 4294901760, %v12719_v59 }
 0x2c1   :  { %20066 = vst [vmem:[#allocation123_spill] sm:$0xff] %v12678_v3  ;;  %20069 = vst [vmem:[#allocation126_spill] sm:$0xff] %v12684_v47  ;;  %v20075_v47 = vld [vmem:[#allocation71_spill] sm:$0xff] }
 0x2c2   :  { %8514 = vmatpush1.bf16.xpose.msra.mxu0 %v20067_v40  ;;  %20070 = vst [vmem:[#allocation132_spill] sm:$0xff] %v12689_v36  ;;  %v12698_v40 = vsub.f32 %v12671_v41, %v18120_v39  ;;  %20074 = vst [vmem:[#allocation138_spill] sm:$0xff] %v12703_v10  ;;  %v12707_v36 = vld [vmem:[#allocation2 + $0x228] sm:$0xff]  ;;  %v12739_v10 = vld [vmem:[#allocation2 + $0x7f0] sm:$0xff] }
 0x2c3   :  { %8516 = vmatprep.subr.bf16.mxu0 %v20071_v62  ;;  %v12709_v62 = vld [vmem:[#allocation2 + $0x7f8] sm:$0xff]  ;;  %v18131_v3 = vand.u32 4294901760, %v12707_v36  ;;  %20079 = vst [vmem:[#allocation150_spill] sm:$0xff] %v12739_v10  ;;  %v18142_v15 = vand.u32 4294901760, %v12739_v10 }
 0x2c4   :  { %9666 = vmatpush1.bf16.xpose.msra.mxu1 %v20072_v37  ;;  %20073 = vst [vmem:[#allocation139_spill] sm:$0xff] %v12698_v40  ;;  %v18129_v37 = vand.u32 4294901760, %v12705_v63  ;;  %v18133_v39 = vand.u32 4294901760, %v12709_v62  ;;  %v12717_v40 = vld [vmem:[#allocation2 + $0x1f0] sm:$0xff] }
 0x2c5   :  { %9668 = vmatprep.subr.bf16.mxu1 %v20075_v47  ;;  %v12731_v31 = vsub.f32 %v12707_v36, %v18131_v3  ;;  %v20084_v3 = vand.u32 4294901760, %v12717_v40 }
 0x2c6   :  { %v12726_v47 = vsub.f32 %v12705_v63, %v18129_v37  ;;  %v12736_v46 = vsub.f32 %v12709_v62, %v18133_v39  ;;  %v12746_v37 = vsub.f32 %v12714_v8, %v20081_v51  ;;  %v12757_v39 = vsub.f32 %v12719_v59, %v18137_v19  ;;  %v20088_v51 = vld [vmem:[#allocation77_spill] sm:$0xff]  ;;  %v12773_v19 = vld [vmem:[#allocation2 + $0x258] sm:$0xff] }
 0x2c7   :  { %20077 = vst [vmem:[#allocation153_spill] sm:$0xff] %v12731_v31  ;;  %v12752_v31 = vsub.f32 %v12717_v40, %v20084_v3  ;;  %v12771_v3 = vsub.f32 %v12741_v29, %v18144_v61  ;;  %v12787_v61 = vld [vmem:[#allocation2 + $0x280] sm:$0xff]  ;;  %v20102_v29 = vand.u32 4294901760, %v12782_v21 }
 0x2c8   :  { %20076 = vst [vmem:[#allocation144_spill] sm:$0xff] %v12726_v47  ;;  %20078 = vst [vmem:[#allocation151_spill] sm:$0xff] %v12736_v46  ;;  %v20083_v47 = vld [vmem:[#allocation74_spill] sm:$0xff]  ;;  %v20087_v46 = vld [vmem:[#allocation80_spill] sm:$0xff]  ;;  %v18159_v58 = vand.u32 4294901760, %v12787_v61 }
 0x2c9   :  { %20082 = vst [vmem:[#allocation203_spill] sm:$0xff] %v12746_v37  ;;  %20085 = vst [vmem:[#allocation9_spill] sm:$0xff] %v12752_v31  ;;  %v20093_v31 = vld [vmem:[#allocation83_spill] sm:$0xff] }
 0x2ca   :  { %8518 = vmatpush1.bf16.xpose.msra.mxu0 %v20083_v47  ;;  %20086 = vst [vmem:[#allocation10_spill] sm:$0xff] %v12757_v39  ;;  %v12766_v47 = vsub.f32 %v12739_v10, %v18142_v15  ;;  %20090 = vst [vmem:[#allocation13_spill] sm:$0xff] %v12771_v3  ;;  %v12775_v39 = vld [vmem:[#allocation2 + $0x288] sm:$0xff]  ;;  %v12807_v3 = vld [vmem:[#allocation2 + $0x850] sm:$0xff]  ;;  %v18166_v10 = vand.u32 4294901760, %v12809_v0 }
 0x2cb   :  { %8520 = vmatprep.subr.bf16.mxu0 %v20087_v46  ;;  %20091 = vst [vmem:[#allocation15_spill] sm:$0xff] %v12775_v39  ;;  %v12777_v46 = vld [vmem:[#allocation2 + $0x858] sm:$0xff]  ;;  %v18153_v37 = vand.u32 4294901760, %v12775_v39  ;;  %20096 = vst [vmem:[#allocation205_spill] sm:$0xff] %v12787_v61 }
 0x2cc   :  { %9670 = vmatpush1.bf16.xpose.msra.mxu1 %v20088_v51  ;;  %20089 = vst [vmem:[#allocation11_spill] sm:$0xff] %v12766_v47  ;;  %20092 = vst [vmem:[#allocation16_spill] sm:$0xff] %v12777_v46  ;;  %v18151_v51 = vand.u32 4294901760, %v12773_v19  ;;  %v18155_v15 = vand.u32 4294901760, %v12777_v46  ;;  %v12785_v47 = vld [vmem:[#allocation2 + $0x250] sm:$0xff] }
 0x2cd   :  { %9672 = vmatprep.subr.bf16.mxu1 %v20093_v31  ;;  %20095 = vst [vmem:[#allocation22_spill] sm:$0xff] %v12785_v47  ;;  %v12799_v38 = vsub.f32 %v12775_v39, %v18153_v37  ;;  %20100 = vst [vmem:[#allocation25_spill] sm:$0xff] %v12807_v3  ;;  %v20105_v37 = vand.u32 4294901760, %v12785_v47 }
 0x2ce   :  { %v12794_v31 = vsub.f32 %v12773_v19, %v18151_v51  ;;  %v12804_v60 = vsub.f32 %v12777_v46, %v18155_v15  ;;  %v12814_v51 = vsub.f32 %v12782_v21, %v20102_v29  ;;  %v12825_v15 = vsub.f32 %v12787_v61, %v18159_v58  ;;  %v20109_v29 = vld [vmem:[#allocation89_spill] sm:$0xff]  ;;  %v12841_v58 = vld [vmem:[#allocation2 + $0x2b8] sm:$0xff] }
 0x2cf   :  { %20098 = vst [vmem:[#allocation19_spill] sm:$0xff] %v12799_v38  ;;  %v12820_v38 = vsub.f32 %v12785_v47, %v20105_v37  ;;  %v18164_v46 = vand.u32 4294901760, %v12807_v3  ;;  %v12839_v37 = vsub.f32 %v12809_v0, %v18166_v10  ;;  %20112 = vst [vmem:[#allocation36_spill] sm:$0xff] %v12841_v58  ;;  %v12850_v61 = vld [vmem:[#allocation2 + $0x8e8] sm:$0xff]  ;;  %v12855_v10 = vld [vmem:[#allocation2 + $0x2e0] sm:$0xff] }
 0x2d0   :  { %20097 = vst [vmem:[#allocation18_spill] sm:$0xff] %v12794_v31  ;;  %20099 = vst [vmem:[#allocation24_spill] sm:$0xff] %v12804_v60  ;;  %v20104_v31 = vld [vmem:[#allocation86_spill] sm:$0xff]  ;;  %v20108_v60 = vld [vmem:[#allocation92_spill] sm:$0xff]  ;;  %v18181_v21 = vand.u32 4294901760, %v12855_v10  ;;  %v20124_v39 = vand.u32 4294901760, %v12850_v61 }
 0x2d1   :  { %20103 = vst [vmem:[#allocation28_spill] sm:$0xff] %v12814_v51  ;;  %20106 = vst [vmem:[#allocation33_spill] sm:$0xff] %v12820_v38  ;;  %v20115_v38 = vld [vmem:[#allocation95_spill] sm:$0xff] }
 0x2d2   :  { %8522 = vmatpush1.bf16.xpose.msra.mxu0 %v20104_v31  ;;  %20107 = vst [vmem:[#allocation34_spill] sm:$0xff] %v12825_v15  ;;  %v12834_v31 = vsub.f32 %v12807_v3, %v18164_v46  ;;  %20111 = vst [vmem:[#allocation31_spill] sm:$0xff] %v12839_v37  ;;  %v12843_v15 = vld [vmem:[#allocation2 + $0x2e8] sm:$0xff]  ;;  %v12875_v37 = vld [vmem:[#allocation2 + $0x8b0] sm:$0xff] }
 0x2d3   :  { %8524 = vmatprep.subr.bf16.mxu0 %v20108_v60  ;;  %20113 = vst [vmem:[#allocation37_spill] sm:$0xff] %v12843_v15  ;;  %v12845_v60 = vld [vmem:[#allocation2 + $0x8b8] sm:$0xff]  ;;  %v18175_v51 = vand.u32 4294901760, %v12843_v15  ;;  %20116 = vst [vmem:[#allocation40_spill] sm:$0xff] %v12850_v61  ;;  %v12877_v0 = vld [vmem:[#allocation2 + $0x8e0] sm:$0xff] }
 0x2d4   :  { %9674 = vmatpush1.bf16.xpose.msra.mxu1 %v20109_v29  ;;  %20110 = vst [vmem:[#allocation29_spill] sm:$0xff] %v12834_v31  ;;  %20114 = vst [vmem:[#allocation39_spill] sm:$0xff] %v12845_v60  ;;  %v18173_v29 = vand.u32 4294901760, %v12841_v58  ;;  %v18177_v46 = vand.u32 4294901760, %v12845_v60  ;;  %v12853_v31 = vld [vmem:[#allocation2 + $0x2b0] sm:$0xff] }
 0x2d5   :  { %9676 = vmatprep.subr.bf16.mxu1 %v20115_v38  ;;  %20117 = vst [vmem:[#allocation45_spill] sm:$0xff] %v12853_v31  ;;  %20118 = vst [vmem:[#allocation46_spill] sm:$0xff] %v12855_v10  ;;  %v12867_v3 = vsub.f32 %v12843_v15, %v18175_v51  ;;  %v20127_v51 = vand.u32 4294901760, %v12853_v31  ;;  %v18188_v15 = vand.u32 4294901760, %v12877_v0 }
 0x2d6   :  { %v12862_v38 = vsub.f32 %v12841_v58, %v18173_v29  ;;  %v12872_v47 = vsub.f32 %v12845_v60, %v18177_v46  ;;  %20122 = vst [vmem:[#allocation49_spill] sm:$0xff] %v12875_v37  ;;  %20123 = vst [vmem:[#allocation51_spill] sm:$0xff] %v12877_v0  ;;  %v12882_v29 = vsub.f32 %v12850_v61, %v20124_v39  ;;  %v18186_v60 = vand.u32 4294901760, %v12875_v37  ;;  %v20131_v39 = vld [vmem:[#allocation101_spill] sm:$0xff] }
 0x2d7   :  { %20120 = vst [vmem:[#allocation43_spill] sm:$0xff] %v12867_v3  ;;  %v12888_v3 = vsub.f32 %v12853_v31, %v20127_v51  ;;  %v12893_v46 = vsub.f32 %v12855_v10, %v18181_v21  ;;  %v12907_v51 = vsub.f32 %v12877_v0, %v18188_v15  ;;  %v12909_v21 = vld [vmem:[#allocation2 + $0x318] sm:$0xff]  ;;  %v12918_v10 = vld [vmem:[#allocation2 + $0x948] sm:$0xff]  ;;  %v12923_v15 = vld [vmem:[#allocation2 + $0x340] sm:$0xff] }
 0x2d8   :  { %20119 = vst [vmem:[#allocation42_spill] sm:$0xff] %v12862_v38  ;;  %20121 = vst [vmem:[#allocation48_spill] sm:$0xff] %v12872_v47  ;;  %v20126_v38 = vld [vmem:[#allocation98_spill] sm:$0xff]  ;;  %v20130_v47 = vld [vmem:[#allocation104_spill] sm:$0xff]  ;;  %v18203_v61 = vand.u32 4294901760, %v12923_v15  ;;  %v20146_v58 = vand.u32 4294901760, %v12918_v10 }
 0x2d9   :  { %20125 = vst [vmem:[#allocation52_spill] sm:$0xff] %v12882_v29  ;;  %20128 = vst [vmem:[#allocation57_spill] sm:$0xff] %v12888_v3  ;;  %v20137_v3 = vld [vmem:[#allocation107_spill] sm:$0xff] }
 0x2da   :  { %8526 = vmatpush1.bf16.xpose.msra.mxu0 %v20126_v38  ;;  %20129 = vst [vmem:[#allocation58_spill] sm:$0xff] %v12893_v46  ;;  %v12902_v38 = vsub.f32 %v12875_v37, %v18186_v60  ;;  %20133 = vst [vmem:[#allocation55_spill] sm:$0xff] %v12907_v51  ;;  %v12911_v46 = vld [vmem:[#allocation2 + $0x348] sm:$0xff]  ;;  %v12943_v51 = vld [vmem:[#allocation2 + $0x910] sm:$0xff] }
 0x2db   :  { %8528 = vmatprep.subr.bf16.mxu0 %v20130_v47  ;;  %20134 = vst [vmem:[#allocation60_spill] sm:$0xff] %v12909_v21  ;;  %20135 = vst [vmem:[#allocation61_spill] sm:$0xff] %v12911_v46  ;;  %v12913_v47 = vld [vmem:[#allocation2 + $0x918] sm:$0xff]  ;;  %v18197_v29 = vand.u32 4294901760, %v12911_v46  ;;  %v12945_v0 = vld [vmem:[#allocation2 + $0x940] sm:$0xff] }
 0x2dc   :  { %9678 = vmatpush1.bf16.xpose.msra.mxu1 %v20131_v39  ;;  %20132 = vst [vmem:[#allocation54_spill] sm:$0xff] %v12902_v38  ;;  %20136 = vst [vmem:[#allocation63_spill] sm:$0xff] %v12913_v47  ;;  %v18195_v39 = vand.u32 4294901760, %v12909_v21  ;;  %v18199_v60 = vand.u32 4294901760, %v12913_v47  ;;  %v12921_v38 = vld [vmem:[#allocation2 + $0x310] sm:$0xff] }
 0x2dd   :  { %9680 = vmatprep.subr.bf16.mxu1 %v20137_v3  ;;  %20138 = vst [vmem:[#allocation64_spill] sm:$0xff] %v12918_v10  ;;  %20139 = vst [vmem:[#allocation69_spill] sm:$0xff] %v12921_v38  ;;  %v12935_v37 = vsub.f32 %v12911_v46, %v18197_v29  ;;  %v20149_v29 = vand.u32 4294901760, %v12921_v38  ;;  %v18210_v46 = vand.u32 4294901760, %v12945_v0 }
 0x2de   :  { %20140 = vst [vmem:[#allocation70_spill] sm:$0xff] %v12923_v15  ;;  %v12930_v3 = vsub.f32 %v12909_v21, %v18195_v39  ;;  %v12940_v31 = vsub.f32 %v12913_v47, %v18199_v60  ;;  %20144 = vst [vmem:[#allocation73_spill] sm:$0xff] %v12943_v51  ;;  %v12950_v39 = vsub.f32 %v12918_v10, %v20146_v58  ;;  %v18208_v47 = vand.u32 4294901760, %v12943_v51  ;;  %v20153_v58 = vld [vmem:[#allocation113_spill] sm:$0xff] }
 0x2df   :  { %20142 = vst [vmem:[#allocation67_spill] sm:$0xff] %v12935_v37  ;;  %20145 = vst [vmem:[#allocation75_spill] sm:$0xff] %v12945_v0  ;;  %v12956_v37 = vsub.f32 %v12921_v38, %v20149_v29  ;;  %v12961_v60 = vsub.f32 %v12923_v15, %v18203_v61  ;;  %v12975_v29 = vsub.f32 %v12945_v0, %v18210_v46  ;;  %v12977_v61 = vld [vmem:[#allocation2 + $0x378] sm:$0xff]  ;;  %v12986_v15 = vld [vmem:[#allocation2 + $0x9a8] sm:$0xff] }
 0x2e0   :  { %20141 = vst [vmem:[#allocation66_spill] sm:$0xff] %v12930_v3  ;;  %20143 = vst [vmem:[#allocation72_spill] sm:$0xff] %v12940_v31  ;;  %v20148_v3 = vld [vmem:[#allocation110_spill] sm:$0xff]  ;;  %v20152_v31 = vld [vmem:[#allocation116_spill] sm:$0xff]  ;;  %v20168_v21 = vand.u32 4294901760, %v12986_v15 }
 0x2e1   :  { %20147 = vst [vmem:[#allocation76_spill] sm:$0xff] %v12950_v39  ;;  %20150 = vst [vmem:[#allocation81_spill] sm:$0xff] %v12956_v37  ;;  %v20159_v37 = vld [vmem:[#allocation119_spill] sm:$0xff] }
 0x2e2   :  { %8530 = vmatpush1.bf16.xpose.msra.mxu0 %v20148_v3  ;;  %20151 = vst [vmem:[#allocation82_spill] sm:$0xff] %v12961_v60  ;;  %v12970_v3 = vsub.f32 %v12943_v51, %v18208_v47  ;;  %20155 = vst [vmem:[#allocation79_spill] sm:$0xff] %v12975_v29  ;;  %v12979_v60 = vld [vmem:[#allocation2 + $0x3a8] sm:$0xff]  ;;  %v12991_v46 = vld [vmem:[#allocation2 + $0x3a0] sm:$0xff] }
 0x2e3   :  { %8532 = vmatprep.subr.bf16.mxu0 %v20152_v31  ;;  %20156 = vst [vmem:[#allocation84_spill] sm:$0xff] %v12977_v61  ;;  %20157 = vst [vmem:[#allocation85_spill] sm:$0xff] %v12979_v60  ;;  %v12981_v31 = vld [vmem:[#allocation2 + $0x978] sm:$0xff]  ;;  %v18219_v39 = vand.u32 4294901760, %v12979_v60  ;;  %v18225_v10 = vand.u32 4294901760, %v12991_v46  ;;  %v13011_v29 = vld [vmem:[#allocation2 + $0x970] sm:$0xff] }
 0x2e4   :  { %9682 = vmatpush1.bf16.xpose.msra.mxu1 %v20153_v58  ;;  %20154 = vst [vmem:[#allocation78_spill] sm:$0xff] %v12970_v3  ;;  %20158 = vst [vmem:[#allocation87_spill] sm:$0xff] %v12981_v31  ;;  %v18217_v58 = vand.u32 4294901760, %v12977_v61  ;;  %v18221_v47 = vand.u32 4294901760, %v12981_v31  ;;  %v12989_v3 = vld [vmem:[#allocation2 + $0x370] sm:$0xff]  ;;  %v13013_v0 = vld [vmem:[#allocation2 + $0x9a0] sm:$0xff] }
 0x2e5   :  { %9684 = vmatprep.subr.bf16.mxu1 %v20159_v37  ;;  %20160 = vst [vmem:[#allocation88_spill] sm:$0xff] %v12986_v15  ;;  %20161 = vst [vmem:[#allocation109_spill] sm:$0xff] %v12989_v3  ;;  %v13003_v51 = vsub.f32 %v12979_v60, %v18219_v39  ;;  %v20171_v39 = vand.u32 4294901760, %v12989_v3  ;;  %v18232_v60 = vand.u32 4294901760, %v13013_v0 }
 0x2e6   :  { %20162 = vst [vmem:[#allocation112_spill] sm:$0xff] %v12991_v46  ;;  %v12998_v37 = vsub.f32 %v12977_v61, %v18217_v58  ;;  %v13008_v38 = vsub.f32 %v12981_v31, %v18221_v47  ;;  %20166 = vst [vmem:[#allocation124_spill] sm:$0xff] %v13011_v29  ;;  %v13018_v58 = vsub.f32 %v12986_v15, %v20168_v21  ;;  %v18230_v31 = vand.u32 4294901760, %v13011_v29  ;;  %v20175_v21 = vld [vmem:[#allocation125_spill] sm:$0xff] }
 0x2e7   :  { %20164 = vst [vmem:[#allocation115_spill] sm:$0xff] %v13003_v51  ;;  %20167 = vst [vmem:[#allocation130_spill] sm:$0xff] %v13013_v0  ;;  %v13024_v51 = vsub.f32 %v12989_v3, %v20171_v39  ;;  %v13029_v47 = vsub.f32 %v12991_v46, %v18225_v10  ;;  %v13043_v39 = vsub.f32 %v13013_v0, %v18232_v60  ;;  %v13045_v10 = vld [vmem:[#allocation2 + $0x3d8] sm:$0xff]  ;;  %v13054_v46 = vld [vmem:[#allocation2 + $0xa08] sm:$0xff] }
 0x2e8   :  { %20163 = vst [vmem:[#allocation118_spill] sm:$0xff] %v12998_v37  ;;  %20165 = vst [vmem:[#allocation121_spill] sm:$0xff] %v13008_v38  ;;  %v20170_v37 = vld [vmem:[#allocation122_spill] sm:$0xff]  ;;  %v20174_v38 = vld [vmem:[#allocation128_spill] sm:$0xff]  ;;  %v20190_v61 = vand.u32 4294901760, %v13054_v46 }
 0x2e9   :  { %20169 = vst [vmem:[#allocation127_spill] sm:$0xff] %v13018_v58  ;;  %20172 = vst [vmem:[#allocation135_spill] sm:$0xff] %v13024_v51  ;;  %v20181_v51 = vld [vmem:[#allocation131_spill] sm:$0xff] }
 0x2ea   :  { %8534 = vmatpush1.bf16.xpose.msra.mxu0 %v20170_v37  ;;  %20173 = vst [vmem:[#allocation136_spill] sm:$0xff] %v13029_v47  ;;  %v13038_v37 = vsub.f32 %v13011_v29, %v18230_v31  ;;  %20177 = vst [vmem:[#allocation171_spill] sm:$0xff] %v13043_v39  ;;  %v13047_v47 = vld [vmem:[#allocation2 + $0x408] sm:$0xff]  ;;  %v13059_v60 = vld [vmem:[#allocation2 + $0x400] sm:$0xff] }
 0x2eb   :  { %8536 = vmatprep.subr.bf16.mxu0 %v20174_v38  ;;  %20178 = vst [vmem:[#allocation172_spill] sm:$0xff] %v13045_v10  ;;  %20179 = vst [vmem:[#allocation177_spill] sm:$0xff] %v13047_v47  ;;  %v13049_v38 = vld [vmem:[#allocation2 + $0x9d8] sm:$0xff]  ;;  %v18241_v58 = vand.u32 4294901760, %v13047_v47  ;;  %v18247_v15 = vand.u32 4294901760, %v13059_v60  ;;  %v13079_v39 = vld [vmem:[#allocation2 + $0x9d0] sm:$0xff] }
 0x2ec   :  { %9686 = vmatpush1.bf16.xpose.msra.mxu1 %v20175_v21  ;;  %20176 = vst [vmem:[#allocation142_spill] sm:$0xff] %v13038_v37  ;;  %20180 = vst [vmem:[#allocation178_spill] sm:$0xff] %v13049_v38  ;;  %v18239_v21 = vand.u32 4294901760, %v13045_v10  ;;  %v18243_v31 = vand.u32 4294901760, %v13049_v38  ;;  %v13057_v37 = vld [vmem:[#allocation2 + $0x3d0] sm:$0xff]  ;;  %v13081_v0 = vld [vmem:[#allocation2 + $0xa00] sm:$0xff] }
 0x2ed   :  { %9688 = vmatprep.subr.bf16.mxu1 %v20181_v51  ;;  %20182 = vst [vmem:[#allocation174_spill] sm:$0xff] %v13054_v46  ;;  %20183 = vst [vmem:[#allocation175_spill] sm:$0xff] %v13057_v37  ;;  %v13071_v29 = vsub.f32 %v13047_v47, %v18241_v58  ;;  %v20193_v58 = vand.u32 4294901760, %v13057_v37  ;;  %v18254_v47 = vand.u32 4294901760, %v13081_v0 }
 0x2ee   :  { %20184 = vst [vmem:[#allocation180_spill] sm:$0xff] %v13059_v60  ;;  %v13066_v51 = vsub.f32 %v13045_v10, %v18239_v21  ;;  %v13076_v3 = vsub.f32 %v13049_v38, %v18243_v31  ;;  %20188 = vst [vmem:[#allocation189_spill] sm:$0xff] %v13079_v39  ;;  %v13086_v21 = vsub.f32 %v13054_v46, %v20190_v61  ;;  %v18252_v38 = vand.u32 4294901760, %v13079_v39  ;;  %v20197_v61 = vld [vmem:[#allocation137_spill] sm:$0xff] }
 0x2ef   :  { %20186 = vst [vmem:[#allocation183_spill] sm:$0xff] %v13071_v29  ;;  %20189 = vst [vmem:[#allocation190_spill] sm:$0xff] %v13081_v0  ;;  %v13092_v29 = vsub.f32 %v13057_v37, %v20193_v58  ;;  %v13097_v31 = vsub.f32 %v13059_v60, %v18247_v15  ;;  %v13111_v58 = vsub.f32 %v13081_v0, %v18254_v47  ;;  %v13113_v15 = vld [vmem:[#allocation2 + $0x438] sm:$0xff]  ;;  %v13122_v60 = vld [vmem:[#allocation2 + $0xa68] sm:$0xff] }
 0x2f0   :  { %20185 = vst [vmem:[#allocation181_spill] sm:$0xff] %v13066_v51  ;;  %20187 = vst [vmem:[#allocation184_spill] sm:$0xff] %v13076_v3  ;;  %v20192_v51 = vld [vmem:[#allocation134_spill] sm:$0xff]  ;;  %v20196_v3 = vld [vmem:[#allocation140_spill] sm:$0xff]  ;;  %v20212_v10 = vand.u32 4294901760, %v13122_v60 }
 0x2f1   :  { %20191 = vst [vmem:[#allocation186_spill] sm:$0xff] %v13086_v21  ;;  %20194 = vst [vmem:[#allocation187_spill] sm:$0xff] %v13092_v29  ;;  %v20203_v29 = vld [vmem:[#allocation143_spill] sm:$0xff] }
 0x2f2   :  { %8538 = vmatpush1.bf16.xpose.msra.mxu0 %v20192_v51  ;;  %20195 = vst [vmem:[#allocation192_spill] sm:$0xff] %v13097_v31  ;;  %v13106_v51 = vsub.f32 %v13079_v39, %v18252_v38  ;;  %20199 = vst [vmem:[#allocation196_spill] sm:$0xff] %v13111_v58  ;;  %v13115_v31 = vld [vmem:[#allocation2 + $0x468] sm:$0xff]  ;;  %v13127_v47 = vld [vmem:[#allocation2 + $0x460] sm:$0xff] }
 0x2f3   :  { %8540 = vmatprep.subr.bf16.mxu0 %v20196_v3  ;;  %20200 = vst [vmem:[#allocation197_spill] sm:$0xff] %v13113_v15  ;;  %20201 = vst [vmem:[#allocation199_spill] sm:$0xff] %v13115_v31  ;;  %v13117_v3 = vld [vmem:[#allocation2 + $0xa38] sm:$0xff]  ;;  %v18263_v21 = vand.u32 4294901760, %v13115_v31  ;;  %v18269_v46 = vand.u32 4294901760, %v13127_v47  ;;  %v13147_v58 = vld [vmem:[#allocation2 + $0xa30] sm:$0xff] }
 0x2f4   :  { %9690 = vmatpush1.bf16.xpose.msra.mxu1 %v20197_v61  ;;  %20198 = vst [vmem:[#allocation193_spill] sm:$0xff] %v13106_v51  ;;  %20202 = vst [vmem:[#allocation200_spill] sm:$0xff] %v13117_v3  ;;  %v18261_v61 = vand.u32 4294901760, %v13113_v15  ;;  %v18265_v38 = vand.u32 4294901760, %v13117_v3  ;;  %v13125_v51 = vld [vmem:[#allocation2 + $0x430] sm:$0xff]  ;;  %v13149_v0 = vld [vmem:[#allocation2 + $0xa60] sm:$0xff] }
 0x2f5   :  { %9692 = vmatprep.subr.bf16.mxu1 %v20203_v29  ;;  %20204 = vst [vmem:[#allocation8_spill] sm:$0xff] %v13122_v60  ;;  %20205 = vst [vmem:[#allocation12_spill] sm:$0xff] %v13125_v51  ;;  %v13139_v39 = vsub.f32 %v13115_v31, %v18263_v21  ;;  %v20215_v21 = vand.u32 4294901760, %v13125_v51  ;;  %v18276_v31 = vand.u32 4294901760, %v13149_v0 }
 0x2f6   :  { %20206 = vst [vmem:[#allocation202_spill] sm:$0xff] %v13127_v47  ;;  %v13134_v29 = vsub.f32 %v13113_v15, %v18261_v61  ;;  %v13144_v37 = vsub.f32 %v13117_v3, %v18265_v38  ;;  %20210 = vst [vmem:[#allocation17_spill] sm:$0xff] %v13147_v58  ;;  %v13154_v61 = vsub.f32 %v13122_v60, %v20212_v10  ;;  %v18274_v3 = vand.u32 4294901760, %v13147_v58  ;;  %v20219_v10 = vld [vmem:[#allocation149_spill] sm:$0xff] }
 0x2f7   :  { %20208 = vst [vmem:[#allocation194_spill] sm:$0xff] %v13139_v39  ;;  %20211 = vst [vmem:[#allocation23_spill] sm:$0xff] %v13149_v0  ;;  %v13160_v39 = vsub.f32 %v13125_v51, %v20215_v21  ;;  %v13165_v38 = vsub.f32 %v13127_v47, %v18269_v46  ;;  %v13179_v21 = vsub.f32 %v13149_v0, %v18276_v31  ;;  %v13181_v46 = vld [vmem:[#allocation2 + $0x498] sm:$0xff]  ;;  %v13190_v47 = vld [vmem:[#allocation2 + $0xac8] sm:$0xff] }
 0x2f8   :  { %20207 = vst [vmem:[#allocation14_spill] sm:$0xff] %v13134_v29  ;;  %20209 = vst [vmem:[#allocation21_spill] sm:$0xff] %v13144_v37  ;;  %v20214_v29 = vld [vmem:[#allocation146_spill] sm:$0xff]  ;;  %v20218_v37 = vld [vmem:[#allocation152_spill] sm:$0xff]  ;;  %v20234_v15 = vand.u32 4294901760, %v13190_v47 }
 0x2f9   :  { %20213 = vst [vmem:[#allocation27_spill] sm:$0xff] %v13154_v61  ;;  %20216 = vst [vmem:[#allocation32_spill] sm:$0xff] %v13160_v39  ;;  %v20225_v39 = vld [vmem:[#allocation155_spill] sm:$0xff] }
 0x2fa   :  { %8542 = vmatpush1.bf16.xpose.msra.mxu0 %v20214_v29  ;;  %20217 = vst [vmem:[#allocation30_spill] sm:$0xff] %v13165_v38  ;;  %v13174_v29 = vsub.f32 %v13147_v58, %v18274_v3  ;;  %20221 = vst [vmem:[#allocation38_spill] sm:$0xff] %v13179_v21  ;;  %v13183_v38 = vld [vmem:[#allocation2 + $0x4c8] sm:$0xff]  ;;  %v13195_v31 = vld [vmem:[#allocation2 + $0x4c0] sm:$0xff] }
 0x2fb   :  { %8544 = vmatprep.subr.bf16.mxu0 %v20218_v37  ;;  %20222 = vst [vmem:[#allocation44_spill] sm:$0xff] %v13181_v46  ;;  %20223 = vst [vmem:[#allocation41_spill] sm:$0xff] %v13183_v38  ;;  %v13185_v37 = vld [vmem:[#allocation2 + $0xa98] sm:$0xff]  ;;  %v18285_v61 = vand.u32 4294901760, %v13183_v38  ;;  %v18291_v60 = vand.u32 4294901760, %v13195_v31  ;;  %v13215_v21 = vld [vmem:[#allocation2 + $0xa90] sm:$0xff] }
 0x2fc   :  { %9694 = vmatpush1.bf16.xpose.msra.mxu1 %v20219_v10  ;;  %20220 = vst [vmem:[#allocation35_spill] sm:$0xff] %v13174_v29  ;;  %20224 = vst [vmem:[#allocation47_spill] sm:$0xff] %v13185_v37  ;;  %v18283_v10 = vand.u32 4294901760, %v13181_v46  ;;  %v18287_v3 = vand.u32 4294901760, %v13185_v37  ;;  %v13193_v29 = vld [vmem:[#allocation2 + $0x490] sm:$0xff]  ;;  %v13217_v0 = vld [vmem:[#allocation2 + $0xac0] sm:$0xff] }
 0x2fd   :  { %9696 = vmatprep.subr.bf16.mxu1 %v20225_v39  ;;  %20226 = vst [vmem:[#allocation50_spill] sm:$0xff] %v13190_v47  ;;  %20227 = vst [vmem:[#allocation56_spill] sm:$0xff] %v13193_v29  ;;  %v13207_v58 = vsub.f32 %v13183_v38, %v18285_v61  ;;  %v20237_v61 = vand.u32 4294901760, %v13193_v29  ;;  %v18298_v38 = vand.u32 4294901760, %v13217_v0 }
 0x2fe   :  { %20228 = vst [vmem:[#allocation53_spill] sm:$0xff] %v13195_v31  ;;  %v13202_v39 = vsub.f32 %v13181_v46, %v18283_v10  ;;  %v13212_v51 = vsub.f32 %v13185_v37, %v18287_v3  ;;  %20232 = vst [vmem:[#allocation65_spill] sm:$0xff] %v13215_v21  ;;  %v13222_v10 = vsub.f32 %v13190_v47, %v20234_v15  ;;  %v18296_v37 = vand.u32 4294901760, %v13215_v21  ;;  %v20241_v15 = vld [vmem:[#allocation161_spill] sm:$0xff] }
 0x2ff   :  { %20230 = vst [vmem:[#allocation62_spill] sm:$0xff] %v13207_v58  ;;  %20233 = vst [vmem:[#allocation71_spill] sm:$0xff] %v13217_v0  ;;  %v13228_v58 = vsub.f32 %v13193_v29, %v20237_v61  ;;  %v13233_v3 = vsub.f32 %v13195_v31, %v18291_v60  ;;  %v13247_v61 = vsub.f32 %v13217_v0, %v18298_v38  ;;  %v13249_v60 = vld [vmem:[#allocation2 + $0x4f8] sm:$0xff]  ;;  %v13258_v31 = vld [vmem:[#allocation2 + $0xb28] sm:$0xff] }
 0x300   :  { %20229 = vst [vmem:[#allocation59_spill] sm:$0xff] %v13202_v39  ;;  %20231 = vst [vmem:[#allocation68_spill] sm:$0xff] %v13212_v51  ;;  %v20236_v39 = vld [vmem:[#allocation158_spill] sm:$0xff]  ;;  %v20240_v51 = vld [vmem:[#allocation164_spill] sm:$0xff]  ;;  %v20256_v46 = vand.u32 4294901760, %v13258_v31 }
 0x301   :  { %20235 = vst [vmem:[#allocation74_spill] sm:$0xff] %v13222_v10  ;;  %20238 = vst [vmem:[#allocation80_spill] sm:$0xff] %v13228_v58  ;;  %v20247_v58 = vld [vmem:[#allocation167_spill] sm:$0xff] }
 0x302   :  { %8546 = vmatpush1.bf16.xpose.msra.mxu0 %v20236_v39  ;;  %20239 = vst [vmem:[#allocation77_spill] sm:$0xff] %v13233_v3  ;;  %v13242_v39 = vsub.f32 %v13215_v21, %v18296_v37  ;;  %20243 = vst [vmem:[#allocation86_spill] sm:$0xff] %v13247_v61  ;;  %v13251_v3 = vld [vmem:[#allocation2 + $0x528] sm:$0xff]  ;;  %v13263_v38 = vld [vmem:[#allocation2 + $0x520] sm:$0xff] }
 0x303   :  { %8548 = vmatprep.subr.bf16.mxu0 %v20240_v51  ;;  %20244 = vst [vmem:[#allocation92_spill] sm:$0xff] %v13249_v60  ;;  %20245 = vst [vmem:[#allocation89_spill] sm:$0xff] %v13251_v3  ;;  %v13253_v51 = vld [vmem:[#allocation2 + $0xaf8] sm:$0xff]  ;;  %v18307_v10 = vand.u32 4294901760, %v13251_v3  ;;  %v18313_v47 = vand.u32 4294901760, %v13263_v38  ;;  %v13283_v61 = vld [vmem:[#allocation2 + $0xaf0] sm:$0xff] }
 0x304   :  { %9698 = vmatpush1.bf16.xpose.msra.mxu1 %v20241_v15  ;;  %20242 = vst [vmem:[#allocation83_spill] sm:$0xff] %v13242_v39  ;;  %20246 = vst [vmem:[#allocation95_spill] sm:$0xff] %v13253_v51  ;;  %v18305_v15 = vand.u32 4294901760, %v13249_v60  ;;  %v18309_v37 = vand.u32 4294901760, %v13253_v51  ;;  %v13261_v39 = vld [vmem:[#allocation2 + $0x4f0] sm:$0xff]  ;;  %v13285_v0 = vld [vmem:[#allocation2 + $0xb20] sm:$0xff] }
 0x305   :  { %9700 = vmatprep.subr.bf16.mxu1 %v20247_v58  ;;  %20248 = vst [vmem:[#allocation98_spill] sm:$0xff] %v13258_v31  ;;  %20249 = vst [vmem:[#allocation104_spill] sm:$0xff] %v13261_v39  ;;  %v13275_v21 = vsub.f32 %v13251_v3, %v18307_v10  ;;  %v20259_v10 = vand.u32 4294901760, %v13261_v39  ;;  %v18320_v3 = vand.u32 4294901760, %v13285_v0 }
 0x306   :  { %20250 = vst [vmem:[#allocation101_spill] sm:$0xff] %v13263_v38  ;;  %v13270_v58 = vsub.f32 %v13249_v60, %v18305_v15  ;;  %v13280_v29 = vsub.f32 %v13253_v51, %v18309_v37  ;;  %20254 = vst [vmem:[#allocation113_spill] sm:$0xff] %v13283_v61  ;;  %v13290_v15 = vsub.f32 %v13258_v31, %v20256_v46  ;;  %v18318_v51 = vand.u32 4294901760, %v13283_v61  ;;  %v20263_v46 = vld [vmem:[#allocation173_spill] sm:$0xff] }
 0x307   :  { %20252 = vst [vmem:[#allocation110_spill] sm:$0xff] %v13275_v21  ;;  %20255 = vst [vmem:[#allocation119_spill] sm:$0xff] %v13285_v0  ;;  %v13296_v21 = vsub.f32 %v13261_v39, %v20259_v10  ;;  %v13301_v37 = vsub.f32 %v13263_v38, %v18313_v47  ;;  %v13315_v10 = vsub.f32 %v13285_v0, %v18320_v3  ;;  %v13317_v47 = vld [vmem:[#allocation2 + $0x558] sm:$0xff]  ;;  %v13326_v38 = vld [vmem:[#allocation2 + $0xb88] sm:$0xff] }
 0x308   :  { %20251 = vst [vmem:[#allocation107_spill] sm:$0xff] %v13270_v58  ;;  %20253 = vst [vmem:[#allocation116_spill] sm:$0xff] %v13280_v29  ;;  %v20258_v58 = vld [vmem:[#allocation170_spill] sm:$0xff]  ;;  %v20262_v29 = vld [vmem:[#allocation176_spill] sm:$0xff]  ;;  %v20277_v60 = vand.u32 4294901760, %v13326_v38 }
 0x309   :  { %20257 = vst [vmem:[#allocation122_spill] sm:$0xff] %v13290_v15  ;;  %20260 = vst [vmem:[#allocation128_spill] sm:$0xff] %v13296_v21  ;;  %v20268_v21 = vld [vmem:[#allocation179_spill] sm:$0xff] }
 0x30a   :  { %8550 = vmatpush1.bf16.xpose.msra.mxu0 %v20258_v58  ;;  %20261 = vst [vmem:[#allocation125_spill] sm:$0xff] %v13301_v37  ;;  %v13310_v58 = vsub.f32 %v13283_v61, %v18318_v51  ;;  %20265 = vst [vmem:[#allocation134_spill] sm:$0xff] %v13315_v10  ;;  %v13319_v37 = vld [vmem:[#allocation2 + $0x588] sm:$0xff]  ;;  %v13331_v3 = vld [vmem:[#allocation2 + $0x580] sm:$0xff] }
 0x30b   :  { %8552 = vmatprep.subr.bf16.mxu0 %v20262_v29  ;;  %20266 = vst [vmem:[#allocation140_spill] sm:$0xff] %v13319_v37  ;;  %v13321_v29 = vld [vmem:[#allocation2 + $0xb58] sm:$0xff]  ;;  %v18329_v15 = vand.u32 4294901760, %v13319_v37  ;;  %20269 = vst [vmem:[#allocation143_spill] sm:$0xff] %v13326_v38  ;;  %v18335_v31 = vand.u32 4294901760, %v13331_v3  ;;  %v13351_v10 = vld [vmem:[#allocation2 + $0xb50] sm:$0xff] }
 0x30c   :  { %9702 = vmatpush1.bf16.xpose.msra.mxu1 %v20263_v46  ;;  %20264 = vst [vmem:[#allocation131_spill] sm:$0xff] %v13310_v58  ;;  %20267 = vst [vmem:[#allocation137_spill] sm:$0xff] %v13321_v29  ;;  %v18327_v46 = vand.u32 4294901760, %v13317_v47  ;;  %v18331_v51 = vand.u32 4294901760, %v13321_v29  ;;  %v13329_v58 = vld [vmem:[#allocation2 + $0x550] sm:$0xff]  ;;  %v13353_v0 = vld [vmem:[#allocation2 + $0xb80] sm:$0xff] }
 0x30d   :  { %9704 = vmatprep.subr.bf16.mxu1 %v20268_v21  ;;  %20270 = vst [vmem:[#allocation146_spill] sm:$0xff] %v13329_v58  ;;  %20271 = vst [vmem:[#allocation152_spill] sm:$0xff] %v13331_v3  ;;  %v13343_v61 = vsub.f32 %v13319_v37, %v18329_v15  ;;  %v20280_v15 = vand.u32 4294901760, %v13329_v58  ;;  %v18342_v37 = vand.u32 4294901760, %v13353_v0 }
 0x30e   :  { %v13338_v21 = vsub.f32 %v13317_v47, %v18327_v46  ;;  %v13348_v39 = vsub.f32 %v13321_v29, %v18331_v51  ;;  %20275 = vst [vmem:[#allocation164_spill] sm:$0xff] %v13351_v10  ;;  %20276 = vst [vmem:[#allocation161_spill] sm:$0xff] %v13353_v0  ;;  %v13358_v46 = vsub.f32 %v13326_v38, %v20277_v60  ;;  %v18340_v29 = vand.u32 4294901760, %v13351_v10  ;;  %v20284_v60 = vld [vmem:[#allocation185_spill] sm:$0xff] }
 0x30f   :  { %20273 = vst [vmem:[#allocation155_spill] sm:$0xff] %v13343_v61  ;;  %v13364_v61 = vsub.f32 %v13329_v58, %v20280_v15  ;;  %v13369_v51 = vsub.f32 %v13331_v3, %v18335_v31  ;;  %v13383_v15 = vsub.f32 %v13353_v0, %v18342_v37  ;;  %v13385_v31 = vld [vmem:[#allocation2 + $0x5b8] sm:$0xff]  ;;  %v13394_v3 = vld [vmem:[#allocation2 + $0xbe8] sm:$0xff]  ;;  %v13399_v37 = vld [vmem:[#allocation2 + $0x5e0] sm:$0xff]  ;;  %v20291_v0 = vand.u32 4294901760, %v12363_v30 }
 0x310   :  { %20272 = vst [vmem:[#allocation149_spill] sm:$0xff] %v13338_v21  ;;  %20274 = vst [vmem:[#allocation158_spill] sm:$0xff] %v13348_v39  ;;  %v20279_v21 = vld [vmem:[#allocation182_spill] sm:$0xff]  ;;  %v20283_v39 = vld [vmem:[#allocation188_spill] sm:$0xff] }
 0x311   :  { %20278 = vst [vmem:[#allocation167_spill] sm:$0xff] %v13358_v46  ;;  %20281 = vst [vmem:[#allocation170_spill] sm:$0xff] %v13364_v61  ;;  %v20288_v61 = vld [vmem:[#allocation191_spill] sm:$0xff]  ;;  %v20293_v46 = vand.u32 4294901760, %v13385_v31 }
 0x312   :  { %8554 = vmatpush1.bf16.xpose.msra.mxu0 %v20279_v21  ;;  %20282 = vst [vmem:[#allocation176_spill] sm:$0xff] %v13369_v51  ;;  %v13378_v21 = vsub.f32 %v13351_v10, %v18340_v29  ;;  %20286 = vst [vmem:[#allocation179_spill] sm:$0xff] %v13383_v15  ;;  %v13387_v51 = vld [vmem:[#allocation2 + $0x5e8] sm:$0xff]  ;;  %v20290_v15 = vand.u32 4294901760, %v12361_v11 }
 0x313   :  { %8556 = vmatprep.subr.bf16.mxu0 %v20283_v39  ;;  %v13389_v39 = vld [vmem:[#allocation2 + $0xbb8] sm:$0xff]  ;;  %20289 = vst [vmem:[#allocation188_spill] sm:$0xff] %v13394_v3  ;;  %v13412_v58 = vsub.f32 %v13385_v31, %v20293_v46  ;;  %v20295_v29 = vand.u32 4294901760, %v13387_v51 }
 0x314   :  { %9706 = vmatpush1.bf16.xpose.msra.mxu1 %v20284_v60  ;;  %20285 = vst [vmem:[#allocation173_spill] sm:$0xff] %v13378_v21  ;;  %20287 = vst [vmem:[#allocation182_spill] sm:$0xff] %v13389_v39  ;;  %v13397_v21 = vld [vmem:[#allocation2 + $0x5b0] sm:$0xff]  ;;  %v13405_v10 = vpack.c.bf16 %v20291_v0, %v20290_v15  ;;  %v20297_v11 = vand.u32 4294901760, %v13389_v39  ;;  %v13427_v60 = vld [vmem:[#allocation2 + $0xbe0] sm:$0xff] }
 0x315   :  { %9708 = vmatprep.subr.bf16.mxu1 %v20288_v61  ;;  %v18352_v61 = vand.u32 4294901760, %v13394_v3  ;;  %20294 = vst [vmem:[#allocation191_spill] sm:$0xff] %v13412_v58  ;;  %v13417_v38 = vsub.f32 %v13387_v51, %v20295_v29  ;;  %v13425_v15 = vld [vmem:[#allocation2 + $0xbb0] sm:$0xff]  ;;  %v32_v29 = vld [vmem:[%s17538_s0 + $0x18] sm:$0xff]  ;;  %v20304_v58 = vand.u32 4294901760, %v13397_v21 }
 0x316   :  { %20292 = vst [vmem:[#allocation185_spill] sm:$0xff] %v13405_v10  ;;  %v13422_v30 = vsub.f32 %v13389_v39, %v20297_v11  ;;  %v20301_v11 = vand.u32 4294901760, %v12365_v13  ;;  %v18358_v13 = vand.u32 4294901760, %v13425_v15 }
 0x317   :  { %20296 = vst [vmem:[#allocation206_spill] sm:$0xff] %v13417_v38  ;;  %v13432_v46 = vsub.f32 %v13394_v3, %v18352_v61  ;;  %v20300_v38 = vld [vmem:[#allocation195_spill] sm:$0xff]  ;;  %v13447_v39 = vsub.f32 %v13397_v21, %v20304_v58  ;;  %v20305_v61 = vand.u32 4294901760, %v13399_v37  ;;  %v13454_v3 = vand.u32 4294901760, %v32_v29 }
 0x318   :  { %20298 = vst [vmem:[#allocation207_spill] sm:$0xff] %v13422_v30  ;;  %v20302_v30 = vand.u32 4294901760, %v12370_v16  ;;  %v18360_v16 = vand.u32 4294901760, %v13427_v60  ;;  %v13466_v58 = vsub.f32 %v13425_v15, %v18358_v13  ;;  %v20316_v13 = vand.u32 4294901760, %v12435_v34 }
 0x319   :  { %20299 = vst [vmem:[#allocation208_spill] sm:$0xff] %v13432_v46  ;;  %v13452_v46 = vsub.f32 %v13399_v37, %v20305_v61  ;;  %20307 = vst [vmem:[#allocation210_spill] sm:$0xff] %v13454_v3 }
 0x31a   :  { %8558 = vmatpush1.bf16.xpose.msra.mxu0 %v20300_v38  ;;  %v13442_v0 = vpack.c.bf16 %v20302_v30, %v20301_v11  ;;  %v13460_v38 = vsub.f32 %v32_v29, %v13454_v3  ;;  %v20308_v30 = vld [vmem:[#allocation198_spill] sm:$0xff]  ;;  %v13471_v61 = vsub.f32 %v13427_v60, %v18360_v16  ;;  %v20311_v11 = vand.u32 4294901760, %v12389_v54 }
 0x31b   :  { %20306 = vst [vmem:[#allocation209_spill] sm:$0xff] %v13452_v46  ;;  %8560 = vmatprep.subr.bf16.mxu0 %v13405_v10  ;;  %20309 = vst [vmem:[#allocation198_spill] sm:$0xff] %v13466_v58  ;;  %v20312_v10 = vand.u32 4294901760, %v12391_v52  ;;  %v20315_v46 = vand.u32 4294901760, %v12433_v55  ;;  %v20318_v54 = vand.u32 4294901760, %v12393_v25  ;;  %v20319_v52 = vand.u32 4294901760, %v12403_v43 }
 0x31c   :  { %20303 = vst [vmem:[#allocation195_spill] sm:$0xff] %v13442_v0  ;;  %9710 = vmatpush1.bf16.xpose.msra.mxu1 %v20308_v30  ;;  %20310 = vst [vmem:[#allocation211_spill] sm:$0xff] %v13471_v61  ;;  %v13481_v30 = vand.u32 4294901760, %v13460_v38  ;;  %v20322_v55 = vand.u32 4294901760, %v12442_v5  ;;  %v20324_v25 = vand.u32 4294901760, %v12445_v49  ;;  %v20325_v43 = vand.u32 4294901760, %v12447_v7 }
 0x31d   :  { %9712 = vmatprep.subr.bf16.mxu1 %v13442_v0  ;;  %v13478_v29 = vpack.c.bf16 %v20312_v10, %v20311_v11  ;;  %v13487_v58 = vpack.c.bf16 %v20316_v13, %v20315_v46  ;;  %v13496_v10 = vpack.c.bf16 %v20319_v52, %v20318_v54  ;;  %v20321_v11 = vand.u32 4294901760, %v12437_v1 }
 0x31e   :  { %20314 = vst [vmem:[#allocation213_spill] sm:$0xff] %v13481_v30  ;;  %v1834_v16 = vsub.f32 %v13460_v38, %v13481_v30  ;;  %v13513_v1 = vpack.c.bf16 %v20325_v43, %v20324_v25  ;;  %v20327_v5 = vand.u32 4294901760, %v12501_v50  ;;  %v20328_v13 = vand.u32 4294901760, %v12503_v20 }
 0x31f   :  { %20313 = vst [vmem:[#allocation212_spill] sm:$0xff] %v13478_v29  ;;  %20317 = vst [vmem:[#allocation214_spill] sm:$0xff] %v13487_v58  ;;  %v13503_v34 = vpack.c.bf16 %v20322_v55, %v20321_v11  ;;  %v20331_v54 = vand.u32 4294901760, %v12469_v32  ;;  %v20333_v49 = vand.u32 4294901760, %v12505_v44  ;;  %v20334_v7 = vand.u32 4294901760, %v12510_v45 }
 0x320   :  { %20320 = vst [vmem:[#allocation215_spill] sm:$0xff] %v13496_v10  ;;  %v1835_v46 = vand.u32 4294901760, %v1834_v16  ;;  %20326 = vst [vmem:[#allocation217_spill] sm:$0xff] %v13513_v1  ;;  %v13519_v16 = vpack.c.bf16 %v20328_v13, %v20327_v5  ;;  %v20337_v32 = vand.u32 4294901760, %v12515_v33  ;;  %v20339_v20 = vand.u32 4294901760, %v12569_v22 }
 0x321   :  { %1697 = vmatmul.mubr.f32.vlgmr.msra.gmra.mrb[0].mxu0 %v20013_v56  ;;  %20323 = vst [vmem:[#allocation216_spill] sm:$0xff] %v13503_v34  ;;  %v13532_v11 = vpack.c.bf16 %v20334_v7, %v20333_v49  ;;  %v20340_v44 = vand.u32 4294901760, %v12571_v28  ;;  %v20342_v45 = vand.u32 4294901760, %v12535_v14  ;;  %v20346_v33 = vand.u32 4294901760, %v12578_v4 }
 0x322   :  { %8562 = vmatpush1.bf16.xpose.msra.mxu0 %v13478_v29  ;;  %1836 = vmatprep.mubr.f32.mxu0 %v1835_v46  ;;  %20329 = vst [vmem:[#allocation218_spill] sm:$0xff] %v13519_v16  ;;  %v20348_v28 = vand.u32 4294901760, %v12581_v27  ;;  %v20351_v22 = vand.u32 4294901760, %v12637_v2  ;;  %v20354_v4 = vand.u32 4294901760, %v12603_v17  ;;  %v20355_v13 = vand.u32 4294901760, %v12605_v57 }
 0x323   :  { %8564 = vmatprep.subr.bf16.mxu0 %v13487_v58  ;;  %5549 = vmatmul.mubr.f32.vlgmr.msra.gmra.mrb[0].mxu1 %v20013_v56  ;;  %v20330_v56 = vand.u32 4294901760, %v12467_v35  ;;  %20335 = vst [vmem:[#allocation220_spill] sm:$0xff] %v13532_v11  ;;  %v20336_v35 = vand.u32 4294901760, %v12513_v24  ;;  %v13547_v55 = vpack.c.bf16 %v20340_v44, %v20339_v20  ;;  %v20345_v24 = vand.u32 4294901760, %v12573_v6  ;;  %v20376_v20 = vld [vmem:[#allocation15_spill] sm:$0xff] }
 0x324   :  { %9714 = vmatpush1.bf16.xpose.msra.mxu1 %v13496_v10  ;;  %5688 = vmatprep.mubr.f32.mxu1 %v1835_v46  ;;  %v20343_v46 = vand.u32 4294901760, %v12537_v42  ;;  %v20349_v42 = vand.u32 4294901760, %v12583_v9  ;;  %v20352_v6 = vand.u32 4294901760, %v12639_v23  ;;  %v20357_v27 = vand.u32 4294901760, %v12641_v12  ;;  %v20634_v10 = vld [vmem:[#allocation105_spill] sm:$0xff] }
 0x325   :  { %9716 = vmatprep.subr.bf16.mxu1 %v13503_v34  ;;  %v13525_v52 = vpack.c.bf16 %v20331_v54, %v20330_v56  ;;  %v13541_v50 = vpack.c.bf16 %v20337_v32, %v20336_v35  ;;  %20341 = vst [vmem:[#allocation222_spill] sm:$0xff] %v13547_v55  ;;  %v13560_v43 = vpack.c.bf16 %v20346_v33, %v20345_v24  ;;  %v20358_v9 = vand.u32 4294901760, %v12646_v48 }
 0x326   :  { %v13553_v25 = vpack.c.bf16 %v20343_v46, %v20342_v45  ;;  %v13569_v14 = vpack.c.bf16 %v20349_v42, %v20348_v28  ;;  %v13575_v5 = vpack.c.bf16 %v20352_v6, %v20351_v22  ;;  %v13581_v56 = vpack.c.bf16 %v20355_v13, %v20354_v4  ;;  %v20381_v46 = vld [vmem:[#allocation204_spill] sm:$0xff]  ;;  %v20391_v4 = vld [vmem:[#allocation205_spill] sm:$0xff] }
 0x327   :  { %20332 = vst [vmem:[#allocation219_spill] sm:$0xff] %v13525_v52  ;;  %20338 = vst [vmem:[#allocation221_spill] sm:$0xff] %v13541_v50  ;;  %v13588_v54 = vpack.c.bf16 %v20358_v9, %v20357_v27  ;;  %v20360_v2 = vand.u32 4294901760, %v12649_v53  ;;  %v20361_v57 = vand.u32 4294901760, %v12651_v18  ;;  %v20363_v23 = vand.u32 4294901760, %v12705_v63  ;;  %v20384_v28 = vld [vmem:[#allocation16_spill] sm:$0xff] }
 0x328   :  { %20344 = vst [vmem:[#allocation223_spill] sm:$0xff] %v13553_v25  ;;  %20347 = vst [vmem:[#allocation224_spill] sm:$0xff] %v13560_v43  ;;  %v20364_v12 = vand.u32 4294901760, %v12707_v36  ;;  %v20366_v48 = vand.u32 4294901760, %v12671_v41  ;;  %v20367_v7 = vand.u32 4294901760, %v12673_v26  ;;  %v20369_v53 = vand.u32 4294901760, %v12709_v62 }
 0x329   :  { %20350 = vst [vmem:[#allocation225_spill] sm:$0xff] %v13569_v14  ;;  %20353 = vst [vmem:[#allocation226_spill] sm:$0xff] %v13575_v5  ;;  %v13597_v17 = vpack.c.bf16 %v20361_v57, %v20360_v2  ;;  %v20370_v18 = vand.u32 4294901760, %v12714_v8  ;;  %v20372_v63 = vand.u32 4294901760, %v12717_v40  ;;  %v20373_v26 = vand.u32 4294901760, %v12719_v59  ;;  %v20379_v8 = vld [vmem:[#allocation150_spill] sm:$0xff] }
 0x32a   :  { %8566 = vmatpush1.bf16.xpose.msra.mxu0 %v13513_v1  ;;  %20356 = vst [vmem:[#allocation227_spill] sm:$0xff] %v13581_v56  ;;  %20359 = vst [vmem:[#allocation228_spill] sm:$0xff] %v13588_v54  ;;  %v13603_v49 = vpack.c.bf16 %v20364_v12, %v20363_v23  ;;  %v13609_v35 = vpack.c.bf16 %v20367_v7, %v20366_v48  ;;  %v20375_v41 = vand.u32 4294901760, %v12773_v19  ;;  %v20377_v62 = vand.u32 4294901760, %v20376_v20  ;;  %v20386_v42 = vld [vmem:[#allocation20_spill] sm:$0xff]  ;;  %v20389_v19 = vld [vmem:[#allocation22_spill] sm:$0xff] }
 0x32b   :  { %8568 = vmatprep.subr.bf16.mxu0 %v13519_v16  ;;  %20362 = vst [vmem:[#allocation229_spill] sm:$0xff] %v13597_v17  ;;  %v13616_v32 = vpack.c.bf16 %v20370_v18, %v20369_v53  ;;  %v13625_v36 = vpack.c.bf16 %v20373_v26, %v20372_v63  ;;  %v20380_v45 = vand.u32 4294901760, %v20379_v8  ;;  %v20382_v24 = vand.u32 4294901760, %v20381_v46  ;;  %v20394_v9 = vld [vmem:[#allocation36_spill] sm:$0xff]  ;;  %v20396_v57 = vld [vmem:[#allocation37_spill] sm:$0xff]  ;;  %v20401_v53 = vld [vmem:[#allocation26_spill] sm:$0xff] }
 0x32c   :  { %9718 = vmatpush1.bf16.xpose.msra.mxu1 %v13525_v52  ;;  %20365 = vst [vmem:[#allocation230_spill] sm:$0xff] %v13603_v49  ;;  %20368 = vst [vmem:[#allocation231_spill] sm:$0xff] %v13609_v35  ;;  %v13631_v44 = vpack.c.bf16 %v20377_v62, %v20375_v41  ;;  %v20385_v40 = vand.u32 4294901760, %v20384_v28  ;;  %v20387_v59 = vand.u32 4294901760, %v20386_v42  ;;  %v20390_v6 = vand.u32 4294901760, %v20389_v19  ;;  %v20399_v48 = vld [vmem:[#allocation25_spill] sm:$0xff] }
 0x32d   :  { %9720 = vmatprep.subr.bf16.mxu1 %v13532_v11  ;;  %20371 = vst [vmem:[#allocation232_spill] sm:$0xff] %v13616_v32  ;;  %20374 = vst [vmem:[#allocation233_spill] sm:$0xff] %v13625_v36  ;;  %v13637_v33 = vpack.c.bf16 %v20382_v24, %v20380_v45  ;;  %v20392_v13 = vand.u32 4294901760, %v20391_v4  ;;  %v20395_v2 = vand.u32 4294901760, %v20394_v9  ;;  %v20397_v23 = vand.u32 4294901760, %v20396_v57  ;;  %v20404_v26 = vld [vmem:[#allocation39_spill] sm:$0xff] }
 0x32e   :  { %20378 = vst [vmem:[#allocation15_spill] sm:$0xff] %v13631_v44  ;;  %v13644_v22 = vpack.c.bf16 %v20387_v59, %v20385_v40  ;;  %v20400_v7 = vand.u32 4294901760, %v20399_v48  ;;  %v20402_v18 = vand.u32 4294901760, %v20401_v53  ;;  %v20405_v41 = vand.u32 4294901760, %v20404_v26  ;;  %v20406_v20 = vld [vmem:[#allocation40_spill] sm:$0xff]  ;;  %v20409_v45 = vld [vmem:[#allocation45_spill] sm:$0xff] }
 0x32f   :  { %20383 = vst [vmem:[#allocation150_spill] sm:$0xff] %v13637_v33  ;;  %v13653_v27 = vpack.c.bf16 %v20392_v13, %v20390_v6  ;;  %v13659_v12 = vpack.c.bf16 %v20397_v23, %v20395_v2  ;;  %v20407_v62 = vand.u32 4294901760, %v20406_v20  ;;  %v20410_v46 = vand.u32 4294901760, %v20409_v45  ;;  %v20411_v24 = vld [vmem:[#allocation46_spill] sm:$0xff]  ;;  %v20414_v42 = vld [vmem:[#allocation60_spill] sm:$0xff]  ;;  %v20416_v19 = vld [vmem:[#allocation61_spill] sm:$0xff] }
 0x330   :  { %20388 = vst [vmem:[#allocation204_spill] sm:$0xff] %v13644_v22  ;;  %v13665_v63 = vpack.c.bf16 %v20402_v18, %v20400_v7  ;;  %v20412_v28 = vand.u32 4294901760, %v20411_v24  ;;  %v20415_v59 = vand.u32 4294901760, %v20414_v42  ;;  %v20417_v6 = vand.u32 4294901760, %v20416_v19  ;;  %v20419_v13 = vld [vmem:[#allocation49_spill] sm:$0xff]  ;;  %v20421_v2 = vld [vmem:[#allocation51_spill] sm:$0xff] }
 0x331   :  { %20393 = vst [vmem:[#allocation16_spill] sm:$0xff] %v13653_v27  ;;  %20398 = vst [vmem:[#allocation20_spill] sm:$0xff] %v13659_v12  ;;  %v13672_v8 = vpack.c.bf16 %v20407_v62, %v20405_v41  ;;  %v20420_v9 = vand.u32 4294901760, %v20419_v13  ;;  %v20422_v57 = vand.u32 4294901760, %v20421_v2  ;;  %v20424_v48 = vld [vmem:[#allocation63_spill] sm:$0xff]  ;;  %v20426_v53 = vld [vmem:[#allocation64_spill] sm:$0xff] }
 0x332   :  { %8570 = vmatpush1.bf16.xpose.msra.mxu0 %v13541_v50  ;;  %20403 = vst [vmem:[#allocation22_spill] sm:$0xff] %v13665_v63  ;;  %v13681_v40 = vpack.c.bf16 %v20412_v28, %v20410_v46  ;;  %v13687_v4 = vpack.c.bf16 %v20417_v6, %v20415_v59  ;;  %v20425_v7 = vand.u32 4294901760, %v20424_v48  ;;  %v20427_v18 = vand.u32 4294901760, %v20426_v53  ;;  %v20429_v41 = vld [vmem:[#allocation69_spill] sm:$0xff]  ;;  %v20431_v62 = vld [vmem:[#allocation70_spill] sm:$0xff]  ;;  %v20434_v24 = vld [vmem:[#allocation84_spill] sm:$0xff] }
 0x333   :  { %8572 = vmatprep.subr.bf16.mxu0 %v13547_v55  ;;  %20408 = vst [vmem:[#allocation205_spill] sm:$0xff] %v13672_v8  ;;  %v13693_v23 = vpack.c.bf16 %v20422_v57, %v20420_v9  ;;  %v20430_v20 = vand.u32 4294901760, %v20429_v41  ;;  %v20432_v45 = vand.u32 4294901760, %v20431_v62  ;;  %v20435_v28 = vand.u32 4294901760, %v20434_v24  ;;  %v20436_v42 = vld [vmem:[#allocation85_spill] sm:$0xff]  ;;  %v20441_v9 = vld [vmem:[#allocation75_spill] sm:$0xff] }
 0x334   :  { %9722 = vmatpush1.bf16.xpose.msra.mxu1 %v13553_v25  ;;  %20413 = vst [vmem:[#allocation36_spill] sm:$0xff] %v13681_v40  ;;  %20418 = vst [vmem:[#allocation37_spill] sm:$0xff] %v13687_v4  ;;  %v13700_v26 = vpack.c.bf16 %v20427_v18, %v20425_v7  ;;  %v20437_v59 = vand.u32 4294901760, %v20436_v42  ;;  %v20439_v6 = vld [vmem:[#allocation73_spill] sm:$0xff]  ;;  %v20442_v2 = vand.u32 4294901760, %v20441_v9  ;;  %v20444_v48 = vld [vmem:[#allocation87_spill] sm:$0xff] }
 0x335   :  { %9724 = vmatprep.subr.bf16.mxu1 %v13560_v43  ;;  %20423 = vst [vmem:[#allocation25_spill] sm:$0xff] %v13693_v23  ;;  %v13709_v46 = vpack.c.bf16 %v20432_v45, %v20430_v20  ;;  %v20440_v13 = vand.u32 4294901760, %v20439_v6  ;;  %v20445_v7 = vand.u32 4294901760, %v20444_v48  ;;  %v20446_v53 = vld [vmem:[#allocation88_spill] sm:$0xff]  ;;  %v20449_v20 = vld [vmem:[#allocation109_spill] sm:$0xff]  ;;  %v20617_v55 = vld [vmem:[#allocation90_spill] sm:$0xff] }
 0x336   :  { %20428 = vst [vmem:[#allocation26_spill] sm:$0xff] %v13700_v26  ;;  %v13715_v19 = vpack.c.bf16 %v20437_v59, %v20435_v28  ;;  %v20447_v18 = vand.u32 4294901760, %v20446_v53  ;;  %v20450_v62 = vand.u32 4294901760, %v20449_v20  ;;  %v20451_v45 = vld [vmem:[#allocation112_spill] sm:$0xff]  ;;  %v20456_v6 = vld [vmem:[#allocation177_spill] sm:$0xff]  ;;  %v20630_v52 = vld [vmem:[#allocation99_spill] sm:$0xff] }
 0x337   :  { %20433 = vst [vmem:[#allocation39_spill] sm:$0xff] %v13709_v46  ;;  %v13721_v57 = vpack.c.bf16 %v20442_v2, %v20440_v13  ;;  %v20452_v24 = vand.u32 4294901760, %v20451_v45  ;;  %v20454_v42 = vld [vmem:[#allocation172_spill] sm:$0xff]  ;;  %v20457_v13 = vand.u32 4294901760, %v20456_v6  ;;  %v20632_v16 = vld [vmem:[#allocation102_spill] sm:$0xff] }
 0x338   :  { %20438 = vst [vmem:[#allocation40_spill] sm:$0xff] %v13715_v19  ;;  %v13728_v41 = vpack.c.bf16 %v20447_v18, %v20445_v7  ;;  %v20455_v59 = vand.u32 4294901760, %v20454_v42  ;;  %v20459_v2 = vld [vmem:[#allocation124_spill] sm:$0xff]  ;;  %v20461_v7 = vld [vmem:[#allocation130_spill] sm:$0xff] }
 0x339   :  { %20443 = vst [vmem:[#allocation45_spill] sm:$0xff] %v13721_v57  ;;  %v13737_v28 = vpack.c.bf16 %v20452_v24, %v20450_v62  ;;  %v20460_v48 = vand.u32 4294901760, %v20459_v2  ;;  %v20462_v53 = vand.u32 4294901760, %v20461_v7  ;;  %v20469_v24 = vld [vmem:[#allocation175_spill] sm:$0xff]  ;;  %v20474_v2 = vld [vmem:[#allocation197_spill] sm:$0xff]  ;;  %v20623_v50 = vld [vmem:[#allocation96_spill] sm:$0xff] }
 0x33a   :  { %8574 = vmatpush1.bf16.xpose.msra.mxu0 %v13569_v14  ;;  %20448 = vst [vmem:[#allocation46_spill] sm:$0xff] %v13728_v41  ;;  %v13743_v9 = vpack.c.bf16 %v20457_v13, %v20455_v59  ;;  %v20470_v42 = vand.u32 4294901760, %v20469_v24  ;;  %v20471_v59 = vld [vmem:[#allocation180_spill] sm:$0xff]  ;;  %v20476_v7 = vld [vmem:[#allocation199_spill] sm:$0xff] }
 0x33b   :  { %8576 = vmatprep.subr.bf16.mxu0 %v13575_v5  ;;  %20453 = vst [vmem:[#allocation60_spill] sm:$0xff] %v13737_v28  ;;  %v13749_v18 = vpack.c.bf16 %v20462_v53, %v20460_v48  ;;  %v20472_v6 = vand.u32 4294901760, %v20471_v59  ;;  %v20475_v48 = vand.u32 4294901760, %v20474_v2  ;;  %v20633_v1 = vld [vmem:[#allocation100_spill] sm:$0xff] }
 0x33c   :  { %9726 = vmatpush1.bf16.xpose.msra.mxu1 %v13581_v56  ;;  %20458 = vst [vmem:[#allocation61_spill] sm:$0xff] %v13743_v9 }
 0x33d   :  { %9728 = vmatprep.subr.bf16.mxu1 %v13588_v54  ;;  %20463 = vst [vmem:[#allocation49_spill] sm:$0xff] %v13749_v18  ;;  %v13765_v13 = vpack.c.bf16 %v20472_v6, %v20470_v42  ;;  %v20489_v6 = vld [vmem:[#allocation12_spill] sm:$0xff] }
 0x33e   :  { %v20490_v2 = vand.u32 4294901760, %v20489_v6 }
 0x33f   :  { %20473 = vst [vmem:[#allocation63_spill] sm:$0xff] %v13765_v13 }
 0x342   :  { %8578 = vmatpush1.bf16.xpose.msra.mxu0 %v13597_v17 }
 0x343   :  { %8580 = vmatprep.subr.bf16.mxu0 %v13603_v49  ;;  %v20603_v49 = vld [vmem:[#allocation159_spill] sm:$0xff] }
 0x344   :  { %9730 = vmatpush1.bf16.xpose.msra.mxu1 %v13609_v35 }
 0x345   :  { %9732 = vmatprep.subr.bf16.mxu1 %v13616_v32 }
 0x34a   :  { %8582 = vmatpush1.bf16.xpose.msra.mxu0 %v13625_v36 }
 0x34b   :  { %8584 = vmatprep.subr.bf16.mxu0 %v13631_v44 }
 0x34c   :  { %9734 = vmatpush1.bf16.xpose.msra.mxu1 %v13637_v33  ;;  %v20589_v33 = vld [vmem:[#allocation154_spill] sm:$0xff] }
 0x34d   :  { %9736 = vmatprep.subr.bf16.mxu1 %v13644_v22 }
 0x352   :  { %8586 = vmatpush1.bf16.xpose.msra.mxu0 %v13653_v27 }
 0x353   :  { %8588 = vmatprep.subr.bf16.mxu0 %v13659_v12  ;;  %v20586_v12 = vand.u32 4294901760, %v13399_v37 }
 0x354   :  { %9738 = vmatpush1.bf16.xpose.msra.mxu1 %v13665_v63 }
 0x355   :  { %9740 = vmatprep.subr.bf16.mxu1 %v13672_v8  ;;  %v20579_v8 = vld [vmem:[#allocation147_spill] sm:$0xff] }
 0x35a   :  { %8590 = vmatpush1.bf16.xpose.msra.mxu0 %v13681_v40 }
 0x35b   :  { %8592 = vmatprep.subr.bf16.mxu0 %v13687_v4  ;;  %v20575_v4 = vld [vmem:[#allocation188_spill] sm:$0xff] }
 0x35c   :  { %9742 = vmatpush1.bf16.xpose.msra.mxu1 %v13693_v23 }
 0x35d   :  { %9744 = vmatprep.subr.bf16.mxu1 %v13700_v26 }
 0x362   :  { %8594 = vmatpush1.bf16.xpose.msra.mxu0 %v13709_v46 }
 0x363   :  { %8596 = vmatprep.subr.bf16.mxu0 %v13715_v19  ;;  %v20576_v19 = vand.u32 4294901760, %v20575_v4 }
 0x364   :  { %9746 = vmatpush1.bf16.xpose.msra.mxu1 %v13721_v57  ;;  %v20466_v57 = vld [vmem:[#allocation174_spill] sm:$0xff] }
 0x365   :  { %9748 = vmatprep.subr.bf16.mxu1 %v13728_v41  ;;  %v20464_v41 = vld [vmem:[#allocation178_spill] sm:$0xff]  ;;  %v20467_v45 = vand.u32 4294901760, %v20466_v57  ;;  %v20479_v57 = vld [vmem:[#allocation189_spill] sm:$0xff] }
 0x366   :  { %v20465_v20 = vand.u32 4294901760, %v20464_v41  ;;  %v20477_v41 = vand.u32 4294901760, %v20476_v7 }
 0x368   :  { %v13756_v62 = vpack.c.bf16 %v20467_v45, %v20465_v20  ;;  %v13771_v53 = vpack.c.bf16 %v20477_v41, %v20475_v48  ;;  %v20480_v20 = vand.u32 4294901760, %v20479_v57  ;;  %v20481_v45 = vld [vmem:[#allocation190_spill] sm:$0xff]  ;;  %v20494_v41 = vld [vmem:[#allocation44_spill] sm:$0xff] }
 0x369   :  { %v20491_v48 = vld [vmem:[#allocation202_spill] sm:$0xff]  ;;  %v20495_v57 = vand.u32 4294901760, %v20494_v41 }
 0x36a   :  { %8598 = vmatpush1.bf16.xpose.msra.mxu0 %v13737_v28  ;;  %20468 = vst [vmem:[#allocation51_spill] sm:$0xff] %v13756_v62  ;;  %20478 = vst [vmem:[#allocation64_spill] sm:$0xff] %v13771_v53  ;;  %v20492_v7 = vand.u32 4294901760, %v20491_v48 }
 0x36b   :  { %8600 = vmatprep.subr.bf16.mxu0 %v13743_v9  ;;  %v20482_v9 = vand.u32 4294901760, %v20481_v45 }
 0x36c   :  { %9750 = vmatpush1.bf16.xpose.msra.mxu1 %v13749_v18  ;;  %v20486_v18 = vld [vmem:[#allocation8_spill] sm:$0xff] }
 0x36d   :  { %9752 = vmatprep.subr.bf16.mxu1 %v13756_v62  ;;  %v13777_v28 = vpack.c.bf16 %v20482_v9, %v20480_v20  ;;  %v20484_v62 = vld [vmem:[#allocation200_spill] sm:$0xff]  ;;  %v20487_v59 = vand.u32 4294901760, %v20486_v18  ;;  %v13793_v9 = vpack.c.bf16 %v20492_v7, %v20490_v2  ;;  %v20496_v20 = vld [vmem:[#allocation41_spill] sm:$0xff] }
 0x36e   :  { %v20485_v24 = vand.u32 4294901760, %v20484_v62  ;;  %v20497_v62 = vand.u32 4294901760, %v20496_v20  ;;  %v20499_v18 = vld [vmem:[#allocation17_spill] sm:$0xff]  ;;  %v20509_v7 = vld [vmem:[#allocation56_spill] sm:$0xff] }
 0x36f   :  { %20483 = vst [vmem:[#allocation69_spill] sm:$0xff] %v13777_v28  ;;  %20493 = vst [vmem:[#allocation84_spill] sm:$0xff] %v13793_v9  ;;  %v20510_v41 = vand.u32 4294901760, %v20509_v7 }
 0x370   :  { %v13784_v42 = vpack.c.bf16 %v20487_v59, %v20485_v24  ;;  %v13799_v45 = vpack.c.bf16 %v20497_v62, %v20495_v57  ;;  %v20500_v24 = vand.u32 4294901760, %v20499_v18  ;;  %v20501_v59 = vld [vmem:[#allocation23_spill] sm:$0xff]  ;;  %v20511_v57 = vld [vmem:[#allocation53_spill] sm:$0xff]  ;;  %v20514_v62 = vld [vmem:[#allocation92_spill] sm:$0xff] }
 0x371   :  { %v20512_v20 = vand.u32 4294901760, %v20511_v57  ;;  %v20515_v18 = vand.u32 4294901760, %v20514_v62 }
 0x372   :  { %8602 = vmatpush1.bf16.xpose.msra.mxu0 %v13765_v13  ;;  %20488 = vst [vmem:[#allocation70_spill] sm:$0xff] %v13784_v42  ;;  %20498 = vst [vmem:[#allocation85_spill] sm:$0xff] %v13799_v45 }
 0x373   :  { %8604 = vmatprep.subr.bf16.mxu0 %v13771_v53  ;;  %v20502_v53 = vand.u32 4294901760, %v20501_v59 }
 0x374   :  { %9754 = vmatpush1.bf16.xpose.msra.mxu1 %v13777_v28  ;;  %v20506_v28 = vld [vmem:[#allocation50_spill] sm:$0xff] }
 0x375   :  { %9756 = vmatprep.subr.bf16.mxu1 %v13784_v42  ;;  %v13805_v13 = vpack.c.bf16 %v20502_v53, %v20500_v24  ;;  %v20504_v42 = vld [vmem:[#allocation47_spill] sm:$0xff]  ;;  %v20507_v48 = vand.u32 4294901760, %v20506_v28  ;;  %v13821_v53 = vpack.c.bf16 %v20512_v20, %v20510_v41  ;;  %v20516_v24 = vld [vmem:[#allocation89_spill] sm:$0xff]  ;;  %v20529_v20 = vld [vmem:[#allocation104_spill] sm:$0xff] }
 0x376   :  { %v20505_v6 = vand.u32 4294901760, %v20504_v42  ;;  %v20517_v42 = vand.u32 4294901760, %v20516_v24  ;;  %v20519_v28 = vld [vmem:[#allocation65_spill] sm:$0xff]  ;;  %v20530_v62 = vand.u32 4294901760, %v20529_v20 }
 0x377   :  { %20503 = vst [vmem:[#allocation73_spill] sm:$0xff] %v13805_v13  ;;  %20513 = vst [vmem:[#allocation87_spill] sm:$0xff] %v13821_v53  ;;  %v31_v20 = vld [vmem:[%s17538_s0 + $0x10] sm:$0xff] }
 0x378   :  { %v13812_v2 = vpack.c.bf16 %v20507_v48, %v20505_v6  ;;  %v13827_v59 = vpack.c.bf16 %v20517_v42, %v20515_v18  ;;  %v20520_v6 = vand.u32 4294901760, %v20519_v28  ;;  %v20521_v48 = vld [vmem:[#allocation71_spill] sm:$0xff]  ;;  %v20531_v18 = vld [vmem:[#allocation101_spill] sm:$0xff]  ;;  %v20534_v42 = vand.u32 4294901760, %v13317_v47  ;;  %v20535_v28 = vld [vmem:[#allocation140_spill] sm:$0xff] }
 0x379   :  { %v20532_v24 = vand.u32 4294901760, %v20531_v18 }
 0x37a   :  { %8606 = vmatpush1.bf16.xpose.msra.mxu0 %v13793_v9  ;;  %20508 = vst [vmem:[#allocation75_spill] sm:$0xff] %v13812_v2  ;;  %20518 = vst [vmem:[#allocation88_spill] sm:$0xff] %v13827_v59 }
 0x37b   :  { %8608 = vmatprep.subr.bf16.mxu0 %v13799_v45  ;;  %v20522_v45 = vand.u32 4294901760, %v20521_v48 }
 0x37c   :  { %9758 = vmatpush1.bf16.xpose.msra.mxu1 %v13805_v13  ;;  %v20526_v13 = vld [vmem:[#allocation98_spill] sm:$0xff] }
 0x37d   :  { %9760 = vmatprep.subr.bf16.mxu1 %v13812_v2  ;;  %v13833_v9 = vpack.c.bf16 %v20522_v45, %v20520_v6  ;;  %v20524_v2 = vld [vmem:[#allocation95_spill] sm:$0xff]  ;;  %v20527_v57 = vand.u32 4294901760, %v20526_v13  ;;  %v13849_v45 = vpack.c.bf16 %v20532_v24, %v20530_v62  ;;  %v20538_v13 = vld [vmem:[#allocation113_spill] sm:$0xff] }
 0x37e   :  { %v20525_v7 = vand.u32 4294901760, %v20524_v2  ;;  %v20536_v2 = vand.u32 4294901760, %v20535_v28  ;;  %v20539_v48 = vand.u32 4294901760, %v20538_v13  ;;  %v20543_v62 = vld [vmem:[#allocation137_spill] sm:$0xff]  ;;  %v20545_v24 = vld [vmem:[#allocation143_spill] sm:$0xff]  ;;  %v20558_v28 = vand.u32 4294901760, %v13385_v31 }
 0x37f   :  { %20523 = vst [vmem:[#allocation109_spill] sm:$0xff] %v13833_v9  ;;  %20533 = vst [vmem:[#allocation172_spill] sm:$0xff] %v13849_v45  ;;  %v20544_v18 = vand.u32 4294901760, %v20543_v62  ;;  %v20546_v47 = vand.u32 4294901760, %v20545_v24  ;;  %v20553_v62 = vld [vmem:[#allocation146_spill] sm:$0xff]  ;;  %v20559_v13 = vand.u32 4294901760, %v13387_v51 }
 0x380   :  { %v13840_v41 = vpack.c.bf16 %v20527_v57, %v20525_v7  ;;  %v13855_v6 = vpack.c.bf16 %v20536_v2, %v20534_v42  ;;  %v20540_v7 = vld [vmem:[#allocation119_spill] sm:$0xff]  ;;  %v20548_v42 = vld [vmem:[#allocation129_spill] sm:$0xff]  ;;  %v20549_v2 = vld [vmem:[#allocation162_spill] sm:$0xff]  ;;  %v20554_v24 = vand.u32 4294901760, %v20553_v62 }
 0x381   :  { %v20541_v57 = vand.u32 4294901760, %v20540_v7  ;;  %v20551_v7 = vld [vmem:[#allocation114_spill] sm:$0xff]  ;;  %v20566_v31 = vld [vmem:[#allocation164_spill] sm:$0xff]  ;;  %v20568_v51 = vld [vmem:[#allocation161_spill] sm:$0xff] }
 0x382   :  { %8610 = vmatpush1.bf16.xpose.msra.mxu0 %v13821_v53  ;;  %20528 = vst [vmem:[#allocation112_spill] sm:$0xff] %v13840_v41  ;;  %20537 = vst [vmem:[#allocation177_spill] sm:$0xff] %v13855_v6  ;;  %v20567_v46 = vand.u32 4294901760, %v20566_v31  ;;  %v20571_v26 = vand.u32 4294901760, %v20551_v7 }
 0x383   :  { %8612 = vmatprep.subr.bf16.mxu0 %v13827_v59  ;;  %v13861_v59 = vpack.c.bf16 %v20541_v57, %v20539_v48  ;;  %v13876_v48 = vand.u32 4294901760, %v31_v20 }
 0x384   :  { %9762 = vmatpush1.bf16.xpose.msra.mxu1 %v13833_v9  ;;  %v20552_v9 = vld [vmem:[#allocation117_spill] sm:$0xff] }
 0x385   :  { %9764 = vmatprep.subr.bf16.mxu1 %v13840_v41  ;;  %20542 = vst [vmem:[#allocation124_spill] sm:$0xff] %v13861_v59  ;;  %v13871_v41 = vpack.c.bf16 %v20546_v47, %v20544_v18  ;;  %20550 = vst [vmem:[#allocation178_spill] sm:$0xff] %v13876_v48  ;;  %v20555_v18 = vld [vmem:[#allocation152_spill] sm:$0xff]  ;;  %v13901_v62 = vsub.f32 %v31_v20, %v13876_v48  ;;  %v20572_v23 = vand.u32 4294901760, %v20552_v9  ;;  %v20573_v20 = vld [vmem:[#allocation182_spill] sm:$0xff] }
 0x386   :  { %v20556_v47 = vand.u32 4294901760, %v20555_v18  ;;  %v20564_v18 = vld [vmem:[#allocation120_spill] sm:$0xff] }
 0x387   :  { %20547 = vst [vmem:[#allocation130_spill] sm:$0xff] %v13871_v41  ;;  %20563 = vst [vmem:[#allocation180_spill] sm:$0xff] %v13901_v62  ;;  %v13928_v63 = vand.u32 4294901760, %v13901_v62 }
 0x388   :  { %v13886_v53 = vpack.c.bf16 %v20556_v47, %v20554_v24  ;;  %v20565_v47 = vld [vmem:[#allocation133_spill] sm:$0xff]  ;;  %v20574_v24 = vand.u32 4294901760, %v20573_v20 }
 0x389   :  { %20580 = vst [vmem:[#allocation189_spill] sm:$0xff] %v13928_v63  ;;  %v20582_v20 = vand.u32 4294901760, %v20565_v47 }
 0x38a   :  { %8614 = vmatpush1.bf16.xpose.msra.mxu0 %v13849_v45  ;;  %20557 = vst [vmem:[#allocation174_spill] sm:$0xff] %v13886_v53  ;;  %v20562_v45 = vand.u32 4294901760, %v20549_v2  ;;  %v13922_v40 = vpack.c.bf16 %v20576_v19, %v20574_v24  ;;  %v20591_v24 = vand.u32 4294901760, %v20579_v8 }
 0x38b   :  { %8616 = vmatprep.subr.bf16.mxu0 %v13855_v6  ;;  %v13892_v6 = vpack.c.bf16 %v20559_v13, %v20558_v28  ;;  %v20569_v28 = vand.u32 4294901760, %v20568_v51  ;;  %v20578_v51 = vld [vmem:[#allocation145_spill] sm:$0xff]  ;;  %v1869_v4 = vsub.f32 %v20565_v47, %v20582_v20 }
 0x38c   :  { %9766 = vmatpush1.bf16.xpose.msra.mxu1 %v13861_v59  ;;  %v20561_v59 = vand.u32 4294901760, %v20548_v42  ;;  %20577 = vst [vmem:[#allocation199_spill] sm:$0xff] %v13922_v40 }
 0x38d   :  { %9768 = vmatprep.subr.bf16.mxu1 %v13871_v41  ;;  %20560 = vst [vmem:[#allocation175_spill] sm:$0xff] %v13892_v6  ;;  %v1863_v41 = vsub.f32 %v20549_v2, %v20562_v45  ;;  %v13909_v13 = vpack.c.bf16 %v20569_v28, %v20567_v46  ;;  %v5715_v45 = vsub.f32 %v20552_v9, %v20572_v23  ;;  %v20581_v23 = vand.u32 4294901760, %v20564_v18  ;;  %v20584_v28 = vld [vmem:[#allocation141_spill] sm:$0xff] }
 0x38e   :  { %v1851_v57 = vsub.f32 %v20548_v42, %v20561_v59  ;;  %v5703_v59 = vsub.f32 %v20551_v7, %v20571_v26  ;;  %v20585_v26 = vand.u32 4294901760, %v13397_v21  ;;  %v1840_v21 = vsub.f32 %v13901_v62, %v13928_v63 }
 0x38f   :  { %20570 = vst [vmem:[#allocation197_spill] sm:$0xff] %v13909_v13  ;;  %v1864_v31 = vand.u32 4294901760, %v1863_v41  ;;  %v20583_v41 = vld [vmem:[#allocation108_spill] sm:$0xff]  ;;  %v1870_v37 = vand.u32 4294901760, %v1869_v4  ;;  %v20596_v20 = vand.u32 4294901760, %v20584_v28 }
 0x390   :  { %v1852_v46 = vand.u32 4294901760, %v1851_v57  ;;  %v5704_v19 = vand.u32 4294901760, %v5703_v59  ;;  %v5716_v57 = vand.u32 4294901760, %v5715_v45  ;;  %v13944_v27 = vpack.c.bf16 %v20586_v12, %v20585_v26 }
 0x391   :  { %v20590_v59 = vand.u32 4294901760, %v20578_v51  ;;  %v20592_v12 = vand.u32 4294901760, %v13425_v15  ;;  %v20593_v26 = vand.u32 4294901760, %v13427_v60  ;;  %v20598_v15 = vand.u32 4294901760, %v20589_v33 }
 0x392   :  { %8618 = vmatpush1.bf16.xpose.msra.mxu0 %v13886_v53  ;;  %v1857_v53 = vsub.f32 %v20564_v18, %v20581_v23  ;;  %20587 = vst [vmem:[#allocation190_spill] sm:$0xff] %v13944_v27  ;;  %v20588_v23 = vld [vmem:[#allocation148_spill] sm:$0xff]  ;;  %v8623_v44 = vpack.c.bf16 %v1864_v31, %v1852_v46  ;;  %v9775_v46 = vpack.c.bf16 %v5716_v57, %v5704_v19  ;;  %v20595_v31 = vand.u32 4294901760, %v20583_v41  ;;  %v20600_v57 = vld [vmem:[#allocation157_spill] sm:$0xff] }
 0x393   :  { %8620 = vmatprep.subr.bf16.mxu0 %v13892_v6  ;;  %v1875_v45 = vsub.f32 %v20578_v51, %v20590_v59  ;;  %v1887_v6 = vsub.f32 %v20579_v8, %v20591_v24  ;;  %v13960_v22 = vpack.c.bf16 %v20593_v26, %v20592_v12  ;;  %v5721_v24 = vsub.f32 %v20584_v28, %v20596_v20  ;;  %v20599_v12 = vld [vmem:[#allocation156_spill] sm:$0xff]  ;;  %v20602_v20 = vld [vmem:[#allocation111_spill] sm:$0xff]  ;;  %v20605_v19 = vld [vmem:[#allocation165_spill] sm:$0xff] }
 0x394   :  { %9770 = vmatpush1.bf16.xpose.msra.mxu1 %v13909_v13  ;;  %v5709_v59 = vsub.f32 %v20583_v41, %v20595_v31  ;;  %v5739_v60 = vsub.f32 %v20589_v33, %v20598_v15  ;;  %v20601_v13 = vld [vmem:[#allocation163_spill] sm:$0xff]  ;;  %v18459_v32 = vand.u32 4294901760, %v20602_v20  ;;  %v20606_v26 = vld [vmem:[#allocation166_spill] sm:$0xff]  ;;  %v20607_v36 = vand.u32 4294901760, %v20599_v12 }
 0x395   :  { %9772 = vmatprep.subr.bf16.mxu1 %v13922_v40  ;;  %v1858_v40 = vand.u32 4294901760, %v1857_v53  ;;  %20594 = vst [vmem:[#allocation200_spill] sm:$0xff] %v13960_v22  ;;  %v20597_v53 = vand.u32 4294901760, %v20588_v23  ;;  %v1876_v31 = vand.u32 4294901760, %v1875_v45  ;;  %v1888_v63 = vand.u32 4294901760, %v1887_v6 }
 0x396   :  { %v5710_v15 = vand.u32 4294901760, %v5709_v59  ;;  %v5722_v56 = vand.u32 4294901760, %v5721_v24  ;;  %v5740_v45 = vand.u32 4294901760, %v5739_v60  ;;  %v20609_v17 = vand.u32 4294901760, %v20601_v13 }
 0x397   :  { %v5727_v4 = vsub.f32 %v20588_v23, %v20597_v53  ;;  %v8625_v35 = vpack.c.bf16 %v1870_v37, %v1858_v40  ;;  %v20604_v53 = vld [vmem:[#allocation160_spill] sm:$0xff]  ;;  %v20608_v40 = vand.u32 4294901760, %v20600_v57  ;;  %v8627_v54 = vpack.c.bf16 %v1888_v63, %v1876_v31 }
 0x398   :  { %v1899_v59 = vsub.f32 %v20601_v13, %v20609_v17  ;;  %v1911_v24 = vsub.f32 %v20602_v20, %v18459_v32  ;;  %v20611_v60 = vand.u32 4294901760, %v20604_v53  ;;  %v9777_v63 = vpack.c.bf16 %v5722_v56, %v5710_v15  ;;  %v20616_v56 = vld [vmem:[#allocation94_spill] sm:$0xff] }
 0x399   :  { %v5728_v6 = vand.u32 4294901760, %v5727_v4  ;;  %v1893_v37 = vsub.f32 %v20600_v57, %v20608_v40  ;;  %v20613_v31 = vand.u32 4294901760, %v20605_v19  ;;  %v20614_v40 = vand.u32 4294901760, %v20606_v26 }
 0x39a   :  { %8622 = vmatpush1.bf16.xpose.msra.mxu0 %v13944_v27  ;;  %v1841_v27 = vand.u32 4294901760, %v1840_v21  ;;  %v1881_v21 = vsub.f32 %v20599_v12, %v20607_v36  ;;  %v5745_v36 = vsub.f32 %v20604_v53, %v20611_v60  ;;  %v1900_v60 = vand.u32 4294901760, %v1899_v59  ;;  %v20621_v59 = vld [vmem:[#allocation93_spill] sm:$0xff] }
 0x39b   :  { %8624 = vmatprep.subr.bf16.mxu0 %v8623_v44  ;;  %v20612_v44 = vld [vmem:[#allocation168_spill] sm:$0xff]  ;;  %v5751_v17 = vsub.f32 %v20605_v19, %v20613_v31  ;;  %v5763_v32 = vsub.f32 %v20606_v26, %v20614_v40  ;;  %v1894_v25 = vand.u32 4294901760, %v1893_v37  ;;  %v1912_v5 = vand.u32 4294901760, %v1911_v24 }
 0x39c   :  { %9774 = vmatpush1.bf16.xpose.msra.mxu1 %v13960_v22  ;;  %v20615_v22 = vld [vmem:[#allocation169_spill] sm:$0xff]  ;;  %v1882_v43 = vand.u32 4294901760, %v1881_v21  ;;  %v5746_v11 = vand.u32 4294901760, %v5745_v36  ;;  %v20618_v40 = vand.u32 4294901760, %v20612_v44  ;;  %v18490_v15 = vand.u32 4294901760, %v20623_v50 }
 0x39d   :  { %9776 = vmatprep.subr.bf16.mxu1 %v9775_v46  ;;  %v20610_v46 = vand.u32 4294901760, %v20603_v49  ;;  %v5764_v21 = vand.u32 4294901760, %v5763_v32  ;;  %v20625_v32 = vand.u32 4294901760, %v20617_v55  ;;  %v20627_v36 = vand.u32 4294901760, %v20621_v59 }
 0x39e   :  { %v1905_v14 = vsub.f32 %v20612_v44, %v20618_v40  ;;  %v8631_v40 = vpack.c.bf16 %v1912_v5, %v1900_v60 }
 0x39f   :  { %v5733_v4 = vsub.f32 %v20603_v49, %v20610_v46  ;;  %v9779_v46 = vpack.c.bf16 %v5740_v45, %v5728_v6  ;;  %v5752_v45 = vand.u32 4294901760, %v5751_v17  ;;  %v20624_v6 = vand.u32 4294901760, %v20616_v56 }
 0x3a0   :  { %v1935_v17 = vsub.f32 %v20617_v55, %v20625_v32  ;;  %v5769_v5 = vsub.f32 %v20621_v59, %v20627_v36  ;;  %v18496_v36 = vand.u32 4294901760, %v20632_v16  ;;  %v20636_v32 = vld [vmem:[#allocation123_spill] sm:$0xff] }
 0x3a1   :  { %1842 = vmatmul.mubr.f32.vlgmr.msra.gmra.mrb[0].mxu0 %v1841_v27  ;;  %v5734_v31 = vand.u32 4294901760, %v5733_v4  ;;  %v20622_v4 = vld [vmem:[#allocation91_spill] sm:$0xff]  ;;  %v18507_v62 = vand.u32 4294901760, %v20636_v32 }
 0x3a2   :  { %8626 = vmatpush1.bf16.xpose.msra.mxu0 %v8625_v35  ;;  %2233 = vmatprep.mubr.f32.mxu0 %v13454_v3  ;;  %v20619_v35 = vld [vmem:[#allocation201_spill] sm:$0xff]  ;;  %v20628_v60 = vand.u32 4294901760, %v20622_v4  ;;  %v5770_v30 = vand.u32 4294901760, %v5769_v5 }
 0x3a3   :  { %8628 = vmatprep.subr.bf16.mxu0 %v8627_v54  ;;  %5694 = vmatmul.mubr.f32.vlgmr.msra.gmra.mrb[0].mxu1 %v1841_v27  ;;  %v20620_v54 = vand.u32 4294901760, %v20615_v22  ;;  %v8629_v27 = vpack.c.bf16 %v1894_v25, %v1882_v43  ;;  %v20626_v24 = vand.u32 4294901760, %v20619_v35  ;;  %v1906_v25 = vand.u32 4294901760, %v1905_v14 }
 0x3a4   :  { %9778 = vmatpush1.bf16.xpose.msra.mxu1 %v9777_v63  ;;  %6085 = vmatprep.mubr.f32.mxu1 %v13454_v3  ;;  %v1923_v63 = vsub.f32 %v20616_v56, %v20624_v6  ;;  %v5775_v6 = vsub.f32 %v20622_v4, %v20628_v60  ;;  %v18501_v60 = vand.u32 4294901760, %v20634_v10 }
 0x3a5   :  { %v1917_v37 = vsub.f32 %v20615_v22, %v20620_v54  ;;  %9780 = vmatprep.subr.bf16.mxu1 %v9779_v46  ;;  %v9781_v54 = vpack.c.bf16 %v5746_v11, %v5734_v31  ;;  %v5757_v3 = vsub.f32 %v20619_v35, %v20626_v24  ;;  %v9783_v46 = vpack.c.bf16 %v5764_v21, %v5752_v45  ;;  %v20629_v31 = vld [vmem:[#allocation97_spill] sm:$0xff]  ;;  %v20631_v21 = vld [vmem:[#allocation106_spill] sm:$0xff] }
 0x3a6   :  { %v5787_v11 = vsub.f32 %v20623_v50, %v18490_v15  ;;  %v18495_v24 = vand.u32 4294901760, %v20630_v52  ;;  %v1924_v14 = vand.u32 4294901760, %v1923_v63  ;;  %v1936_v45 = vand.u32 4294901760, %v1935_v17  ;;  %v20635_v15 = vld [vmem:[#allocation103_spill] sm:$0xff] }
 0x3a7   :  { %v1918_v43 = vand.u32 4294901760, %v1917_v37  ;;  %v18505_v29 = vand.u32 4294901760, %v20635_v15  ;;  %v20637_v17 = vand.u32 4294901760, %v20629_v31 }
 0x3a8   :  { %v5788_v63 = vand.u32 4294901760, %v5787_v11  ;;  %v8635_v34 = vpack.c.bf16 %v1936_v45, %v1924_v14  ;;  %v20640_v11 = vld [vmem:[#allocation126_spill] sm:$0xff]  ;;  %v5811_v45 = vsub.f32 %v20636_v32, %v18507_v62  ;;  %v20645_v62 = vld [vmem:[#allocation139_spill] sm:$0xff] }
 0x3a9   :  { %v8633_v58 = vpack.c.bf16 %v1918_v43, %v1906_v25  ;;  %v1929_v37 = vsub.f32 %v20629_v31, %v20637_v17  ;;  %v1959_v43 = vsub.f32 %v20632_v16, %v18496_v36  ;;  %v5799_v14 = vsub.f32 %v20635_v15, %v18505_v29 }
 0x3aa   :  { %8630 = vmatpush1.bf16.xpose.msra.mxu0 %v8629_v27  ;;  %v5758_v27 = vand.u32 4294901760, %v5757_v3  ;;  %v1941_v3 = vsub.f32 %v20630_v52, %v18495_v24  ;;  %v20644_v29 = vand.u32 4294901760, %v20640_v11  ;;  %v18511_v32 = vand.u32 4294901760, %v20645_v62 }
 0x3ab   :  { %8632 = vmatprep.subr.bf16.mxu0 %v8631_v40  ;;  %v5776_v40 = vand.u32 4294901760, %v5775_v6  ;;  %v5793_v6 = vsub.f32 %v20634_v10, %v18501_v60  ;;  %v1960_v60 = vand.u32 4294901760, %v1959_v43  ;;  %v20642_v10 = vld [vmem:[#allocation144_spill] sm:$0xff] }
 0x3ac   :  { %9782 = vmatpush1.bf16.xpose.msra.mxu1 %v9781_v54  ;;  %v20638_v54 = vand.u32 4294901760, %v20631_v21  ;;  %v9785_v24 = vpack.c.bf16 %v5770_v30, %v5758_v27  ;;  %v18510_v17 = vand.u32 4294901760, %v20642_v10  ;;  %v20643_v30 = vld [vmem:[#allocation153_spill] sm:$0xff]  ;;  %v1953_v15 = vsub.f32 %v20640_v11, %v20644_v29 }
 0x3ad   :  { %9784 = vmatprep.subr.bf16.mxu1 %v9783_v46  ;;  %v20639_v46 = vand.u32 4294901760, %v20633_v1  ;;  %v9787_v0 = vpack.c.bf16 %v5788_v63, %v5776_v40  ;;  %v5794_v52 = vand.u32 4294901760, %v5793_v6  ;;  %v5812_v40 = vand.u32 4294901760, %v5811_v45 }
 0x3ae   :  { %v1947_v25 = vsub.f32 %v20631_v21, %v20638_v54  ;;  %v20641_v54 = vld [vmem:[#allocation132_spill] sm:$0xff]  ;;  %v1971_v29 = vsub.f32 %v20642_v10, %v18510_v17  ;;  %v20651_v17 = vld [vmem:[#allocation10_spill] sm:$0xff]  ;;  %v20655_v10 = vld [vmem:[#allocation13_spill] sm:$0xff] }
 0x3af   :  { %v5781_v5 = vsub.f32 %v20633_v1, %v20639_v46  ;;  %v18509_v36 = vand.u32 4294901760, %v20641_v54  ;;  %v1930_v46 = vand.u32 4294901760, %v1929_v37  ;;  %v1942_v1 = vand.u32 4294901760, %v1941_v3  ;;  %v20646_v37 = vld [vmem:[#allocation138_spill] sm:$0xff] }
 0x3b0   :  { %v1948_v16 = vand.u32 4294901760, %v1947_v25  ;;  %v18513_v63 = vand.u32 4294901760, %v20646_v37  ;;  %v20647_v25 = vld [vmem:[#allocation151_spill] sm:$0xff] }
 0x3b1   :  { %v5782_v21 = vand.u32 4294901760, %v5781_v5  ;;  %v8637_v3 = vpack.c.bf16 %v1942_v1, %v1930_v46  ;;  %v18517_v43 = vand.u32 4294901760, %v20647_v25  ;;  %v20648_v5 = vld [vmem:[#allocation203_spill] sm:$0xff]  ;;  %v1954_v1 = vand.u32 4294901760, %v1953_v15 }
 0x3b2   :  { %8634 = vmatpush1.bf16.xpose.msra.mxu0 %v8633_v58  ;;  %v5800_v58 = vand.u32 4294901760, %v5799_v14  ;;  %v18520_v6 = vand.u32 4294901760, %v20648_v5  ;;  %v8639_v27 = vpack.c.bf16 %v1960_v60, %v1948_v16  ;;  %v5817_v16 = vsub.f32 %v20646_v37, %v18513_v63  ;;  %v20654_v37 = vld [vmem:[#allocation11_spill] sm:$0xff] }
 0x3b3   :  { %8636 = vmatprep.subr.bf16.mxu0 %v8635_v34  ;;  %v1965_v34 = vsub.f32 %v20641_v54, %v18509_v36  ;;  %v9789_v45 = vpack.c.bf16 %v5794_v52, %v5782_v21  ;;  %v5805_v36 = vsub.f32 %v20645_v62, %v18511_v32  ;;  %v5823_v60 = vsub.f32 %v20647_v25, %v18517_v43  ;;  %v20650_v21 = vld [vmem:[#allocation9_spill] sm:$0xff]  ;;  %v20653_v62 = vld [vmem:[#allocation19_spill] sm:$0xff] }
 0x3b4   :  { %9786 = vmatpush1.bf16.xpose.msra.mxu1 %v9785_v24  ;;  %v20649_v24 = vand.u32 4294901760, %v20643_v30  ;;  %v5835_v52 = vsub.f32 %v20648_v5, %v18520_v6  ;;  %v18523_v32 = vand.u32 4294901760, %v20651_v17  ;;  %v1972_v15 = vand.u32 4294901760, %v1971_v29  ;;  %v20656_v6 = vld [vmem:[#allocation24_spill] sm:$0xff] }
 0x3b5   :  { %9788 = vmatprep.subr.bf16.mxu1 %v9787_v0  ;;  %v9791_v0 = vpack.c.bf16 %v5812_v40, %v5800_v58  ;;  %v1966_v46 = vand.u32 4294901760, %v1965_v34  ;;  %v20652_v40 = vld [vmem:[#allocation18_spill] sm:$0xff]  ;;  %v18524_v63 = vand.u32 4294901760, %v20653_v62  ;;  %v18528_v43 = vand.u32 4294901760, %v20655_v10 }
 0x3b6   :  { %v1983_v14 = vsub.f32 %v20643_v30, %v20649_v24  ;;  %v5818_v54 = vand.u32 4294901760, %v5817_v16  ;;  %v18532_v5 = vand.u32 4294901760, %v20656_v6  ;;  %v20657_v24 = vld [vmem:[#allocation28_spill] sm:$0xff]  ;;  %v5836_v29 = vand.u32 4294901760, %v5835_v52  ;;  %v20661_v52 = vld [vmem:[#allocation33_spill] sm:$0xff] }
 0x3b7   :  { %v8641_v25 = vpack.c.bf16 %v1966_v46, %v1954_v1  ;;  %v18534_v11 = vand.u32 4294901760, %v20657_v24  ;;  %v2007_v46 = vsub.f32 %v20653_v62, %v18524_v63 }
 0x3b8   :  { %v1984_v58 = vand.u32 4294901760, %v1983_v14  ;;  %v20658_v14 = vand.u32 4294901760, %v20650_v21 }
 0x3ba   :  { %8638 = vmatpush1.bf16.xpose.msra.mxu0 %v8637_v3  ;;  %v5806_v3 = vand.u32 4294901760, %v5805_v36  ;;  %v1977_v34 = vsub.f32 %v20650_v21, %v20658_v14  ;;  %v1989_v36 = vsub.f32 %v20651_v17, %v18523_v32  ;;  %v8643_v30 = vpack.c.bf16 %v1984_v58, %v1972_v15 }
 0x3bb   :  { %8640 = vmatprep.subr.bf16.mxu0 %v8639_v27  ;;  %v5824_v27 = vand.u32 4294901760, %v5823_v60  ;;  %v5841_v60 = vsub.f32 %v20655_v10, %v18528_v43  ;;  %v5847_v15 = vsub.f32 %v20656_v6, %v18532_v5  ;;  %v5859_v58 = vsub.f32 %v20657_v24, %v18534_v11  ;;  %v20663_v10 = vld [vmem:[#allocation42_spill] sm:$0xff]  ;;  %v20666_v11 = vld [vmem:[#allocation29_spill] sm:$0xff] }
 0x3bc   :  { %9790 = vmatpush1.bf16.xpose.msra.mxu1 %v9789_v45  ;;  %v20659_v45 = vand.u32 4294901760, %v20652_v40  ;;  %v9793_v32 = vpack.c.bf16 %v5818_v54, %v5806_v3  ;;  %v2008_v43 = vand.u32 4294901760, %v2007_v46  ;;  %v18537_v14 = vand.u32 4294901760, %v20663_v10  ;;  %v20664_v54 = vld [vmem:[#allocation43_spill] sm:$0xff] }
 0x3bd   :  { %9792 = vmatprep.subr.bf16.mxu1 %v9791_v0  ;;  %v20660_v0 = vand.u32 4294901760, %v20654_v37  ;;  %v9795_v62 = vpack.c.bf16 %v5836_v29, %v5824_v27  ;;  %v5842_v21 = vand.u32 4294901760, %v5841_v60  ;;  %v20665_v5 = vand.u32 4294901760, %v20661_v52 }
 0x3be   :  { %v1995_v1 = vsub.f32 %v20652_v40, %v20659_v45  ;;  %v20662_v45 = vld [vmem:[#allocation34_spill] sm:$0xff]  ;;  %v18538_v24 = vand.u32 4294901760, %v20666_v11  ;;  %v5860_v27 = vand.u32 4294901760, %v5859_v58 }
 0x3bf   :  { %v5829_v16 = vsub.f32 %v20654_v37, %v20660_v0  ;;  %v18536_v63 = vand.u32 4294901760, %v20662_v45  ;;  %v1978_v0 = vand.u32 4294901760, %v1977_v34  ;;  %v1990_v37 = vand.u32 4294901760, %v1989_v36  ;;  %v20667_v34 = vld [vmem:[#allocation31_spill] sm:$0xff] }
 0x3c0   :  { %v1996_v40 = vand.u32 4294901760, %v1995_v1  ;;  %v2001_v6 = vsub.f32 %v20661_v52, %v20665_v5  ;;  %v18540_v29 = vand.u32 4294901760, %v20667_v34  ;;  %v20668_v1 = vld [vmem:[#allocation48_spill] sm:$0xff]  ;;  %v2019_v5 = vsub.f32 %v20663_v10, %v18537_v14  ;;  %v20672_v14 = vld [vmem:[#allocation58_spill] sm:$0xff]  ;;  %v20676_v10 = vld [vmem:[#allocation55_spill] sm:$0xff] }
 0x3c1   :  { %v5830_v17 = vand.u32 4294901760, %v5829_v16  ;;  %v8645_v36 = vpack.c.bf16 %v1990_v37, %v1978_v0  ;;  %v18544_v46 = vand.u32 4294901760, %v20668_v1  ;;  %v20669_v16 = vld [vmem:[#allocation52_spill] sm:$0xff] }
 0x3c2   :  { %8642 = vmatpush1.bf16.xpose.msra.mxu0 %v8641_v25  ;;  %v5848_v25 = vand.u32 4294901760, %v5847_v15  ;;  %v18547_v60 = vand.u32 4294901760, %v20669_v16  ;;  %v8647_v3 = vpack.c.bf16 %v2008_v43, %v1996_v40  ;;  %v2002_v37 = vand.u32 4294901760, %v2001_v6 }
 0x3c3   :  { %8644 = vmatprep.subr.bf16.mxu0 %v8643_v30  ;;  %v2013_v30 = vsub.f32 %v20662_v45, %v18536_v63  ;;  %v9797_v58 = vpack.c.bf16 %v5842_v21, %v5830_v17  ;;  %v5853_v63 = vsub.f32 %v20666_v11, %v18538_v24  ;;  %v5865_v43 = vsub.f32 %v20667_v34, %v18540_v29  ;;  %v20671_v21 = vld [vmem:[#allocation57_spill] sm:$0xff]  ;;  %v20674_v11 = vld [vmem:[#allocation67_spill] sm:$0xff]  ;;  %v20675_v34 = vld [vmem:[#allocation54_spill] sm:$0xff] }
 0x3c4   :  { %9794 = vmatpush1.bf16.xpose.msra.mxu1 %v9793_v32  ;;  %v20670_v32 = vand.u32 4294901760, %v20664_v54  ;;  %v5871_v40 = vsub.f32 %v20668_v1, %v18544_v46  ;;  %v5883_v17 = vsub.f32 %v20669_v16, %v18547_v60  ;;  %v18550_v24 = vand.u32 4294901760, %v20672_v14  ;;  %v20677_v60 = vld [vmem:[#allocation72_spill] sm:$0xff] }
 0x3c5   :  { %9796 = vmatprep.subr.bf16.mxu1 %v9795_v62  ;;  %v9799_v62 = vpack.c.bf16 %v5860_v27, %v5848_v25  ;;  %v2014_v0 = vand.u32 4294901760, %v2013_v30  ;;  %v2020_v6 = vand.u32 4294901760, %v2019_v5  ;;  %v20673_v27 = vld [vmem:[#allocation66_spill] sm:$0xff]  ;;  %v18551_v29 = vand.u32 4294901760, %v20674_v11 }
 0x3c6   :  { %v2031_v15 = vsub.f32 %v20664_v54, %v20670_v32  ;;  %v18555_v46 = vand.u32 4294901760, %v20676_v10  ;;  %v5866_v45 = vand.u32 4294901760, %v5865_v43  ;;  %v18559_v16 = vand.u32 4294901760, %v20677_v60  ;;  %v20678_v32 = vld [vmem:[#allocation76_spill] sm:$0xff] }
 0x3c7   :  { %v8649_v1 = vpack.c.bf16 %v2014_v0, %v2002_v37  ;;  %v18561_v52 = vand.u32 4294901760, %v20678_v32  ;;  %v5884_v5 = vand.u32 4294901760, %v5883_v17  ;;  %v2055_v0 = vsub.f32 %v20674_v11, %v18551_v29  ;;  %v20682_v17 = vld [vmem:[#allocation81_spill] sm:$0xff] }
 0x3c8   :  { %v2032_v25 = vand.u32 4294901760, %v2031_v15  ;;  %v20679_v15 = vand.u32 4294901760, %v20671_v21 }
 0x3ca   :  { %8646 = vmatpush1.bf16.xpose.msra.mxu0 %v8645_v36  ;;  %v5854_v36 = vand.u32 4294901760, %v5853_v63  ;;  %v2025_v30 = vsub.f32 %v20671_v21, %v20679_v15  ;;  %v2037_v63 = vsub.f32 %v20672_v14, %v18550_v24  ;;  %v8651_v54 = vpack.c.bf16 %v2032_v25, %v2020_v6 }
 0x3cb   :  { %8648 = vmatprep.subr.bf16.mxu0 %v8647_v3  ;;  %v5872_v3 = vand.u32 4294901760, %v5871_v40  ;;  %v5889_v40 = vsub.f32 %v20676_v10, %v18555_v46  ;;  %v5895_v6 = vsub.f32 %v20677_v60, %v18559_v16  ;;  %v5907_v25 = vsub.f32 %v20678_v32, %v18561_v52  ;;  %v20684_v10 = vld [vmem:[#allocation118_spill] sm:$0xff] }
 0x3cc   :  { %9798 = vmatpush1.bf16.xpose.msra.mxu1 %v9797_v58  ;;  %v20680_v58 = vand.u32 4294901760, %v20673_v27  ;;  %v9801_v24 = vpack.c.bf16 %v5866_v45, %v5854_v36  ;;  %v2056_v46 = vand.u32 4294901760, %v2055_v0  ;;  %v18564_v15 = vand.u32 4294901760, %v20684_v10  ;;  %v20685_v45 = vld [vmem:[#allocation115_spill] sm:$0xff]  ;;  %v20687_v52 = vld [vmem:[#allocation78_spill] sm:$0xff] }
 0x3cd   :  { %9800 = vmatprep.subr.bf16.mxu1 %v9799_v62  ;;  %v20681_v62 = vand.u32 4294901760, %v20675_v34  ;;  %v9803_v11 = vpack.c.bf16 %v5884_v5, %v5872_v3  ;;  %v5890_v21 = vand.u32 4294901760, %v5889_v40  ;;  %v20686_v16 = vand.u32 4294901760, %v20682_v17 }
 0x3ce   :  { %v2043_v37 = vsub.f32 %v20673_v27, %v20680_v58  ;;  %v20683_v58 = vld [vmem:[#allocation82_spill] sm:$0xff]  ;;  %v18565_v32 = vand.u32 4294901760, %v20687_v52  ;;  %v5908_v3 = vand.u32 4294901760, %v5907_v25 }
 0x3cf   :  { %v5877_v43 = vsub.f32 %v20675_v34, %v20681_v62  ;;  %v18563_v29 = vand.u32 4294901760, %v20683_v58  ;;  %v2026_v62 = vand.u32 4294901760, %v2025_v30  ;;  %v2038_v34 = vand.u32 4294901760, %v2037_v63  ;;  %v20688_v30 = vld [vmem:[#allocation79_spill] sm:$0xff] }
 0x3d0   :  { %v2044_v27 = vand.u32 4294901760, %v2043_v37  ;;  %v2049_v60 = vsub.f32 %v20682_v17, %v20686_v16  ;;  %v18567_v5 = vand.u32 4294901760, %v20688_v30  ;;  %v20689_v37 = vld [vmem:[#allocation121_spill] sm:$0xff]  ;;  %v2067_v16 = vsub.f32 %v20684_v10, %v18564_v15  ;;  %v20693_v15 = vld [vmem:[#allocation136_spill] sm:$0xff]  ;;  %v20697_v10 = vld [vmem:[#allocation171_spill] sm:$0xff] }
 0x3d1   :  { %v5878_v14 = vand.u32 4294901760, %v5877_v43  ;;  %v8653_v63 = vpack.c.bf16 %v2038_v34, %v2026_v62  ;;  %v18571_v0 = vand.u32 4294901760, %v20689_v37  ;;  %v20690_v43 = vld [vmem:[#allocation127_spill] sm:$0xff] }
 0x3d2   :  { %8650 = vmatpush1.bf16.xpose.msra.mxu0 %v8649_v1  ;;  %v5896_v1 = vand.u32 4294901760, %v5895_v6  ;;  %v18574_v40 = vand.u32 4294901760, %v20690_v43  ;;  %v8655_v36 = vpack.c.bf16 %v2056_v46, %v2044_v27  ;;  %v2050_v34 = vand.u32 4294901760, %v2049_v60 }
 0x3d3   :  { %8652 = vmatprep.subr.bf16.mxu0 %v8651_v54  ;;  %v2061_v54 = vsub.f32 %v20683_v58, %v18563_v29  ;;  %v9805_v25 = vpack.c.bf16 %v5890_v21, %v5878_v14  ;;  %v5901_v29 = vsub.f32 %v20687_v52, %v18565_v32  ;;  %v5913_v46 = vsub.f32 %v20688_v30, %v18567_v5  ;;  %v20692_v21 = vld [vmem:[#allocation135_spill] sm:$0xff]  ;;  %v20696_v30 = vld [vmem:[#allocation142_spill] sm:$0xff] }
 0x3d4   :  { %9802 = vmatpush1.bf16.xpose.msra.mxu1 %v9801_v24  ;;  %v20691_v24 = vand.u32 4294901760, %v20685_v45  ;;  %v5919_v27 = vsub.f32 %v20689_v37, %v18571_v0  ;;  %v5931_v14 = vsub.f32 %v20690_v43, %v18574_v40  ;;  %v18577_v32 = vand.u32 4294901760, %v20693_v15  ;;  %v20695_v52 = vld [vmem:[#allocation183_spill] sm:$0xff]  ;;  %v20698_v40 = vld [vmem:[#allocation184_spill] sm:$0xff] }
 0x3d5   :  { %9804 = vmatprep.subr.bf16.mxu1 %v9803_v11  ;;  %v9807_v11 = vpack.c.bf16 %v5908_v3, %v5896_v1  ;;  %v2062_v62 = vand.u32 4294901760, %v2061_v54  ;;  %v2068_v60 = vand.u32 4294901760, %v2067_v16  ;;  %v20694_v3 = vld [vmem:[#allocation181_spill] sm:$0xff]  ;;  %v18578_v5 = vand.u32 4294901760, %v20695_v52 }
 0x3d6   :  { %v2079_v6 = vsub.f32 %v20685_v45, %v20691_v24  ;;  %v18582_v0 = vand.u32 4294901760, %v20697_v10  ;;  %v5914_v58 = vand.u32 4294901760, %v5913_v46  ;;  %v18586_v43 = vand.u32 4294901760, %v20698_v40  ;;  %v20699_v24 = vld [vmem:[#allocation186_spill] sm:$0xff] }
 0x3d7   :  { %v8657_v37 = vpack.c.bf16 %v2062_v62, %v2050_v34  ;;  %v18588_v17 = vand.u32 4294901760, %v20699_v24  ;;  %v5932_v16 = vand.u32 4294901760, %v5931_v14  ;;  %v2103_v62 = vsub.f32 %v20695_v52, %v18578_v5  ;;  %v20703_v14 = vld [vmem:[#allocation187_spill] sm:$0xff] }
 0x3d8   :  { %v2080_v1 = vand.u32 4294901760, %v2079_v6  ;;  %v20700_v6 = vand.u32 4294901760, %v20692_v21 }
 0x3da   :  { %8654 = vmatpush1.bf16.xpose.msra.mxu0 %v8653_v63  ;;  %v5902_v63 = vand.u32 4294901760, %v5901_v29  ;;  %v2073_v54 = vsub.f32 %v20692_v21, %v20700_v6  ;;  %v2085_v29 = vsub.f32 %v20693_v15, %v18577_v32  ;;  %v8659_v45 = vpack.c.bf16 %v2080_v1, %v2068_v60 }
 0x3db   :  { %8656 = vmatprep.subr.bf16.mxu0 %v8655_v36  ;;  %v5920_v36 = vand.u32 4294901760, %v5919_v27  ;;  %v5937_v27 = vsub.f32 %v20697_v10, %v18582_v0  ;;  %v5943_v60 = vsub.f32 %v20698_v40, %v18586_v43  ;;  %v5955_v1 = vsub.f32 %v20699_v24, %v18588_v17  ;;  %v20705_v10 = vld [vmem:[#allocation14_spill] sm:$0xff]  ;;  %v20708_v17 = vld [vmem:[#allocation193_spill] sm:$0xff] }
 0x3dc   :  { %9806 = vmatpush1.bf16.xpose.msra.mxu1 %v9805_v25  ;;  %v20701_v25 = vand.u32 4294901760, %v20694_v3  ;;  %v9809_v32 = vpack.c.bf16 %v5914_v58, %v5902_v63  ;;  %v2104_v0 = vand.u32 4294901760, %v2103_v62  ;;  %v18591_v6 = vand.u32 4294901760, %v20705_v10  ;;  %v20706_v58 = vld [vmem:[#allocation194_spill] sm:$0xff] }
 0x3dd   :  { %9808 = vmatprep.subr.bf16.mxu1 %v9807_v11  ;;  %v20702_v11 = vand.u32 4294901760, %v20696_v30  ;;  %v9811_v52 = vpack.c.bf16 %v5932_v16, %v5920_v36  ;;  %v5938_v21 = vand.u32 4294901760, %v5937_v27  ;;  %v20707_v43 = vand.u32 4294901760, %v20703_v14 }
 0x3de   :  { %v2091_v34 = vsub.f32 %v20694_v3, %v20701_v25  ;;  %v20704_v25 = vld [vmem:[#allocation192_spill] sm:$0xff]  ;;  %v18592_v24 = vand.u32 4294901760, %v20708_v17  ;;  %v5956_v36 = vand.u32 4294901760, %v5955_v1 }
 0x3df   :  { %v5925_v46 = vsub.f32 %v20696_v30, %v20702_v11  ;;  %v18590_v5 = vand.u32 4294901760, %v20704_v25  ;;  %v2074_v11 = vand.u32 4294901760, %v2073_v54  ;;  %v2086_v30 = vand.u32 4294901760, %v2085_v29  ;;  %v20709_v54 = vld [vmem:[#allocation196_spill] sm:$0xff] }
 0x3e0   :  { %v2092_v3 = vand.u32 4294901760, %v2091_v34  ;;  %v2097_v40 = vsub.f32 %v20703_v14, %v20707_v43  ;;  %v18594_v16 = vand.u32 4294901760, %v20709_v54  ;;  %v20710_v34 = vld [vmem:[#allocation21_spill] sm:$0xff]  ;;  %v2115_v43 = vsub.f32 %v20705_v10, %v18591_v6  ;;  %v20714_v6 = vld [vmem:[#allocation30_spill] sm:$0xff] }
 0x3e1   :  { %v5926_v15 = vand.u32 4294901760, %v5925_v46  ;;  %v8661_v29 = vpack.c.bf16 %v2086_v30, %v2074_v11  ;;  %v18598_v62 = vand.u32 4294901760, %v20710_v34  ;;  %v20711_v46 = vld [vmem:[#allocation27_spill] sm:$0xff]  ;;  %v20718_v10 = vld [vmem:[#allocation38_spill] sm:$0xff] }
 0x3e2   :  { %8658 = vmatpush1.bf16.xpose.msra.mxu0 %v8657_v37  ;;  %v5944_v37 = vand.u32 4294901760, %v5943_v60  ;;  %v18601_v27 = vand.u32 4294901760, %v20711_v46  ;;  %v8663_v63 = vpack.c.bf16 %v2104_v0, %v2092_v3  ;;  %v2098_v30 = vand.u32 4294901760, %v2097_v40 }
 0x3e3   :  { %8660 = vmatprep.subr.bf16.mxu0 %v8659_v45  ;;  %v2109_v45 = vsub.f32 %v20704_v25, %v18590_v5  ;;  %v9813_v1 = vpack.c.bf16 %v5938_v21, %v5926_v15  ;;  %v5949_v5 = vsub.f32 %v20708_v17, %v18592_v24  ;;  %v5961_v0 = vsub.f32 %v20709_v54, %v18594_v16  ;;  %v20713_v21 = vld [vmem:[#allocation32_spill] sm:$0xff]  ;;  %v20716_v17 = vld [vmem:[#allocation62_spill] sm:$0xff]  ;;  %v20717_v54 = vld [vmem:[#allocation35_spill] sm:$0xff] }
 0x3e4   :  { %9810 = vmatpush1.bf16.xpose.msra.mxu1 %v9809_v32  ;;  %v20712_v32 = vand.u32 4294901760, %v20706_v58  ;;  %v5967_v3 = vsub.f32 %v20710_v34, %v18598_v62  ;;  %v5979_v15 = vsub.f32 %v20711_v46, %v18601_v27  ;;  %v18604_v24 = vand.u32 4294901760, %v20714_v6  ;;  %v20719_v27 = vld [vmem:[#allocation68_spill] sm:$0xff] }
 0x3e5   :  { %9812 = vmatprep.subr.bf16.mxu1 %v9811_v52  ;;  %v9815_v52 = vpack.c.bf16 %v5956_v36, %v5944_v37  ;;  %v2110_v11 = vand.u32 4294901760, %v2109_v45  ;;  %v2116_v40 = vand.u32 4294901760, %v2115_v43  ;;  %v20715_v36 = vld [vmem:[#allocation59_spill] sm:$0xff]  ;;  %v18605_v16 = vand.u32 4294901760, %v20716_v17 }
 0x3e6   :  { %v2127_v60 = vsub.f32 %v20706_v58, %v20712_v32  ;;  %v18609_v62 = vand.u32 4294901760, %v20718_v10  ;;  %v5962_v25 = vand.u32 4294901760, %v5961_v0  ;;  %v18613_v46 = vand.u32 4294901760, %v20719_v27  ;;  %v20720_v32 = vld [vmem:[#allocation74_spill] sm:$0xff] }
 0x3e7   :  { %v8665_v34 = vpack.c.bf16 %v2110_v11, %v2098_v30  ;;  %v18615_v14 = vand.u32 4294901760, %v20720_v32  ;;  %v5980_v43 = vand.u32 4294901760, %v5979_v15  ;;  %v2151_v11 = vsub.f32 %v20716_v17, %v18605_v16  ;;  %v20724_v15 = vld [vmem:[#allocation80_spill] sm:$0xff] }
 0x3e8   :  { %v2128_v37 = vand.u32 4294901760, %v2127_v60  ;;  %v20721_v60 = vand.u32 4294901760, %v20713_v21 }
 0x3ea   :  { %8662 = vmatpush1.bf16.xpose.msra.mxu0 %v8661_v29  ;;  %v5950_v29 = vand.u32 4294901760, %v5949_v5  ;;  %v2121_v45 = vsub.f32 %v20713_v21, %v20721_v60  ;;  %v2133_v5 = vsub.f32 %v20714_v6, %v18604_v24  ;;  %v8667_v58 = vpack.c.bf16 %v2128_v37, %v2116_v40 }
 0x3eb   :  { %8664 = vmatprep.subr.bf16.mxu0 %v8663_v63  ;;  %v5968_v63 = vand.u32 4294901760, %v5967_v3  ;;  %v5985_v3 = vsub.f32 %v20718_v10, %v18609_v62  ;;  %v5991_v40 = vsub.f32 %v20719_v27, %v18613_v46  ;;  %v6003_v37 = vsub.f32 %v20720_v32, %v18615_v14  ;;  %v20726_v10 = vld [vmem:[#allocation107_spill] sm:$0xff] }
 0x3ec   :  { %9814 = vmatpush1.bf16.xpose.msra.mxu1 %v9813_v1  ;;  %v20722_v1 = vand.u32 4294901760, %v20715_v36  ;;  %v9817_v24 = vpack.c.bf16 %v5962_v25, %v5950_v29  ;;  %v2152_v62 = vand.u32 4294901760, %v2151_v11  ;;  %v18618_v60 = vand.u32 4294901760, %v20726_v10  ;;  %v20727_v25 = vld [vmem:[#allocation110_spill] sm:$0xff]  ;;  %v20729_v14 = vld [vmem:[#allocation83_spill] sm:$0xff] }
 0x3ed   :  { %9816 = vmatprep.subr.bf16.mxu1 %v9815_v52  ;;  %v20723_v52 = vand.u32 4294901760, %v20717_v54  ;;  %v9819_v17 = vpack.c.bf16 %v5980_v43, %v5968_v63  ;;  %v5986_v21 = vand.u32 4294901760, %v5985_v3  ;;  %v20728_v46 = vand.u32 4294901760, %v20724_v15 }
 0x3ee   :  { %v2139_v30 = vsub.f32 %v20715_v36, %v20722_v1  ;;  %v20725_v1 = vld [vmem:[#allocation77_spill] sm:$0xff]  ;;  %v18619_v32 = vand.u32 4294901760, %v20729_v14  ;;  %v6004_v63 = vand.u32 4294901760, %v6003_v37 }
 0x3ef   :  { %v5973_v0 = vsub.f32 %v20717_v54, %v20723_v52  ;;  %v18617_v16 = vand.u32 4294901760, %v20725_v1  ;;  %v2122_v52 = vand.u32 4294901760, %v2121_v45  ;;  %v2134_v54 = vand.u32 4294901760, %v2133_v5  ;;  %v20730_v45 = vld [vmem:[#allocation86_spill] sm:$0xff] }
 0x3f0   :  { %v2140_v36 = vand.u32 4294901760, %v2139_v30  ;;  %v2145_v27 = vsub.f32 %v20724_v15, %v20728_v46  ;;  %v18621_v43 = vand.u32 4294901760, %v20730_v45  ;;  %v20731_v30 = vld [vmem:[#allocation116_spill] sm:$0xff]  ;;  %v2163_v46 = vsub.f32 %v20726_v10, %v18618_v60  ;;  %v20735_v60 = vld [vmem:[#allocation125_spill] sm:$0xff]  ;;  %v20739_v10 = vld [vmem:[#allocation134_spill] sm:$0xff] }
 0x3f1   :  { %v5974_v6 = vand.u32 4294901760, %v5973_v0  ;;  %v8669_v5 = vpack.c.bf16 %v2134_v54, %v2122_v52  ;;  %v18625_v11 = vand.u32 4294901760, %v20731_v30  ;;  %v20732_v0 = vld [vmem:[#allocation122_spill] sm:$0xff] }
 0x3f2   :  { %8666 = vmatpush1.bf16.xpose.msra.mxu0 %v8665_v34  ;;  %v5992_v34 = vand.u32 4294901760, %v5991_v40  ;;  %v18628_v3 = vand.u32 4294901760, %v20732_v0  ;;  %v8671_v29 = vpack.c.bf16 %v2152_v62, %v2140_v36  ;;  %v2146_v54 = vand.u32 4294901760, %v2145_v27 }
 0x3f3   :  { %8668 = vmatprep.subr.bf16.mxu0 %v8667_v58  ;;  %v2157_v58 = vsub.f32 %v20725_v1, %v18617_v16  ;;  %v9821_v37 = vpack.c.bf16 %v5986_v21, %v5974_v6  ;;  %v5997_v16 = vsub.f32 %v20729_v14, %v18619_v32  ;;  %v6009_v62 = vsub.f32 %v20730_v45, %v18621_v43  ;;  %v20734_v21 = vld [vmem:[#allocation128_spill] sm:$0xff]  ;;  %v20737_v14 = vld [vmem:[#allocation155_spill] sm:$0xff] }
 0x3f4   :  { %9818 = vmatpush1.bf16.xpose.msra.mxu1 %v9817_v24  ;;  %v20733_v24 = vand.u32 4294901760, %v20727_v25  ;;  %v6015_v36 = vsub.f32 %v20731_v30, %v18625_v11  ;;  %v6027_v6 = vsub.f32 %v20732_v0, %v18628_v3  ;;  %v18631_v32 = vand.u32 4294901760, %v20735_v60  ;;  %v20738_v45 = vld [vmem:[#allocation131_spill] sm:$0xff]  ;;  %v20740_v3 = vld [vmem:[#allocation158_spill] sm:$0xff] }
 0x3f5   :  { %9820 = vmatprep.subr.bf16.mxu1 %v9819_v17  ;;  %v9823_v17 = vpack.c.bf16 %v6004_v63, %v5992_v34  ;;  %v2158_v52 = vand.u32 4294901760, %v2157_v58  ;;  %v2164_v27 = vand.u32 4294901760, %v2163_v46  ;;  %v20736_v63 = vld [vmem:[#allocation149_spill] sm:$0xff]  ;;  %v18632_v43 = vand.u32 4294901760, %v20737_v14 }
 0x3f6   :  { %v2175_v40 = vsub.f32 %v20727_v25, %v20733_v24  ;;  %v18636_v11 = vand.u32 4294901760, %v20739_v10  ;;  %v6010_v1 = vand.u32 4294901760, %v6009_v62  ;;  %v18640_v0 = vand.u32 4294901760, %v20740_v3  ;;  %v20741_v24 = vld [vmem:[#allocation167_spill] sm:$0xff] }
 0x3f7   :  { %v8673_v30 = vpack.c.bf16 %v2158_v52, %v2146_v54  ;;  %v18642_v15 = vand.u32 4294901760, %v20741_v24  ;;  %v6028_v46 = vand.u32 4294901760, %v6027_v6  ;;  %v2199_v52 = vsub.f32 %v20737_v14, %v18632_v43  ;;  %v20745_v6 = vld [vmem:[#allocation170_spill] sm:$0xff] }
 0x3f8   :  { %v2176_v34 = vand.u32 4294901760, %v2175_v40  ;;  %v20742_v40 = vand.u32 4294901760, %v20734_v21 }
 0x3fa   :  { %8670 = vmatpush1.bf16.xpose.msra.mxu0 %v8669_v5  ;;  %v5998_v5 = vand.u32 4294901760, %v5997_v16  ;;  %v2169_v58 = vsub.f32 %v20734_v21, %v20742_v40  ;;  %v2181_v16 = vsub.f32 %v20735_v60, %v18631_v32  ;;  %v8675_v25 = vpack.c.bf16 %v2176_v34, %v2164_v27 }
 0x3fb   :  { %8672 = vmatprep.subr.bf16.mxu0 %v8671_v29  ;;  %v6016_v29 = vand.u32 4294901760, %v6015_v36  ;;  %v6033_v36 = vsub.f32 %v20739_v10, %v18636_v11  ;;  %v6039_v27 = vsub.f32 %v20740_v3, %v18640_v0  ;;  %v6051_v34 = vsub.f32 %v20741_v24, %v18642_v15  ;;  %v20747_v10 = vld [vmem:[#allocation191_spill] sm:$0xff]  ;;  %v20750_v15 = vld [vmem:[#allocation173_spill] sm:$0xff] }
 0x3fc   :  { %9822 = vmatpush1.bf16.xpose.msra.mxu1 %v9821_v37  ;;  %v20743_v37 = vand.u32 4294901760, %v20736_v63  ;;  %v9825_v32 = vpack.c.bf16 %v6010_v1, %v5998_v5  ;;  %v2200_v11 = vand.u32 4294901760, %v2199_v52  ;;  %v18647_v40 = vand.u32 4294901760, %v20747_v10  ;;  %v20748_v1 = vld [vmem:[#allocation206_spill] sm:$0xff] }
 0x3fd   :  { %9824 = vmatprep.subr.bf16.mxu1 %v9823_v17  ;;  %v20744_v17 = vand.u32 4294901760, %v20738_v45  ;;  %v9827_v14 = vpack.c.bf16 %v6028_v46, %v6016_v29  ;;  %v6034_v21 = vand.u32 4294901760, %v6033_v36  ;;  %v20749_v0 = vand.u32 4294901760, %v20745_v6 }
 0x3fe   :  { %v2187_v54 = vsub.f32 %v20736_v63, %v20743_v37  ;;  %v20746_v37 = vld [vmem:[#allocation176_spill] sm:$0xff]  ;;  %v18645_v24 = vand.u32 4294901760, %v20750_v15  ;;  %v6052_v29 = vand.u32 4294901760, %v6051_v34 }
 0x3ff   :  { %v6021_v62 = vsub.f32 %v20738_v45, %v20744_v17  ;;  %v18644_v43 = vand.u32 4294901760, %v20746_v37  ;;  %v2170_v17 = vand.u32 4294901760, %v2169_v58  ;;  %v2182_v45 = vand.u32 4294901760, %v2181_v16  ;;  %v20751_v58 = vld [vmem:[#allocation179_spill] sm:$0xff] }
 0x400   :  { %v2188_v63 = vand.u32 4294901760, %v2187_v54  ;;  %v2193_v3 = vsub.f32 %v20745_v6, %v20749_v0  ;;  %v18646_v46 = vand.u32 4294901760, %v20751_v58  ;;  %v20752_v54 = vld [vmem:[#allocation207_spill] sm:$0xff]  ;;  %v2211_v0 = vsub.f32 %v20747_v10, %v18647_v40 }
 0x401   :  { %v6022_v60 = vand.u32 4294901760, %v6021_v62  ;;  %v8677_v16 = vpack.c.bf16 %v2182_v45, %v2170_v17  ;;  %v18649_v52 = vand.u32 4294901760, %v20752_v54  ;;  %v20753_v62 = vld [vmem:[#allocation208_spill] sm:$0xff] }
 0x402   :  { %8674 = vmatpush1.bf16.xpose.msra.mxu0 %v8673_v30  ;;  %v6040_v30 = vand.u32 4294901760, %v6039_v27  ;;  %v18651_v36 = vand.u32 4294901760, %v20753_v62  ;;  %v8679_v5 = vpack.c.bf16 %v2200_v11, %v2188_v63  ;;  %v2194_v45 = vand.u32 4294901760, %v2193_v3 }
 0x403   :  { %8676 = vmatprep.subr.bf16.mxu0 %v8675_v25  ;;  %v2205_v25 = vsub.f32 %v20746_v37, %v18644_v43  ;;  %v9829_v34 = vpack.c.bf16 %v6034_v21, %v6022_v60  ;;  %v6045_v43 = vsub.f32 %v20750_v15, %v18645_v24  ;;  %v6057_v11 = vsub.f32 %v20751_v58, %v18646_v46 }
 0x404   :  { %9826 = vmatpush1.bf16.xpose.msra.mxu1 %v9825_v32  ;;  %v20754_v32 = vand.u32 4294901760, %v20748_v1  ;;  %v6063_v63 = vsub.f32 %v20752_v54, %v18649_v52  ;;  %v6075_v60 = vsub.f32 %v20753_v62, %v18651_v36  ;;  %v18655_v21 = vand.u32 4294901760, %v13447_v39 }
 0x405   :  { %9828 = vmatprep.subr.bf16.mxu1 %v9827_v14  ;;  %v9831_v14 = vpack.c.bf16 %v6052_v29, %v6040_v30  ;;  %v2206_v17 = vand.u32 4294901760, %v2205_v25  ;;  %v2212_v3 = vand.u32 4294901760, %v2211_v0  ;;  %v6046_v29 = vand.u32 4294901760, %v6045_v43 }
 0x406   :  { %v2223_v27 = vsub.f32 %v20748_v1, %v20754_v32  ;;  %v20755_v32 = vld [vmem:[#allocation209_spill] sm:$0xff]  ;;  %v6058_v46 = vand.u32 4294901760, %v6057_v11  ;;  %v18652_v58 = vand.u32 4294901760, %v13471_v61  ;;  %v6064_v52 = vand.u32 4294901760, %v6063_v63 }
 0x407   :  { %v18654_v24 = vand.u32 4294901760, %v20755_v32  ;;  %v8681_v25 = vpack.c.bf16 %v2206_v17, %v2194_v45  ;;  %v6076_v54 = vand.u32 4294901760, %v6075_v60  ;;  %v2217_v36 = vsub.f32 %v13447_v39, %v18655_v21  ;;  %v20775_v21 = vld [vmem:[#allocation19_spill] sm:$0xff] }
 0x408   :  { %v2224_v30 = vand.u32 4294901760, %v2223_v27  ;;  %v9833_v43 = vpack.c.bf16 %v6058_v46, %v6046_v29  ;;  %v8687_v46 = vpack.c.bf16 %v20549_v2, %v20548_v42  ;;  %v9843_v29 = vpack.c.bf16 %v20589_v33, %v20588_v23 }
 0x409   :  { %v2218_v45 = vand.u32 4294901760, %v2217_v36  ;;  %v9841_v36 = vpack.c.bf16 %v20584_v28, %v20583_v41 }
 0x40a   :  { %8678 = vmatpush1.bf16.xpose.msra.mxu0 %v8677_v16  ;;  %v20756_v16 = vld [vmem:[#allocation198_spill] sm:$0xff]  ;;  %v8683_v0 = vpack.c.bf16 %v2224_v30, %v2212_v3  ;;  %v9839_v30 = vpack.c.bf16 %v20552_v9, %v20551_v7 }
 0x40b   :  { %8680 = vmatprep.subr.bf16.mxu0 %v8679_v5  ;;  %v18653_v40 = vand.u32 4294901760, %v20756_v16  ;;  %v2229_v5 = vsub.f32 %v20755_v32, %v18654_v24 }
 0x40c   :  { %9830 = vmatpush1.bf16.xpose.msra.mxu1 %v9829_v34  ;;  %v6081_v34 = vsub.f32 %v13471_v61, %v18652_v58  ;;  %v20770_v58 = vld [vmem:[#allocation151_spill] sm:$0xff] }
 0x40d   :  { %9832 = vmatprep.subr.bf16.mxu1 %v9831_v14  ;;  %v6069_v27 = vsub.f32 %v20756_v16, %v18653_v40  ;;  %v9835_v14 = vpack.c.bf16 %v6076_v54, %v6064_v52  ;;  %v2230_v17 = vand.u32 4294901760, %v2229_v5  ;;  %v8689_v54 = vpack.c.bf16 %v20565_v47, %v20564_v18  ;;  %v20771_v40 = vld [vmem:[#allocation203_spill] sm:$0xff] }
 0x40e   :  { %v6082_v63 = vand.u32 4294901760, %v6081_v34  ;;  %v8691_v52 = vpack.c.bf16 %v20579_v8, %v20578_v51  ;;  %v8695_v5 = vpack.c.bf16 %v20602_v20, %v20601_v13  ;;  %v9849_v34 = vpack.c.bf16 %v20621_v59, %v20619_v35 }
 0x40f   :  { %v6070_v11 = vand.u32 4294901760, %v6069_v27  ;;  %v8685_v60 = vpack.c.bf16 %v2230_v17, %v2218_v45  ;;  %v8699_v27 = vpack.c.bf16 %v20617_v55, %v20616_v56  ;;  %v20757_v45 = vld [vmem:[#allocation99_spill] sm:$0xff]  ;;  %v9859_v24 = vpack.c.bf16 %v20771_v40, %v20770_v58 }
 0x410   :  { %v8701_v17 = vpack.c.bf16 %v20757_v45, %v20629_v31  ;;  %v20783_v40 = vld [vmem:[#allocation43_spill] sm:$0xff] }
 0x411   :  { %v9837_v3 = vpack.c.bf16 %v6082_v63, %v6070_v11  ;;  %v20758_v11 = vld [vmem:[#allocation106_spill] sm:$0xff] }
 0x412   :  { %8682 = vmatpush1.bf16.xpose.msra.mxu0 %v8681_v25  ;;  %v8693_v25 = vpack.c.bf16 %v20600_v57, %v20599_v12  ;;  %v20759_v63 = vld [vmem:[#allocation102_spill] sm:$0xff] }
 0x413   :  { %8684 = vmatprep.subr.bf16.mxu0 %v8683_v0  ;;  %v9845_v0 = vpack.c.bf16 %v20604_v53, %v20603_v49 }
 0x414   :  { %9834 = vmatpush1.bf16.xpose.msra.mxu1 %v9833_v43  ;;  %v9847_v43 = vpack.c.bf16 %v20606_v26, %v20605_v19 }
 0x415   :  { %9836 = vmatprep.subr.bf16.mxu1 %v9835_v14  ;;  %v9851_v14 = vpack.c.bf16 %v20623_v50, %v20622_v4 }
 0x41a   :  { %8686 = vmatpush1.bf16.xpose.msra.mxu0 %v8685_v60  ;;  %v8703_v60 = vpack.c.bf16 %v20759_v63, %v20758_v11 }
 0x41b   :  { %8688 = vmatprep.subr.bf16.mxu0 %v8687_v46  ;;  %v20760_v46 = vld [vmem:[#allocation100_spill] sm:$0xff] }
 0x41c   :  { %9838 = vmatpush1.bf16.xpose.msra.mxu1 %v9837_v3  ;;  %v20761_v3 = vld [vmem:[#allocation105_spill] sm:$0xff] }
 0x41d   :  { %9840 = vmatprep.subr.bf16.mxu1 %v9839_v30  ;;  %v9853_v30 = vpack.c.bf16 %v20761_v3, %v20760_v46 }
 0x421   :  { %2235 = vmatmul.mubr.f32.vlgmr.msra.gmra.mrb[0].mxu0 %v13876_v48 }
 0x422   :  { %8690 = vmatpush1.bf16.xpose.msra.mxu0 %v8689_v54  ;;  %2435 = vmatprep.mubr.f32.mxu0 %v13460_v38  ;;  %v20762_v54 = vld [vmem:[#allocation103_spill] sm:$0xff] }
 0x423   :  { %8692 = vmatprep.subr.bf16.mxu0 %v8691_v52  ;;  %6087 = vmatmul.mubr.f32.vlgmr.msra.gmra.mrb[0].mxu1 %v13876_v48  ;;  %v20763_v52 = vld [vmem:[#allocation123_spill] sm:$0xff] }
 0x424   :  { %9842 = vmatpush1.bf16.xpose.msra.mxu1 %v9841_v36  ;;  %6287 = vmatprep.mubr.f32.mxu1 %v13460_v38  ;;  %v8697_v38 = vpack.c.bf16 %v20615_v22, %v20612_v44  ;;  %v9855_v36 = vpack.c.bf16 %v20763_v52, %v20762_v54 }
 0x425   :  { %9844 = vmatprep.subr.bf16.mxu1 %v9843_v29  ;;  %v20764_v29 = vld [vmem:[#allocation126_spill] sm:$0xff] }
 0x42a   :  { %8694 = vmatpush1.bf16.xpose.msra.mxu0 %v8693_v25  ;;  %v20765_v25 = vld [vmem:[#allocation132_spill] sm:$0xff] }
 0x42b   :  { %8696 = vmatprep.subr.bf16.mxu0 %v8695_v5  ;;  %v8705_v5 = vpack.c.bf16 %v20765_v25, %v20764_v29  ;;  %v20776_v25 = vld [vmem:[#allocation11_spill] sm:$0xff]  ;;  %v20777_v29 = vld [vmem:[#allocation13_spill] sm:$0xff] }
 0x42c   :  { %9846 = vmatpush1.bf16.xpose.msra.mxu1 %v9845_v0  ;;  %v20766_v0 = vld [vmem:[#allocation144_spill] sm:$0xff]  ;;  %v9861_v52 = vpack.c.bf16 %v20777_v29, %v20776_v25 }
 0x42d   :  { %9848 = vmatprep.subr.bf16.mxu1 %v9847_v43  ;;  %v20767_v43 = vld [vmem:[#allocation153_spill] sm:$0xff] }
 0x432   :  { %8698 = vmatpush1.bf16.xpose.msra.mxu0 %v8697_v38  ;;  %v8707_v38 = vpack.c.bf16 %v20767_v43, %v20766_v0  ;;  %v20778_v43 = vld [vmem:[#allocation24_spill] sm:$0xff] }
 0x433   :  { %8700 = vmatprep.subr.bf16.mxu0 %v8699_v27  ;;  %v20768_v27 = vld [vmem:[#allocation139_spill] sm:$0xff]  ;;  %v20779_v0 = vld [vmem:[#allocation28_spill] sm:$0xff] }
 0x434   :  { %9850 = vmatpush1.bf16.xpose.msra.mxu1 %v9849_v34  ;;  %v20769_v34 = vld [vmem:[#allocation138_spill] sm:$0xff] }
 0x435   :  { %9852 = vmatprep.subr.bf16.mxu1 %v9851_v14  ;;  %v9857_v14 = vpack.c.bf16 %v20769_v34, %v20768_v27  ;;  %v9863_v34 = vpack.c.bf16 %v20779_v0, %v20778_v43  ;;  %v20791_v0 = vld [vmem:[#allocation67_spill] sm:$0xff] }
 0x43a   :  { %8702 = vmatpush1.bf16.xpose.msra.mxu0 %v8701_v17  ;;  %v20772_v17 = vld [vmem:[#allocation9_spill] sm:$0xff] }
 0x43b   :  { %8704 = vmatprep.subr.bf16.mxu0 %v8703_v60  ;;  %v20773_v60 = vld [vmem:[#allocation10_spill] sm:$0xff] }
 0x43c   :  { %9854 = vmatpush1.bf16.xpose.msra.mxu1 %v9853_v30  ;;  %v8709_v30 = vpack.c.bf16 %v20773_v60, %v20772_v17  ;;  %v20784_v60 = vld [vmem:[#allocation29_spill] sm:$0xff]  ;;  %v20785_v17 = vld [vmem:[#allocation31_spill] sm:$0xff] }
 0x43d   :  { %9856 = vmatprep.subr.bf16.mxu1 %v9855_v36  ;;  %v20774_v36 = vld [vmem:[#allocation18_spill] sm:$0xff]  ;;  %v9865_v27 = vpack.c.bf16 %v20785_v17, %v20784_v60 }
 0x43e   :  { %v8711_v48 = vpack.c.bf16 %v20775_v21, %v20774_v36  ;;  %v20786_v21 = vld [vmem:[#allocation48_spill] sm:$0xff] }
 0x43f   :  { %v20787_v36 = vld [vmem:[#allocation52_spill] sm:$0xff] }
 0x440   :  { %v9867_v29 = vpack.c.bf16 %v20787_v36, %v20786_v21  ;;  %v20799_v36 = vld [vmem:[#allocation115_spill] sm:$0xff] }
 0x442   :  { %8706 = vmatpush1.bf16.xpose.msra.mxu0 %v8705_v5  ;;  %v20780_v5 = vld [vmem:[#allocation33_spill] sm:$0xff] }
 0x443   :  { %8708 = vmatprep.subr.bf16.mxu0 %v8707_v38  ;;  %v20781_v38 = vld [vmem:[#allocation34_spill] sm:$0xff] }
 0x444   :  { %9858 = vmatpush1.bf16.xpose.msra.mxu1 %v9857_v14  ;;  %v8713_v14 = vpack.c.bf16 %v20781_v38, %v20780_v5  ;;  %v20792_v38 = vld [vmem:[#allocation54_spill] sm:$0xff]  ;;  %v20793_v5 = vld [vmem:[#allocation55_spill] sm:$0xff] }
 0x445   :  { %9860 = vmatprep.subr.bf16.mxu1 %v9859_v24  ;;  %v20782_v24 = vld [vmem:[#allocation42_spill] sm:$0xff]  ;;  %v9869_v25 = vpack.c.bf16 %v20793_v5, %v20792_v38 }
 0x446   :  { %v8715_v58 = vpack.c.bf16 %v20783_v40, %v20782_v24  ;;  %v20794_v40 = vld [vmem:[#allocation72_spill] sm:$0xff] }
 0x447   :  { %v20795_v24 = vld [vmem:[#allocation76_spill] sm:$0xff] }
 0x448   :  { %v9871_v17 = vpack.c.bf16 %v20795_v24, %v20794_v40  ;;  %v20807_v24 = vld [vmem:[#allocation183_spill] sm:$0xff] }
 0x44a   :  { %8710 = vmatpush1.bf16.xpose.msra.mxu0 %v8709_v30  ;;  %v20788_v30 = vld [vmem:[#allocation57_spill] sm:$0xff] }
 0x44b   :  { %8712 = vmatprep.subr.bf16.mxu0 %v8711_v48  ;;  %v20789_v48 = vld [vmem:[#allocation58_spill] sm:$0xff] }
 0x44c   :  { %9862 = vmatpush1.bf16.xpose.msra.mxu1 %v9861_v52  ;;  %v8717_v52 = vpack.c.bf16 %v20789_v48, %v20788_v30  ;;  %v20800_v48 = vld [vmem:[#allocation78_spill] sm:$0xff]  ;;  %v20801_v30 = vld [vmem:[#allocation79_spill] sm:$0xff] }
 0x44d   :  { %9864 = vmatprep.subr.bf16.mxu1 %v9863_v34  ;;  %v20790_v34 = vld [vmem:[#allocation66_spill] sm:$0xff]  ;;  %v9873_v60 = vpack.c.bf16 %v20801_v30, %v20800_v48 }
 0x44e   :  { %v8719_v43 = vpack.c.bf16 %v20791_v0, %v20790_v34  ;;  %v20802_v0 = vld [vmem:[#allocation121_spill] sm:$0xff]  ;;  %v20803_v34 = vld [vmem:[#allocation127_spill] sm:$0xff] }
 0x44f   :  { %v9875_v5 = vpack.c.bf16 %v20803_v34, %v20802_v0  ;;  %v20815_v34 = vld [vmem:[#allocation194_spill] sm:$0xff] }
 0x452   :  { %8714 = vmatpush1.bf16.xpose.msra.mxu0 %v8713_v14  ;;  %v20796_v14 = vld [vmem:[#allocation81_spill] sm:$0xff] }
 0x453   :  { %8716 = vmatprep.subr.bf16.mxu0 %v8715_v58  ;;  %v20797_v58 = vld [vmem:[#allocation82_spill] sm:$0xff] }
 0x454   :  { %9866 = vmatpush1.bf16.xpose.msra.mxu1 %v9865_v27  ;;  %v8721_v27 = vpack.c.bf16 %v20797_v58, %v20796_v14  ;;  %v20808_v58 = vld [vmem:[#allocation142_spill] sm:$0xff]  ;;  %v20809_v14 = vld [vmem:[#allocation171_spill] sm:$0xff] }
 0x455   :  { %9868 = vmatprep.subr.bf16.mxu1 %v9867_v29  ;;  %v20798_v29 = vld [vmem:[#allocation118_spill] sm:$0xff]  ;;  %v9877_v38 = vpack.c.bf16 %v20809_v14, %v20808_v58 }
 0x456   :  { %v8723_v21 = vpack.c.bf16 %v20799_v36, %v20798_v29  ;;  %v20810_v36 = vld [vmem:[#allocation184_spill] sm:$0xff]  ;;  %v20811_v29 = vld [vmem:[#allocation186_spill] sm:$0xff] }
 0x457   :  { %v9879_v30 = vpack.c.bf16 %v20811_v29, %v20810_v36  ;;  %v20823_v29 = vld [vmem:[#allocation62_spill] sm:$0xff] }
 0x45a   :  { %8718 = vmatpush1.bf16.xpose.msra.mxu0 %v8717_v52  ;;  %v20804_v52 = vld [vmem:[#allocation135_spill] sm:$0xff] }
 0x45b   :  { %8720 = vmatprep.subr.bf16.mxu0 %v8719_v43  ;;  %v20805_v43 = vld [vmem:[#allocation136_spill] sm:$0xff] }
 0x45c   :  { %9870 = vmatpush1.bf16.xpose.msra.mxu1 %v9869_v25  ;;  %v8725_v25 = vpack.c.bf16 %v20805_v43, %v20804_v52  ;;  %v20816_v43 = vld [vmem:[#allocation193_spill] sm:$0xff]  ;;  %v20817_v52 = vld [vmem:[#allocation196_spill] sm:$0xff] }
 0x45d   :  { %9872 = vmatprep.subr.bf16.mxu1 %v9871_v17  ;;  %v20806_v17 = vld [vmem:[#allocation181_spill] sm:$0xff]  ;;  %v9881_v48 = vpack.c.bf16 %v20817_v52, %v20816_v43 }
 0x45e   :  { %v8727_v40 = vpack.c.bf16 %v20807_v24, %v20806_v17  ;;  %v20818_v24 = vld [vmem:[#allocation21_spill] sm:$0xff]  ;;  %v20819_v17 = vld [vmem:[#allocation27_spill] sm:$0xff] }
 0x45f   :  { %v9883_v14 = vpack.c.bf16 %v20819_v17, %v20818_v24  ;;  %v20831_v17 = vld [vmem:[#allocation110_spill] sm:$0xff] }
 0x462   :  { %8722 = vmatpush1.bf16.xpose.msra.mxu0 %v8721_v27  ;;  %v20812_v27 = vld [vmem:[#allocation187_spill] sm:$0xff] }
 0x463   :  { %8724 = vmatprep.subr.bf16.mxu0 %v8723_v21  ;;  %v20813_v21 = vld [vmem:[#allocation192_spill] sm:$0xff] }
 0x464   :  { %9874 = vmatpush1.bf16.xpose.msra.mxu1 %v9873_v60  ;;  %v8729_v60 = vpack.c.bf16 %v20813_v21, %v20812_v27  ;;  %v20824_v21 = vld [vmem:[#allocation35_spill] sm:$0xff]  ;;  %v20825_v27 = vld [vmem:[#allocation38_spill] sm:$0xff] }
 0x465   :  { %9876 = vmatprep.subr.bf16.mxu1 %v9875_v5  ;;  %v20814_v5 = vld [vmem:[#allocation14_spill] sm:$0xff]  ;;  %v9885_v58 = vpack.c.bf16 %v20825_v27, %v20824_v21 }
 0x466   :  { %v8731_v0 = vpack.c.bf16 %v20815_v34, %v20814_v5  ;;  %v20826_v34 = vld [vmem:[#allocation68_spill] sm:$0xff]  ;;  %v20827_v5 = vld [vmem:[#allocation74_spill] sm:$0xff] }
 0x467   :  { %v9887_v52 = vpack.c.bf16 %v20827_v5, %v20826_v34  ;;  %v20839_v5 = vld [vmem:[#allocation155_spill] sm:$0xff] }
 0x46a   :  { %8726 = vmatpush1.bf16.xpose.msra.mxu0 %v8725_v25  ;;  %v20820_v25 = vld [vmem:[#allocation32_spill] sm:$0xff] }
 0x46b   :  { %8728 = vmatprep.subr.bf16.mxu0 %v8727_v40  ;;  %v20821_v40 = vld [vmem:[#allocation30_spill] sm:$0xff] }
 0x46c   :  { %9878 = vmatpush1.bf16.xpose.msra.mxu1 %v9877_v38  ;;  %v8733_v38 = vpack.c.bf16 %v20821_v40, %v20820_v25  ;;  %v20832_v40 = vld [vmem:[#allocation83_spill] sm:$0xff]  ;;  %v20833_v25 = vld [vmem:[#allocation86_spill] sm:$0xff] }
 0x46d   :  { %9880 = vmatprep.subr.bf16.mxu1 %v9879_v30  ;;  %v20822_v30 = vld [vmem:[#allocation59_spill] sm:$0xff]  ;;  %v9889_v43 = vpack.c.bf16 %v20833_v25, %v20832_v40 }
 0x46e   :  { %v8735_v36 = vpack.c.bf16 %v20823_v29, %v20822_v30  ;;  %v20834_v29 = vld [vmem:[#allocation116_spill] sm:$0xff]  ;;  %v20835_v30 = vld [vmem:[#allocation122_spill] sm:$0xff] }
 0x46f   :  { %v9891_v27 = vpack.c.bf16 %v20835_v30, %v20834_v29 }
 0x472   :  { %8730 = vmatpush1.bf16.xpose.msra.mxu0 %v8729_v60  ;;  %v20828_v60 = vld [vmem:[#allocation80_spill] sm:$0xff] }
 0x473   :  { %8732 = vmatprep.subr.bf16.mxu0 %v8731_v0  ;;  %v20829_v0 = vld [vmem:[#allocation77_spill] sm:$0xff] }
 0x474   :  { %9882 = vmatpush1.bf16.xpose.msra.mxu1 %v9881_v48  ;;  %v8737_v48 = vpack.c.bf16 %v20829_v0, %v20828_v60  ;;  %v20840_v0 = vld [vmem:[#allocation131_spill] sm:$0xff]  ;;  %v20841_v60 = vld [vmem:[#allocation134_spill] sm:$0xff] }
 0x475   :  { %9884 = vmatprep.subr.bf16.mxu1 %v9883_v14  ;;  %v20830_v14 = vld [vmem:[#allocation107_spill] sm:$0xff]  ;;  %v9893_v21 = vpack.c.bf16 %v20841_v60, %v20840_v0 }
 0x476   :  { %v8739_v24 = vpack.c.bf16 %v20831_v17, %v20830_v14  ;;  %v20842_v17 = vld [vmem:[#allocation158_spill] sm:$0xff]  ;;  %v20843_v14 = vld [vmem:[#allocation167_spill] sm:$0xff] }
 0x477   :  { %v9895_v25 = vpack.c.bf16 %v20843_v14, %v20842_v17 }
 0x47a   :  { %8734 = vmatpush1.bf16.xpose.msra.mxu0 %v8733_v38  ;;  %v20836_v38 = vld [vmem:[#allocation128_spill] sm:$0xff] }
 0x47b   :  { %8736 = vmatprep.subr.bf16.mxu0 %v8735_v36  ;;  %v20837_v36 = vld [vmem:[#allocation125_spill] sm:$0xff] }
 0x47c   :  { %9886 = vmatpush1.bf16.xpose.msra.mxu1 %v9885_v58  ;;  %v8741_v58 = vpack.c.bf16 %v20837_v36, %v20836_v38 }
 0x47d   :  { %9888 = vmatprep.subr.bf16.mxu1 %v9887_v52  ;;  %v20838_v52 = vld [vmem:[#allocation149_spill] sm:$0xff] }
 0x47e   :  { %v8743_v34 = vpack.c.bf16 %v20839_v5, %v20838_v52  ;;  %v20845_v5 = vld [vmem:[#allocation207_spill] sm:$0xff] }
 0x47f   :  { %v9899_v60 = vpack.c.bf16 %v20753_v62, %v20845_v5  ;;  %v20850_v62 = vld [vmem:[#allocation213_spill] sm:$0xff] }
 0x482   :  { %8738 = vmatpush1.bf16.xpose.msra.mxu0 %v8737_v48 }
 0x483   :  { %8740 = vmatprep.subr.bf16.mxu0 %v8739_v24  ;;  %v8745_v24 = vpack.c.bf16 %v20746_v37, %v20745_v6 }
 0x484   :  { %9890 = vmatpush1.bf16.xpose.msra.mxu1 %v9889_v43  ;;  %v8747_v43 = vpack.c.bf16 %v20748_v1, %v20747_v10 }
 0x485   :  { %9892 = vmatprep.subr.bf16.mxu1 %v9891_v27  ;;  %v20844_v27 = vld [vmem:[#allocation179_spill] sm:$0xff] }
 0x486   :  { %v9897_v48 = vpack.c.bf16 %v20844_v27, %v20750_v15  ;;  %v20848_v27 = vld [vmem:[#allocation180_spill] sm:$0xff] }
 0x48a   :  { %8742 = vmatpush1.bf16.xpose.msra.mxu0 %v8741_v58  ;;  %v20847_v58 = vld [vmem:[#allocation195_spill] sm:$0xff] }
 0x48b   :  { %8744 = vmatprep.subr.bf16.mxu0 %v8743_v34  ;;  %v8749_v34 = vpack.c.bf16 %v20755_v32, %v13447_v39 }
 0x48c   :  { %9894 = vmatpush1.bf16.xpose.msra.mxu1 %v9893_v21  ;;  %v9901_v21 = vpack.c.bf16 %v13471_v61, %v20756_v16  ;;  %v20859_v61 = vld [vmem:[#allocation222_spill] sm:$0xff] }
 0x48d   :  { %9896 = vmatprep.subr.bf16.mxu1 %v9895_v25  ;;  %v20846_v25 = vld [vmem:[#allocation185_spill] sm:$0xff] }
 0x492   :  { %8746 = vmatpush1.bf16.xpose.msra.mxu0 %v8745_v24  ;;  %v20849_v24 = vld [vmem:[#allocation212_spill] sm:$0xff] }
 0x493   :  { %8748 = vmatprep.subr.bf16.mxu0 %v8747_v43  ;;  %v20851_v43 = vld [vmem:[#allocation214_spill] sm:$0xff] }
 0x494   :  { %9898 = vmatpush1.bf16.xpose.msra.mxu1 %v9897_v48  ;;  %v20853_v48 = vld [vmem:[#allocation216_spill] sm:$0xff] }
 0x495   :  { %9900 = vmatprep.subr.bf16.mxu1 %v9899_v60  ;;  %v20852_v60 = vld [vmem:[#allocation215_spill] sm:$0xff] }
 0x49a   :  { %8750 = vmatpush1.bf16.xpose.msra.mxu0 %v8749_v34  ;;  %v20854_v34 = vld [vmem:[#allocation217_spill] sm:$0xff] }
 0x49b   :  { %8752 = vmatprep.subr.bf16.mxu0 %v20846_v25  ;;  %v20857_v25 = vld [vmem:[#allocation220_spill] sm:$0xff] }
 0x49c   :  { %9902 = vmatpush1.bf16.xpose.msra.mxu1 %v9901_v21  ;;  %v20855_v21 = vld [vmem:[#allocation218_spill] sm:$0xff] }
 0x49d   :  { %9904 = vmatprep.subr.bf16.mxu1 %v20847_v58  ;;  %v20856_v58 = vld [vmem:[#allocation219_spill] sm:$0xff] }
 0x4a1   :  { %2438 = vmatmul.mubr.f32.vlgmr.msra.gmra.mrb[0].mxu0 %v20848_v27 }
 0x4a2   :  { %8754 = vmatpush1.bf16.xpose.msra.mxu0 %v20849_v24  ;;  %2575 = vmatprep.mubr.f32.mxu0 %v20850_v62  ;;  %v20858_v24 = vld [vmem:[#allocation221_spill] sm:$0xff] }
 0x4a3   :  { %8756 = vmatprep.subr.bf16.mxu0 %v20851_v43  ;;  %6290 = vmatmul.mubr.f32.vlgmr.msra.gmra.mrb[0].mxu1 %v20848_v27  ;;  %v20860_v43 = vld [vmem:[#allocation223_spill] sm:$0xff]  ;;  %v20861_v27 = vld [vmem:[#allocation224_spill] sm:$0xff] }
 0x4a4   :  { %9906 = vmatpush1.bf16.xpose.msra.mxu1 %v20852_v60  ;;  %6427 = vmatprep.mubr.f32.mxu1 %v20850_v62  ;;  %v20862_v60 = vld [vmem:[#allocation225_spill] sm:$0xff]  ;;  %v20863_v62 = vld [vmem:[#allocation226_spill] sm:$0xff] }
 0x4a5   :  { %9908 = vmatprep.subr.bf16.mxu1 %v20853_v48  ;;  %v20864_v48 = vld [vmem:[#allocation227_spill] sm:$0xff] }
 0x4aa   :  { %8758 = vmatpush1.bf16.xpose.msra.mxu0 %v20854_v34  ;;  %v20865_v34 = vld [vmem:[#allocation228_spill] sm:$0xff] }
 0x4ab   :  { %8760 = vmatprep.subr.bf16.mxu0 %v20855_v21  ;;  %v20866_v21 = vld [vmem:[#allocation229_spill] sm:$0xff] }
 0x4ac   :  { %9910 = vmatpush1.bf16.xpose.msra.mxu1 %v20856_v58  ;;  %v20867_v58 = vld [vmem:[#allocation230_spill] sm:$0xff] }
 0x4ad   :  { %9912 = vmatprep.subr.bf16.mxu1 %v20857_v25  ;;  %v20868_v25 = vld [vmem:[#allocation231_spill] sm:$0xff] }
 0x4b2   :  { %8762 = vmatpush1.bf16.xpose.msra.mxu0 %v20858_v24  ;;  %v20869_v24 = vld [vmem:[#allocation232_spill] sm:$0xff] }
 0x4b3   :  { %8764 = vmatprep.subr.bf16.mxu0 %v20859_v61  ;;  %v20870_v61 = vld [vmem:[#allocation233_spill] sm:$0xff] }
 0x4b4   :  { %9914 = vmatpush1.bf16.xpose.msra.mxu1 %v20860_v43  ;;  %v20871_v43 = vld [vmem:[#allocation15_spill] sm:$0xff] }
 0x4b5   :  { %9916 = vmatprep.subr.bf16.mxu1 %v20861_v27  ;;  %v20872_v27 = vld [vmem:[#allocation150_spill] sm:$0xff] }
 0x4ba   :  { %8766 = vmatpush1.bf16.xpose.msra.mxu0 %v20862_v60  ;;  %v20873_v60 = vld [vmem:[#allocation204_spill] sm:$0xff] }
 0x4bb   :  { %8768 = vmatprep.subr.bf16.mxu0 %v20863_v62  ;;  %v20874_v62 = vld [vmem:[#allocation16_spill] sm:$0xff] }
 0x4bc   :  { %9918 = vmatpush1.bf16.xpose.msra.mxu1 %v20864_v48  ;;  %v20875_v48 = vld [vmem:[#allocation20_spill] sm:$0xff] }
 0x4bd   :  { %9920 = vmatprep.subr.bf16.mxu1 %v20865_v34  ;;  %v20876_v34 = vld [vmem:[#allocation22_spill] sm:$0xff] }
 0x4c2   :  { %8770 = vmatpush1.bf16.xpose.msra.mxu0 %v20866_v21  ;;  %v20877_v21 = vld [vmem:[#allocation205_spill] sm:$0xff] }
 0x4c3   :  { %8772 = vmatprep.subr.bf16.mxu0 %v20867_v58  ;;  %v20878_v58 = vld [vmem:[#allocation36_spill] sm:$0xff] }
 0x4c4   :  { %9922 = vmatpush1.bf16.xpose.msra.mxu1 %v20868_v25  ;;  %v20879_v25 = vld [vmem:[#allocation37_spill] sm:$0xff] }
 0x4c5   :  { %9924 = vmatprep.subr.bf16.mxu1 %v20869_v24  ;;  %v20880_v24 = vld [vmem:[#allocation25_spill] sm:$0xff] }
 0x4ca   :  { %8774 = vmatpush1.bf16.xpose.msra.mxu0 %v20870_v61  ;;  %v20881_v61 = vld [vmem:[#allocation26_spill] sm:$0xff] }
 0x4cb   :  { %8776 = vmatprep.subr.bf16.mxu0 %v20871_v43  ;;  %v20882_v43 = vld [vmem:[#allocation39_spill] sm:$0xff] }
 0x4cc   :  { %9926 = vmatpush1.bf16.xpose.msra.mxu1 %v20872_v27  ;;  %v20883_v27 = vld [vmem:[#allocation40_spill] sm:$0xff] }
 0x4cd   :  { %9928 = vmatprep.subr.bf16.mxu1 %v20873_v60  ;;  %v20884_v60 = vld [vmem:[#allocation45_spill] sm:$0xff] }
 0x4d2   :  { %8778 = vmatpush1.bf16.xpose.msra.mxu0 %v20874_v62  ;;  %v20885_v62 = vld [vmem:[#allocation46_spill] sm:$0xff] }
 0x4d3   :  { %8780 = vmatprep.subr.bf16.mxu0 %v20875_v48  ;;  %v20886_v48 = vld [vmem:[#allocation60_spill] sm:$0xff] }
 0x4d4   :  { %9930 = vmatpush1.bf16.xpose.msra.mxu1 %v20876_v34  ;;  %v20887_v34 = vld [vmem:[#allocation61_spill] sm:$0xff] }
 0x4d5   :  { %9932 = vmatprep.subr.bf16.mxu1 %v20877_v21  ;;  %v20888_v21 = vld [vmem:[#allocation49_spill] sm:$0xff] }
 0x4da   :  { %8782 = vmatpush1.bf16.xpose.msra.mxu0 %v20878_v58  ;;  %v20889_v58 = vld [vmem:[#allocation51_spill] sm:$0xff] }
 0x4db   :  { %8784 = vmatprep.subr.bf16.mxu0 %v20879_v25  ;;  %v20890_v25 = vld [vmem:[#allocation63_spill] sm:$0xff] }
 0x4dc   :  { %9934 = vmatpush1.bf16.xpose.msra.mxu1 %v20880_v24  ;;  %v20891_v24 = vld [vmem:[#allocation64_spill] sm:$0xff] }
 0x4dd   :  { %9936 = vmatprep.subr.bf16.mxu1 %v20881_v61  ;;  %v20892_v61 = vld [vmem:[#allocation69_spill] sm:$0xff] }
 0x4e2   :  { %8786 = vmatpush1.bf16.xpose.msra.mxu0 %v20882_v43  ;;  %v20893_v43 = vld [vmem:[#allocation70_spill] sm:$0xff] }
 0x4e3   :  { %8788 = vmatprep.subr.bf16.mxu0 %v20883_v27  ;;  %v20894_v27 = vld [vmem:[#allocation84_spill] sm:$0xff] }
 0x4e4   :  { %9938 = vmatpush1.bf16.xpose.msra.mxu1 %v20884_v60  ;;  %v20895_v60 = vld [vmem:[#allocation85_spill] sm:$0xff] }
 0x4e5   :  { %9940 = vmatprep.subr.bf16.mxu1 %v20885_v62  ;;  %v20896_v62 = vld [vmem:[#allocation73_spill] sm:$0xff] }
 0x4ea   :  { %8790 = vmatpush1.bf16.xpose.msra.mxu0 %v20886_v48  ;;  %v20897_v48 = vld [vmem:[#allocation75_spill] sm:$0xff] }
 0x4eb   :  { %8792 = vmatprep.subr.bf16.mxu0 %v20887_v34  ;;  %v20898_v34 = vld [vmem:[#allocation87_spill] sm:$0xff] }
 0x4ec   :  { %9942 = vmatpush1.bf16.xpose.msra.mxu1 %v20888_v21  ;;  %v20899_v21 = vld [vmem:[#allocation88_spill] sm:$0xff] }
 0x4ed   :  { %9944 = vmatprep.subr.bf16.mxu1 %v20889_v58  ;;  %v20900_v58 = vld [vmem:[#allocation109_spill] sm:$0xff] }
 0x4f2   :  { %8794 = vmatpush1.bf16.xpose.msra.mxu0 %v20890_v25  ;;  %v20901_v25 = vld [vmem:[#allocation112_spill] sm:$0xff] }
 0x4f3   :  { %8796 = vmatprep.subr.bf16.mxu0 %v20891_v24  ;;  %v20902_v24 = vld [vmem:[#allocation172_spill] sm:$0xff] }
 0x4f4   :  { %9946 = vmatpush1.bf16.xpose.msra.mxu1 %v20892_v61  ;;  %v20903_v61 = vld [vmem:[#allocation177_spill] sm:$0xff] }
 0x4f5   :  { %9948 = vmatprep.subr.bf16.mxu1 %v20893_v43  ;;  %v20904_v43 = vld [vmem:[#allocation124_spill] sm:$0xff] }
 0x4fa   :  { %8798 = vmatpush1.bf16.xpose.msra.mxu0 %v20894_v27  ;;  %v20905_v27 = vld [vmem:[#allocation130_spill] sm:$0xff] }
 0x4fb   :  { %8800 = vmatprep.subr.bf16.mxu0 %v20895_v60  ;;  %v20906_v60 = vld [vmem:[#allocation174_spill] sm:$0xff] }
 0x4fc   :  { %9950 = vmatpush1.bf16.xpose.msra.mxu1 %v20896_v62  ;;  %v20907_v62 = vld [vmem:[#allocation175_spill] sm:$0xff] }
 0x4fd   :  { %9952 = vmatprep.subr.bf16.mxu1 %v20897_v48  ;;  %v20908_v48 = vld [vmem:[#allocation197_spill] sm:$0xff] }
 0x502   :  { %8802 = vmatpush1.bf16.xpose.msra.mxu0 %v20898_v34  ;;  %v20909_v34 = vld [vmem:[#allocation199_spill] sm:$0xff] }
 0x503   :  { %8804 = vmatprep.subr.bf16.mxu0 %v20899_v21 }
 0x504   :  { %9954 = vmatpush1.bf16.xpose.msra.mxu1 %v20900_v58  ;;  %v20910_v58 = vand.u32 4294901760, %v20548_v42  ;;  %v20918_v42 = vand.u32 4294901760, %v20578_v51  ;;  %v20927_v51 = vand.u32 4294901760, %v20600_v57 }
 0x505   :  { %9956 = vmatprep.subr.bf16.mxu1 %v20901_v25  ;;  %v20911_v25 = vand.u32 4294901760, %v20549_v2  ;;  %v20919_v2 = vand.u32 4294901760, %v20579_v8  ;;  %v20926_v8 = vand.u32 4294901760, %v20599_v12  ;;  %v20934_v12 = vand.u32 4294901760, %v20612_v44 }
 0x506   :  { %v20943_v44 = vand.u32 4294901760, %v20757_v45 }
 0x507   :  { %v8815_v21 = vpack.c.bf16 %v20911_v25, %v20910_v58  ;;  %v8819_v25 = vpack.c.bf16 %v20919_v2, %v20918_v42  ;;  %v20920_v58 = vld [vmem:[#allocation189_spill] sm:$0xff]  ;;  %v20933_v42 = vand.u32 4294901760, %v20606_v26  ;;  %v20940_v26 = vand.u32 4294901760, %v20622_v4 }
 0x508   :  { %v20947_v4 = vand.u32 4294901760, %v20761_v3 }
 0x50a   :  { %8806 = vmatpush1.bf16.xpose.msra.mxu0 %v20902_v24  ;;  %v20912_v24 = vld [vmem:[#allocation190_spill] sm:$0xff] }
 0x50b   :  { %8808 = vmatprep.subr.bf16.mxu0 %v20903_v61  ;;  %v20913_v61 = vand.u32 4294901760, %v20551_v7  ;;  %v20921_v7 = vand.u32 4294901760, %v20583_v41  ;;  %v20928_v41 = vand.u32 4294901760, %v20601_v13  ;;  %v20935_v13 = vand.u32 4294901760, %v20615_v22 }
 0x50c   :  { %9958 = vmatpush1.bf16.xpose.msra.mxu1 %v20904_v43  ;;  %v20914_v43 = vand.u32 4294901760, %v20552_v9  ;;  %v20942_v22 = vand.u32 4294901760, %v20629_v31  ;;  %v20951_v31 = vld [vmem:[#allocation126_spill] sm:$0xff] }
 0x50d   :  { %9960 = vmatprep.subr.bf16.mxu1 %v20905_v27  ;;  %v8825_v57 = vpack.c.bf16 %v20935_v13, %v20934_v12  ;;  %v20952_v45 = vand.u32 4294901760, %v20951_v31 }
 0x50e   :  { %v9967_v27 = vpack.c.bf16 %v20914_v43, %v20913_v61  ;;  %v20922_v61 = vand.u32 4294901760, %v20584_v28  ;;  %v20923_v43 = vand.u32 4294901760, %v20588_v23  ;;  %v8821_v28 = vpack.c.bf16 %v20927_v51, %v20926_v8 }
 0x50f   :  { %v20929_v23 = vand.u32 4294901760, %v20602_v20  ;;  %v20936_v20 = vand.u32 4294901760, %v20616_v56  ;;  %v20944_v56 = vand.u32 4294901760, %v20758_v11  ;;  %v20953_v11 = vld [vmem:[#allocation132_spill] sm:$0xff] }
 0x510   :  { %v9969_v9 = vpack.c.bf16 %v20922_v61, %v20921_v7  ;;  %v20941_v7 = vand.u32 4294901760, %v20623_v50  ;;  %v20948_v50 = vand.u32 4294901760, %v20762_v54  ;;  %v20954_v51 = vand.u32 4294901760, %v20953_v11  ;;  %v20987_v11 = vld [vmem:[#allocation42_spill] sm:$0xff] }
 0x512   :  { %8810 = vmatpush1.bf16.xpose.msra.mxu0 %v20906_v60  ;;  %v20915_v60 = vld [vmem:[#allocation200_spill] sm:$0xff]  ;;  %v9979_v61 = vpack.c.bf16 %v20941_v7, %v20940_v26  ;;  %v20973_v26 = vld [vmem:[#allocation19_spill] sm:$0xff] }
 0x513   :  { %8812 = vmatprep.subr.bf16.mxu0 %v20907_v62  ;;  %v20974_v7 = vand.u32 4294901760, %v20973_v26  ;;  %v21007_v26 = vld [vmem:[#allocation54_spill] sm:$0xff] }
 0x514   :  { %9962 = vmatpush1.bf16.xpose.msra.mxu1 %v20908_v48  ;;  %v20916_v48 = vand.u32 4294901760, %v20564_v18  ;;  %v20924_v18 = vand.u32 4294901760, %v20589_v33  ;;  %v8823_v33 = vpack.c.bf16 %v20929_v23, %v20928_v41 }
 0x515   :  { %9964 = vmatprep.subr.bf16.mxu1 %v20909_v34  ;;  %v20917_v34 = vand.u32 4294901760, %v20565_v47  ;;  %v20925_v47 = vld [vmem:[#allocation210_spill] sm:$0xff] }
 0x517   :  { %v8817_v62 = vpack.c.bf16 %v20917_v34, %v20916_v48  ;;  %v20930_v48 = vand.u32 4294901760, %v20603_v49  ;;  %v20931_v34 = vand.u32 4294901760, %v20604_v53  ;;  %v20937_v49 = vand.u32 4294901760, %v20617_v55 }
 0x518   :  { %v8829_v55 = vpack.c.bf16 %v20943_v44, %v20942_v22  ;;  %v20975_v22 = vld [vmem:[#allocation11_spill] sm:$0xff] }
 0x519   :  { %v8827_v53 = vpack.c.bf16 %v20937_v49, %v20936_v20  ;;  %v20969_v49 = vld [vmem:[#allocation10_spill] sm:$0xff]  ;;  %v20976_v44 = vand.u32 4294901760, %v20975_v22 }
 0x51a   :  { %8814 = vmatpush1.bf16.xpose.msra.mxu0 %v20912_v24 }
 0x51b   :  { %8816 = vmatprep.subr.bf16.mxu0 %v8815_v21  ;;  %v9971_v21 = vpack.c.bf16 %v20924_v18, %v20923_v43  ;;  %v20949_v18 = vld [vmem:[#allocation123_spill] sm:$0xff] }
 0x51c   :  { %9966 = vmatpush1.bf16.xpose.msra.mxu1 %v20915_v60 }
 0x51d   :  { %9968 = vmatprep.subr.bf16.mxu1 %v9967_v27  ;;  %v9973_v27 = vpack.c.bf16 %v20931_v34, %v20930_v48  ;;  %v20961_v34 = vld [vmem:[#allocation138_spill] sm:$0xff] }
 0x51e   :  { %v20962_v54 = vand.u32 4294901760, %v20961_v34  ;;  %v20995_v34 = vld [vmem:[#allocation48_spill] sm:$0xff] }
 0x521   :  { %2579 = vmatmul.mubr.f32.vlgmr.msra.gmra.mrb[0].mxu0 %v20920_v58 }
 0x522   :  { %8818 = vmatpush1.bf16.xpose.msra.mxu0 %v8817_v62  ;;  %2842 = vmatprep.mubr.f32.mxu0 %v20925_v47  ;;  %v20932_v62 = vand.u32 4294901760, %v20605_v19  ;;  %v20939_v19 = vand.u32 4294901760, %v20621_v59 }
 0x523   :  { %8820 = vmatprep.subr.bf16.mxu0 %v8819_v25  ;;  %6431 = vmatmul.mubr.f32.vlgmr.msra.gmra.mrb[0].mxu1 %v20920_v58  ;;  %v20938_v25 = vand.u32 4294901760, %v20619_v35  ;;  %v20945_v35 = vand.u32 4294901760, %v20759_v63  ;;  %v8833_v63 = vpack.c.bf16 %v20954_v51, %v20952_v45  ;;  %v20988_v51 = vand.u32 4294901760, %v20987_v11 }
 0x524   :  { %9970 = vmatpush1.bf16.xpose.msra.mxu1 %v9969_v9  ;;  %6694 = vmatprep.mubr.f32.mxu1 %v20925_v47  ;;  %v9975_v2 = vpack.c.bf16 %v20933_v42, %v20932_v62  ;;  %v20946_v9 = vand.u32 4294901760, %v20760_v46  ;;  %v20957_v46 = vld [vmem:[#allocation153_spill] sm:$0xff]  ;;  %v20963_v62 = vld [vmem:[#allocation151_spill] sm:$0xff] }
 0x525   :  { %9972 = vmatprep.subr.bf16.mxu1 %v9971_v21  ;;  %v9977_v58 = vpack.c.bf16 %v20939_v19, %v20938_v25  ;;  %v8831_v59 = vpack.c.bf16 %v20945_v35, %v20944_v56  ;;  %v20950_v21 = vand.u32 4294901760, %v20949_v18  ;;  %v20958_v23 = vand.u32 4294901760, %v20957_v46  ;;  %v20971_v19 = vld [vmem:[#allocation18_spill] sm:$0xff]  ;;  %v20983_v18 = vld [vmem:[#allocation33_spill] sm:$0xff] }
 0x526   :  { %v9981_v43 = vpack.c.bf16 %v20947_v4, %v20946_v9  ;;  %v20964_v42 = vand.u32 4294901760, %v20963_v62  ;;  %v20981_v4 = vld [vmem:[#allocation28_spill] sm:$0xff]  ;;  %v20991_v46 = vld [vmem:[#allocation29_spill] sm:$0xff] }
 0x527   :  { %v9983_v8 = vpack.c.bf16 %v20950_v21, %v20948_v50  ;;  %v20984_v21 = vand.u32 4294901760, %v20983_v18 }
 0x52a   :  { %8822 = vmatpush1.bf16.xpose.msra.mxu0 %v8821_v28  ;;  %v20955_v28 = vld [vmem:[#allocation144_spill] sm:$0xff] }
 0x52b   :  { %8824 = vmatprep.subr.bf16.mxu0 %v8823_v33  ;;  %v20956_v41 = vand.u32 4294901760, %v20955_v28  ;;  %v20959_v33 = vld [vmem:[#allocation139_spill] sm:$0xff] }
 0x52c   :  { %9974 = vmatpush1.bf16.xpose.msra.mxu1 %v9973_v27  ;;  %v20960_v48 = vand.u32 4294901760, %v20959_v33 }
 0x52d   :  { %9976 = vmatprep.subr.bf16.mxu1 %v9975_v2  ;;  %v8835_v3 = vpack.c.bf16 %v20958_v23, %v20956_v41  ;;  %v20965_v2 = vld [vmem:[#allocation203_spill] sm:$0xff]  ;;  %v20992_v23 = vand.u32 4294901760, %v20991_v46 }
 0x52e   :  { %v9985_v27 = vpack.c.bf16 %v20962_v54, %v20960_v48  ;;  %v20966_v12 = vand.u32 4294901760, %v20965_v2  ;;  %v20996_v54 = vand.u32 4294901760, %v20995_v34  ;;  %v20999_v2 = vld [vmem:[#allocation57_spill] sm:$0xff] }
 0x530   :  { %v9987_v13 = vpack.c.bf16 %v20966_v12, %v20964_v42  ;;  %v21000_v12 = vand.u32 4294901760, %v20999_v2 }
 0x532   :  { %8826 = vmatpush1.bf16.xpose.msra.mxu0 %v8825_v57  ;;  %v20967_v57 = vld [vmem:[#allocation9_spill] sm:$0xff] }
 0x533   :  { %8828 = vmatprep.subr.bf16.mxu0 %v8827_v53  ;;  %v20968_v20 = vand.u32 4294901760, %v20967_v57  ;;  %v20970_v53 = vand.u32 4294901760, %v20969_v49  ;;  %v21003_v49 = vld [vmem:[#allocation66_spill] sm:$0xff] }
 0x534   :  { %9978 = vmatpush1.bf16.xpose.msra.mxu1 %v9977_v58  ;;  %v20972_v58 = vand.u32 4294901760, %v20971_v19 }
 0x535   :  { %9980 = vmatprep.subr.bf16.mxu1 %v9979_v61  ;;  %v8837_v25 = vpack.c.bf16 %v20970_v53, %v20968_v20  ;;  %v21004_v53 = vand.u32 4294901760, %v21003_v49 }
 0x536   :  { %v8839_v61 = vpack.c.bf16 %v20974_v7, %v20972_v58  ;;  %v21008_v7 = vand.u32 4294901760, %v21007_v26 }
 0x53a   :  { %8830 = vmatpush1.bf16.xpose.msra.mxu0 %v8829_v55  ;;  %v20977_v55 = vld [vmem:[#allocation13_spill] sm:$0xff] }
 0x53b   :  { %8832 = vmatprep.subr.bf16.mxu0 %v8831_v59  ;;  %v20978_v56 = vand.u32 4294901760, %v20977_v55  ;;  %v20979_v59 = vld [vmem:[#allocation24_spill] sm:$0xff] }
 0x53c   :  { %9982 = vmatpush1.bf16.xpose.msra.mxu1 %v9981_v43  ;;  %v20980_v9 = vand.u32 4294901760, %v20979_v59  ;;  %v20982_v43 = vand.u32 4294901760, %v20981_v4  ;;  %v21011_v55 = vld [vmem:[#allocation72_spill] sm:$0xff]  ;;  %v21015_v4 = vld [vmem:[#allocation81_spill] sm:$0xff] }
 0x53d   :  { %9984 = vmatprep.subr.bf16.mxu1 %v9983_v8  ;;  %v9989_v35 = vpack.c.bf16 %v20978_v56, %v20976_v44  ;;  %v20985_v8 = vld [vmem:[#allocation34_spill] sm:$0xff]  ;;  %v21012_v56 = vand.u32 4294901760, %v21011_v55 }
 0x53e   :  { %v9991_v50 = vpack.c.bf16 %v20982_v43, %v20980_v9  ;;  %v20986_v31 = vand.u32 4294901760, %v20985_v8  ;;  %v21016_v43 = vand.u32 4294901760, %v21015_v4  ;;  %v21019_v8 = vld [vmem:[#allocation118_spill] sm:$0xff] }
 0x540   :  { %v8841_v45 = vpack.c.bf16 %v20986_v31, %v20984_v21  ;;  %v21020_v31 = vand.u32 4294901760, %v21019_v8 }
 0x542   :  { %8834 = vmatpush1.bf16.xpose.msra.mxu0 %v8833_v63  ;;  %v20989_v63 = vld [vmem:[#allocation43_spill] sm:$0xff] }
 0x543   :  { %8836 = vmatprep.subr.bf16.mxu0 %v8835_v3  ;;  %v20990_v28 = vand.u32 4294901760, %v20989_v63  ;;  %v20993_v3 = vld [vmem:[#allocation31_spill] sm:$0xff]  ;;  %v21023_v63 = vld [vmem:[#allocation78_spill] sm:$0xff] }
 0x544   :  { %9986 = vmatpush1.bf16.xpose.msra.mxu1 %v9985_v27  ;;  %v20994_v33 = vand.u32 4294901760, %v20993_v3  ;;  %v20997_v27 = vld [vmem:[#allocation52_spill] sm:$0xff]  ;;  %v21027_v3 = vld [vmem:[#allocation121_spill] sm:$0xff] }
 0x545   :  { %9988 = vmatprep.subr.bf16.mxu1 %v9987_v13  ;;  %v8843_v41 = vpack.c.bf16 %v20990_v28, %v20988_v51  ;;  %v20998_v62 = vand.u32 4294901760, %v20997_v27  ;;  %v21001_v13 = vld [vmem:[#allocation58_spill] sm:$0xff]  ;;  %v21024_v28 = vand.u32 4294901760, %v21023_v63  ;;  %v21031_v27 = vld [vmem:[#allocation135_spill] sm:$0xff] }
 0x546   :  { %v9993_v48 = vpack.c.bf16 %v20994_v33, %v20992_v23  ;;  %v21002_v57 = vand.u32 4294901760, %v21001_v13  ;;  %v21028_v33 = vand.u32 4294901760, %v21027_v3  ;;  %v21035_v13 = vld [vmem:[#allocation181_spill] sm:$0xff] }
 0x547   :  { %v9995_v42 = vpack.c.bf16 %v20998_v62, %v20996_v54  ;;  %v21032_v62 = vand.u32 4294901760, %v21031_v27 }
 0x548   :  { %v8845_v20 = vpack.c.bf16 %v21002_v57, %v21000_v12  ;;  %v21036_v57 = vand.u32 4294901760, %v21035_v13 }
 0x54a   :  { %8838 = vmatpush1.bf16.xpose.msra.mxu0 %v8837_v25  ;;  %v21005_v25 = vld [vmem:[#allocation67_spill] sm:$0xff] }
 0x54b   :  { %8840 = vmatprep.subr.bf16.mxu0 %v8839_v61  ;;  %v21006_v19 = vand.u32 4294901760, %v21005_v25  ;;  %v21009_v61 = vld [vmem:[#allocation55_spill] sm:$0xff]  ;;  %v21039_v25 = vld [vmem:[#allocation142_spill] sm:$0xff] }
 0x54c   :  { %9990 = vmatpush1.bf16.xpose.msra.mxu1 %v9989_v35  ;;  %v21010_v22 = vand.u32 4294901760, %v21009_v61  ;;  %v21013_v35 = vld [vmem:[#allocation76_spill] sm:$0xff] }
 0x54d   :  { %9992 = vmatprep.subr.bf16.mxu1 %v9991_v50  ;;  %v8847_v58 = vpack.c.bf16 %v21006_v19, %v21004_v53  ;;  %v21014_v59 = vand.u32 4294901760, %v21013_v35  ;;  %v21017_v50 = vld [vmem:[#allocation82_spill] sm:$0xff]  ;;  %v21040_v19 = vand.u32 4294901760, %v21039_v25  ;;  %v21043_v61 = vld [vmem:[#allocation184_spill] sm:$0xff]  ;;  %v21047_v35 = vld [vmem:[#allocation187_spill] sm:$0xff] }
 0x54e   :  { %v9997_v44 = vpack.c.bf16 %v21010_v22, %v21008_v7  ;;  %v21018_v18 = vand.u32 4294901760, %v21017_v50  ;;  %v21044_v22 = vand.u32 4294901760, %v21043_v61  ;;  %v21051_v50 = vld [vmem:[#allocation14_spill] sm:$0xff] }
 0x54f   :  { %v9999_v9 = vpack.c.bf16 %v21014_v59, %v21012_v56  ;;  %v21048_v59 = vand.u32 4294901760, %v21047_v35 }
 0x550   :  { %v8849_v21 = vpack.c.bf16 %v21018_v18, %v21016_v43  ;;  %v21052_v18 = vand.u32 4294901760, %v21051_v50 }
 0x552   :  { %8842 = vmatpush1.bf16.xpose.msra.mxu0 %v8841_v45  ;;  %v21021_v45 = vld [vmem:[#allocation115_spill] sm:$0xff] }
 0x553   :  { %8844 = vmatprep.subr.bf16.mxu0 %v8843_v41  ;;  %v21022_v11 = vand.u32 4294901760, %v21021_v45  ;;  %v21025_v41 = vld [vmem:[#allocation79_spill] sm:$0xff]  ;;  %v21055_v45 = vld [vmem:[#allocation193_spill] sm:$0xff] }
 0x554   :  { %9994 = vmatpush1.bf16.xpose.msra.mxu1 %v9993_v48  ;;  %v21026_v46 = vand.u32 4294901760, %v21025_v41  ;;  %v21029_v48 = vld [vmem:[#allocation127_spill] sm:$0xff]  ;;  %v21059_v41 = vld [vmem:[#allocation21_spill] sm:$0xff] }
 0x555   :  { %9996 = vmatprep.subr.bf16.mxu1 %v9995_v42  ;;  %v8851_v51 = vpack.c.bf16 %v21022_v11, %v21020_v31  ;;  %v21030_v34 = vand.u32 4294901760, %v21029_v48  ;;  %v21033_v42 = vld [vmem:[#allocation136_spill] sm:$0xff]  ;;  %v21056_v11 = vand.u32 4294901760, %v21055_v45 }
 0x556   :  { %v10001_v23 = vpack.c.bf16 %v21026_v46, %v21024_v28  ;;  %v21034_v2 = vand.u32 4294901760, %v21033_v42  ;;  %v21060_v46 = vand.u32 4294901760, %v21059_v41  ;;  %v21063_v48 = vld [vmem:[#allocation32_spill] sm:$0xff]  ;;  %v21067_v42 = vld [vmem:[#allocation59_spill] sm:$0xff]  ;;  %v21093_v41 = vand.u32 4294901760, %v20837_v36 }
 0x557   :  { %v10003_v54 = vpack.c.bf16 %v21030_v34, %v21028_v33  ;;  %v21064_v34 = vand.u32 4294901760, %v21063_v48  ;;  %v21097_v48 = vand.u32 4294901760, %v20840_v0  ;;  %v21103_v36 = vand.u32 4294901760, %v20746_v37 }
 0x558   :  { %v8853_v12 = vpack.c.bf16 %v21034_v2, %v21032_v62  ;;  %v21068_v2 = vand.u32 4294901760, %v21067_v42  ;;  %v21104_v42 = vand.u32 4294901760, %v20747_v10  ;;  %v21105_v0 = vand.u32 4294901760, %v20748_v1 }
 0x559   :  { %v21113_v10 = vand.u32 4294901760, %v20755_v32  ;;  %v21114_v1 = vand.u32 4294901760, %v20756_v16  ;;  %v14912_v16 = vld [vmem:[#allocation2 + $0x658] sm:$0xff] }
 0x55a   :  { %8846 = vmatpush1.bf16.xpose.msra.mxu0 %v8845_v20  ;;  %v21037_v20 = vld [vmem:[#allocation183_spill] sm:$0xff] }
 0x55b   :  { %8848 = vmatprep.subr.bf16.mxu0 %v8847_v58  ;;  %v21038_v49 = vand.u32 4294901760, %v21037_v20  ;;  %v21041_v58 = vld [vmem:[#allocation171_spill] sm:$0xff] }
 0x55c   :  { %9998 = vmatpush1.bf16.xpose.msra.mxu1 %v9997_v44  ;;  %v21042_v26 = vand.u32 4294901760, %v21041_v58  ;;  %v21045_v44 = vld [vmem:[#allocation186_spill] sm:$0xff]  ;;  %v21071_v20 = vld [vmem:[#allocation35_spill] sm:$0xff]  ;;  %v21075_v58 = vld [vmem:[#allocation68_spill] sm:$0xff] }
 0x55d   :  { %10000 = vmatprep.subr.bf16.mxu1 %v9999_v9  ;;  %v8855_v53 = vpack.c.bf16 %v21038_v49, %v21036_v57  ;;  %v21046_v55 = vand.u32 4294901760, %v21045_v44  ;;  %v21049_v9 = vld [vmem:[#allocation192_spill] sm:$0xff]  ;;  %v21072_v49 = vand.u32 4294901760, %v21071_v20 }
 0x55e   :  { %v10005_v7 = vpack.c.bf16 %v21042_v26, %v21040_v19  ;;  %v21050_v4 = vand.u32 4294901760, %v21049_v9  ;;  %v21076_v26 = vand.u32 4294901760, %v21075_v58  ;;  %v21079_v44 = vld [vmem:[#allocation80_spill] sm:$0xff]  ;;  %v21083_v9 = vld [vmem:[#allocation107_spill] sm:$0xff]  ;;  %v21117_v58 = vld [vmem:[#allocation185_spill] sm:$0xff] }
 0x55f   :  { %v10007_v56 = vpack.c.bf16 %v21046_v55, %v21044_v22  ;;  %v21080_v55 = vand.u32 4294901760, %v21079_v44  ;;  %v21110_v20 = vld [vmem:[#allocation208_spill] sm:$0xff]  ;;  %v18679_v44 = vand.u32 4294901760, %v14912_v16 }
 0x560   :  { %v8857_v43 = vpack.c.bf16 %v21050_v4, %v21048_v59  ;;  %v21084_v4 = vand.u32 4294901760, %v21083_v9  ;;  %v14933_v9 = vld [vmem:[#allocation2 + $0x50] sm:$0xff] }
 0x562   :  { %8850 = vmatpush1.bf16.xpose.msra.mxu0 %v8849_v21  ;;  %v21053_v21 = vld [vmem:[#allocation194_spill] sm:$0xff] }
 0x563   :  { %8852 = vmatprep.subr.bf16.mxu0 %v8851_v51  ;;  %v21054_v8 = vand.u32 4294901760, %v21053_v21  ;;  %v21057_v51 = vld [vmem:[#allocation196_spill] sm:$0xff]  ;;  %v21087_v21 = vand.u32 4294901760, %v20832_v40  ;;  %v21095_v40 = vld [vmem:[#allocation155_spill] sm:$0xff] }
 0x564   :  { %10002 = vmatpush1.bf16.xpose.msra.mxu1 %v10001_v23  ;;  %v21058_v63 = vand.u32 4294901760, %v21057_v51  ;;  %v21061_v23 = vld [vmem:[#allocation27_spill] sm:$0xff]  ;;  %v21091_v51 = vand.u32 4294901760, %v20835_v30  ;;  %v21100_v30 = vand.u32 4294901760, %v20842_v17 }
 0x565   :  { %10004 = vmatprep.subr.bf16.mxu1 %v10003_v54  ;;  %v8859_v31 = vpack.c.bf16 %v21054_v8, %v21052_v18  ;;  %v21062_v3 = vand.u32 4294901760, %v21061_v23  ;;  %v21065_v54 = vld [vmem:[#allocation30_spill] sm:$0xff]  ;;  %v21094_v23 = vand.u32 4294901760, %v20838_v52 }
 0x566   :  { %v10009_v28 = vpack.c.bf16 %v21058_v63, %v21056_v11  ;;  %v21066_v27 = vand.u32 4294901760, %v21065_v54  ;;  %v21088_v8 = vld [vmem:[#allocation86_spill] sm:$0xff]  ;;  %v21090_v11 = vand.u32 4294901760, %v20834_v29 }
 0x567   :  { %v10011_v33 = vpack.c.bf16 %v21062_v3, %v21060_v46  ;;  %v21096_v3 = vand.u32 4294901760, %v21095_v40  ;;  %v14975_v40 = vld [vmem:[#allocation2 + $0x88] sm:$0xff] }
 0x568   :  { %v8861_v62 = vpack.c.bf16 %v21066_v27, %v21064_v34  ;;  %v10019_v63 = vpack.c.bf16 %v21091_v51, %v21090_v11  ;;  %v21098_v34 = vld [vmem:[#allocation134_spill] sm:$0xff]  ;;  %v21101_v27 = vand.u32 4294901760, %v20843_v14  ;;  %v21109_v14 = vand.u32 4294901760, %v20845_v5  ;;  %v14903_v5 = vld [vmem:[#allocation2 + $0x28] sm:$0xff] }
 0x569   :  { %v21099_v29 = vand.u32 4294901760, %v21098_v34 }
 0x56a   :  { %8854 = vmatpush1.bf16.xpose.msra.mxu0 %v8853_v12  ;;  %v21069_v12 = vld [vmem:[#allocation62_spill] sm:$0xff] }
 0x56b   :  { %8856 = vmatprep.subr.bf16.mxu0 %v8855_v53  ;;  %v21070_v13 = vand.u32 4294901760, %v21069_v12  ;;  %v21073_v53 = vld [vmem:[#allocation38_spill] sm:$0xff]  ;;  %v10021_v54 = vpack.c.bf16 %v21099_v29, %v21097_v48  ;;  %v21106_v12 = vand.u32 4294901760, %v20750_v15  ;;  %v21115_v15 = vld [vmem:[#allocation211_spill] sm:$0xff]  ;;  %v21131_v48 = vld [vmem:[#allocation216_spill] sm:$0xff] }
 0x56c   :  { %10006 = vmatpush1.bf16.xpose.msra.mxu1 %v10005_v7  ;;  %v21074_v25 = vand.u32 4294901760, %v21073_v53  ;;  %v21077_v7 = vld [vmem:[#allocation74_spill] sm:$0xff] }
 0x56d   :  { %10008 = vmatprep.subr.bf16.mxu1 %v10007_v56  ;;  %v8863_v57 = vpack.c.bf16 %v21070_v13, %v21068_v2  ;;  %v21078_v61 = vand.u32 4294901760, %v21077_v7  ;;  %v21081_v56 = vld [vmem:[#allocation77_spill] sm:$0xff]  ;;  %v8875_v2 = vpack.c.bf16 %v21105_v0, %v21104_v42  ;;  %v21107_v13 = vld [vmem:[#allocation179_spill] sm:$0xff] }
 0x56e   :  { %v10013_v19 = vpack.c.bf16 %v21074_v25, %v21072_v49  ;;  %v21082_v35 = vand.u32 4294901760, %v21081_v56  ;;  %v21108_v17 = vand.u32 4294901760, %v21107_v13  ;;  %v21111_v49 = vand.u32 4294901760, %v21110_v20  ;;  %v14907_v7 = vld [vmem:[#allocation2 + $0x628] sm:$0xff]  ;;  %v14984_v29 = vld [vmem:[#allocation2 + $0x6b8] sm:$0xff] }
 0x56f   :  { %v10015_v22 = vpack.c.bf16 %v21078_v61, %v21076_v26  ;;  %v21116_v25 = vand.u32 4294901760, %v21115_v15  ;;  %v14905_v26 = vld [vmem:[#allocation2 + $0x58] sm:$0xff] }
 0x570   :  { %v8865_v59 = vpack.c.bf16 %v21082_v35, %v21080_v55  ;;  %v10027_v53 = vpack.c.bf16 %v21111_v49, %v21109_v14  ;;  %v21118_v61 = vld [vmem:[#allocation195_spill] sm:$0xff]  ;;  %v18682_v32 = vand.u32 4294901760, %v14905_v26  ;;  %v21139_v20 = vld [vmem:[#allocation218_spill] sm:$0xff] }
 0x571   :  { %v15045_v15 = vld [vmem:[#allocation2 + $0x118] sm:$0xff] }
 0x572   :  { %8858 = vmatpush1.bf16.xpose.msra.mxu0 %v8857_v43  ;;  %v21085_v43 = vld [vmem:[#allocation110_spill] sm:$0xff]  ;;  %v14924_v56 = vsub.f32 %v14905_v26, %v18682_v32 }
 0x573   :  { %8860 = vmatprep.subr.bf16.mxu0 %v8859_v31  ;;  %v21086_v50 = vand.u32 4294901760, %v21085_v43  ;;  %v21089_v31 = vand.u32 4294901760, %v21088_v8  ;;  %v21122_v43 = vld [vmem:[#allocation178_spill] sm:$0xff] }
 0x574   :  { %10010 = vmatpush1.bf16.xpose.msra.mxu1 %v10009_v28  ;;  %v21092_v28 = vand.u32 4294901760, %v20836_v38  ;;  %v21102_v38 = vand.u32 4294901760, %v20745_v6  ;;  %v21112_v6 = vand.u32 4294901760, %v13447_v39  ;;  %v18683_v39 = vand.u32 4294901760, %v14903_v5  ;;  %21120 = vst [vmem:[#allocation12_spill] sm:$0xff] %v14924_v56  ;;  %v14945_v8 = vld [vmem:[#allocation2 + $0x650] sm:$0xff] }
 0x575   :  { %10012 = vmatprep.subr.bf16.mxu1 %v10011_v33  ;;  %v8867_v18 = vpack.c.bf16 %v21086_v50, %v21084_v4  ;;  %v10017_v45 = vpack.c.bf16 %v21089_v31, %v21087_v21  ;;  %v8871_v33 = vpack.c.bf16 %v21096_v3, %v21094_v23  ;;  %v14935_v4 = vld [vmem:[#allocation2 + $0x620] sm:$0xff]  ;;  %v14941_v50 = vsub.f32 %v14912_v16, %v18679_v44  ;;  %v14977_v3 = vld [vmem:[#allocation2 + $0xb8] sm:$0xff]  ;;  %v15147_v32 = vld [vmem:[#allocation2 + $0x770] sm:$0xff] }
 0x576   :  { %v8869_v46 = vpack.c.bf16 %v21093_v41, %v21092_v28  ;;  %v8873_v52 = vpack.c.bf16 %v21103_v36, %v21102_v38  ;;  %v8877_v37 = vpack.c.bf16 %v21113_v10, %v21112_v6  ;;  %v14919_v55 = vsub.f32 %v14903_v5, %v18683_v39  ;;  %v21124_v31 = vld [vmem:[#allocation212_spill] sm:$0xff]  ;;  %v21128_v41 = vld [vmem:[#allocation215_spill] sm:$0xff]  ;;  %v15351_v56 = vld [vmem:[#allocation2 + $0x890] sm:$0xff] }
 0x577   :  { %21123 = vst [vmem:[#allocation44_spill] sm:$0xff] %v14941_v50  ;;  %v18676_v21 = vand.u32 4294901760, %v14933_v9  ;;  %v18669_v28 = vand.u32 4294901760, %v14945_v8  ;;  %v18674_v34 = vand.u32 4294901760, %v14977_v3  ;;  %v21140_v6 = vld [vmem:[#allocation219_spill] sm:$0xff]  ;;  %21211 = vst [vmem:[#allocation191_spill] sm:$0xff] %v15351_v56 }
 0x578   :  { %21119 = vst [vmem:[#allocation8_spill] sm:$0xff] %v14919_v55  ;;  %v15123_v44 = vld [vmem:[#allocation2 + $0x140] sm:$0xff] }
 0x579   :  { %v14958_v51 = vsub.f32 %v14933_v9, %v18676_v21  ;;  %v14973_v23 = vsub.f32 %v14945_v8, %v18669_v28 }
 0x57a   :  { %8862 = vmatpush1.bf16.xpose.msra.mxu0 %v8861_v62  ;;  %v10023_v62 = vpack.c.bf16 %v21101_v27, %v21100_v30  ;;  %v14987_v30 = vld [vmem:[#allocation2 + $0x80] sm:$0xff]  ;;  %v14989_v27 = vld [vmem:[#allocation2 + $0xb0] sm:$0xff] }
 0x57b   :  { %8864 = vmatprep.subr.bf16.mxu0 %v8863_v57  ;;  %v10025_v57 = vpack.c.bf16 %v21108_v17, %v21106_v12  ;;  %21127 = vst [vmem:[#allocation17_spill] sm:$0xff] %v14958_v51  ;;  %21130 = vst [vmem:[#allocation47_spill] sm:$0xff] %v14973_v23  ;;  %v18663_v38 = vand.u32 4294901760, %v14987_v30  ;;  %v18662_v0 = vand.u32 4294901760, %v14989_v27  ;;  %v15011_v12 = vld [vmem:[#allocation2 + $0x6b0] sm:$0xff] }
 0x57c   :  { %10014 = vmatpush1.bf16.xpose.msra.mxu1 %v10013_v19  ;;  %v10029_v19 = vpack.c.bf16 %v21116_v25, %v21114_v1  ;;  %v21136_v17 = vld [vmem:[#allocation217_spill] sm:$0xff] }
 0x57d   :  { %10016 = vmatprep.subr.bf16.mxu1 %v10015_v22  ;;  %v18681_v22 = vand.u32 4294901760, %v14907_v7  ;;  %v15027_v14 = vsub.f32 %v14989_v27, %v18662_v0  ;;  %v15043_v1 = vld [vmem:[#allocation2 + $0xe8] sm:$0xff]  ;;  %v15077_v0 = vld [vmem:[#allocation2 + $0x6e0] sm:$0xff]  ;;  %v15283_v23 = vld [vmem:[#allocation2 + $0x830] sm:$0xff] }
 0x57e   :  { %v15047_v25 = vld [vmem:[#allocation2 + $0x6e8] sm:$0xff]  ;;  %v18678_v28 = vand.u32 4294901760, %v15077_v0  ;;  %21189 = vst [vmem:[#allocation111_spill] sm:$0xff] %v15283_v23  ;;  %v18746_v50 = vand.u32 4294901760, %v15283_v23 }
 0x57f   :  { %v14929_v35 = vsub.f32 %v14907_v7, %v18681_v22  ;;  %21138 = vst [vmem:[#allocation65_spill] sm:$0xff] %v15027_v14  ;;  %v15145_v22 = vld [vmem:[#allocation2 + $0x740] sm:$0xff] }
 0x581   :  { %21121 = vst [vmem:[#allocation202_spill] sm:$0xff] %v14929_v35  ;;  %v15324_v35 = vld [vmem:[#allocation2 + $0x898] sm:$0xff] }
 0x582   :  { %8866 = vmatpush1.bf16.xpose.msra.mxu0 %v8865_v59  ;;  %v14931_v59 = vld [vmem:[#allocation2 + $0x20] sm:$0xff]  ;;  %21204 = vst [vmem:[#allocation201_spill] sm:$0xff] %v15324_v35 }
 0x583   :  { %8868 = vmatprep.subr.bf16.mxu0 %v8867_v18  ;;  %v18677_v18 = vand.u32 4294901760, %v14931_v59 }
 0x584   :  { %10018 = vmatpush1.bf16.xpose.msra.mxu1 %v10017_v45  ;;  %v21125_v45 = vld [vmem:[#allocation214_spill] sm:$0xff] }
 0x585   :  { %10020 = vmatprep.subr.bf16.mxu1 %v10019_v63  ;;  %v14953_v11 = vsub.f32 %v14931_v59, %v18677_v18  ;;  %v18670_v63 = vand.u32 4294901760, %v14935_v4  ;;  %v15120_v18 = vld [vmem:[#allocation2 + $0x778] sm:$0xff] }
 0x587   :  { %21126 = vst [vmem:[#allocation41_spill] sm:$0xff] %v14953_v11 }
 0x58a   :  { %8870 = vmatpush1.bf16.xpose.msra.mxu0 %v8869_v46  ;;  %v14968_v46 = vsub.f32 %v14935_v4, %v18670_v63 }
 0x58b   :  { %8872 = vmatprep.subr.bf16.mxu0 %v8871_v33  ;;  %v14979_v33 = vld [vmem:[#allocation2 + $0x688] sm:$0xff] }
 0x58c   :  { %10022 = vmatpush1.bf16.xpose.msra.mxu1 %v10021_v54  ;;  %21129 = vst [vmem:[#allocation23_spill] sm:$0xff] %v14968_v46  ;;  %v18668_v54 = vand.u32 4294901760, %v14979_v33 }
 0x58d   :  { %10024 = vmatprep.subr.bf16.mxu1 %v10023_v62  ;;  %v18665_v62 = vand.u32 4294901760, %v14984_v29 }
 0x58e   :  { %v15006_v42 = vsub.f32 %v14979_v33, %v18668_v54  ;;  %v21151_v54 = vld [vmem:[#allocation222_spill] sm:$0xff] }
 0x58f   :  { %v15016_v13 = vsub.f32 %v14984_v29, %v18665_v62  ;;  %v21148_v62 = vld [vmem:[#allocation221_spill] sm:$0xff] }
 0x590   :  { %21134 = vst [vmem:[#allocation53_spill] sm:$0xff] %v15006_v42  ;;  %v15256_v42 = vld [vmem:[#allocation2 + $0x838] sm:$0xff] }
 0x591   :  { %21135 = vst [vmem:[#allocation92_spill] sm:$0xff] %v15016_v13  ;;  %v21190_v51 = vand.u32 4294901760, %v15256_v42 }
 0x592   :  { %8874 = vmatpush1.bf16.xpose.msra.mxu0 %v8873_v52  ;;  %v15001_v52 = vsub.f32 %v14977_v3, %v18674_v34  ;;  %v15113_v34 = vld [vmem:[#allocation2 + $0x178] sm:$0xff] }
 0x593   :  { %8876 = vmatprep.subr.bf16.mxu0 %v8875_v2  ;;  %v15009_v2 = vld [vmem:[#allocation2 + $0x680] sm:$0xff]  ;;  %v18689_v21 = vand.u32 4294901760, %v15113_v34 }
 0x594   :  { %10026 = vmatpush1.bf16.xpose.msra.mxu1 %v10025_v57  ;;  %21133 = vst [vmem:[#allocation56_spill] sm:$0xff] %v15001_v52  ;;  %v15022_v57 = vsub.f32 %v14987_v30, %v18663_v38  ;;  %v18661_v49 = vand.u32 4294901760, %v15009_v2  ;;  %v15079_v38 = vld [vmem:[#allocation2 + $0x710] sm:$0xff] }
 0x595   :  { %10028 = vmatprep.subr.bf16.mxu1 %v10027_v53  ;;  %v18660_v53 = vand.u32 4294901760, %v15011_v12  ;;  %v18680_v63 = vand.u32 4294901760, %v15079_v38  ;;  %v15137_v39 = vsub.f32 %v15113_v34, %v18689_v21  ;;  %v21162_v21 = vand.u32 4294901760, %v15123_v44 }
 0x596   :  { %21137 = vst [vmem:[#allocation89_spill] sm:$0xff] %v15022_v57  ;;  %v15036_v10 = vsub.f32 %v15009_v2, %v18661_v49 }
 0x597   :  { %21157 = vst [vmem:[#allocation162_spill] sm:$0xff] %v15137_v39  ;;  %v15158_v39 = vsub.f32 %v15123_v44, %v21162_v21 }
 0x598   :  { %21141 = vst [vmem:[#allocation71_spill] sm:$0xff] %v15036_v10 }
 0x599   :  { %21163 = vst [vmem:[#allocation146_spill] sm:$0xff] %v15158_v39  ;;  %v21169_v39 = vld [vmem:[#allocation228_spill] sm:$0xff] }
 0x59a   :  { %8878 = vmatpush1.bf16.xpose.msra.mxu0 %v8877_v37  ;;  %v15041_v37 = vsub.f32 %v15011_v12, %v18660_v53 }
 0x59b   :  { %8880 = vmatprep.subr.bf16.mxu0 %v21117_v58  ;;  %v18664_v58 = vand.u32 4294901760, %v15043_v1 }
 0x59c   :  { %10030 = vmatpush1.bf16.xpose.msra.mxu1 %v10029_v19  ;;  %21142 = vst [vmem:[#allocation95_spill] sm:$0xff] %v15041_v37  ;;  %v21143_v19 = vld [vmem:[#allocation220_spill] sm:$0xff]  ;;  %v15215_v37 = vld [vmem:[#allocation2 + $0x7d0] sm:$0xff] }
 0x59d   :  { %10032 = vmatprep.subr.bf16.mxu1 %v21118_v61  ;;  %v18666_v61 = vand.u32 4294901760, %v15045_v15  ;;  %v18724_v13 = vand.u32 4294901760, %v15215_v37 }
 0x5a1   :  { %2844 = vmatmul.mubr.f32.vlgmr.msra.gmra.mrb[0].mxu0 %v21122_v43 }
 0x5a2   :  { %8882 = vmatpush1.bf16.xpose.msra.mxu0 %v21124_v31  ;;  %2979 = vmatprep.mubr.f32.mxu0 %v20925_v47  ;;  %v15052_v31 = vld [vmem:[#allocation2 + $0x718] sm:$0xff] }
 0x5a3   :  { %8884 = vmatprep.subr.bf16.mxu0 %v21125_v45  ;;  %6696 = vmatmul.mubr.f32.vlgmr.msra.gmra.mrb[0].mxu1 %v21122_v43  ;;  %v18667_v45 = vand.u32 4294901760, %v15047_v25 }
 0x5a4   :  { %10034 = vmatpush1.bf16.xpose.msra.mxu1 %v21128_v41  ;;  %6831 = vmatprep.mubr.f32.mxu1 %v20925_v47  ;;  %v18675_v47 = vand.u32 4294901760, %v14975_v40  ;;  %v15055_v41 = vld [vmem:[#allocation2 + $0xe0] sm:$0xff] }
 0x5a5   :  { %10036 = vmatprep.subr.bf16.mxu1 %v21131_v48  ;;  %v15057_v48 = vld [vmem:[#allocation2 + $0x110] sm:$0xff]  ;;  %v15074_v53 = vsub.f32 %v15047_v25, %v18667_v45 }
 0x5a6   :  { %v14996_v36 = vsub.f32 %v14975_v40, %v18675_v47  ;;  %v18673_v49 = vand.u32 4294901760, %v15057_v48  ;;  %v21155_v47 = vld [vmem:[#allocation224_spill] sm:$0xff] }
 0x5a7   :  { %21146 = vst [vmem:[#allocation101_spill] sm:$0xff] %v15074_v53  ;;  %v15188_v53 = vld [vmem:[#allocation2 + $0x7d8] sm:$0xff] }
 0x5a8   :  { %21132 = vst [vmem:[#allocation50_spill] sm:$0xff] %v14996_v36  ;;  %v15095_v45 = vsub.f32 %v15057_v48, %v18673_v49  ;;  %v15111_v49 = vld [vmem:[#allocation2 + $0x148] sm:$0xff]  ;;  %v21173_v14 = vand.u32 4294901760, %v15188_v53 }
 0x5aa   :  { %8886 = vmatpush1.bf16.xpose.msra.mxu0 %v21136_v17  ;;  %v18671_v17 = vand.u32 4294901760, %v15052_v31  ;;  %21150 = vst [vmem:[#allocation119_spill] sm:$0xff] %v15095_v45  ;;  %v21159_v45 = vand.u32 4294901760, %v15120_v18 }
 0x5ab   :  { %8888 = vmatprep.subr.bf16.mxu0 %v21139_v20  ;;  %v18672_v20 = vand.u32 4294901760, %v15055_v41 }
 0x5ac   :  { %10038 = vmatpush1.bf16.xpose.msra.mxu1 %v21140_v6  ;;  %v15064_v6 = vsub.f32 %v15043_v1, %v18664_v58  ;;  %v15084_v58 = vsub.f32 %v15052_v31, %v18671_v17  ;;  %v21152_v17 = vld [vmem:[#allocation223_spill] sm:$0xff] }
 0x5ad   :  { %10040 = vmatprep.subr.bf16.mxu1 %v21143_v19  ;;  %v15069_v19 = vsub.f32 %v15045_v15, %v18666_v61  ;;  %v15090_v61 = vsub.f32 %v15055_v41, %v18672_v20  ;;  %v15109_v20 = vsub.f32 %v15079_v38, %v18680_v63  ;;  %v15125_v63 = vld [vmem:[#allocation2 + $0x170] sm:$0xff] }
 0x5ae   :  { %21144 = vst [vmem:[#allocation98_spill] sm:$0xff] %v15064_v6  ;;  %21147 = vst [vmem:[#allocation140_spill] sm:$0xff] %v15084_v58  ;;  %v18702_v58 = vand.u32 4294901760, %v15147_v32 }
 0x5af   :  { %21145 = vst [vmem:[#allocation104_spill] sm:$0xff] %v15069_v19  ;;  %21149 = vst [vmem:[#allocation113_spill] sm:$0xff] %v15090_v61  ;;  %v18700_v61 = vand.u32 4294901760, %v15145_v22 }
 0x5b0   :  { %21154 = vst [vmem:[#allocation143_spill] sm:$0xff] %v15109_v20  ;;  %v15177_v21 = vsub.f32 %v15147_v32, %v18702_v58  ;;  %v15193_v58 = vld [vmem:[#allocation2 + $0x1d0] sm:$0xff] }
 0x5b1   :  { %v18717_v6 = vand.u32 4294901760, %v15193_v58 }
 0x5b2   :  { %8890 = vmatpush1.bf16.xpose.msra.mxu0 %v21148_v62  ;;  %v15104_v62 = vsub.f32 %v15077_v0, %v18678_v28  ;;  %21168 = vst [vmem:[#allocation133_spill] sm:$0xff] %v15177_v21  ;;  %v15213_v21 = vld [vmem:[#allocation2 + $0x7a0] sm:$0xff] }
 0x5b3   :  { %8892 = vmatprep.subr.bf16.mxu0 %v21151_v54  ;;  %v15115_v54 = vld [vmem:[#allocation2 + $0x748] sm:$0xff]  ;;  %v18722_v57 = vand.u32 4294901760, %v15213_v21 }
 0x5b4   :  { %10042 = vmatpush1.bf16.xpose.msra.mxu1 %v21152_v17  ;;  %21153 = vst [vmem:[#allocation137_spill] sm:$0xff] %v15104_v62  ;;  %v18687_v17 = vand.u32 4294901760, %v15111_v49  ;;  %v18691_v28 = vand.u32 4294901760, %v15115_v54  ;;  %v18695_v62 = vand.u32 4294901760, %v15125_v63 }
 0x5b5   :  { %10044 = vmatprep.subr.bf16.mxu1 %v21155_v47 }
 0x5b6   :  { %v15132_v47 = vsub.f32 %v15111_v49, %v18687_v17  ;;  %v15142_v20 = vsub.f32 %v15115_v54, %v18691_v28  ;;  %v15152_v17 = vsub.f32 %v15120_v18, %v21159_v45  ;;  %v15163_v28 = vsub.f32 %v15125_v63, %v18695_v62  ;;  %v21166_v45 = vld [vmem:[#allocation227_spill] sm:$0xff]  ;;  %v15179_v62 = vld [vmem:[#allocation2 + $0x1a8] sm:$0xff] }
 0x5b8   :  { %21156 = vst [vmem:[#allocation129_spill] sm:$0xff] %v15132_v47  ;;  %21158 = vst [vmem:[#allocation114_spill] sm:$0xff] %v15142_v20  ;;  %v21161_v47 = vld [vmem:[#allocation225_spill] sm:$0xff]  ;;  %v21165_v20 = vld [vmem:[#allocation226_spill] sm:$0xff] }
 0x5b9   :  { %21160 = vst [vmem:[#allocation117_spill] sm:$0xff] %v15152_v17  ;;  %21164 = vst [vmem:[#allocation152_spill] sm:$0xff] %v15163_v28  ;;  %v15181_v28 = vld [vmem:[#allocation2 + $0x1d8] sm:$0xff] }
 0x5ba   :  { %8894 = vmatpush1.bf16.xpose.msra.mxu0 %v21161_v47  ;;  %v15172_v47 = vsub.f32 %v15145_v22, %v18700_v61  ;;  %v18711_v17 = vand.u32 4294901760, %v15181_v28 }
 0x5bb   :  { %8896 = vmatprep.subr.bf16.mxu0 %v21165_v20  ;;  %v15183_v20 = vld [vmem:[#allocation2 + $0x7a8] sm:$0xff] }
 0x5bc   :  { %10046 = vmatpush1.bf16.xpose.msra.mxu1 %v21166_v45  ;;  %21167 = vst [vmem:[#allocation120_spill] sm:$0xff] %v15172_v47  ;;  %v18709_v45 = vand.u32 4294901760, %v15179_v62  ;;  %v18713_v61 = vand.u32 4294901760, %v15183_v20  ;;  %v15191_v47 = vld [vmem:[#allocation2 + $0x1a0] sm:$0xff]  ;;  %v15205_v10 = vsub.f32 %v15181_v28, %v18711_v17 }
 0x5bd   :  { %10048 = vmatprep.subr.bf16.mxu1 %v21169_v39  ;;  %v21176_v17 = vand.u32 4294901760, %v15191_v47 }
 0x5be   :  { %v15200_v39 = vsub.f32 %v15179_v62, %v18709_v45  ;;  %21171 = vst [vmem:[#allocation161_spill] sm:$0xff] %v15205_v10  ;;  %v15210_v19 = vsub.f32 %v15183_v20, %v18713_v61  ;;  %v15220_v45 = vsub.f32 %v15188_v53, %v21173_v14  ;;  %v15231_v61 = vsub.f32 %v15193_v58, %v18717_v6  ;;  %v21180_v14 = vld [vmem:[#allocation231_spill] sm:$0xff]  ;;  %v15247_v6 = vld [vmem:[#allocation2 + $0x208] sm:$0xff] }
 0x5bf   :  { %v15226_v10 = vsub.f32 %v15191_v47, %v21176_v17  ;;  %v15245_v17 = vsub.f32 %v15215_v37, %v18724_v13  ;;  %v15261_v13 = vld [vmem:[#allocation2 + $0x230] sm:$0xff] }
 0x5c0   :  { %21170 = vst [vmem:[#allocation164_spill] sm:$0xff] %v15200_v39  ;;  %21172 = vst [vmem:[#allocation182_spill] sm:$0xff] %v15210_v19  ;;  %v21175_v39 = vld [vmem:[#allocation229_spill] sm:$0xff]  ;;  %v21179_v19 = vld [vmem:[#allocation230_spill] sm:$0xff]  ;;  %v18739_v36 = vand.u32 4294901760, %v15261_v13 }
 0x5c1   :  { %21174 = vst [vmem:[#allocation188_spill] sm:$0xff] %v15220_v45  ;;  %21177 = vst [vmem:[#allocation145_spill] sm:$0xff] %v15226_v10  ;;  %v21183_v10 = vld [vmem:[#allocation232_spill] sm:$0xff] }
 0x5c2   :  { %8898 = vmatpush1.bf16.xpose.msra.mxu0 %v21175_v39  ;;  %21178 = vst [vmem:[#allocation147_spill] sm:$0xff] %v15231_v61  ;;  %v15240_v39 = vsub.f32 %v15213_v21, %v18722_v57  ;;  %21182 = vst [vmem:[#allocation141_spill] sm:$0xff] %v15245_v17  ;;  %v15249_v61 = vld [vmem:[#allocation2 + $0x238] sm:$0xff]  ;;  %v15281_v17 = vld [vmem:[#allocation2 + $0x800] sm:$0xff] }
 0x5c3   :  { %8900 = vmatprep.subr.bf16.mxu0 %v21179_v19  ;;  %v15251_v19 = vld [vmem:[#allocation2 + $0x808] sm:$0xff]  ;;  %v18733_v45 = vand.u32 4294901760, %v15249_v61  ;;  %21184 = vst [vmem:[#allocation148_spill] sm:$0xff] %v15261_v13  ;;  %21188 = vst [vmem:[#allocation163_spill] sm:$0xff] %v15281_v17  ;;  %v18744_v11 = vand.u32 4294901760, %v15281_v17 }
 0x5c4   :  { %10050 = vmatpush1.bf16.xpose.msra.mxu1 %v21180_v14  ;;  %21181 = vst [vmem:[#allocation108_spill] sm:$0xff] %v15240_v39  ;;  %v18731_v14 = vand.u32 4294901760, %v15247_v6  ;;  %v18735_v57 = vand.u32 4294901760, %v15251_v19  ;;  %v15259_v39 = vld [vmem:[#allocation2 + $0x200] sm:$0xff] }
 0x5c5   :  { %10052 = vmatprep.subr.bf16.mxu1 %v21183_v10  ;;  %v15273_v46 = vsub.f32 %v15249_v61, %v18733_v45  ;;  %v21193_v45 = vand.u32 4294901760, %v15259_v39 }
 0x5c6   :  { %v15268_v10 = vsub.f32 %v15247_v6, %v18731_v14  ;;  %v15278_v52 = vsub.f32 %v15251_v19, %v18735_v57  ;;  %v15288_v14 = vsub.f32 %v15256_v42, %v21190_v51  ;;  %v15299_v57 = vsub.f32 %v15261_v13, %v18739_v36  ;;  %v21197_v51 = vld [vmem:[#allocation150_spill] sm:$0xff]  ;;  %v15315_v36 = vld [vmem:[#allocation2 + $0x268] sm:$0xff] }
 0x5c7   :  { %21186 = vst [vmem:[#allocation156_spill] sm:$0xff] %v15273_v46  ;;  %v15294_v46 = vsub.f32 %v15259_v39, %v21193_v45  ;;  %v15313_v45 = vsub.f32 %v15283_v23, %v18746_v50  ;;  %21200 = vst [vmem:[#allocation169_spill] sm:$0xff] %v15315_v36  ;;  %v15329_v50 = vld [vmem:[#allocation2 + $0x290] sm:$0xff]  ;;  %v21212_v13 = vand.u32 4294901760, %v15324_v35 }
 0x5c8   :  { %21185 = vst [vmem:[#allocation154_spill] sm:$0xff] %v15268_v10  ;;  %21187 = vst [vmem:[#allocation157_spill] sm:$0xff] %v15278_v52  ;;  %v21192_v10 = vld [vmem:[#allocation233_spill] sm:$0xff]  ;;  %v21196_v52 = vld [vmem:[#allocation15_spill] sm:$0xff] }
 0x5c9   :  { %21191 = vst [vmem:[#allocation159_spill] sm:$0xff] %v15288_v14  ;;  %21194 = vst [vmem:[#allocation160_spill] sm:$0xff] %v15294_v46  ;;  %v21203_v46 = vld [vmem:[#allocation204_spill] sm:$0xff] }
 0x5ca   :  { %8902 = vmatpush1.bf16.xpose.msra.mxu0 %v21192_v10  ;;  %21195 = vst [vmem:[#allocation165_spill] sm:$0xff] %v15299_v57  ;;  %v15308_v10 = vsub.f32 %v15281_v17, %v18744_v11  ;;  %21199 = vst [vmem:[#allocation168_spill] sm:$0xff] %v15313_v45  ;;  %v15317_v57 = vld [vmem:[#allocation2 + $0x298] sm:$0xff]  ;;  %v18761_v17 = vand.u32 4294901760, %v15329_v50  ;;  %v15349_v45 = vld [vmem:[#allocation2 + $0x860] sm:$0xff] }
 0x5cb   :  { %8904 = vmatprep.subr.bf16.mxu0 %v21196_v52  ;;  %21201 = vst [vmem:[#allocation94_spill] sm:$0xff] %v15317_v57  ;;  %v15319_v52 = vld [vmem:[#allocation2 + $0x868] sm:$0xff]  ;;  %v18755_v14 = vand.u32 4294901760, %v15317_v57  ;;  %21206 = vst [vmem:[#allocation91_spill] sm:$0xff] %v15329_v50 }
 0x5cc   :  { %10054 = vmatpush1.bf16.xpose.msra.mxu1 %v21197_v51  ;;  %21198 = vst [vmem:[#allocation166_spill] sm:$0xff] %v15308_v10  ;;  %21202 = vst [vmem:[#allocation90_spill] sm:$0xff] %v15319_v52  ;;  %v18753_v51 = vand.u32 4294901760, %v15315_v36  ;;  %v18757_v11 = vand.u32 4294901760, %v15319_v52  ;;  %v15327_v10 = vld [vmem:[#allocation2 + $0x260] sm:$0xff] }
 0x5cd   :  { %10056 = vmatprep.subr.bf16.mxu1 %v21203_v46  ;;  %21205 = vst [vmem:[#allocation93_spill] sm:$0xff] %v15327_v10  ;;  %v15341_v55 = vsub.f32 %v15317_v57, %v18755_v14  ;;  %21210 = vst [vmem:[#allocation176_spill] sm:$0xff] %v15349_v45  ;;  %v21215_v14 = vand.u32 4294901760, %v15327_v10  ;;  %v18768_v57 = vand.u32 4294901760, %v15351_v56 }
 0x5ce   :  { %v15336_v46 = vsub.f32 %v15315_v36, %v18753_v51  ;;  %v15346_v23 = vsub.f32 %v15319_v52, %v18757_v11  ;;  %v15356_v51 = vsub.f32 %v15324_v35, %v21212_v13  ;;  %v15367_v11 = vsub.f32 %v15329_v50, %v18761_v17  ;;  %v21219_v13 = vld [vmem:[#allocation22_spill] sm:$0xff]  ;;  %v15383_v17 = vld [vmem:[#allocation2 + $0x2c8] sm:$0xff] }
 0x5cf   :  { %21208 = vst [vmem:[#allocation97_spill] sm:$0xff] %v15341_v55  ;;  %v15362_v55 = vsub.f32 %v15327_v10, %v21215_v14  ;;  %v18766_v52 = vand.u32 4294901760, %v15349_v45  ;;  %v15381_v14 = vsub.f32 %v15351_v56, %v18768_v57  ;;  %21222 = vst [vmem:[#allocation106_spill] sm:$0xff] %v15383_v17  ;;  %v15392_v50 = vld [vmem:[#allocation2 + $0x8f8] sm:$0xff]  ;;  %v15397_v57 = vld [vmem:[#allocation2 + $0x2f0] sm:$0xff] }
 0x5d0   :  { %21207 = vst [vmem:[#allocation96_spill] sm:$0xff] %v15336_v46  ;;  %21209 = vst [vmem:[#allocation170_spill] sm:$0xff] %v15346_v23  ;;  %v21214_v46 = vld [vmem:[#allocation16_spill] sm:$0xff]  ;;  %v18783_v35 = vand.u32 4294901760, %v15397_v57  ;;  %v15419_v56 = vld [vmem:[#allocation2 + $0x8f0] sm:$0xff]  ;;  %v21234_v36 = vand.u32 4294901760, %v15392_v50 }
 0x5d1   :  { %21213 = vst [vmem:[#allocation206_spill] sm:$0xff] %v15356_v51  ;;  %21216 = vst [vmem:[#allocation173_spill] sm:$0xff] %v15362_v55  ;;  %v21218_v23 = vld [vmem:[#allocation20_spill] sm:$0xff]  ;;  %v21225_v55 = vld [vmem:[#allocation205_spill] sm:$0xff] }
 0x5d2   :  { %8906 = vmatpush1.bf16.xpose.msra.mxu0 %v21214_v46  ;;  %21217 = vst [vmem:[#allocation209_spill] sm:$0xff] %v15367_v11  ;;  %v15376_v46 = vsub.f32 %v15349_v45, %v18766_v52  ;;  %21221 = vst [vmem:[#allocation99_spill] sm:$0xff] %v15381_v14  ;;  %v15385_v11 = vld [vmem:[#allocation2 + $0x2f8] sm:$0xff]  ;;  %v15417_v14 = vld [vmem:[#allocation2 + $0x8c0] sm:$0xff] }
 0x5d3   :  { %8908 = vmatprep.subr.bf16.mxu0 %v21218_v23  ;;  %21223 = vst [vmem:[#allocation102_spill] sm:$0xff] %v15385_v11  ;;  %v15387_v23 = vld [vmem:[#allocation2 + $0x8c8] sm:$0xff]  ;;  %v18777_v51 = vand.u32 4294901760, %v15385_v11  ;;  %21226 = vst [vmem:[#allocation105_spill] sm:$0xff] %v15392_v50 }
 0x5d4   :  { %10058 = vmatpush1.bf16.xpose.msra.mxu1 %v21219_v13  ;;  %21220 = vst [vmem:[#allocation198_spill] sm:$0xff] %v15376_v46  ;;  %21224 = vst [vmem:[#allocation100_spill] sm:$0xff] %v15387_v23  ;;  %v18775_v13 = vand.u32 4294901760, %v15383_v17  ;;  %v18779_v52 = vand.u32 4294901760, %v15387_v23  ;;  %v15395_v46 = vld [vmem:[#allocation2 + $0x2c0] sm:$0xff] }
 0x5d5   :  { %10060 = vmatprep.subr.bf16.mxu1 %v21225_v55  ;;  %21227 = vst [vmem:[#allocation103_spill] sm:$0xff] %v15395_v46  ;;  %21228 = vst [vmem:[#allocation83_spill] sm:$0xff] %v15397_v57  ;;  %v15409_v45 = vsub.f32 %v15385_v11, %v18777_v51  ;;  %v21237_v51 = vand.u32 4294901760, %v15395_v46  ;;  %v18790_v11 = vand.u32 4294901760, %v15419_v56 }
 0x5d6   :  { %v15404_v55 = vsub.f32 %v15383_v17, %v18775_v13  ;;  %v15414_v10 = vsub.f32 %v15387_v23, %v18779_v52  ;;  %21232 = vst [vmem:[#allocation125_spill] sm:$0xff] %v15417_v14  ;;  %21233 = vst [vmem:[#allocation149_spill] sm:$0xff] %v15419_v56  ;;  %v15424_v13 = vsub.f32 %v15392_v50, %v21234_v36  ;;  %v18788_v23 = vand.u32 4294901760, %v15417_v14  ;;  %v21241_v36 = vld [vmem:[#allocation25_spill] sm:$0xff] }
 0x5d7   :  { %21230 = vst [vmem:[#allocation122_spill] sm:$0xff] %v15409_v45  ;;  %v15430_v45 = vsub.f32 %v15395_v46, %v21237_v51  ;;  %v15435_v52 = vsub.f32 %v15397_v57, %v18783_v35  ;;  %v15449_v51 = vsub.f32 %v15419_v56, %v18790_v11  ;;  %v15451_v35 = vld [vmem:[#allocation2 + $0x328] sm:$0xff]  ;;  %v15460_v57 = vld [vmem:[#allocation2 + $0x958] sm:$0xff]  ;;  %v15465_v11 = vld [vmem:[#allocation2 + $0x350] sm:$0xff] }
 0x5d8   :  { %21229 = vst [vmem:[#allocation116_spill] sm:$0xff] %v15404_v55  ;;  %21231 = vst [vmem:[#allocation128_spill] sm:$0xff] %v15414_v10  ;;  %v21236_v55 = vld [vmem:[#allocation36_spill] sm:$0xff]  ;;  %v21240_v10 = vld [vmem:[#allocation37_spill] sm:$0xff]  ;;  %v18805_v50 = vand.u32 4294901760, %v15465_v11  ;;  %v21256_v17 = vand.u32 4294901760, %v15460_v57 }
 0x5d9   :  { %21235 = vst [vmem:[#allocation131_spill] sm:$0xff] %v15424_v13  ;;  %21238 = vst [vmem:[#allocation158_spill] sm:$0xff] %v15430_v45  ;;  %v21247_v45 = vld [vmem:[#allocation26_spill] sm:$0xff] }
 0x5da   :  { %8910 = vmatpush1.bf16.xpose.msra.mxu0 %v21236_v55  ;;  %21239 = vst [vmem:[#allocation167_spill] sm:$0xff] %v15435_v52  ;;  %v15444_v55 = vsub.f32 %v15417_v14, %v18788_v23  ;;  %21243 = vst [vmem:[#allocation180_spill] sm:$0xff] %v15449_v51  ;;  %v15453_v52 = vld [vmem:[#allocation2 + $0x358] sm:$0xff]  ;;  %v15485_v51 = vld [vmem:[#allocation2 + $0x920] sm:$0xff] }
 0x5db   :  { %8912 = vmatprep.subr.bf16.mxu0 %v21240_v10  ;;  %21244 = vst [vmem:[#allocation213_spill] sm:$0xff] %v15451_v35  ;;  %21245 = vst [vmem:[#allocation190_spill] sm:$0xff] %v15453_v52  ;;  %v15455_v10 = vld [vmem:[#allocation2 + $0x928] sm:$0xff]  ;;  %v18799_v13 = vand.u32 4294901760, %v15453_v52  ;;  %v15487_v56 = vld [vmem:[#allocation2 + $0x950] sm:$0xff] }
 0x5dc   :  { %10062 = vmatpush1.bf16.xpose.msra.mxu1 %v21241_v36  ;;  %21242 = vst [vmem:[#allocation207_spill] sm:$0xff] %v15444_v55  ;;  %21246 = vst [vmem:[#allocation200_spill] sm:$0xff] %v15455_v10  ;;  %v18797_v36 = vand.u32 4294901760, %v15451_v35  ;;  %v18801_v23 = vand.u32 4294901760, %v15455_v10  ;;  %v15463_v55 = vld [vmem:[#allocation2 + $0x320] sm:$0xff] }
 0x5dd   :  { %10064 = vmatprep.subr.bf16.mxu1 %v21247_v45  ;;  %21248 = vst [vmem:[#allocation189_spill] sm:$0xff] %v15460_v57  ;;  %21249 = vst [vmem:[#allocation210_spill] sm:$0xff] %v15463_v55  ;;  %v15477_v14 = vsub.f32 %v15453_v52, %v18799_v13  ;;  %v21259_v13 = vand.u32 4294901760, %v15463_v55  ;;  %v18812_v52 = vand.u32 4294901760, %v15487_v56 }
 0x5de   :  { %21250 = vst [vmem:[#allocation123_spill] sm:$0xff] %v15465_v11  ;;  %v15472_v45 = vsub.f32 %v15451_v35, %v18797_v36  ;;  %v15482_v46 = vsub.f32 %v15455_v10, %v18801_v23  ;;  %21254 = vst [vmem:[#allocation153_spill] sm:$0xff] %v15485_v51  ;;  %v15492_v36 = vsub.f32 %v15460_v57, %v21256_v17  ;;  %v18810_v10 = vand.u32 4294901760, %v15485_v51  ;;  %v21263_v17 = vld [vmem:[#allocation45_spill] sm:$0xff] }
 0x5df   :  { %21252 = vst [vmem:[#allocation132_spill] sm:$0xff] %v15477_v14  ;;  %21255 = vst [vmem:[#allocation139_spill] sm:$0xff] %v15487_v56  ;;  %v15498_v14 = vsub.f32 %v15463_v55, %v21259_v13  ;;  %v15503_v23 = vsub.f32 %v15465_v11, %v18805_v50  ;;  %v15517_v13 = vsub.f32 %v15487_v56, %v18812_v52  ;;  %v15519_v50 = vld [vmem:[#allocation2 + $0x388] sm:$0xff]  ;;  %v15528_v11 = vld [vmem:[#allocation2 + $0x9b8] sm:$0xff] }
 0x5e0   :  { %21251 = vst [vmem:[#allocation126_spill] sm:$0xff] %v15472_v45  ;;  %21253 = vst [vmem:[#allocation144_spill] sm:$0xff] %v15482_v46  ;;  %v21258_v45 = vld [vmem:[#allocation39_spill] sm:$0xff]  ;;  %v21262_v46 = vld [vmem:[#allocation40_spill] sm:$0xff]  ;;  %v21278_v35 = vand.u32 4294901760, %v15528_v11 }
 0x5e1   :  { %21257 = vst [vmem:[#allocation138_spill] sm:$0xff] %v15492_v36  ;;  %21260 = vst [vmem:[#allocation151_spill] sm:$0xff] %v15498_v14  ;;  %v21269_v14 = vld [vmem:[#allocation46_spill] sm:$0xff] }
 0x5e2   :  { %8914 = vmatpush1.bf16.xpose.msra.mxu0 %v21258_v45  ;;  %21261 = vst [vmem:[#allocation203_spill] sm:$0xff] %v15503_v23  ;;  %v15512_v45 = vsub.f32 %v15485_v51, %v18810_v10  ;;  %21265 = vst [vmem:[#allocation10_spill] sm:$0xff] %v15517_v13  ;;  %v15521_v23 = vld [vmem:[#allocation2 + $0x3b8] sm:$0xff]  ;;  %v15533_v52 = vld [vmem:[#allocation2 + $0x3b0] sm:$0xff] }
 0x5e3   :  { %8916 = vmatprep.subr.bf16.mxu0 %v21262_v46  ;;  %21266 = vst [vmem:[#allocation18_spill] sm:$0xff] %v15519_v50  ;;  %21267 = vst [vmem:[#allocation19_spill] sm:$0xff] %v15521_v23  ;;  %v15523_v46 = vld [vmem:[#allocation2 + $0x988] sm:$0xff]  ;;  %v18821_v36 = vand.u32 4294901760, %v15521_v23  ;;  %v18827_v57 = vand.u32 4294901760, %v15533_v52  ;;  %v15553_v13 = vld [vmem:[#allocation2 + $0x980] sm:$0xff] }
 0x5e4   :  { %10066 = vmatpush1.bf16.xpose.msra.mxu1 %v21263_v17  ;;  %21264 = vst [vmem:[#allocation9_spill] sm:$0xff] %v15512_v45  ;;  %21268 = vst [vmem:[#allocation11_spill] sm:$0xff] %v15523_v46  ;;  %v18819_v17 = vand.u32 4294901760, %v15519_v50  ;;  %v18823_v10 = vand.u32 4294901760, %v15523_v46  ;;  %v15531_v45 = vld [vmem:[#allocation2 + $0x380] sm:$0xff]  ;;  %v15555_v56 = vld [vmem:[#allocation2 + $0x9b0] sm:$0xff] }
 0x5e5   :  { %10068 = vmatprep.subr.bf16.mxu1 %v21269_v14  ;;  %21270 = vst [vmem:[#allocation13_spill] sm:$0xff] %v15528_v11  ;;  %21271 = vst [vmem:[#allocation24_spill] sm:$0xff] %v15531_v45  ;;  %v15545_v51 = vsub.f32 %v15521_v23, %v18821_v36  ;;  %v21281_v36 = vand.u32 4294901760, %v15531_v45  ;;  %v18834_v23 = vand.u32 4294901760, %v15555_v56 }
 0x5e6   :  { %21272 = vst [vmem:[#allocation28_spill] sm:$0xff] %v15533_v52  ;;  %v15540_v14 = vsub.f32 %v15519_v50, %v18819_v17  ;;  %v15550_v55 = vsub.f32 %v15523_v46, %v18823_v10  ;;  %21276 = vst [vmem:[#allocation43_spill] sm:$0xff] %v15553_v13  ;;  %v15560_v17 = vsub.f32 %v15528_v11, %v21278_v35  ;;  %v18832_v46 = vand.u32 4294901760, %v15553_v13  ;;  %v21285_v35 = vld [vmem:[#allocation49_spill] sm:$0xff] }
 0x5e7   :  { %21274 = vst [vmem:[#allocation34_spill] sm:$0xff] %v15545_v51  ;;  %21277 = vst [vmem:[#allocation29_spill] sm:$0xff] %v15555_v56  ;;  %v15566_v51 = vsub.f32 %v15531_v45, %v21281_v36  ;;  %v15571_v10 = vsub.f32 %v15533_v52, %v18827_v57  ;;  %v15585_v36 = vsub.f32 %v15555_v56, %v18834_v23  ;;  %v15587_v57 = vld [vmem:[#allocation2 + $0x3e8] sm:$0xff]  ;;  %v15596_v52 = vld [vmem:[#allocation2 + $0xa18] sm:$0xff] }
 0x5e8   :  { %21273 = vst [vmem:[#allocation33_spill] sm:$0xff] %v15540_v14  ;;  %21275 = vst [vmem:[#allocation42_spill] sm:$0xff] %v15550_v55  ;;  %v21280_v14 = vld [vmem:[#allocation60_spill] sm:$0xff]  ;;  %v21284_v55 = vld [vmem:[#allocation61_spill] sm:$0xff]  ;;  %v21300_v50 = vand.u32 4294901760, %v15596_v52 }
 0x5e9   :  { %21279 = vst [vmem:[#allocation31_spill] sm:$0xff] %v15560_v17  ;;  %21282 = vst [vmem:[#allocation48_spill] sm:$0xff] %v15566_v51  ;;  %v21291_v51 = vld [vmem:[#allocation51_spill] sm:$0xff]  ;;  %v15601_v23 = vld [vmem:[#allocation2 + $0x410] sm:$0xff] }
 0x5ea   :  { %8918 = vmatpush1.bf16.xpose.msra.mxu0 %v21280_v14  ;;  %21283 = vst [vmem:[#allocation52_spill] sm:$0xff] %v15571_v10  ;;  %v15580_v14 = vsub.f32 %v15553_v13, %v18832_v46  ;;  %21287 = vst [vmem:[#allocation58_spill] sm:$0xff] %v15585_v36  ;;  %v15589_v10 = vld [vmem:[#allocation2 + $0x418] sm:$0xff]  ;;  %v18849_v11 = vand.u32 4294901760, %v15601_v23  ;;  %v15621_v36 = vld [vmem:[#allocation2 + $0x9e0] sm:$0xff] }
 0x5eb   :  { %8920 = vmatprep.subr.bf16.mxu0 %v21284_v55  ;;  %21288 = vst [vmem:[#allocation66_spill] sm:$0xff] %v15587_v57  ;;  %21289 = vst [vmem:[#allocation67_spill] sm:$0xff] %v15589_v10  ;;  %v15591_v55 = vld [vmem:[#allocation2 + $0x9e8] sm:$0xff]  ;;  %v18843_v17 = vand.u32 4294901760, %v15589_v10  ;;  %v15623_v56 = vld [vmem:[#allocation2 + $0xa10] sm:$0xff] }
 0x5ec   :  { %10070 = vmatpush1.bf16.xpose.msra.mxu1 %v21285_v35  ;;  %21286 = vst [vmem:[#allocation57_spill] sm:$0xff] %v15580_v14  ;;  %21290 = vst [vmem:[#allocation54_spill] sm:$0xff] %v15591_v55  ;;  %v18841_v35 = vand.u32 4294901760, %v15587_v57  ;;  %v18845_v46 = vand.u32 4294901760, %v15591_v55  ;;  %v15599_v14 = vld [vmem:[#allocation2 + $0x3e0] sm:$0xff] }
 0x5ed   :  { %10072 = vmatprep.subr.bf16.mxu1 %v21291_v51  ;;  %21292 = vst [vmem:[#allocation55_spill] sm:$0xff] %v15596_v52  ;;  %21293 = vst [vmem:[#allocation72_spill] sm:$0xff] %v15599_v14  ;;  %v15613_v13 = vsub.f32 %v15589_v10, %v18843_v17  ;;  %v21303_v17 = vand.u32 4294901760, %v15599_v14  ;;  %v18856_v10 = vand.u32 4294901760, %v15623_v56 }
 0x5ee   :  { %21294 = vst [vmem:[#allocation76_spill] sm:$0xff] %v15601_v23  ;;  %v15608_v51 = vsub.f32 %v15587_v57, %v18841_v35  ;;  %v15618_v45 = vsub.f32 %v15591_v55, %v18845_v46  ;;  %21298 = vst [vmem:[#allocation115_spill] sm:$0xff] %v15621_v36  ;;  %v15628_v35 = vsub.f32 %v15596_v52, %v21300_v50  ;;  %v18854_v55 = vand.u32 4294901760, %v15621_v36  ;;  %v21307_v50 = vld [vmem:[#allocation69_spill] sm:$0xff] }
 0x5ef   :  { %21296 = vst [vmem:[#allocation82_spill] sm:$0xff] %v15613_v13  ;;  %21299 = vst [vmem:[#allocation78_spill] sm:$0xff] %v15623_v56  ;;  %v15634_v13 = vsub.f32 %v15599_v14, %v21303_v17  ;;  %v15639_v46 = vsub.f32 %v15601_v23, %v18849_v11  ;;  %v15653_v17 = vsub.f32 %v15623_v56, %v18856_v10  ;;  %v15655_v11 = vld [vmem:[#allocation2 + $0x448] sm:$0xff]  ;;  %v15664_v23 = vld [vmem:[#allocation2 + $0xa78] sm:$0xff] }
 0x5f0   :  { %21295 = vst [vmem:[#allocation81_spill] sm:$0xff] %v15608_v51  ;;  %21297 = vst [vmem:[#allocation118_spill] sm:$0xff] %v15618_v45  ;;  %v21302_v51 = vld [vmem:[#allocation63_spill] sm:$0xff]  ;;  %v21306_v45 = vld [vmem:[#allocation64_spill] sm:$0xff]  ;;  %v21322_v57 = vand.u32 4294901760, %v15664_v23 }
 0x5f1   :  { %21301 = vst [vmem:[#allocation79_spill] sm:$0xff] %v15628_v35  ;;  %21304 = vst [vmem:[#allocation121_spill] sm:$0xff] %v15634_v13  ;;  %v21313_v13 = vld [vmem:[#allocation70_spill] sm:$0xff] }
 0x5f2   :  { %8922 = vmatpush1.bf16.xpose.msra.mxu0 %v21302_v51  ;;  %21305 = vst [vmem:[#allocation127_spill] sm:$0xff] %v15639_v46  ;;  %v15648_v51 = vsub.f32 %v15621_v36, %v18854_v55  ;;  %21309 = vst [vmem:[#allocation136_spill] sm:$0xff] %v15653_v17  ;;  %v15657_v46 = vld [vmem:[#allocation2 + $0x478] sm:$0xff]  ;;  %v15669_v10 = vld [vmem:[#allocation2 + $0x470] sm:$0xff] }
 0x5f3   :  { %8924 = vmatprep.subr.bf16.mxu0 %v21306_v45  ;;  %21310 = vst [vmem:[#allocation181_spill] sm:$0xff] %v15655_v11  ;;  %21311 = vst [vmem:[#allocation183_spill] sm:$0xff] %v15657_v46  ;;  %v15659_v45 = vld [vmem:[#allocation2 + $0xa48] sm:$0xff]  ;;  %v18865_v35 = vand.u32 4294901760, %v15657_v46  ;;  %v18871_v52 = vand.u32 4294901760, %v15669_v10  ;;  %v15689_v17 = vld [vmem:[#allocation2 + $0xa40] sm:$0xff] }
 0x5f4   :  { %10074 = vmatpush1.bf16.xpose.msra.mxu1 %v21307_v50  ;;  %21308 = vst [vmem:[#allocation135_spill] sm:$0xff] %v15648_v51  ;;  %21312 = vst [vmem:[#allocation142_spill] sm:$0xff] %v15659_v45  ;;  %v18863_v50 = vand.u32 4294901760, %v15655_v11  ;;  %v18867_v55 = vand.u32 4294901760, %v15659_v45  ;;  %v15667_v51 = vld [vmem:[#allocation2 + $0x440] sm:$0xff]  ;;  %v15691_v56 = vld [vmem:[#allocation2 + $0xa70] sm:$0xff] }
 0x5f5   :  { %10076 = vmatprep.subr.bf16.mxu1 %v21313_v13  ;;  %21314 = vst [vmem:[#allocation171_spill] sm:$0xff] %v15664_v23  ;;  %21315 = vst [vmem:[#allocation184_spill] sm:$0xff] %v15667_v51  ;;  %v15681_v36 = vsub.f32 %v15657_v46, %v18865_v35  ;;  %v21325_v35 = vand.u32 4294901760, %v15667_v51  ;;  %v18878_v46 = vand.u32 4294901760, %v15691_v56 }
 0x5f6   :  { %21316 = vst [vmem:[#allocation186_spill] sm:$0xff] %v15669_v10  ;;  %v15676_v13 = vsub.f32 %v15655_v11, %v18863_v50  ;;  %v15686_v14 = vsub.f32 %v15659_v45, %v18867_v55  ;;  %21320 = vst [vmem:[#allocation194_spill] sm:$0xff] %v15689_v17  ;;  %v15696_v50 = vsub.f32 %v15664_v23, %v21322_v57  ;;  %v18876_v45 = vand.u32 4294901760, %v15689_v17  ;;  %v21329_v57 = vld [vmem:[#allocation73_spill] sm:$0xff] }
 0x5f7   :  { %21318 = vst [vmem:[#allocation192_spill] sm:$0xff] %v15681_v36  ;;  %21321 = vst [vmem:[#allocation193_spill] sm:$0xff] %v15691_v56  ;;  %v15702_v36 = vsub.f32 %v15667_v51, %v21325_v35  ;;  %v15707_v55 = vsub.f32 %v15669_v10, %v18871_v52  ;;  %v15721_v35 = vsub.f32 %v15691_v56, %v18878_v46  ;;  %v15723_v52 = vld [vmem:[#allocation2 + $0x4a8] sm:$0xff]  ;;  %v15732_v10 = vld [vmem:[#allocation2 + $0xad8] sm:$0xff] }
 0x5f8   :  { %21317 = vst [vmem:[#allocation187_spill] sm:$0xff] %v15676_v13  ;;  %21319 = vst [vmem:[#allocation14_spill] sm:$0xff] %v15686_v14  ;;  %v21324_v13 = vld [vmem:[#allocation84_spill] sm:$0xff]  ;;  %v21328_v14 = vld [vmem:[#allocation85_spill] sm:$0xff]  ;;  %v21344_v11 = vand.u32 4294901760, %v15732_v10 }
 0x5f9   :  { %21323 = vst [vmem:[#allocation196_spill] sm:$0xff] %v15696_v50  ;;  %21326 = vst [vmem:[#allocation21_spill] sm:$0xff] %v15702_v36  ;;  %v21335_v36 = vld [vmem:[#allocation75_spill] sm:$0xff]  ;;  %v15737_v46 = vld [vmem:[#allocation2 + $0x4d0] sm:$0xff] }
 0x5fa   :  { %8926 = vmatpush1.bf16.xpose.msra.mxu0 %v21324_v13  ;;  %21327 = vst [vmem:[#allocation27_spill] sm:$0xff] %v15707_v55  ;;  %v15716_v13 = vsub.f32 %v15689_v17, %v18876_v45  ;;  %21331 = vst [vmem:[#allocation30_spill] sm:$0xff] %v15721_v35  ;;  %v15725_v55 = vld [vmem:[#allocation2 + $0x4d8] sm:$0xff]  ;;  %v18893_v23 = vand.u32 4294901760, %v15737_v46  ;;  %v15757_v35 = vld [vmem:[#allocation2 + $0xaa0] sm:$0xff] }
 0x5fb   :  { %8928 = vmatprep.subr.bf16.mxu0 %v21328_v14  ;;  %21332 = vst [vmem:[#allocation59_spill] sm:$0xff] %v15723_v52  ;;  %21333 = vst [vmem:[#allocation62_spill] sm:$0xff] %v15725_v55  ;;  %v15727_v14 = vld [vmem:[#allocation2 + $0xaa8] sm:$0xff]  ;;  %v18887_v50 = vand.u32 4294901760, %v15725_v55  ;;  %v15759_v56 = vld [vmem:[#allocation2 + $0xad0] sm:$0xff] }
 0x5fc   :  { %10078 = vmatpush1.bf16.xpose.msra.mxu1 %v21329_v57  ;;  %21330 = vst [vmem:[#allocation32_spill] sm:$0xff] %v15716_v13  ;;  %21334 = vst [vmem:[#allocation35_spill] sm:$0xff] %v15727_v14  ;;  %v18885_v57 = vand.u32 4294901760, %v15723_v52  ;;  %v18889_v45 = vand.u32 4294901760, %v15727_v14  ;;  %v15735_v13 = vld [vmem:[#allocation2 + $0x4a0] sm:$0xff] }
 0x5fd   :  { %10080 = vmatprep.subr.bf16.mxu1 %v21335_v36  ;;  %21336 = vst [vmem:[#allocation38_spill] sm:$0xff] %v15732_v10  ;;  %21337 = vst [vmem:[#allocation68_spill] sm:$0xff] %v15735_v13  ;;  %v15749_v17 = vsub.f32 %v15725_v55, %v18887_v50  ;;  %v21347_v50 = vand.u32 4294901760, %v15735_v13  ;;  %v18900_v55 = vand.u32 4294901760, %v15759_v56 }
 0x5fe   :  { %21338 = vst [vmem:[#allocation74_spill] sm:$0xff] %v15737_v46  ;;  %v15744_v36 = vsub.f32 %v15723_v52, %v18885_v57  ;;  %v15754_v51 = vsub.f32 %v15727_v14, %v18889_v45  ;;  %21342 = vst [vmem:[#allocation110_spill] sm:$0xff] %v15757_v35  ;;  %v15764_v57 = vsub.f32 %v15732_v10, %v21344_v11  ;;  %v18898_v14 = vand.u32 4294901760, %v15757_v35  ;;  %v21351_v11 = vld [vmem:[#allocation109_spill] sm:$0xff] }
 0x5ff   :  { %21340 = vst [vmem:[#allocation77_spill] sm:$0xff] %v15749_v17  ;;  %21343 = vst [vmem:[#allocation86_spill] sm:$0xff] %v15759_v56  ;;  %v15770_v17 = vsub.f32 %v15735_v13, %v21347_v50  ;;  %v15775_v45 = vsub.f32 %v15737_v46, %v18893_v23  ;;  %v15789_v50 = vsub.f32 %v15759_v56, %v18900_v55  ;;  %v15791_v23 = vld [vmem:[#allocation2 + $0x508] sm:$0xff]  ;;  %v15800_v46 = vld [vmem:[#allocation2 + $0xb38] sm:$0xff] }
 0x600   :  { %21339 = vst [vmem:[#allocation80_spill] sm:$0xff] %v15744_v36  ;;  %21341 = vst [vmem:[#allocation107_spill] sm:$0xff] %v15754_v51  ;;  %v21346_v36 = vld [vmem:[#allocation87_spill] sm:$0xff]  ;;  %v21350_v51 = vld [vmem:[#allocation88_spill] sm:$0xff]  ;;  %v21366_v52 = vand.u32 4294901760, %v15800_v46 }
 0x601   :  { %21345 = vst [vmem:[#allocation155_spill] sm:$0xff] %v15764_v57  ;;  %21348 = vst [vmem:[#allocation134_spill] sm:$0xff] %v15770_v17  ;;  %v21357_v17 = vld [vmem:[#allocation112_spill] sm:$0xff]  ;;  %v15805_v55 = vld [vmem:[#allocation2 + $0x530] sm:$0xff] }
 0x602   :  { %8930 = vmatpush1.bf16.xpose.msra.mxu0 %v21346_v36  ;;  %21349 = vst [vmem:[#allocation179_spill] sm:$0xff] %v15775_v45  ;;  %v15784_v36 = vsub.f32 %v15757_v35, %v18898_v14  ;;  %21353 = vst [vmem:[#allocation211_spill] sm:$0xff] %v15789_v50  ;;  %v15793_v45 = vld [vmem:[#allocation2 + $0x538] sm:$0xff]  ;;  %v18915_v10 = vand.u32 4294901760, %v15805_v55  ;;  %v15825_v50 = vld [vmem:[#allocation2 + $0xb00] sm:$0xff] }
 0x603   :  { %8932 = vmatprep.subr.bf16.mxu0 %v21350_v51  ;;  %21354 = vst [vmem:[#allocation185_spill] sm:$0xff] %v15791_v23  ;;  %21355 = vst [vmem:[#allocation195_spill] sm:$0xff] %v15793_v45  ;;  %v15795_v51 = vld [vmem:[#allocation2 + $0xb08] sm:$0xff]  ;;  %v18909_v57 = vand.u32 4294901760, %v15793_v45  ;;  %v15827_v56 = vld [vmem:[#allocation2 + $0xb30] sm:$0xff] }
 0x604   :  { %10082 = vmatpush1.bf16.xpose.msra.mxu1 %v21351_v11  ;;  %21352 = vst [vmem:[#allocation208_spill] sm:$0xff] %v15784_v36  ;;  %21356 = vst [vmem:[#allocation178_spill] sm:$0xff] %v15795_v51  ;;  %v18907_v11 = vand.u32 4294901760, %v15791_v23  ;;  %v18911_v14 = vand.u32 4294901760, %v15795_v51  ;;  %v15803_v36 = vld [vmem:[#allocation2 + $0x500] sm:$0xff] }
 0x605   :  { %10084 = vmatprep.subr.bf16.mxu1 %v21357_v17  ;;  %21358 = vst [vmem:[#allocation212_spill] sm:$0xff] %v15800_v46  ;;  %21359 = vst [vmem:[#allocation214_spill] sm:$0xff] %v15803_v36  ;;  %v15817_v35 = vsub.f32 %v15793_v45, %v18909_v57  ;;  %v21369_v57 = vand.u32 4294901760, %v15803_v36  ;;  %v18922_v45 = vand.u32 4294901760, %v15827_v56 }
 0x606   :  { %21360 = vst [vmem:[#allocation215_spill] sm:$0xff] %v15805_v55  ;;  %v15812_v17 = vsub.f32 %v15791_v23, %v18907_v11  ;;  %v15822_v13 = vsub.f32 %v15795_v51, %v18911_v14  ;;  %21364 = vst [vmem:[#allocation219_spill] sm:$0xff] %v15825_v50  ;;  %v15832_v11 = vsub.f32 %v15800_v46, %v21366_v52  ;;  %v18920_v51 = vand.u32 4294901760, %v15825_v50  ;;  %v21373_v52 = vld [vmem:[#allocation124_spill] sm:$0xff] }
 0x607   :  { %21362 = vst [vmem:[#allocation217_spill] sm:$0xff] %v15817_v35  ;;  %21365 = vst [vmem:[#allocation220_spill] sm:$0xff] %v15827_v56  ;;  %v15838_v35 = vsub.f32 %v15803_v36, %v21369_v57  ;;  %v15843_v14 = vsub.f32 %v15805_v55, %v18915_v10  ;;  %v15857_v57 = vsub.f32 %v15827_v56, %v18922_v45  ;;  %v15859_v10 = vld [vmem:[#allocation2 + $0x568] sm:$0xff]  ;;  %v15868_v55 = vld [vmem:[#allocation2 + $0xb98] sm:$0xff] }
 0x608   :  { %21361 = vst [vmem:[#allocation216_spill] sm:$0xff] %v15812_v17  ;;  %21363 = vst [vmem:[#allocation218_spill] sm:$0xff] %v15822_v13  ;;  %v21368_v17 = vld [vmem:[#allocation172_spill] sm:$0xff]  ;;  %v21372_v13 = vld [vmem:[#allocation177_spill] sm:$0xff]  ;;  %v21387_v23 = vand.u32 4294901760, %v15868_v55 }
 0x609   :  { %21367 = vst [vmem:[#allocation221_spill] sm:$0xff] %v15832_v11  ;;  %21370 = vst [vmem:[#allocation222_spill] sm:$0xff] %v15838_v35  ;;  %v21378_v35 = vld [vmem:[#allocation130_spill] sm:$0xff] }
 0x60a   :  { %8934 = vmatpush1.bf16.xpose.msra.mxu0 %v21368_v17  ;;  %21371 = vst [vmem:[#allocation223_spill] sm:$0xff] %v15843_v14  ;;  %v15852_v17 = vsub.f32 %v15825_v50, %v18920_v51  ;;  %21375 = vst [vmem:[#allocation225_spill] sm:$0xff] %v15857_v57  ;;  %v15861_v14 = vld [vmem:[#allocation2 + $0x598] sm:$0xff]  ;;  %v15873_v45 = vld [vmem:[#allocation2 + $0x590] sm:$0xff] }
 0x60b   :  { %8936 = vmatprep.subr.bf16.mxu0 %v21372_v13  ;;  %21376 = vst [vmem:[#allocation226_spill] sm:$0xff] %v15861_v14  ;;  %v15863_v13 = vld [vmem:[#allocation2 + $0xb68] sm:$0xff]  ;;  %v18931_v11 = vand.u32 4294901760, %v15861_v14  ;;  %21379 = vst [vmem:[#allocation228_spill] sm:$0xff] %v15868_v55  ;;  %v18937_v46 = vand.u32 4294901760, %v15873_v45  ;;  %v15893_v57 = vld [vmem:[#allocation2 + $0xb60] sm:$0xff] }
 0x60c   :  { %10086 = vmatpush1.bf16.xpose.msra.mxu1 %v21373_v52  ;;  %21374 = vst [vmem:[#allocation224_spill] sm:$0xff] %v15852_v17  ;;  %21377 = vst [vmem:[#allocation227_spill] sm:$0xff] %v15863_v13  ;;  %v18929_v52 = vand.u32 4294901760, %v15859_v10  ;;  %v18933_v51 = vand.u32 4294901760, %v15863_v13  ;;  %v15871_v17 = vld [vmem:[#allocation2 + $0x560] sm:$0xff]  ;;  %v15895_v56 = vld [vmem:[#allocation2 + $0xb90] sm:$0xff] }
 0x60d   :  { %10088 = vmatprep.subr.bf16.mxu1 %v21378_v35  ;;  %21380 = vst [vmem:[#allocation229_spill] sm:$0xff] %v15871_v17  ;;  %21381 = vst [vmem:[#allocation230_spill] sm:$0xff] %v15873_v45  ;;  %v15885_v50 = vsub.f32 %v15861_v14, %v18931_v11  ;;  %v21390_v11 = vand.u32 4294901760, %v15871_v17  ;;  %v18944_v14 = vand.u32 4294901760, %v15895_v56 }
 0x60e   :  { %v15880_v35 = vsub.f32 %v15859_v10, %v18929_v52  ;;  %v15890_v36 = vsub.f32 %v15863_v13, %v18933_v51  ;;  %21385 = vst [vmem:[#allocation15_spill] sm:$0xff] %v15893_v57  ;;  %21386 = vst [vmem:[#allocation150_spill] sm:$0xff] %v15895_v56  ;;  %v15900_v52 = vsub.f32 %v15868_v55, %v21387_v23  ;;  %v18942_v13 = vand.u32 4294901760, %v15893_v57  ;;  %v21394_v23 = vld [vmem:[#allocation197_spill] sm:$0xff] }
 0x60f   :  { %21383 = vst [vmem:[#allocation232_spill] sm:$0xff] %v15885_v50  ;;  %v15906_v50 = vsub.f32 %v15871_v17, %v21390_v11  ;;  %v15911_v51 = vsub.f32 %v15873_v45, %v18937_v46  ;;  %v15925_v11 = vsub.f32 %v15895_v56, %v18944_v14  ;;  %v15927_v46 = vld [vmem:[#allocation2 + $0x5c8] sm:$0xff]  ;;  %v15936_v45 = vld [vmem:[#allocation2 + $0xbf8] sm:$0xff]  ;;  %v15941_v14 = vld [vmem:[#allocation2 + $0x5f0] sm:$0xff]  ;;  %v21400_v56 = vand.u32 4294901760, %v14905_v26 }
 0x610   :  { %21382 = vst [vmem:[#allocation231_spill] sm:$0xff] %v15880_v35  ;;  %21384 = vst [vmem:[#allocation233_spill] sm:$0xff] %v15890_v36  ;;  %v21389_v35 = vld [vmem:[#allocation174_spill] sm:$0xff]  ;;  %v21393_v36 = vld [vmem:[#allocation175_spill] sm:$0xff] }
 0x611   :  { %21388 = vst [vmem:[#allocation204_spill] sm:$0xff] %v15900_v52  ;;  %21391 = vst [vmem:[#allocation16_spill] sm:$0xff] %v15906_v50  ;;  %v21397_v50 = vld [vmem:[#allocation199_spill] sm:$0xff]  ;;  %v21402_v52 = vand.u32 4294901760, %v15927_v46 }
 0x612   :  { %8938 = vmatpush1.bf16.xpose.msra.mxu0 %v21389_v35  ;;  %21392 = vst [vmem:[#allocation20_spill] sm:$0xff] %v15911_v51  ;;  %v15920_v35 = vsub.f32 %v15893_v57, %v18942_v13  ;;  %21396 = vst [vmem:[#allocation205_spill] sm:$0xff] %v15925_v11  ;;  %v15929_v51 = vld [vmem:[#allocation2 + $0x5f8] sm:$0xff]  ;;  %v21399_v11 = vand.u32 4294901760, %v14903_v5 }
 0x613   :  { %8940 = vmatprep.subr.bf16.mxu0 %v21393_v36  ;;  %v15931_v36 = vld [vmem:[#allocation2 + $0xbc8] sm:$0xff]  ;;  %21398 = vst [vmem:[#allocation36_spill] sm:$0xff] %v15936_v45  ;;  %v15954_v17 = vsub.f32 %v15927_v46, %v21402_v52  ;;  %v21404_v13 = vand.u32 4294901760, %v15929_v51 }
 0x614   :  { %10090 = vmatpush1.bf16.xpose.msra.mxu1 %v21394_v23  ;;  %21395 = vst [vmem:[#allocation22_spill] sm:$0xff] %v15920_v35  ;;  %v15939_v35 = vld [vmem:[#allocation2 + $0x5c0] sm:$0xff]  ;;  %v15947_v57 = vpack.c.bf16 %v21400_v56, %v21399_v11  ;;  %v21406_v5 = vand.u32 4294901760, %v15931_v36  ;;  %v15969_v23 = vld [vmem:[#allocation2 + $0xbf0] sm:$0xff] }
 0x615   :  { %10092 = vmatprep.subr.bf16.mxu1 %v21397_v50  ;;  %v18953_v50 = vand.u32 4294901760, %v15936_v45  ;;  %21403 = vst [vmem:[#allocation25_spill] sm:$0xff] %v15954_v17  ;;  %v15959_v55 = vsub.f32 %v15929_v51, %v21404_v13  ;;  %v15967_v11 = vld [vmem:[#allocation2 + $0xbc0] sm:$0xff]  ;;  %v34_v13 = vld [vmem:[%s17538_s0 + $0x28] sm:$0xff] }
 0x616   :  { %21401 = vst [vmem:[#allocation37_spill] sm:$0xff] %v15947_v57  ;;  %v15964_v26 = vsub.f32 %v15931_v36, %v21406_v5  ;;  %v21409_v5 = vand.u32 4294901760, %v14907_v7  ;;  %v18960_v7 = vand.u32 4294901760, %v15969_v23 }
 0x617   :  { %21405 = vst [vmem:[#allocation26_spill] sm:$0xff] %v15959_v55  ;;  %v15974_v52 = vsub.f32 %v15936_v45, %v18953_v50  ;;  %v21412_v55 = vand.u32 4294901760, %v15939_v35  ;;  %v21413_v50 = vand.u32 4294901760, %v15941_v14  ;;  %v15996_v45 = vand.u32 4294901760, %v34_v13 }
 0x618   :  { %21407 = vst [vmem:[#allocation39_spill] sm:$0xff] %v15964_v26  ;;  %v21410_v26 = vand.u32 4294901760, %v14912_v16 }
 0x619   :  { %21408 = vst [vmem:[#allocation40_spill] sm:$0xff] %v15974_v52  ;;  %v15989_v17 = vsub.f32 %v15939_v35, %v21412_v55  ;;  %v15994_v52 = vsub.f32 %v15941_v14, %v21413_v50  ;;  %21414 = vst [vmem:[#allocation46_spill] sm:$0xff] %v15996_v45  ;;  %v16002_v16 = vsub.f32 %v34_v13, %v15996_v45 }
 0x61a   :  { %8942 = vmatpush1.bf16.xpose.msra.mxu0 %v20912_v24  ;;  %v15984_v56 = vpack.c.bf16 %v21410_v26, %v21409_v5  ;;  %v18958_v24 = vand.u32 4294901760, %v15967_v11  ;;  %v16013_v50 = vsub.f32 %v15969_v23, %v18960_v7  ;;  %v21417_v26 = vand.u32 4294901760, %v14931_v59 }
 0x61b   :  { %8944 = vmatprep.subr.bf16.mxu0 %v15947_v57  ;;  %v21418_v5 = vand.u32 4294901760, %v14933_v9  ;;  %v21421_v57 = vand.u32 4294901760, %v14975_v40  ;;  %v21424_v59 = vand.u32 4294901760, %v14935_v4  ;;  %v21425_v9 = vand.u32 4294901760, %v14945_v8 }
 0x61c   :  { %21411 = vst [vmem:[#allocation45_spill] sm:$0xff] %v15984_v56  ;;  %10094 = vmatpush1.bf16.xpose.msra.mxu1 %v20915_v60  ;;  %v16008_v55 = vsub.f32 %v15967_v11, %v18958_v24  ;;  %21416 = vst [vmem:[#allocation61_spill] sm:$0xff] %v16013_v50  ;;  %v16023_v60 = vand.u32 4294901760, %v16002_v16  ;;  %v21422_v24 = vand.u32 4294901760, %v14977_v3  ;;  %v21428_v40 = vand.u32 4294901760, %v14984_v29 }
 0x61d   :  { %10096 = vmatprep.subr.bf16.mxu1 %v15984_v56  ;;  %v16020_v13 = vpack.c.bf16 %v21418_v5, %v21417_v26  ;;  %v16038_v26 = vpack.c.bf16 %v21425_v9, %v21424_v59  ;;  %v21427_v5 = vand.u32 4294901760, %v14979_v33  ;;  %v21430_v4 = vand.u32 4294901760, %v14987_v30 }
 0x61e   :  { %21415 = vst [vmem:[#allocation60_spill] sm:$0xff] %v16008_v55  ;;  %21420 = vst [vmem:[#allocation51_spill] sm:$0xff] %v16023_v60  ;;  %v16029_v55 = vpack.c.bf16 %v21422_v24, %v21421_v57  ;;  %v3118_v7 = vsub.f32 %v16002_v16, %v16023_v60  ;;  %v21431_v8 = vand.u32 4294901760, %v14989_v27  ;;  %v21433_v29 = vand.u32 4294901760, %v15043_v1 }
 0x61f   :  { %21419 = vst [vmem:[#allocation49_spill] sm:$0xff] %v16020_v13  ;;  %21426 = vst [vmem:[#allocation64_spill] sm:$0xff] %v16038_v26  ;;  %v16045_v3 = vpack.c.bf16 %v21428_v40, %v21427_v5  ;;  %v21434_v24 = vand.u32 4294901760, %v15045_v15  ;;  %v21437_v59 = vand.u32 4294901760, %v15011_v12  ;;  %v21439_v30 = vand.u32 4294901760, %v15047_v25 }
 0x620   :  { %21423 = vst [vmem:[#allocation63_spill] sm:$0xff] %v16029_v55  ;;  %v3119_v57 = vand.u32 4294901760, %v3118_v7  ;;  %v16055_v33 = vpack.c.bf16 %v21431_v8, %v21430_v4  ;;  %v21440_v27 = vand.u32 4294901760, %v15052_v31  ;;  %v21443_v12 = vand.u32 4294901760, %v15057_v48 }
 0x621   :  { %2981 = vmatmul.mubr.f32.vlgmr.msra.gmra.mrb[0].mxu0 %v21122_v43  ;;  %21429 = vst [vmem:[#allocation69_spill] sm:$0xff] %v16045_v3  ;;  %v16061_v7 = vpack.c.bf16 %v21434_v24, %v21433_v29  ;;  %v21445_v15 = vand.u32 4294901760, %v15111_v49  ;;  %v21446_v25 = vand.u32 4294901760, %v15113_v34  ;;  %v21448_v31 = vand.u32 4294901760, %v15077_v0 }
 0x622   :  { %8946 = vmatpush1.bf16.xpose.msra.mxu0 %v16020_v13  ;;  %3120 = vmatprep.mubr.f32.mxu0 %v3119_v57  ;;  %21432 = vst [vmem:[#allocation70_spill] sm:$0xff] %v16055_v33  ;;  %v16074_v5 = vpack.c.bf16 %v21440_v27, %v21439_v30  ;;  %v21452_v48 = vand.u32 4294901760, %v15120_v18  ;;  %v21454_v34 = vand.u32 4294901760, %v15123_v44  ;;  %v21457_v49 = vand.u32 4294901760, %v15179_v62 }
 0x623   :  { %8948 = vmatprep.subr.bf16.mxu0 %v16029_v55  ;;  %6833 = vmatmul.mubr.f32.vlgmr.msra.gmra.mrb[0].mxu1 %v21122_v43  ;;  %21435 = vst [vmem:[#allocation84_spill] sm:$0xff] %v16061_v7  ;;  %v21436_v43 = vand.u32 4294901760, %v15009_v2  ;;  %v21442_v2 = vand.u32 4294901760, %v15055_v41  ;;  %v16089_v40 = vpack.c.bf16 %v21446_v25, %v21445_v15  ;;  %v21451_v41 = vand.u32 4294901760, %v15115_v54  ;;  %v21482_v15 = vld [vmem:[#allocation169_spill] sm:$0xff] }
 0x624   :  { %10098 = vmatpush1.bf16.xpose.msra.mxu1 %v16038_v26  ;;  %6972 = vmatprep.mubr.f32.mxu1 %v3119_v57  ;;  %21441 = vst [vmem:[#allocation73_spill] sm:$0xff] %v16074_v5  ;;  %v21449_v57 = vand.u32 4294901760, %v15079_v38  ;;  %v21455_v38 = vand.u32 4294901760, %v15125_v63  ;;  %v21458_v54 = vand.u32 4294901760, %v15181_v28  ;;  %v21460_v18 = vand.u32 4294901760, %v15145_v22  ;;  %v21741_v55 = vld [vmem:[#allocation133_spill] sm:$0xff] }
 0x625   :  { %10100 = vmatprep.subr.bf16.mxu1 %v16045_v3  ;;  %v16067_v9 = vpack.c.bf16 %v21437_v59, %v21436_v43  ;;  %v16083_v1 = vpack.c.bf16 %v21443_v12, %v21442_v2  ;;  %21447 = vst [vmem:[#allocation87_spill] sm:$0xff] %v16089_v40  ;;  %v16102_v8 = vpack.c.bf16 %v21452_v48, %v21451_v41  ;;  %v21461_v24 = vand.u32 4294901760, %v15147_v32  ;;  %v21489_v48 = vld [vmem:[#allocation111_spill] sm:$0xff]  ;;  %v21740_v3 = vld [vmem:[#allocation120_spill] sm:$0xff] }
 0x626   :  { %v16095_v4 = vpack.c.bf16 %v21449_v57, %v21448_v31  ;;  %v16111_v0 = vpack.c.bf16 %v21455_v38, %v21454_v34  ;;  %v16117_v29 = vpack.c.bf16 %v21458_v54, %v21457_v49  ;;  %v21463_v44 = vand.u32 4294901760, %v15183_v20  ;;  %v21484_v31 = vld [vmem:[#allocation94_spill] sm:$0xff]  ;;  %v21494_v54 = vld [vmem:[#allocation201_spill] sm:$0xff] }
 0x627   :  { %21438 = vst [vmem:[#allocation85_spill] sm:$0xff] %v16067_v9  ;;  %21444 = vst [vmem:[#allocation75_spill] sm:$0xff] %v16083_v1  ;;  %v16123_v43 = vpack.c.bf16 %v21461_v24, %v21460_v18  ;;  %v21464_v63 = vand.u32 4294901760, %v15188_v53  ;;  %v21466_v22 = vand.u32 4294901760, %v15191_v47  ;;  %v21467_v32 = vand.u32 4294901760, %v15193_v58  ;;  %v21492_v49 = vld [vmem:[#allocation90_spill] sm:$0xff] }
 0x628   :  { %21450 = vst [vmem:[#allocation88_spill] sm:$0xff] %v16095_v4  ;;  %21453 = vst [vmem:[#allocation109_spill] sm:$0xff] %v16102_v8  ;;  %v21469_v62 = vand.u32 4294901760, %v15247_v6  ;;  %v21470_v20 = vand.u32 4294901760, %v15249_v61  ;;  %v21472_v53 = vand.u32 4294901760, %v15213_v21  ;;  %v21473_v27 = vand.u32 4294901760, %v15215_v37 }
 0x629   :  { %21456 = vst [vmem:[#allocation112_spill] sm:$0xff] %v16111_v0  ;;  %21459 = vst [vmem:[#allocation172_spill] sm:$0xff] %v16117_v29  ;;  %v16130_v59 = vpack.c.bf16 %v21464_v63, %v21463_v44  ;;  %v16139_v28 = vpack.c.bf16 %v21467_v32, %v21466_v22  ;;  %v21475_v47 = vand.u32 4294901760, %v15251_v19  ;;  %v21476_v58 = vand.u32 4294901760, %v15256_v42  ;;  %v21479_v6 = vld [vmem:[#allocation148_spill] sm:$0xff]  ;;  %v21487_v42 = vld [vmem:[#allocation163_spill] sm:$0xff] }
 0x62a   :  { %8950 = vmatpush1.bf16.xpose.msra.mxu0 %v16055_v33  ;;  %21462 = vst [vmem:[#allocation177_spill] sm:$0xff] %v16123_v43  ;;  %v16145_v30 = vpack.c.bf16 %v21470_v20, %v21469_v62  ;;  %v16151_v2 = vpack.c.bf16 %v21473_v27, %v21472_v53  ;;  %v21478_v61 = vand.u32 4294901760, %v15259_v39  ;;  %v21480_v37 = vand.u32 4294901760, %v21479_v6  ;;  %v21497_v44 = vld [vmem:[#allocation93_spill] sm:$0xff]  ;;  %v21499_v22 = vld [vmem:[#allocation91_spill] sm:$0xff]  ;;  %v21502_v20 = vld [vmem:[#allocation106_spill] sm:$0xff] }
 0x62b   :  { %8952 = vmatprep.subr.bf16.mxu0 %v16061_v7  ;;  %21465 = vst [vmem:[#allocation124_spill] sm:$0xff] %v16130_v59  ;;  %21468 = vst [vmem:[#allocation130_spill] sm:$0xff] %v16139_v28  ;;  %v16158_v12 = vpack.c.bf16 %v21476_v58, %v21475_v47  ;;  %v21483_v25 = vand.u32 4294901760, %v21482_v15  ;;  %v21485_v19 = vand.u32 4294901760, %v21484_v31  ;;  %v21488_v41 = vand.u32 4294901760, %v21487_v42  ;;  %v21504_v27 = vld [vmem:[#allocation102_spill] sm:$0xff] }
 0x62c   :  { %10102 = vmatpush1.bf16.xpose.msra.mxu1 %v16067_v9  ;;  %21471 = vst [vmem:[#allocation174_spill] sm:$0xff] %v16145_v30  ;;  %21474 = vst [vmem:[#allocation175_spill] sm:$0xff] %v16151_v2  ;;  %v16167_v21 = vpack.c.bf16 %v21480_v37, %v21478_v61  ;;  %v21490_v34 = vand.u32 4294901760, %v21489_v48  ;;  %v21493_v39 = vand.u32 4294901760, %v21492_v49  ;;  %v21495_v18 = vand.u32 4294901760, %v21494_v54  ;;  %v21507_v61 = vld [vmem:[#allocation176_spill] sm:$0xff] }
 0x62d   :  { %10104 = vmatprep.subr.bf16.mxu1 %v16074_v5  ;;  %21477 = vst [vmem:[#allocation197_spill] sm:$0xff] %v16158_v12  ;;  %v16173_v57 = vpack.c.bf16 %v21485_v19, %v21483_v25  ;;  %v21498_v63 = vand.u32 4294901760, %v21497_v44  ;;  %v21500_v32 = vand.u32 4294901760, %v21499_v22  ;;  %v21503_v53 = vand.u32 4294901760, %v21502_v20  ;;  %v21509_v37 = vld [vmem:[#allocation191_spill] sm:$0xff]  ;;  %v21512_v31 = vld [vmem:[#allocation100_spill] sm:$0xff] }
 0x62e   :  { %21481 = vst [vmem:[#allocation199_spill] sm:$0xff] %v16167_v21  ;;  %v16179_v38 = vpack.c.bf16 %v21490_v34, %v21488_v41  ;;  %v16186_v24 = vpack.c.bf16 %v21495_v18, %v21493_v39  ;;  %v21505_v47 = vand.u32 4294901760, %v21504_v27  ;;  %v21508_v6 = vand.u32 4294901760, %v21507_v61  ;;  %v21514_v42 = vld [vmem:[#allocation105_spill] sm:$0xff]  ;;  %v21517_v34 = vld [vmem:[#allocation103_spill] sm:$0xff]  ;;  %v21524_v22 = vld [vmem:[#allocation190_spill] sm:$0xff] }
 0x62f   :  { %21486 = vst [vmem:[#allocation148_spill] sm:$0xff] %v16173_v57  ;;  %v16195_v62 = vpack.c.bf16 %v21500_v32, %v21498_v63  ;;  %v21510_v15 = vand.u32 4294901760, %v21509_v37  ;;  %v21513_v19 = vand.u32 4294901760, %v21512_v31  ;;  %v21515_v41 = vand.u32 4294901760, %v21514_v42  ;;  %v21519_v39 = vld [vmem:[#allocation83_spill] sm:$0xff]  ;;  %v21522_v44 = vld [vmem:[#allocation213_spill] sm:$0xff] }
 0x630   :  { %21491 = vst [vmem:[#allocation169_spill] sm:$0xff] %v16179_v38  ;;  %21496 = vst [vmem:[#allocation94_spill] sm:$0xff] %v16186_v24  ;;  %v16201_v58 = vpack.c.bf16 %v21505_v47, %v21503_v53  ;;  %v21518_v49 = vand.u32 4294901760, %v21517_v34  ;;  %v21520_v54 = vand.u32 4294901760, %v21519_v39  ;;  %v21523_v63 = vand.u32 4294901760, %v21522_v44  ;;  %v21527_v53 = vld [vmem:[#allocation125_spill] sm:$0xff] }
 0x631   :  { %21501 = vst [vmem:[#allocation163_spill] sm:$0xff] %v16195_v62  ;;  %v16207_v25 = vpack.c.bf16 %v21510_v15, %v21508_v6  ;;  %v16214_v48 = vpack.c.bf16 %v21515_v41, %v21513_v19  ;;  %v21525_v32 = vand.u32 4294901760, %v21524_v22  ;;  %v21528_v27 = vand.u32 4294901760, %v21527_v53  ;;  %v21529_v47 = vld [vmem:[#allocation149_spill] sm:$0xff]  ;;  %v21532_v37 = vld [vmem:[#allocation200_spill] sm:$0xff]  ;;  %v21537_v41 = vld [vmem:[#allocation210_spill] sm:$0xff] }
 0x632   :  { %8954 = vmatpush1.bf16.xpose.msra.mxu0 %v16083_v1  ;;  %21506 = vst [vmem:[#allocation111_spill] sm:$0xff] %v16201_v58  ;;  %v16223_v18 = vpack.c.bf16 %v21520_v54, %v21518_v49  ;;  %v21530_v61 = vand.u32 4294901760, %v21529_v47  ;;  %v21533_v15 = vand.u32 4294901760, %v21532_v37  ;;  %v21534_v31 = vld [vmem:[#allocation189_spill] sm:$0xff]  ;;  %v21538_v34 = vand.u32 4294901760, %v21537_v41  ;;  %v21539_v49 = vld [vmem:[#allocation123_spill] sm:$0xff] }
 0x633   :  { %8956 = vmatprep.subr.bf16.mxu0 %v16089_v40  ;;  %21511 = vst [vmem:[#allocation90_spill] sm:$0xff] %v16207_v25  ;;  %21516 = vst [vmem:[#allocation201_spill] sm:$0xff] %v16214_v48  ;;  %v16229_v20 = vpack.c.bf16 %v21525_v32, %v21523_v63  ;;  %v21535_v19 = vand.u32 4294901760, %v21534_v31  ;;  %v21540_v39 = vand.u32 4294901760, %v21539_v49  ;;  %v21542_v44 = vld [vmem:[#allocation18_spill] sm:$0xff]  ;;  %v21544_v22 = vld [vmem:[#allocation19_spill] sm:$0xff] }
 0x634   :  { %10106 = vmatpush1.bf16.xpose.msra.mxu1 %v16095_v4  ;;  %21521 = vst [vmem:[#allocation93_spill] sm:$0xff] %v16223_v18  ;;  %v16235_v6 = vpack.c.bf16 %v21530_v61, %v21528_v27  ;;  %v21543_v63 = vand.u32 4294901760, %v21542_v44  ;;  %v21545_v32 = vand.u32 4294901760, %v21544_v22  ;;  %v21547_v27 = vld [vmem:[#allocation153_spill] sm:$0xff]  ;;  %v21549_v61 = vld [vmem:[#allocation139_spill] sm:$0xff]  ;;  %v21724_v1 = vld [vmem:[#allocation162_spill] sm:$0xff] }
 0x635   :  { %10108 = vmatprep.subr.bf16.mxu1 %v16102_v8  ;;  %21526 = vst [vmem:[#allocation91_spill] sm:$0xff] %v16229_v20  ;;  %v16242_v42 = vpack.c.bf16 %v21535_v19, %v21533_v15  ;;  %v16251_v54 = vpack.c.bf16 %v21540_v39, %v21538_v34  ;;  %v21548_v47 = vand.u32 4294901760, %v21547_v27  ;;  %v21550_v37 = vand.u32 4294901760, %v21549_v61  ;;  %v21552_v31 = vld [vmem:[#allocation11_spill] sm:$0xff]  ;;  %v21554_v41 = vld [vmem:[#allocation13_spill] sm:$0xff]  ;;  %v21557_v39 = vld [vmem:[#allocation24_spill] sm:$0xff] }
 0x636   :  { %21531 = vst [vmem:[#allocation106_spill] sm:$0xff] %v16235_v6  ;;  %v16257_v53 = vpack.c.bf16 %v21545_v32, %v21543_v63  ;;  %v21553_v19 = vand.u32 4294901760, %v21552_v31  ;;  %v21555_v49 = vand.u32 4294901760, %v21554_v41  ;;  %v21558_v44 = vand.u32 4294901760, %v21557_v39  ;;  %v21559_v63 = vld [vmem:[#allocation28_spill] sm:$0xff]  ;;  %v21562_v27 = vld [vmem:[#allocation66_spill] sm:$0xff] }
 0x637   :  { %21536 = vst [vmem:[#allocation102_spill] sm:$0xff] %v16242_v42  ;;  %21541 = vst [vmem:[#allocation176_spill] sm:$0xff] %v16251_v54  ;;  %v16263_v15 = vpack.c.bf16 %v21550_v37, %v21548_v47  ;;  %v21560_v22 = vand.u32 4294901760, %v21559_v63  ;;  %v21563_v47 = vand.u32 4294901760, %v21562_v27  ;;  %v21564_v61 = vld [vmem:[#allocation67_spill] sm:$0xff]  ;;  %v21730_v5 = vld [vmem:[#allocation117_spill] sm:$0xff] }
 0x638   :  { %21546 = vst [vmem:[#allocation191_spill] sm:$0xff] %v16257_v53  ;;  %v16270_v34 = vpack.c.bf16 %v21555_v49, %v21553_v19  ;;  %v21565_v37 = vand.u32 4294901760, %v21564_v61  ;;  %v21567_v19 = vld [vmem:[#allocation43_spill] sm:$0xff]  ;;  %v21569_v49 = vld [vmem:[#allocation29_spill] sm:$0xff]  ;;  %v21737_v7 = vld [vmem:[#allocation152_spill] sm:$0xff] }
 0x639   :  { %21551 = vst [vmem:[#allocation100_spill] sm:$0xff] %v16263_v15  ;;  %v16279_v32 = vpack.c.bf16 %v21560_v22, %v21558_v44  ;;  %v21568_v41 = vand.u32 4294901760, %v21567_v19  ;;  %v21577_v22 = vld [vmem:[#allocation72_spill] sm:$0xff]  ;;  %v21739_v33 = vld [vmem:[#allocation161_spill] sm:$0xff] }
 0x63a   :  { %8958 = vmatpush1.bf16.xpose.msra.mxu0 %v16111_v0  ;;  %21556 = vst [vmem:[#allocation105_spill] sm:$0xff] %v16270_v34  ;;  %v16285_v31 = vpack.c.bf16 %v21565_v37, %v21563_v47  ;;  %v21578_v27 = vand.u32 4294901760, %v21577_v22  ;;  %v21579_v47 = vld [vmem:[#allocation76_spill] sm:$0xff]  ;;  %v21582_v37 = vld [vmem:[#allocation181_spill] sm:$0xff] }
 0x63b   :  { %8960 = vmatprep.subr.bf16.mxu0 %v16117_v29  ;;  %21561 = vst [vmem:[#allocation103_spill] sm:$0xff] %v16279_v32  ;;  %v21580_v61 = vand.u32 4294901760, %v21579_v47  ;;  %v21583_v19 = vand.u32 4294901760, %v21582_v37 }
 0x63c   :  { %10110 = vmatpush1.bf16.xpose.msra.mxu1 %v16123_v43  ;;  %21566 = vst [vmem:[#allocation83_spill] sm:$0xff] %v16285_v31 }
 0x63d   :  { %10112 = vmatprep.subr.bf16.mxu1 %v16130_v59 }
 0x642   :  { %8962 = vmatpush1.bf16.xpose.msra.mxu0 %v16139_v28  ;;  %v21710_v28 = vld [vmem:[#allocation71_spill] sm:$0xff] }
 0x643   :  { %8964 = vmatprep.subr.bf16.mxu0 %v16145_v30 }
 0x644   :  { %10114 = vmatpush1.bf16.xpose.msra.mxu1 %v16151_v2 }
 0x645   :  { %10116 = vmatprep.subr.bf16.mxu1 %v16158_v12 }
 0x64a   :  { %8966 = vmatpush1.bf16.xpose.msra.mxu0 %v16167_v21 }
 0x64b   :  { %8968 = vmatprep.subr.bf16.mxu0 %v16173_v57  ;;  %v21696_v57 = vld [vmem:[#allocation92_spill] sm:$0xff] }
 0x64c   :  { %10118 = vmatpush1.bf16.xpose.msra.mxu1 %v16179_v38 }
 0x64d   :  { %10120 = vmatprep.subr.bf16.mxu1 %v16186_v24 }
 0x652   :  { %8970 = vmatpush1.bf16.xpose.msra.mxu0 %v16195_v62  ;;  %v21693_v62 = vand.u32 4294901760, %v15941_v14 }
 0x653   :  { %8972 = vmatprep.subr.bf16.mxu0 %v16201_v58 }
 0x654   :  { %10122 = vmatpush1.bf16.xpose.msra.mxu1 %v16207_v25  ;;  %v21686_v25 = vld [vmem:[#allocation56_spill] sm:$0xff] }
 0x655   :  { %10124 = vmatprep.subr.bf16.mxu1 %v16214_v48 }
 0x65a   :  { %8974 = vmatpush1.bf16.xpose.msra.mxu0 %v16223_v18 }
 0x65b   :  { %8976 = vmatprep.subr.bf16.mxu0 %v16229_v20 }
 0x65c   :  { %10126 = vmatpush1.bf16.xpose.msra.mxu1 %v16235_v6 }
 0x65d   :  { %10128 = vmatprep.subr.bf16.mxu1 %v16242_v42 }
 0x662   :  { %8978 = vmatpush1.bf16.xpose.msra.mxu0 %v16251_v54 }
 0x663   :  { %8980 = vmatprep.subr.bf16.mxu0 %v16257_v53  ;;  %v21570_v53 = vand.u32 4294901760, %v21569_v49 }
 0x664   :  { %10130 = vmatpush1.bf16.xpose.msra.mxu1 %v16263_v15  ;;  %v21574_v15 = vld [vmem:[#allocation55_spill] sm:$0xff] }
 0x665   :  { %10132 = vmatprep.subr.bf16.mxu1 %v16270_v34  ;;  %v16291_v54 = vpack.c.bf16 %v21570_v53, %v21568_v41  ;;  %v21572_v34 = vld [vmem:[#allocation54_spill] sm:$0xff]  ;;  %v21575_v63 = vand.u32 4294901760, %v21574_v15  ;;  %v16307_v53 = vpack.c.bf16 %v21580_v61, %v21578_v27  ;;  %v21584_v41 = vld [vmem:[#allocation183_spill] sm:$0xff]  ;;  %v21597_v61 = vld [vmem:[#allocation184_spill] sm:$0xff] }
 0x666   :  { %v21573_v39 = vand.u32 4294901760, %v21572_v34  ;;  %v21585_v34 = vand.u32 4294901760, %v21584_v41  ;;  %v21587_v15 = vld [vmem:[#allocation115_spill] sm:$0xff]  ;;  %v21598_v37 = vand.u32 4294901760, %v21597_v61 }
 0x667   :  { %21571 = vst [vmem:[#allocation213_spill] sm:$0xff] %v16291_v54  ;;  %21581 = vst [vmem:[#allocation125_spill] sm:$0xff] %v16307_v53 }
 0x668   :  { %v16298_v44 = vpack.c.bf16 %v21575_v63, %v21573_v39  ;;  %v16313_v49 = vpack.c.bf16 %v21585_v34, %v21583_v19  ;;  %v21588_v39 = vand.u32 4294901760, %v21587_v15  ;;  %v21589_v63 = vld [vmem:[#allocation78_spill] sm:$0xff]  ;;  %v21602_v34 = vld [vmem:[#allocation59_spill] sm:$0xff] }
 0x669   :  { %v21599_v19 = vld [vmem:[#allocation186_spill] sm:$0xff]  ;;  %v21603_v15 = vand.u32 4294901760, %v21602_v34 }
 0x66a   :  { %8982 = vmatpush1.bf16.xpose.msra.mxu0 %v16279_v32  ;;  %21576 = vst [vmem:[#allocation190_spill] sm:$0xff] %v16298_v44  ;;  %21586 = vst [vmem:[#allocation149_spill] sm:$0xff] %v16313_v49  ;;  %v21600_v41 = vand.u32 4294901760, %v21599_v19 }
 0x66b   :  { %8984 = vmatprep.subr.bf16.mxu0 %v16285_v31  ;;  %v21590_v31 = vand.u32 4294901760, %v21589_v63 }
 0x66c   :  { %10134 = vmatpush1.bf16.xpose.msra.mxu1 %v16291_v54  ;;  %v21594_v54 = vld [vmem:[#allocation171_spill] sm:$0xff] }
 0x66d   :  { %10136 = vmatprep.subr.bf16.mxu1 %v16298_v44  ;;  %v16319_v32 = vpack.c.bf16 %v21590_v31, %v21588_v39  ;;  %v21592_v44 = vld [vmem:[#allocation142_spill] sm:$0xff]  ;;  %v21595_v47 = vand.u32 4294901760, %v21594_v54  ;;  %v16335_v31 = vpack.c.bf16 %v21600_v41, %v21598_v37  ;;  %v21617_v41 = vld [vmem:[#allocation68_spill] sm:$0xff] }
 0x66e   :  { %v21593_v22 = vand.u32 4294901760, %v21592_v44  ;;  %v21604_v39 = vld [vmem:[#allocation62_spill] sm:$0xff]  ;;  %v21618_v34 = vand.u32 4294901760, %v21617_v41 }
 0x66f   :  { %21591 = vst [vmem:[#allocation200_spill] sm:$0xff] %v16319_v32  ;;  %21601 = vst [vmem:[#allocation210_spill] sm:$0xff] %v16335_v31  ;;  %v21605_v44 = vand.u32 4294901760, %v21604_v39  ;;  %v21607_v54 = vld [vmem:[#allocation194_spill] sm:$0xff] }
 0x670   :  { %v16326_v27 = vpack.c.bf16 %v21595_v47, %v21593_v22  ;;  %v21608_v22 = vand.u32 4294901760, %v21607_v54  ;;  %v21609_v47 = vld [vmem:[#allocation193_spill] sm:$0xff] }
 0x671   :  { %v16341_v63 = vpack.c.bf16 %v21605_v44, %v21603_v15  ;;  %v21619_v15 = vld [vmem:[#allocation74_spill] sm:$0xff]  ;;  %v21622_v44 = vld [vmem:[#allocation185_spill] sm:$0xff] }
 0x672   :  { %8986 = vmatpush1.bf16.xpose.msra.mxu0 %v16307_v53  ;;  %21596 = vst [vmem:[#allocation189_spill] sm:$0xff] %v16326_v27  ;;  %v21620_v39 = vand.u32 4294901760, %v21619_v15  ;;  %v21623_v54 = vand.u32 4294901760, %v21622_v44 }
 0x673   :  { %8988 = vmatprep.subr.bf16.mxu0 %v16313_v49  ;;  %21606 = vst [vmem:[#allocation123_spill] sm:$0xff] %v16341_v63  ;;  %v21610_v49 = vand.u32 4294901760, %v21609_v47 }
 0x674   :  { %10138 = vmatpush1.bf16.xpose.msra.mxu1 %v16319_v32  ;;  %v21614_v32 = vld [vmem:[#allocation38_spill] sm:$0xff] }
 0x675   :  { %10140 = vmatprep.subr.bf16.mxu1 %v16326_v27  ;;  %v16347_v53 = vpack.c.bf16 %v21610_v49, %v21608_v22  ;;  %v21612_v27 = vld [vmem:[#allocation35_spill] sm:$0xff]  ;;  %v21615_v19 = vand.u32 4294901760, %v21614_v32  ;;  %v16363_v49 = vpack.c.bf16 %v21620_v39, %v21618_v34  ;;  %v21627_v32 = vld [vmem:[#allocation110_spill] sm:$0xff] }
 0x676   :  { %v21613_v61 = vand.u32 4294901760, %v21612_v27  ;;  %v21624_v22 = vld [vmem:[#allocation195_spill] sm:$0xff]  ;;  %v21637_v39 = vld [vmem:[#allocation214_spill] sm:$0xff] }
 0x677   :  { %21611 = vst [vmem:[#allocation18_spill] sm:$0xff] %v16347_v53  ;;  %21621 = vst [vmem:[#allocation153_spill] sm:$0xff] %v16363_v49  ;;  %v21625_v27 = vand.u32 4294901760, %v21624_v22  ;;  %v21638_v44 = vand.u32 4294901760, %v21637_v39  ;;  %v33_v39 = vld [vmem:[%s17538_s0 + $0x20] sm:$0xff] }
 0x678   :  { %v16354_v37 = vpack.c.bf16 %v21615_v19, %v21613_v61  ;;  %v21628_v61 = vand.u32 4294901760, %v21627_v32  ;;  %v21629_v19 = vld [vmem:[#allocation86_spill] sm:$0xff] }
 0x679   :  { %v16369_v47 = vpack.c.bf16 %v21625_v27, %v21623_v54  ;;  %v21639_v54 = vld [vmem:[#allocation215_spill] sm:$0xff]  ;;  %v21642_v27 = vand.u32 4294901760, %v15859_v10  ;;  %v21643_v32 = vld [vmem:[#allocation226_spill] sm:$0xff] }
 0x67a   :  { %8990 = vmatpush1.bf16.xpose.msra.mxu0 %v16335_v31  ;;  %21616 = vst [vmem:[#allocation19_spill] sm:$0xff] %v16354_v37  ;;  %v21640_v22 = vand.u32 4294901760, %v21639_v54 }
 0x67b   :  { %8992 = vmatprep.subr.bf16.mxu0 %v16341_v63  ;;  %21626 = vst [vmem:[#allocation139_spill] sm:$0xff] %v16369_v47  ;;  %v21630_v63 = vand.u32 4294901760, %v21629_v19 }
 0x67c   :  { %10142 = vmatpush1.bf16.xpose.msra.mxu1 %v16347_v53  ;;  %v21634_v53 = vld [vmem:[#allocation212_spill] sm:$0xff] }
 0x67d   :  { %10144 = vmatprep.subr.bf16.mxu1 %v16354_v37  ;;  %v16375_v31 = vpack.c.bf16 %v21630_v63, %v21628_v61  ;;  %v21632_v37 = vld [vmem:[#allocation178_spill] sm:$0xff]  ;;  %v21635_v15 = vand.u32 4294901760, %v21634_v53  ;;  %v16391_v63 = vpack.c.bf16 %v21640_v22, %v21638_v44  ;;  %v21646_v53 = vld [vmem:[#allocation219_spill] sm:$0xff]  ;;  %v21653_v22 = vld [vmem:[#allocation228_spill] sm:$0xff] }
 0x67e   :  { %v21633_v41 = vand.u32 4294901760, %v21632_v37  ;;  %v21644_v37 = vand.u32 4294901760, %v21643_v32  ;;  %v21647_v19 = vand.u32 4294901760, %v21646_v53  ;;  %v21651_v44 = vld [vmem:[#allocation227_spill] sm:$0xff]  ;;  %v21654_v10 = vand.u32 4294901760, %v21653_v22 }
 0x67f   :  { %21631 = vst [vmem:[#allocation11_spill] sm:$0xff] %v16375_v31  ;;  %21641 = vst [vmem:[#allocation24_spill] sm:$0xff] %v16391_v63  ;;  %v21652_v54 = vand.u32 4294901760, %v21651_v44  ;;  %v21661_v44 = vld [vmem:[#allocation229_spill] sm:$0xff]  ;;  %v21666_v32 = vand.u32 4294901760, %v15927_v46  ;;  %v21667_v53 = vand.u32 4294901760, %v15929_v51 }
 0x680   :  { %v16382_v34 = vpack.c.bf16 %v21635_v15, %v21633_v41  ;;  %v16397_v61 = vpack.c.bf16 %v21644_v37, %v21642_v27  ;;  %v21648_v41 = vld [vmem:[#allocation220_spill] sm:$0xff]  ;;  %v21662_v22 = vand.u32 4294901760, %v21661_v44  ;;  %v21674_v46 = vld [vmem:[#allocation15_spill] sm:$0xff]  ;;  %v21676_v51 = vld [vmem:[#allocation150_spill] sm:$0xff] }
 0x681   :  { %v21649_v15 = vand.u32 4294901760, %v21648_v41  ;;  %v21656_v27 = vld [vmem:[#allocation8_spill] sm:$0xff]  ;;  %v21659_v41 = vld [vmem:[#allocation202_spill] sm:$0xff]  ;;  %v21675_v6 = vand.u32 4294901760, %v21674_v46 }
 0x682   :  { %8994 = vmatpush1.bf16.xpose.msra.mxu0 %v16363_v49  ;;  %21636 = vst [vmem:[#allocation13_spill] sm:$0xff] %v16382_v34  ;;  %21645 = vst [vmem:[#allocation28_spill] sm:$0xff] %v16397_v61  ;;  %v21657_v37 = vld [vmem:[#allocation12_spill] sm:$0xff]  ;;  %v21679_v20 = vand.u32 4294901760, %v21659_v41 }
 0x683   :  { %8996 = vmatprep.subr.bf16.mxu0 %v16369_v47  ;;  %v16403_v47 = vpack.c.bf16 %v21649_v15, %v21647_v19  ;;  %v16418_v19 = vand.u32 4294901760, %v33_v39 }
 0x684   :  { %10146 = vmatpush1.bf16.xpose.msra.mxu1 %v16375_v31  ;;  %v21660_v31 = vld [vmem:[#allocation44_spill] sm:$0xff] }
 0x685   :  { %10148 = vmatprep.subr.bf16.mxu1 %v16382_v34  ;;  %21650 = vst [vmem:[#allocation66_spill] sm:$0xff] %v16403_v47  ;;  %v16413_v34 = vpack.c.bf16 %v21654_v10, %v21652_v54  ;;  %21658 = vst [vmem:[#allocation43_spill] sm:$0xff] %v16418_v19  ;;  %v21663_v54 = vld [vmem:[#allocation230_spill] sm:$0xff]  ;;  %v16443_v44 = vsub.f32 %v33_v39, %v16418_v19  ;;  %v21680_v18 = vand.u32 4294901760, %v21660_v31  ;;  %v21681_v39 = vand.u32 4294901760, %v15931_v36 }
 0x686   :  { %v21664_v10 = vand.u32 4294901760, %v21663_v54  ;;  %v21672_v54 = vld [vmem:[#allocation41_spill] sm:$0xff] }
 0x687   :  { %21655 = vst [vmem:[#allocation67_spill] sm:$0xff] %v16413_v34  ;;  %21671 = vst [vmem:[#allocation55_spill] sm:$0xff] %v16443_v44  ;;  %v16470_v58 = vand.u32 4294901760, %v16443_v44 }
 0x688   :  { %v16428_v49 = vpack.c.bf16 %v21664_v10, %v21662_v22  ;;  %v21673_v10 = vld [vmem:[#allocation17_spill] sm:$0xff]  ;;  %v21682_v22 = vld [vmem:[#allocation36_spill] sm:$0xff] }
 0x689   :  { %v21683_v42 = vand.u32 4294901760, %v21682_v22  ;;  %21687 = vst [vmem:[#allocation181_spill] sm:$0xff] %v16470_v58  ;;  %v21689_v36 = vand.u32 4294901760, %v21673_v10 }
 0x68a   :  { %8998 = vmatpush1.bf16.xpose.msra.mxu0 %v16391_v63  ;;  %21665 = vst [vmem:[#allocation29_spill] sm:$0xff] %v16428_v49  ;;  %v21670_v63 = vand.u32 4294901760, %v21657_v37 }
 0x68b   :  { %9000 = vmatprep.subr.bf16.mxu0 %v16397_v61  ;;  %v16434_v61 = vpack.c.bf16 %v21667_v53, %v21666_v32  ;;  %v21677_v32 = vand.u32 4294901760, %v21676_v51  ;;  %v16464_v48 = vpack.c.bf16 %v21683_v42, %v21681_v39  ;;  %v21685_v51 = vld [vmem:[#allocation50_spill] sm:$0xff]  ;;  %v3153_v42 = vsub.f32 %v21673_v10, %v21689_v36 }
 0x68c   :  { %10150 = vmatpush1.bf16.xpose.msra.mxu1 %v16403_v47  ;;  %v21669_v47 = vand.u32 4294901760, %v21656_v27  ;;  %v21698_v39 = vand.u32 4294901760, %v21686_v25 }
 0x68d   :  { %10152 = vmatprep.subr.bf16.mxu1 %v16413_v34  ;;  %21668 = vst [vmem:[#allocation54_spill] sm:$0xff] %v16434_v61  ;;  %v3147_v34 = vsub.f32 %v21657_v37, %v21670_v63  ;;  %v16451_v53 = vpack.c.bf16 %v21677_v32, %v21675_v6  ;;  %v6999_v63 = vsub.f32 %v21660_v31, %v21680_v18  ;;  %21684 = vst [vmem:[#allocation76_spill] sm:$0xff] %v16464_v48  ;;  %v21691_v32 = vld [vmem:[#allocation47_spill] sm:$0xff] }
 0x68e   :  { %v3135_v15 = vsub.f32 %v21656_v27, %v21669_v47  ;;  %v6987_v47 = vsub.f32 %v21659_v41, %v21679_v20  ;;  %v21688_v18 = vand.u32 4294901760, %v21672_v54  ;;  %v21692_v20 = vand.u32 4294901760, %v15939_v35 }
 0x68f   :  { %21678 = vst [vmem:[#allocation72_spill] sm:$0xff] %v16451_v53  ;;  %v3148_v46 = vand.u32 4294901760, %v3147_v34  ;;  %v21690_v34 = vld [vmem:[#allocation23_spill] sm:$0xff]  ;;  %v3124_v35 = vsub.f32 %v16443_v44, %v16470_v58  ;;  %v3154_v14 = vand.u32 4294901760, %v3153_v42  ;;  %v21703_v36 = vand.u32 4294901760, %v21691_v32 }
 0x690   :  { %v3136_v6 = vand.u32 4294901760, %v3135_v15  ;;  %v6988_v22 = vand.u32 4294901760, %v6987_v47  ;;  %v7000_v15 = vand.u32 4294901760, %v6999_v63  ;;  %v16486_v24 = vpack.c.bf16 %v21693_v62, %v21692_v20 }
 0x691   :  { %v21697_v47 = vand.u32 4294901760, %v21685_v51  ;;  %v21699_v62 = vand.u32 4294901760, %v15967_v11  ;;  %v21700_v20 = vand.u32 4294901760, %v15969_v23  ;;  %v21705_v11 = vand.u32 4294901760, %v21696_v57 }
 0x692   :  { %9002 = vmatpush1.bf16.xpose.msra.mxu0 %v16428_v49  ;;  %v3141_v49 = vsub.f32 %v21672_v54, %v21688_v18  ;;  %21694 = vst [vmem:[#allocation183_spill] sm:$0xff] %v16486_v24  ;;  %v21695_v18 = vld [vmem:[#allocation53_spill] sm:$0xff]  ;;  %v9007_v21 = vpack.c.bf16 %v3148_v46, %v3136_v6  ;;  %v10159_v6 = vpack.c.bf16 %v7000_v15, %v6988_v22  ;;  %v21702_v46 = vand.u32 4294901760, %v21690_v34 }
 0x693   :  { %9004 = vmatprep.subr.bf16.mxu0 %v16434_v61  ;;  %v3159_v63 = vsub.f32 %v21685_v51, %v21697_v47  ;;  %v3171_v61 = vsub.f32 %v21686_v25, %v21698_v39  ;;  %v16502_v38 = vpack.c.bf16 %v21700_v20, %v21699_v62  ;;  %v7005_v39 = vsub.f32 %v21691_v32, %v21703_v36  ;;  %v21706_v62 = vld [vmem:[#allocation89_spill] sm:$0xff]  ;;  %v21709_v36 = vld [vmem:[#allocation104_spill] sm:$0xff] }
 0x694   :  { %10154 = vmatpush1.bf16.xpose.msra.mxu1 %v16451_v53  ;;  %v6993_v47 = vsub.f32 %v21690_v34, %v21702_v46  ;;  %v7023_v23 = vsub.f32 %v21696_v57, %v21705_v11  ;;  %v21707_v15 = vld [vmem:[#allocation65_spill] sm:$0xff]  ;;  %v21708_v53 = vld [vmem:[#allocation98_spill] sm:$0xff]  ;;  %v19061_v2 = vand.u32 4294901760, %v21709_v36  ;;  %v21713_v20 = vld [vmem:[#allocation140_spill] sm:$0xff]  ;;  %v21714_v12 = vand.u32 4294901760, %v21706_v62 }
 0x695   :  { %10156 = vmatprep.subr.bf16.mxu1 %v16464_v48  ;;  %v3142_v48 = vand.u32 4294901760, %v3141_v49  ;;  %21701 = vst [vmem:[#allocation115_spill] sm:$0xff] %v16502_v38  ;;  %v21704_v49 = vand.u32 4294901760, %v21695_v18  ;;  %v3160_v46 = vand.u32 4294901760, %v3159_v63  ;;  %v3172_v58 = vand.u32 4294901760, %v3171_v61  ;;  %v21712_v22 = vld [vmem:[#allocation101_spill] sm:$0xff] }
 0x696   :  { %v6994_v11 = vand.u32 4294901760, %v6993_v47  ;;  %v7006_v29 = vand.u32 4294901760, %v7005_v39  ;;  %v7024_v63 = vand.u32 4294901760, %v7023_v23  ;;  %v21716_v59 = vand.u32 4294901760, %v21708_v53 }
 0x697   :  { %v7011_v42 = vsub.f32 %v21695_v18, %v21704_v49  ;;  %v9009_v30 = vpack.c.bf16 %v3154_v14, %v3142_v48  ;;  %v21711_v49 = vld [vmem:[#allocation95_spill] sm:$0xff]  ;;  %v21715_v48 = vand.u32 4294901760, %v21707_v15  ;;  %v9011_v43 = vpack.c.bf16 %v3172_v58, %v3160_v46 }
 0x698   :  { %v3183_v47 = vsub.f32 %v21708_v53, %v21716_v59  ;;  %v3195_v39 = vsub.f32 %v21709_v36, %v19061_v2  ;;  %v21718_v23 = vand.u32 4294901760, %v21711_v49  ;;  %v10161_v58 = vpack.c.bf16 %v7006_v29, %v6994_v11  ;;  %v21723_v29 = vld [vmem:[#allocation129_spill] sm:$0xff] }
 0x699   :  { %v7012_v61 = vand.u32 4294901760, %v7011_v42  ;;  %v3177_v14 = vsub.f32 %v21707_v15, %v21715_v48  ;;  %v21720_v46 = vand.u32 4294901760, %v21712_v22  ;;  %v21721_v48 = vand.u32 4294901760, %v21713_v20 }
 0x69a   :  { %9006 = vmatpush1.bf16.xpose.msra.mxu0 %v16486_v24  ;;  %v3125_v24 = vand.u32 4294901760, %v3124_v35  ;;  %v3165_v35 = vsub.f32 %v21706_v62, %v21714_v12  ;;  %v7029_v12 = vsub.f32 %v21711_v49, %v21718_v23  ;;  %v3184_v23 = vand.u32 4294901760, %v3183_v47  ;;  %v21728_v47 = vld [vmem:[#allocation143_spill] sm:$0xff] }
 0x69b   :  { %9008 = vmatprep.subr.bf16.mxu0 %v9007_v21  ;;  %v21719_v21 = vld [vmem:[#allocation113_spill] sm:$0xff]  ;;  %v7035_v59 = vsub.f32 %v21712_v22, %v21720_v46  ;;  %v7047_v2 = vsub.f32 %v21713_v20, %v21721_v48  ;;  %v3178_v40 = vand.u32 4294901760, %v3177_v14  ;;  %v3196_v0 = vand.u32 4294901760, %v3195_v39 }
 0x69c   :  { %10158 = vmatpush1.bf16.xpose.msra.mxu1 %v16502_v38  ;;  %v21722_v38 = vld [vmem:[#allocation119_spill] sm:$0xff]  ;;  %v3166_v4 = vand.u32 4294901760, %v3165_v35  ;;  %v7030_v9 = vand.u32 4294901760, %v7029_v12  ;;  %v21725_v48 = vand.u32 4294901760, %v21719_v21  ;;  %v19092_v11 = vand.u32 4294901760, %v21730_v5 }
 0x69d   :  { %10160 = vmatprep.subr.bf16.mxu1 %v10159_v6  ;;  %v21717_v6 = vand.u32 4294901760, %v21710_v28  ;;  %v7048_v35 = vand.u32 4294901760, %v7047_v2  ;;  %v21732_v2 = vand.u32 4294901760, %v21724_v1  ;;  %v21734_v12 = vand.u32 4294901760, %v21728_v47 }
 0x69e   :  { %v3189_v8 = vsub.f32 %v21719_v21, %v21725_v48  ;;  %v9015_v48 = vpack.c.bf16 %v3196_v0, %v3184_v23 }
 0x69f   :  { %v7017_v42 = vsub.f32 %v21710_v28, %v21717_v6  ;;  %v10163_v6 = vpack.c.bf16 %v7024_v63, %v7012_v61  ;;  %v7036_v63 = vand.u32 4294901760, %v7035_v59  ;;  %v21731_v61 = vand.u32 4294901760, %v21723_v29 }
 0x6a0   :  { %v3219_v59 = vsub.f32 %v21724_v1, %v21732_v2  ;;  %v7053_v0 = vsub.f32 %v21728_v47, %v21734_v12  ;;  %v19098_v12 = vand.u32 4294901760, %v21739_v33  ;;  %v21743_v2 = vld [vmem:[#allocation188_spill] sm:$0xff] }
 0x6a1   :  { %3126 = vmatmul.mubr.f32.vlgmr.msra.gmra.mrb[0].mxu0 %v3125_v24  ;;  %v7018_v46 = vand.u32 4294901760, %v7017_v42  ;;  %v21729_v42 = vld [vmem:[#allocation114_spill] sm:$0xff]  ;;  %v19108_v56 = vand.u32 4294901760, %v21743_v2 }
 0x6a2   :  { %9010 = vmatpush1.bf16.xpose.msra.mxu0 %v9009_v30  ;;  %3517 = vmatprep.mubr.f32.mxu0 %v15996_v45  ;;  %v21726_v30 = vld [vmem:[#allocation137_spill] sm:$0xff]  ;;  %v21735_v23 = vand.u32 4294901760, %v21729_v42  ;;  %v7054_v13 = vand.u32 4294901760, %v7053_v0 }
 0x6a3   :  { %9012 = vmatprep.subr.bf16.mxu0 %v9011_v43  ;;  %6978 = vmatmul.mubr.f32.vlgmr.msra.gmra.mrb[0].mxu1 %v3125_v24  ;;  %v21727_v43 = vand.u32 4294901760, %v21722_v38  ;;  %v9013_v24 = vpack.c.bf16 %v3178_v40, %v3166_v4  ;;  %v21733_v39 = vand.u32 4294901760, %v21726_v30  ;;  %v3190_v40 = vand.u32 4294901760, %v3189_v8 }
 0x6a4   :  { %10162 = vmatpush1.bf16.xpose.msra.mxu1 %v10161_v58  ;;  %7369 = vmatprep.mubr.f32.mxu1 %v15996_v45  ;;  %v3207_v58 = vsub.f32 %v21723_v29, %v21731_v61  ;;  %v7059_v61 = vsub.f32 %v21729_v42, %v21735_v23  ;;  %v19102_v23 = vand.u32 4294901760, %v21741_v55 }
 0x6a5   :  { %v3201_v14 = vsub.f32 %v21722_v38, %v21727_v43  ;;  %10164 = vmatprep.subr.bf16.mxu1 %v10163_v6  ;;  %v10165_v43 = vpack.c.bf16 %v7030_v9, %v7018_v46  ;;  %v7041_v45 = vsub.f32 %v21726_v30, %v21733_v39  ;;  %v10167_v6 = vpack.c.bf16 %v7048_v35, %v7036_v63  ;;  %v21736_v46 = vld [vmem:[#allocation146_spill] sm:$0xff]  ;;  %v21738_v35 = vld [vmem:[#allocation164_spill] sm:$0xff] }
 0x6a6   :  { %v7071_v9 = vsub.f32 %v21730_v5, %v19092_v11  ;;  %v19097_v39 = vand.u32 4294901760, %v21737_v7  ;;  %v3208_v8 = vand.u32 4294901760, %v3207_v58  ;;  %v3220_v63 = vand.u32 4294901760, %v3219_v59  ;;  %v21742_v11 = vld [vmem:[#allocation182_spill] sm:$0xff] }
 0x6a7   :  { %v3202_v4 = vand.u32 4294901760, %v3201_v14  ;;  %v19106_v44 = vand.u32 4294901760, %v21742_v11  ;;  %v21744_v59 = vand.u32 4294901760, %v21736_v46 }
 0x6a8   :  { %v7072_v58 = vand.u32 4294901760, %v7071_v9  ;;  %v9019_v26 = vpack.c.bf16 %v3220_v63, %v3208_v8  ;;  %v21747_v9 = vld [vmem:[#allocation145_spill] sm:$0xff]  ;;  %v7095_v63 = vsub.f32 %v21743_v2, %v19108_v56  ;;  %v21752_v56 = vld [vmem:[#allocation108_spill] sm:$0xff] }
 0x6a9   :  { %v9017_v60 = vpack.c.bf16 %v3202_v4, %v3190_v40  ;;  %v3213_v14 = vsub.f32 %v21736_v46, %v21744_v59  ;;  %v3243_v4 = vsub.f32 %v21739_v33, %v19098_v12  ;;  %v7083_v8 = vsub.f32 %v21742_v11, %v19106_v44 }
 0x6aa   :  { %9014 = vmatpush1.bf16.xpose.msra.mxu0 %v9013_v24  ;;  %v7042_v24 = vand.u32 4294901760, %v7041_v45  ;;  %v3225_v45 = vsub.f32 %v21737_v7, %v19097_v39  ;;  %v21751_v44 = vand.u32 4294901760, %v21747_v9  ;;  %v19112_v2 = vand.u32 4294901760, %v21752_v56 }
 0x6ab   :  { %9016 = vmatprep.subr.bf16.mxu0 %v9015_v48  ;;  %v7060_v48 = vand.u32 4294901760, %v7059_v61  ;;  %v7077_v61 = vsub.f32 %v21741_v55, %v19102_v23  ;;  %v3244_v23 = vand.u32 4294901760, %v3243_v4  ;;  %v21749_v55 = vld [vmem:[#allocation154_spill] sm:$0xff] }
 0x6ac   :  { %10166 = vmatpush1.bf16.xpose.msra.mxu1 %v10165_v43  ;;  %v21745_v43 = vand.u32 4294901760, %v21738_v35  ;;  %v10169_v39 = vpack.c.bf16 %v7054_v13, %v7042_v24  ;;  %v19111_v59 = vand.u32 4294901760, %v21749_v55  ;;  %v21750_v13 = vld [vmem:[#allocation156_spill] sm:$0xff]  ;;  %v3237_v11 = vsub.f32 %v21747_v9, %v21751_v44 }
 0x6ad   :  { %10168 = vmatprep.subr.bf16.mxu1 %v10167_v6  ;;  %v21746_v6 = vand.u32 4294901760, %v21740_v3  ;;  %v10171_v33 = vpack.c.bf16 %v7072_v58, %v7060_v48  ;;  %v7078_v46 = vand.u32 4294901760, %v7077_v61  ;;  %v7096_v48 = vand.u32 4294901760, %v7095_v63 }
 0x6ae   :  { %v3231_v40 = vsub.f32 %v21738_v35, %v21745_v43  ;;  %v21748_v43 = vld [vmem:[#allocation147_spill] sm:$0xff]  ;;  %v3255_v44 = vsub.f32 %v21749_v55, %v19111_v59  ;;  %v21758_v59 = vld [vmem:[#allocation165_spill] sm:$0xff]  ;;  %v21762_v55 = vld [vmem:[#allocation168_spill] sm:$0xff] }
 0x6af   :  { %v7065_v0 = vsub.f32 %v21740_v3, %v21746_v6  ;;  %v19110_v12 = vand.u32 4294901760, %v21748_v43  ;;  %v3214_v6 = vand.u32 4294901760, %v3213_v14  ;;  %v3226_v3 = vand.u32 4294901760, %v3225_v45  ;;  %v21753_v14 = vld [vmem:[#allocation141_spill] sm:$0xff] }
 0x6b0   :  { %v3232_v35 = vand.u32 4294901760, %v3231_v40  ;;  %v19114_v58 = vand.u32 4294901760, %v21753_v14  ;;  %v21754_v40 = vld [vmem:[#allocation157_spill] sm:$0xff] }
 0x6b1   :  { %v7066_v7 = vand.u32 4294901760, %v7065_v0  ;;  %v9021_v45 = vpack.c.bf16 %v3226_v3, %v3214_v6  ;;  %v19118_v4 = vand.u32 4294901760, %v21754_v40  ;;  %v21755_v0 = vld [vmem:[#allocation159_spill] sm:$0xff]  ;;  %v3238_v3 = vand.u32 4294901760, %v3237_v11 }
 0x6b2   :  { %9018 = vmatpush1.bf16.xpose.msra.mxu0 %v9017_v60  ;;  %v7084_v60 = vand.u32 4294901760, %v7083_v8  ;;  %v19121_v61 = vand.u32 4294901760, %v21755_v0  ;;  %v9023_v24 = vpack.c.bf16 %v3244_v23, %v3232_v35  ;;  %v7101_v35 = vsub.f32 %v21753_v14, %v19114_v58  ;;  %v21761_v14 = vld [vmem:[#allocation166_spill] sm:$0xff] }
 0x6b3   :  { %9020 = vmatprep.subr.bf16.mxu0 %v9019_v26  ;;  %v3249_v26 = vsub.f32 %v21748_v43, %v19110_v12  ;;  %v10173_v63 = vpack.c.bf16 %v7078_v46, %v7066_v7  ;;  %v7089_v12 = vsub.f32 %v21752_v56, %v19112_v2  ;;  %v7107_v23 = vsub.f32 %v21754_v40, %v19118_v4  ;;  %v21757_v46 = vld [vmem:[#allocation160_spill] sm:$0xff]  ;;  %v21760_v56 = vld [vmem:[#allocation97_spill] sm:$0xff] }
 0x6b4   :  { %10170 = vmatpush1.bf16.xpose.msra.mxu1 %v10169_v39  ;;  %v21756_v39 = vand.u32 4294901760, %v21750_v13  ;;  %v7119_v7 = vsub.f32 %v21755_v0, %v19121_v61  ;;  %v19124_v2 = vand.u32 4294901760, %v21758_v59  ;;  %v3256_v11 = vand.u32 4294901760, %v3255_v44  ;;  %v21763_v61 = vld [vmem:[#allocation170_spill] sm:$0xff] }
 0x6b5   :  { %10172 = vmatprep.subr.bf16.mxu1 %v10171_v33  ;;  %v10175_v33 = vpack.c.bf16 %v7096_v48, %v7084_v60  ;;  %v3250_v6 = vand.u32 4294901760, %v3249_v26  ;;  %v21759_v48 = vld [vmem:[#allocation96_spill] sm:$0xff]  ;;  %v19125_v58 = vand.u32 4294901760, %v21760_v56  ;;  %v19129_v4 = vand.u32 4294901760, %v21762_v55 }
 0x6b6   :  { %v3267_v8 = vsub.f32 %v21750_v13, %v21756_v39  ;;  %v7102_v43 = vand.u32 4294901760, %v7101_v35  ;;  %v19133_v0 = vand.u32 4294901760, %v21763_v61  ;;  %v21764_v39 = vld [vmem:[#allocation206_spill] sm:$0xff]  ;;  %v7120_v44 = vand.u32 4294901760, %v7119_v7  ;;  %v21768_v7 = vld [vmem:[#allocation173_spill] sm:$0xff] }
 0x6b7   :  { %v9025_v40 = vpack.c.bf16 %v3250_v6, %v3238_v3  ;;  %v19135_v9 = vand.u32 4294901760, %v21764_v39  ;;  %v3291_v6 = vsub.f32 %v21760_v56, %v19125_v58 }
 0x6b8   :  { %v3268_v60 = vand.u32 4294901760, %v3267_v8  ;;  %v21765_v8 = vand.u32 4294901760, %v21757_v46 }
 0x6ba   :  { %9022 = vmatpush1.bf16.xpose.msra.mxu0 %v9021_v45  ;;  %v7090_v45 = vand.u32 4294901760, %v7089_v12  ;;  %v3261_v26 = vsub.f32 %v21757_v46, %v21765_v8  ;;  %v3273_v12 = vsub.f32 %v21758_v59, %v19124_v2  ;;  %v9027_v13 = vpack.c.bf16 %v3268_v60, %v3256_v11 }
 0x6bb   :  { %9024 = vmatprep.subr.bf16.mxu0 %v9023_v24  ;;  %v7108_v24 = vand.u32 4294901760, %v7107_v23  ;;  %v7125_v23 = vsub.f32 %v21762_v55, %v19129_v4  ;;  %v7131_v11 = vsub.f32 %v21763_v61, %v19133_v0  ;;  %v7143_v60 = vsub.f32 %v21764_v39, %v19135_v9  ;;  %v21770_v55 = vld [vmem:[#allocation116_spill] sm:$0xff]  ;;  %v21773_v9 = vld [vmem:[#allocation198_spill] sm:$0xff] }
 0x6bc   :  { %10174 = vmatpush1.bf16.xpose.msra.mxu1 %v10173_v63  ;;  %v21766_v63 = vand.u32 4294901760, %v21759_v48  ;;  %v10177_v2 = vpack.c.bf16 %v7102_v43, %v7090_v45  ;;  %v3292_v4 = vand.u32 4294901760, %v3291_v6  ;;  %v19138_v8 = vand.u32 4294901760, %v21770_v55  ;;  %v21771_v43 = vld [vmem:[#allocation122_spill] sm:$0xff] }
 0x6bd   :  { %10176 = vmatprep.subr.bf16.mxu1 %v10175_v33  ;;  %v21767_v33 = vand.u32 4294901760, %v21761_v14  ;;  %v10179_v56 = vpack.c.bf16 %v7120_v44, %v7108_v24  ;;  %v7126_v46 = vand.u32 4294901760, %v7125_v23  ;;  %v21772_v0 = vand.u32 4294901760, %v21768_v7 }
 0x6be   :  { %v3279_v3 = vsub.f32 %v21759_v48, %v21766_v63  ;;  %v21769_v63 = vld [vmem:[#allocation209_spill] sm:$0xff]  ;;  %v19139_v39 = vand.u32 4294901760, %v21773_v9  ;;  %v7144_v24 = vand.u32 4294901760, %v7143_v60 }
 0x6bf   :  { %v7113_v35 = vsub.f32 %v21761_v14, %v21767_v33  ;;  %v19137_v58 = vand.u32 4294901760, %v21769_v63  ;;  %v3262_v33 = vand.u32 4294901760, %v3261_v26  ;;  %v3274_v14 = vand.u32 4294901760, %v3273_v12  ;;  %v21774_v26 = vld [vmem:[#allocation99_spill] sm:$0xff] }
 0x6c0   :  { %v3280_v48 = vand.u32 4294901760, %v3279_v3  ;;  %v3285_v61 = vsub.f32 %v21768_v7, %v21772_v0  ;;  %v19141_v44 = vand.u32 4294901760, %v21774_v26  ;;  %v21775_v3 = vld [vmem:[#allocation128_spill] sm:$0xff]  ;;  %v3303_v0 = vsub.f32 %v21770_v55, %v19138_v8  ;;  %v21779_v8 = vld [vmem:[#allocation167_spill] sm:$0xff] }
 0x6c1   :  { %v7114_v59 = vand.u32 4294901760, %v7113_v35  ;;  %v9029_v12 = vpack.c.bf16 %v3274_v14, %v3262_v33  ;;  %v19145_v6 = vand.u32 4294901760, %v21775_v3  ;;  %v21776_v35 = vld [vmem:[#allocation131_spill] sm:$0xff]  ;;  %v21783_v55 = vld [vmem:[#allocation180_spill] sm:$0xff] }
 0x6c2   :  { %9026 = vmatpush1.bf16.xpose.msra.mxu0 %v9025_v40  ;;  %v7132_v40 = vand.u32 4294901760, %v7131_v11  ;;  %v19148_v23 = vand.u32 4294901760, %v21776_v35  ;;  %v9031_v45 = vpack.c.bf16 %v3292_v4, %v3280_v48  ;;  %v3286_v14 = vand.u32 4294901760, %v3285_v61 }
 0x6c3   :  { %9028 = vmatprep.subr.bf16.mxu0 %v9027_v13  ;;  %v3297_v13 = vsub.f32 %v21769_v63, %v19137_v58  ;;  %v10181_v60 = vpack.c.bf16 %v7126_v46, %v7114_v59  ;;  %v7137_v58 = vsub.f32 %v21773_v9, %v19139_v39  ;;  %v7149_v4 = vsub.f32 %v21774_v26, %v19141_v44  ;;  %v21778_v46 = vld [vmem:[#allocation158_spill] sm:$0xff]  ;;  %v21781_v9 = vld [vmem:[#allocation132_spill] sm:$0xff]  ;;  %v21782_v26 = vld [vmem:[#allocation207_spill] sm:$0xff] }
 0x6c4   :  { %10178 = vmatpush1.bf16.xpose.msra.mxu1 %v10177_v2  ;;  %v21777_v2 = vand.u32 4294901760, %v21771_v43  ;;  %v7155_v48 = vsub.f32 %v21775_v3, %v19145_v6  ;;  %v7167_v59 = vsub.f32 %v21776_v35, %v19148_v23  ;;  %v19151_v39 = vand.u32 4294901760, %v21779_v8  ;;  %v21784_v23 = vld [vmem:[#allocation144_spill] sm:$0xff] }
 0x6c5   :  { %10180 = vmatprep.subr.bf16.mxu1 %v10179_v56  ;;  %v10183_v56 = vpack.c.bf16 %v7144_v24, %v7132_v40  ;;  %v3298_v33 = vand.u32 4294901760, %v3297_v13  ;;  %v3304_v61 = vand.u32 4294901760, %v3303_v0  ;;  %v21780_v24 = vld [vmem:[#allocation126_spill] sm:$0xff]  ;;  %v19152_v44 = vand.u32 4294901760, %v21781_v9 }
 0x6c6   :  { %v3315_v11 = vsub.f32 %v21771_v43, %v21777_v2  ;;  %v19156_v6 = vand.u32 4294901760, %v21783_v55  ;;  %v7150_v63 = vand.u32 4294901760, %v7149_v4  ;;  %v19160_v35 = vand.u32 4294901760, %v21784_v23  ;;  %v21785_v2 = vld [vmem:[#allocation138_spill] sm:$0xff] }
 0x6c7   :  { %v9033_v3 = vpack.c.bf16 %v3298_v33, %v3286_v14  ;;  %v19162_v7 = vand.u32 4294901760, %v21785_v2  ;;  %v7168_v0 = vand.u32 4294901760, %v7167_v59  ;;  %v3339_v33 = vsub.f32 %v21781_v9, %v19152_v44  ;;  %v21789_v59 = vld [vmem:[#allocation151_spill] sm:$0xff] }
 0x6c8   :  { %v3316_v40 = vand.u32 4294901760, %v3315_v11  ;;  %v21786_v11 = vand.u32 4294901760, %v21778_v46 }
 0x6ca   :  { %9030 = vmatpush1.bf16.xpose.msra.mxu0 %v9029_v12  ;;  %v7138_v12 = vand.u32 4294901760, %v7137_v58  ;;  %v3309_v13 = vsub.f32 %v21778_v46, %v21786_v11  ;;  %v3321_v58 = vsub.f32 %v21779_v8, %v19151_v39  ;;  %v9035_v43 = vpack.c.bf16 %v3316_v40, %v3304_v61 }
 0x6cb   :  { %9032 = vmatprep.subr.bf16.mxu0 %v9031_v45  ;;  %v7156_v45 = vand.u32 4294901760, %v7155_v48  ;;  %v7173_v48 = vsub.f32 %v21783_v55, %v19156_v6  ;;  %v7179_v61 = vsub.f32 %v21784_v23, %v19160_v35  ;;  %v7191_v40 = vsub.f32 %v21785_v2, %v19162_v7  ;;  %v21791_v55 = vld [vmem:[#allocation33_spill] sm:$0xff] }
 0x6cc   :  { %10182 = vmatpush1.bf16.xpose.msra.mxu1 %v10181_v60  ;;  %v21787_v60 = vand.u32 4294901760, %v21780_v24  ;;  %v10185_v39 = vpack.c.bf16 %v7150_v63, %v7138_v12  ;;  %v3340_v6 = vand.u32 4294901760, %v3339_v33  ;;  %v19165_v11 = vand.u32 4294901760, %v21791_v55  ;;  %v21792_v63 = vld [vmem:[#allocation34_spill] sm:$0xff]  ;;  %v21794_v7 = vld [vmem:[#allocation9_spill] sm:$0xff] }
 0x6cd   :  { %10184 = vmatprep.subr.bf16.mxu1 %v10183_v56  ;;  %v21788_v56 = vand.u32 4294901760, %v21782_v26  ;;  %v10187_v9 = vpack.c.bf16 %v7168_v0, %v7156_v45  ;;  %v7174_v46 = vand.u32 4294901760, %v7173_v48  ;;  %v21793_v35 = vand.u32 4294901760, %v21789_v59 }
 0x6ce   :  { %v3327_v14 = vsub.f32 %v21780_v24, %v21787_v60  ;;  %v21790_v60 = vld [vmem:[#allocation203_spill] sm:$0xff]  ;;  %v19166_v2 = vand.u32 4294901760, %v21794_v7  ;;  %v7192_v45 = vand.u32 4294901760, %v7191_v40 }
 0x6cf   :  { %v7161_v4 = vsub.f32 %v21782_v26, %v21788_v56  ;;  %v19164_v44 = vand.u32 4294901760, %v21790_v60  ;;  %v3310_v56 = vand.u32 4294901760, %v3309_v13  ;;  %v3322_v26 = vand.u32 4294901760, %v3321_v58  ;;  %v21795_v13 = vld [vmem:[#allocation10_spill] sm:$0xff] }
 0x6d0   :  { %v3328_v24 = vand.u32 4294901760, %v3327_v14  ;;  %v3333_v23 = vsub.f32 %v21789_v59, %v21793_v35  ;;  %v19168_v0 = vand.u32 4294901760, %v21795_v13  ;;  %v21796_v14 = vld [vmem:[#allocation42_spill] sm:$0xff]  ;;  %v3351_v35 = vsub.f32 %v21791_v55, %v19165_v11  ;;  %v21800_v11 = vld [vmem:[#allocation52_spill] sm:$0xff] }
 0x6d1   :  { %v7162_v8 = vand.u32 4294901760, %v7161_v4  ;;  %v9037_v58 = vpack.c.bf16 %v3322_v26, %v3310_v56  ;;  %v19172_v33 = vand.u32 4294901760, %v21796_v14  ;;  %v21797_v4 = vld [vmem:[#allocation31_spill] sm:$0xff]  ;;  %v21804_v55 = vld [vmem:[#allocation58_spill] sm:$0xff] }
 0x6d2   :  { %9034 = vmatpush1.bf16.xpose.msra.mxu0 %v9033_v3  ;;  %v7180_v3 = vand.u32 4294901760, %v7179_v61  ;;  %v19175_v48 = vand.u32 4294901760, %v21797_v4  ;;  %v9039_v12 = vpack.c.bf16 %v3340_v6, %v3328_v24  ;;  %v3334_v26 = vand.u32 4294901760, %v3333_v23 }
 0x6d3   :  { %9036 = vmatprep.subr.bf16.mxu0 %v9035_v43  ;;  %v3345_v43 = vsub.f32 %v21790_v60, %v19164_v44  ;;  %v10189_v40 = vpack.c.bf16 %v7174_v46, %v7162_v8  ;;  %v7185_v44 = vsub.f32 %v21794_v7, %v19166_v2  ;;  %v7197_v6 = vsub.f32 %v21795_v13, %v19168_v0  ;;  %v21799_v46 = vld [vmem:[#allocation48_spill] sm:$0xff]  ;;  %v21802_v7 = vld [vmem:[#allocation82_spill] sm:$0xff]  ;;  %v21803_v13 = vld [vmem:[#allocation57_spill] sm:$0xff] }
 0x6d4   :  { %10186 = vmatpush1.bf16.xpose.msra.mxu1 %v10185_v39  ;;  %v21798_v39 = vand.u32 4294901760, %v21792_v63  ;;  %v7203_v24 = vsub.f32 %v21796_v14, %v19172_v33  ;;  %v7215_v8 = vsub.f32 %v21797_v4, %v19175_v48  ;;  %v19178_v2 = vand.u32 4294901760, %v21800_v11  ;;  %v21805_v48 = vld [vmem:[#allocation118_spill] sm:$0xff] }
 0x6d5   :  { %10188 = vmatprep.subr.bf16.mxu1 %v10187_v9  ;;  %v10191_v9 = vpack.c.bf16 %v7192_v45, %v7180_v3  ;;  %v3346_v56 = vand.u32 4294901760, %v3345_v43  ;;  %v3352_v23 = vand.u32 4294901760, %v3351_v35  ;;  %v21801_v45 = vld [vmem:[#allocation81_spill] sm:$0xff]  ;;  %v19179_v0 = vand.u32 4294901760, %v21802_v7 }
 0x6d6   :  { %v3363_v61 = vsub.f32 %v21792_v63, %v21798_v39  ;;  %v19183_v33 = vand.u32 4294901760, %v21804_v55  ;;  %v7198_v60 = vand.u32 4294901760, %v7197_v6  ;;  %v19187_v4 = vand.u32 4294901760, %v21805_v48  ;;  %v21806_v39 = vld [vmem:[#allocation79_spill] sm:$0xff] }
 0x6d7   :  { %v9041_v14 = vpack.c.bf16 %v3346_v56, %v3334_v26  ;;  %v19189_v59 = vand.u32 4294901760, %v21806_v39  ;;  %v7216_v35 = vand.u32 4294901760, %v7215_v8  ;;  %v3387_v56 = vsub.f32 %v21802_v7, %v19179_v0  ;;  %v21810_v8 = vld [vmem:[#allocation121_spill] sm:$0xff] }
 0x6d8   :  { %v3364_v3 = vand.u32 4294901760, %v3363_v61  ;;  %v21807_v61 = vand.u32 4294901760, %v21799_v46 }
 0x6da   :  { %9038 = vmatpush1.bf16.xpose.msra.mxu0 %v9037_v58  ;;  %v7186_v58 = vand.u32 4294901760, %v7185_v44  ;;  %v3357_v43 = vsub.f32 %v21799_v46, %v21807_v61  ;;  %v3369_v44 = vsub.f32 %v21800_v11, %v19178_v2  ;;  %v9043_v63 = vpack.c.bf16 %v3364_v3, %v3352_v23 }
 0x6db   :  { %9040 = vmatprep.subr.bf16.mxu0 %v9039_v12  ;;  %v7204_v12 = vand.u32 4294901760, %v7203_v24  ;;  %v7221_v24 = vsub.f32 %v21804_v55, %v19183_v33  ;;  %v7227_v23 = vsub.f32 %v21805_v48, %v19187_v4  ;;  %v7239_v3 = vsub.f32 %v21806_v39, %v19189_v59  ;;  %v21812_v55 = vld [vmem:[#allocation187_spill] sm:$0xff] }
 0x6dc   :  { %10190 = vmatpush1.bf16.xpose.msra.mxu1 %v10189_v40  ;;  %v21808_v40 = vand.u32 4294901760, %v21801_v45  ;;  %v10193_v2 = vpack.c.bf16 %v7198_v60, %v7186_v58  ;;  %v3388_v33 = vand.u32 4294901760, %v3387_v56  ;;  %v19192_v61 = vand.u32 4294901760, %v21812_v55  ;;  %v21813_v60 = vld [vmem:[#allocation192_spill] sm:$0xff]  ;;  %v21815_v59 = vld [vmem:[#allocation135_spill] sm:$0xff] }
 0x6dd   :  { %10192 = vmatprep.subr.bf16.mxu1 %v10191_v9  ;;  %v21809_v9 = vand.u32 4294901760, %v21803_v13  ;;  %v10195_v7 = vpack.c.bf16 %v7216_v35, %v7204_v12  ;;  %v7222_v46 = vand.u32 4294901760, %v7221_v24  ;;  %v21814_v4 = vand.u32 4294901760, %v21810_v8 }
 0x6de   :  { %v3375_v26 = vsub.f32 %v21801_v45, %v21808_v40  ;;  %v21811_v40 = vld [vmem:[#allocation127_spill] sm:$0xff]  ;;  %v19193_v39 = vand.u32 4294901760, %v21815_v59  ;;  %v7240_v12 = vand.u32 4294901760, %v7239_v3 }
 0x6df   :  { %v7209_v6 = vsub.f32 %v21803_v13, %v21809_v9  ;;  %v19191_v0 = vand.u32 4294901760, %v21811_v40  ;;  %v3358_v9 = vand.u32 4294901760, %v3357_v43  ;;  %v3370_v13 = vand.u32 4294901760, %v3369_v44  ;;  %v21816_v43 = vld [vmem:[#allocation136_spill] sm:$0xff] }
 0x6e0   :  { %v3376_v45 = vand.u32 4294901760, %v3375_v26  ;;  %v3381_v48 = vsub.f32 %v21810_v8, %v21814_v4  ;;  %v19195_v35 = vand.u32 4294901760, %v21816_v43  ;;  %v21817_v26 = vld [vmem:[#allocation14_spill] sm:$0xff]  ;;  %v3399_v4 = vsub.f32 %v21812_v55, %v19192_v61  ;;  %v21821_v61 = vld [vmem:[#allocation27_spill] sm:$0xff] }
 0x6e1   :  { %v7210_v11 = vand.u32 4294901760, %v7209_v6  ;;  %v9045_v44 = vpack.c.bf16 %v3370_v13, %v3358_v9  ;;  %v19199_v56 = vand.u32 4294901760, %v21817_v26  ;;  %v21818_v6 = vld [vmem:[#allocation196_spill] sm:$0xff]  ;;  %v21825_v55 = vld [vmem:[#allocation30_spill] sm:$0xff] }
 0x6e2   :  { %9042 = vmatpush1.bf16.xpose.msra.mxu0 %v9041_v14  ;;  %v7228_v14 = vand.u32 4294901760, %v7227_v23  ;;  %v19202_v24 = vand.u32 4294901760, %v21818_v6  ;;  %v9047_v58 = vpack.c.bf16 %v3388_v33, %v3376_v45  ;;  %v3382_v13 = vand.u32 4294901760, %v3381_v48 }
 0x6e3   :  { %9044 = vmatprep.subr.bf16.mxu0 %v9043_v63  ;;  %v3393_v63 = vsub.f32 %v21811_v40, %v19191_v0  ;;  %v10197_v3 = vpack.c.bf16 %v7222_v46, %v7210_v11  ;;  %v7233_v0 = vsub.f32 %v21815_v59, %v19193_v39  ;;  %v7245_v33 = vsub.f32 %v21816_v43, %v19195_v35  ;;  %v21820_v46 = vld [vmem:[#allocation21_spill] sm:$0xff]  ;;  %v21824_v43 = vld [vmem:[#allocation32_spill] sm:$0xff] }
 0x6e4   :  { %10194 = vmatpush1.bf16.xpose.msra.mxu1 %v10193_v2  ;;  %v21819_v2 = vand.u32 4294901760, %v21813_v60  ;;  %v7251_v45 = vsub.f32 %v21817_v26, %v19199_v56  ;;  %v7263_v11 = vsub.f32 %v21818_v6, %v19202_v24  ;;  %v19205_v39 = vand.u32 4294901760, %v21821_v61  ;;  %v21823_v59 = vld [vmem:[#allocation77_spill] sm:$0xff]  ;;  %v21826_v24 = vld [vmem:[#allocation107_spill] sm:$0xff] }
 0x6e5   :  { %10196 = vmatprep.subr.bf16.mxu1 %v10195_v7  ;;  %v10199_v7 = vpack.c.bf16 %v7240_v12, %v7228_v14  ;;  %v3394_v9 = vand.u32 4294901760, %v3393_v63  ;;  %v3400_v48 = vand.u32 4294901760, %v3399_v4  ;;  %v21822_v12 = vld [vmem:[#allocation80_spill] sm:$0xff]  ;;  %v19206_v35 = vand.u32 4294901760, %v21823_v59 }
 0x6e6   :  { %v3411_v23 = vsub.f32 %v21813_v60, %v21819_v2  ;;  %v19210_v56 = vand.u32 4294901760, %v21825_v55  ;;  %v7246_v40 = vand.u32 4294901760, %v7245_v33  ;;  %v19214_v6 = vand.u32 4294901760, %v21826_v24  ;;  %v21827_v2 = vld [vmem:[#allocation155_spill] sm:$0xff] }
 0x6e7   :  { %v9049_v26 = vpack.c.bf16 %v3394_v9, %v3382_v13  ;;  %v19216_v8 = vand.u32 4294901760, %v21827_v2  ;;  %v7264_v4 = vand.u32 4294901760, %v7263_v11  ;;  %v3435_v9 = vsub.f32 %v21823_v59, %v19206_v35  ;;  %v21831_v11 = vld [vmem:[#allocation134_spill] sm:$0xff] }
 0x6e8   :  { %v3412_v14 = vand.u32 4294901760, %v3411_v23  ;;  %v21828_v23 = vand.u32 4294901760, %v21820_v46 }
 0x6ea   :  { %9046 = vmatpush1.bf16.xpose.msra.mxu0 %v9045_v44  ;;  %v7234_v44 = vand.u32 4294901760, %v7233_v0  ;;  %v3405_v63 = vsub.f32 %v21820_v46, %v21828_v23  ;;  %v3417_v0 = vsub.f32 %v21821_v61, %v19205_v39  ;;  %v9051_v60 = vpack.c.bf16 %v3412_v14, %v3400_v48 }
 0x6eb   :  { %9048 = vmatprep.subr.bf16.mxu0 %v9047_v58  ;;  %v7252_v58 = vand.u32 4294901760, %v7251_v45  ;;  %v7269_v45 = vsub.f32 %v21825_v55, %v19210_v56  ;;  %v7275_v48 = vsub.f32 %v21826_v24, %v19214_v6  ;;  %v7287_v14 = vsub.f32 %v21827_v2, %v19216_v8  ;;  %v21833_v55 = vld [vmem:[#allocation216_spill] sm:$0xff] }
 0x6ec   :  { %10198 = vmatpush1.bf16.xpose.msra.mxu1 %v10197_v3  ;;  %v21829_v3 = vand.u32 4294901760, %v21822_v12  ;;  %v10201_v39 = vpack.c.bf16 %v7246_v40, %v7234_v44  ;;  %v3436_v56 = vand.u32 4294901760, %v3435_v9  ;;  %v19219_v23 = vand.u32 4294901760, %v21833_v55  ;;  %v21834_v40 = vld [vmem:[#allocation217_spill] sm:$0xff]  ;;  %v21836_v8 = vld [vmem:[#allocation208_spill] sm:$0xff] }
 0x6ed   :  { %10200 = vmatprep.subr.bf16.mxu1 %v10199_v7  ;;  %v21830_v7 = vand.u32 4294901760, %v21824_v43  ;;  %v10203_v59 = vpack.c.bf16 %v7264_v4, %v7252_v58  ;;  %v7270_v46 = vand.u32 4294901760, %v7269_v45  ;;  %v21835_v6 = vand.u32 4294901760, %v21831_v11 }
 0x6ee   :  { %v3423_v13 = vsub.f32 %v21822_v12, %v21829_v3  ;;  %v21832_v3 = vld [vmem:[#allocation179_spill] sm:$0xff]  ;;  %v19220_v2 = vand.u32 4294901760, %v21836_v8  ;;  %v7288_v58 = vand.u32 4294901760, %v7287_v14 }
 0x6ef   :  { %v7257_v33 = vsub.f32 %v21824_v43, %v21830_v7  ;;  %v19218_v35 = vand.u32 4294901760, %v21832_v3  ;;  %v3406_v7 = vand.u32 4294901760, %v3405_v63  ;;  %v3418_v43 = vand.u32 4294901760, %v3417_v0  ;;  %v21837_v63 = vld [vmem:[#allocation211_spill] sm:$0xff] }
 0x6f0   :  { %v3424_v12 = vand.u32 4294901760, %v3423_v13  ;;  %v3429_v24 = vsub.f32 %v21831_v11, %v21835_v6  ;;  %v19222_v4 = vand.u32 4294901760, %v21837_v63  ;;  %v21838_v13 = vld [vmem:[#allocation218_spill] sm:$0xff]  ;;  %v3447_v6 = vsub.f32 %v21833_v55, %v19219_v23  ;;  %v21842_v23 = vld [vmem:[#allocation223_spill] sm:$0xff]  ;;  %v21846_v55 = vld [vmem:[#allocation225_spill] sm:$0xff] }
 0x6f1   :  { %v7258_v61 = vand.u32 4294901760, %v7257_v33  ;;  %v9053_v0 = vpack.c.bf16 %v3418_v43, %v3406_v7  ;;  %v19226_v9 = vand.u32 4294901760, %v21838_v13  ;;  %v21839_v33 = vld [vmem:[#allocation221_spill] sm:$0xff] }
 0x6f2   :  { %9050 = vmatpush1.bf16.xpose.msra.mxu0 %v9049_v26  ;;  %v7276_v26 = vand.u32 4294901760, %v7275_v48  ;;  %v19229_v45 = vand.u32 4294901760, %v21839_v33  ;;  %v9055_v44 = vpack.c.bf16 %v3436_v56, %v3424_v12  ;;  %v3430_v43 = vand.u32 4294901760, %v3429_v24 }
 0x6f3   :  { %9052 = vmatprep.subr.bf16.mxu0 %v9051_v60  ;;  %v3441_v60 = vsub.f32 %v21832_v3, %v19218_v35  ;;  %v10205_v14 = vpack.c.bf16 %v7270_v46, %v7258_v61  ;;  %v7281_v35 = vsub.f32 %v21836_v8, %v19220_v2  ;;  %v7293_v56 = vsub.f32 %v21837_v63, %v19222_v4  ;;  %v21841_v46 = vld [vmem:[#allocation222_spill] sm:$0xff]  ;;  %v21844_v8 = vld [vmem:[#allocation232_spill] sm:$0xff] }
 0x6f4   :  { %10202 = vmatpush1.bf16.xpose.msra.mxu1 %v10201_v39  ;;  %v21840_v39 = vand.u32 4294901760, %v21834_v40  ;;  %v7299_v12 = vsub.f32 %v21838_v13, %v19226_v9  ;;  %v7311_v61 = vsub.f32 %v21839_v33, %v19229_v45  ;;  %v19232_v2 = vand.u32 4294901760, %v21842_v23  ;;  %v21845_v63 = vld [vmem:[#allocation224_spill] sm:$0xff]  ;;  %v21847_v45 = vld [vmem:[#allocation233_spill] sm:$0xff] }
 0x6f5   :  { %10204 = vmatprep.subr.bf16.mxu1 %v10203_v59  ;;  %v10207_v59 = vpack.c.bf16 %v7288_v58, %v7276_v26  ;;  %v3442_v7 = vand.u32 4294901760, %v3441_v60  ;;  %v3448_v24 = vand.u32 4294901760, %v3447_v6  ;;  %v21843_v58 = vld [vmem:[#allocation231_spill] sm:$0xff]  ;;  %v19233_v4 = vand.u32 4294901760, %v21844_v8 }
 0x6f6   :  { %v3459_v48 = vsub.f32 %v21834_v40, %v21840_v39  ;;  %v19237_v9 = vand.u32 4294901760, %v21846_v55  ;;  %v7294_v3 = vand.u32 4294901760, %v7293_v56  ;;  %v19241_v33 = vand.u32 4294901760, %v21847_v45  ;;  %v21848_v39 = vld [vmem:[#allocation204_spill] sm:$0xff] }
 0x6f7   :  { %v9057_v13 = vpack.c.bf16 %v3442_v7, %v3430_v43  ;;  %v19243_v11 = vand.u32 4294901760, %v21848_v39  ;;  %v7312_v6 = vand.u32 4294901760, %v7311_v61  ;;  %v3483_v7 = vsub.f32 %v21844_v8, %v19233_v4  ;;  %v21852_v61 = vld [vmem:[#allocation16_spill] sm:$0xff] }
 0x6f8   :  { %v3460_v26 = vand.u32 4294901760, %v3459_v48  ;;  %v21849_v48 = vand.u32 4294901760, %v21841_v46 }
 0x6fa   :  { %9054 = vmatpush1.bf16.xpose.msra.mxu0 %v9053_v0  ;;  %v7282_v0 = vand.u32 4294901760, %v7281_v35  ;;  %v3453_v60 = vsub.f32 %v21841_v46, %v21849_v48  ;;  %v3465_v35 = vsub.f32 %v21842_v23, %v19232_v2  ;;  %v9059_v40 = vpack.c.bf16 %v3460_v26, %v3448_v24 }
 0x6fb   :  { %9056 = vmatprep.subr.bf16.mxu0 %v9055_v44  ;;  %v7300_v44 = vand.u32 4294901760, %v7299_v12  ;;  %v7317_v12 = vsub.f32 %v21846_v55, %v19237_v9  ;;  %v7323_v24 = vsub.f32 %v21847_v45, %v19241_v33  ;;  %v7335_v26 = vsub.f32 %v21848_v39, %v19243_v11  ;;  %v21854_v55 = vld [vmem:[#allocation25_spill] sm:$0xff]  ;;  %v21857_v11 = vld [vmem:[#allocation22_spill] sm:$0xff] }
 0x6fc   :  { %10206 = vmatpush1.bf16.xpose.msra.mxu1 %v10205_v14  ;;  %v21850_v14 = vand.u32 4294901760, %v21843_v58  ;;  %v10209_v2 = vpack.c.bf16 %v7294_v3, %v7282_v0  ;;  %v3484_v9 = vand.u32 4294901760, %v3483_v7  ;;  %v19248_v48 = vand.u32 4294901760, %v21854_v55  ;;  %v21855_v3 = vld [vmem:[#allocation26_spill] sm:$0xff] }
 0x6fd   :  { %10208 = vmatprep.subr.bf16.mxu1 %v10207_v59  ;;  %v21851_v59 = vand.u32 4294901760, %v21845_v63  ;;  %v10211_v8 = vpack.c.bf16 %v7312_v6, %v7300_v44  ;;  %v7318_v46 = vand.u32 4294901760, %v7317_v12  ;;  %v21856_v33 = vand.u32 4294901760, %v21852_v61 }
 0x6fe   :  { %v3471_v43 = vsub.f32 %v21843_v58, %v21850_v14  ;;  %v21853_v14 = vld [vmem:[#allocation20_spill] sm:$0xff]  ;;  %v19247_v39 = vand.u32 4294901760, %v21857_v11  ;;  %v7336_v44 = vand.u32 4294901760, %v7335_v26 }
 0x6ff   :  { %v7305_v56 = vsub.f32 %v21845_v63, %v21851_v59  ;;  %v19245_v4 = vand.u32 4294901760, %v21853_v14  ;;  %v3454_v59 = vand.u32 4294901760, %v3453_v60  ;;  %v3466_v63 = vand.u32 4294901760, %v3465_v35  ;;  %v21858_v60 = vld [vmem:[#allocation205_spill] sm:$0xff] }
 0x700   :  { %v3472_v58 = vand.u32 4294901760, %v3471_v43  ;;  %v3477_v45 = vsub.f32 %v21852_v61, %v21856_v33  ;;  %v19246_v6 = vand.u32 4294901760, %v21858_v60  ;;  %v21859_v43 = vld [vmem:[#allocation39_spill] sm:$0xff]  ;;  %v3495_v33 = vsub.f32 %v21854_v55, %v19248_v48 }
 0x701   :  { %v7306_v23 = vand.u32 4294901760, %v7305_v56  ;;  %v9061_v35 = vpack.c.bf16 %v3466_v63, %v3454_v59  ;;  %v19249_v7 = vand.u32 4294901760, %v21859_v43  ;;  %v21860_v56 = vld [vmem:[#allocation40_spill] sm:$0xff]  ;;  %v19252_v48 = vand.u32 4294901760, %v16013_v50 }
 0x702   :  { %9058 = vmatpush1.bf16.xpose.msra.mxu0 %v9057_v13  ;;  %v7324_v13 = vand.u32 4294901760, %v7323_v24  ;;  %v19251_v12 = vand.u32 4294901760, %v21860_v56  ;;  %v9063_v0 = vpack.c.bf16 %v3484_v9, %v3472_v58  ;;  %v3478_v63 = vand.u32 4294901760, %v3477_v45 }
 0x703   :  { %9060 = vmatprep.subr.bf16.mxu0 %v9059_v40  ;;  %v3489_v40 = vsub.f32 %v21853_v14, %v19245_v4  ;;  %v10213_v26 = vpack.c.bf16 %v7318_v46, %v7306_v23  ;;  %v7329_v4 = vsub.f32 %v21857_v11, %v19247_v39  ;;  %v7341_v9 = vsub.f32 %v21858_v60, %v19246_v6 }
 0x704   :  { %10210 = vmatpush1.bf16.xpose.msra.mxu1 %v10209_v2  ;;  %v21861_v2 = vand.u32 4294901760, %v21855_v3  ;;  %v7347_v58 = vsub.f32 %v21859_v43, %v19249_v7  ;;  %v7359_v23 = vsub.f32 %v21860_v56, %v19251_v12  ;;  %v19255_v46 = vand.u32 4294901760, %v15989_v17 }
 0x705   :  { %10212 = vmatprep.subr.bf16.mxu1 %v10211_v8  ;;  %v10215_v8 = vpack.c.bf16 %v7336_v44, %v7324_v13  ;;  %v3490_v59 = vand.u32 4294901760, %v3489_v40  ;;  %v3496_v45 = vand.u32 4294901760, %v3495_v33  ;;  %v7330_v44 = vand.u32 4294901760, %v7329_v4 }
 0x706   :  { %v3507_v24 = vsub.f32 %v21855_v3, %v21861_v2  ;;  %v19254_v2 = vand.u32 4294901760, %v15994_v52  ;;  %v7342_v6 = vand.u32 4294901760, %v7341_v9  ;;  %v7348_v7 = vand.u32 4294901760, %v7347_v58 }
 0x707   :  { %v9065_v40 = vpack.c.bf16 %v3490_v59, %v3478_v63  ;;  %v7360_v43 = vand.u32 4294901760, %v7359_v23  ;;  %v3501_v12 = vsub.f32 %v15989_v17, %v19255_v46 }
 0x708   :  { %v3508_v13 = vand.u32 4294901760, %v3507_v24  ;;  %v10217_v4 = vpack.c.bf16 %v7342_v6, %v7330_v44  ;;  %v9071_v6 = vpack.c.bf16 %v21657_v37, %v21656_v27  ;;  %v10227_v44 = vpack.c.bf16 %v21696_v57, %v21695_v18 }
 0x709   :  { %v3502_v63 = vand.u32 4294901760, %v3501_v12  ;;  %v10225_v12 = vpack.c.bf16 %v21691_v32, %v21690_v34 }
 0x70a   :  { %9062 = vmatpush1.bf16.xpose.msra.mxu0 %v9061_v35  ;;  %v21862_v35 = vld [vmem:[#allocation60_spill] sm:$0xff]  ;;  %v9067_v33 = vpack.c.bf16 %v3508_v13, %v3496_v45  ;;  %v10223_v13 = vpack.c.bf16 %v21660_v31, %v21659_v41 }
 0x70b   :  { %9064 = vmatprep.subr.bf16.mxu0 %v9063_v0  ;;  %v19253_v39 = vand.u32 4294901760, %v21862_v35  ;;  %v3513_v0 = vsub.f32 %v15994_v52, %v19254_v2  ;;  %v21878_v2 = vld [vmem:[#allocation159_spill] sm:$0xff] }
 0x70c   :  { %10214 = vmatpush1.bf16.xpose.msra.mxu1 %v10213_v26  ;;  %v7365_v26 = vsub.f32 %v16013_v50, %v19252_v48 }
 0x70d   :  { %10216 = vmatprep.subr.bf16.mxu1 %v10215_v8  ;;  %v7353_v24 = vsub.f32 %v21862_v35, %v19253_v39  ;;  %v10219_v8 = vpack.c.bf16 %v7360_v43, %v7348_v7  ;;  %v3514_v59 = vand.u32 4294901760, %v3513_v0  ;;  %v9073_v43 = vpack.c.bf16 %v21673_v10, %v21672_v54  ;;  %v21877_v39 = vld [vmem:[#allocation157_spill] sm:$0xff] }
 0x70e   :  { %v7366_v58 = vand.u32 4294901760, %v7365_v26  ;;  %v9075_v7 = vpack.c.bf16 %v21686_v25, %v21685_v51  ;;  %v9079_v0 = vpack.c.bf16 %v21709_v36, %v21708_v53  ;;  %v10233_v26 = vpack.c.bf16 %v21728_v47, %v21726_v30 }
 0x70f   :  { %v7354_v9 = vand.u32 4294901760, %v7353_v24  ;;  %v9069_v23 = vpack.c.bf16 %v3514_v59, %v3502_v63  ;;  %v9083_v24 = vpack.c.bf16 %v21724_v1, %v21723_v29  ;;  %v21863_v63 = vld [vmem:[#allocation146_spill] sm:$0xff]  ;;  %v21864_v59 = vld [vmem:[#allocation152_spill] sm:$0xff]  ;;  %v10243_v46 = vpack.c.bf16 %v21878_v2, %v21877_v39 }
 0x710   :  { %v21890_v2 = vld [vmem:[#allocation122_spill] sm:$0xff] }
 0x711   :  { %v10221_v45 = vpack.c.bf16 %v7366_v58, %v7354_v9  ;;  %v9085_v9 = vpack.c.bf16 %v21864_v59, %v21863_v63  ;;  %v21865_v58 = vld [vmem:[#allocation164_spill] sm:$0xff] }
 0x712   :  { %9066 = vmatpush1.bf16.xpose.msra.mxu0 %v9065_v40  ;;  %v9077_v40 = vpack.c.bf16 %v21707_v15, %v21706_v62 }
 0x713   :  { %9068 = vmatprep.subr.bf16.mxu0 %v9067_v33  ;;  %v10229_v33 = vpack.c.bf16 %v21711_v49, %v21710_v28 }
 0x714   :  { %10218 = vmatpush1.bf16.xpose.msra.mxu1 %v10217_v4  ;;  %v10231_v4 = vpack.c.bf16 %v21713_v20, %v21712_v22 }
 0x715   :  { %10220 = vmatprep.subr.bf16.mxu1 %v10219_v8  ;;  %v10235_v8 = vpack.c.bf16 %v21730_v5, %v21729_v42 }
 0x71a   :  { %9070 = vmatpush1.bf16.xpose.msra.mxu0 %v9069_v23  ;;  %v21866_v23 = vld [vmem:[#allocation161_spill] sm:$0xff] }
 0x71b   :  { %9072 = vmatprep.subr.bf16.mxu0 %v9071_v6  ;;  %v9087_v6 = vpack.c.bf16 %v21866_v23, %v21865_v58 }
 0x71c   :  { %10222 = vmatpush1.bf16.xpose.msra.mxu1 %v10221_v45  ;;  %v21867_v45 = vld [vmem:[#allocation120_spill] sm:$0xff] }
 0x71d   :  { %10224 = vmatprep.subr.bf16.mxu1 %v10223_v13  ;;  %v21868_v13 = vld [vmem:[#allocation133_spill] sm:$0xff] }
 0x721   :  { %3519 = vmatmul.mubr.f32.vlgmr.msra.gmra.mrb[0].mxu0 %v16418_v19 }
 0x722   :  { %9074 = vmatpush1.bf16.xpose.msra.mxu0 %v9073_v43  ;;  %3719 = vmatprep.mubr.f32.mxu0 %v16002_v16  ;;  %v10237_v43 = vpack.c.bf16 %v21868_v13, %v21867_v45 }
 0x723   :  { %9076 = vmatprep.subr.bf16.mxu0 %v9075_v7  ;;  %7371 = vmatmul.mubr.f32.vlgmr.msra.gmra.mrb[0].mxu1 %v16418_v19  ;;  %v21869_v7 = vld [vmem:[#allocation182_spill] sm:$0xff]  ;;  %v21882_v19 = vld [vmem:[#allocation97_spill] sm:$0xff] }
 0x724   :  { %10226 = vmatpush1.bf16.xpose.msra.mxu1 %v10225_v12  ;;  %7571 = vmatprep.mubr.f32.mxu1 %v16002_v16  ;;  %v9081_v16 = vpack.c.bf16 %v21722_v38, %v21719_v21  ;;  %v21870_v12 = vld [vmem:[#allocation188_spill] sm:$0xff] }
 0x725   :  { %10228 = vmatprep.subr.bf16.mxu1 %v10227_v44  ;;  %v10239_v44 = vpack.c.bf16 %v21870_v12, %v21869_v7 }
 0x72a   :  { %9078 = vmatpush1.bf16.xpose.msra.mxu0 %v9077_v40  ;;  %v21871_v40 = vld [vmem:[#allocation145_spill] sm:$0xff] }
 0x72b   :  { %9080 = vmatprep.subr.bf16.mxu0 %v9079_v0  ;;  %v21872_v0 = vld [vmem:[#allocation147_spill] sm:$0xff] }
 0x72c   :  { %10230 = vmatpush1.bf16.xpose.msra.mxu1 %v10229_v33  ;;  %v9089_v33 = vpack.c.bf16 %v21872_v0, %v21871_v40  ;;  %v21883_v0 = vld [vmem:[#allocation166_spill] sm:$0xff]  ;;  %v21884_v40 = vld [vmem:[#allocation168_spill] sm:$0xff] }
 0x72d   :  { %10232 = vmatprep.subr.bf16.mxu1 %v10231_v4  ;;  %v21873_v4 = vld [vmem:[#allocation154_spill] sm:$0xff]  ;;  %v10245_v7 = vpack.c.bf16 %v21884_v40, %v21883_v0 }
 0x732   :  { %9082 = vmatpush1.bf16.xpose.msra.mxu0 %v9081_v16  ;;  %v21874_v16 = vld [vmem:[#allocation156_spill] sm:$0xff] }
 0x733   :  { %9084 = vmatprep.subr.bf16.mxu0 %v9083_v24  ;;  %v9091_v24 = vpack.c.bf16 %v21874_v16, %v21873_v4  ;;  %v21885_v16 = vld [vmem:[#allocation170_spill] sm:$0xff] }
 0x734   :  { %10234 = vmatpush1.bf16.xpose.msra.mxu1 %v10233_v26  ;;  %v21875_v26 = vld [vmem:[#allocation108_spill] sm:$0xff]  ;;  %v21886_v4 = vld [vmem:[#allocation206_spill] sm:$0xff] }
 0x735   :  { %10236 = vmatprep.subr.bf16.mxu1 %v10235_v8  ;;  %v21876_v8 = vld [vmem:[#allocation141_spill] sm:$0xff] }
 0x736   :  { %v10241_v48 = vpack.c.bf16 %v21876_v8, %v21875_v26  ;;  %v10247_v8 = vpack.c.bf16 %v21886_v4, %v21885_v16  ;;  %v21898_v4 = vld [vmem:[#allocation132_spill] sm:$0xff] }
 0x73a   :  { %9086 = vmatpush1.bf16.xpose.msra.mxu0 %v9085_v9  ;;  %v21879_v9 = vld [vmem:[#allocation160_spill] sm:$0xff] }
 0x73b   :  { %9088 = vmatprep.subr.bf16.mxu0 %v9087_v6  ;;  %v21880_v6 = vld [vmem:[#allocation165_spill] sm:$0xff] }
 0x73c   :  { %10238 = vmatpush1.bf16.xpose.msra.mxu1 %v10237_v43  ;;  %v9093_v43 = vpack.c.bf16 %v21880_v6, %v21879_v9  ;;  %v21891_v6 = vld [vmem:[#allocation198_spill] sm:$0xff]  ;;  %v21892_v9 = vld [vmem:[#allocation99_spill] sm:$0xff] }
 0x73d   :  { %10240 = vmatprep.subr.bf16.mxu1 %v10239_v44  ;;  %v21881_v44 = vld [vmem:[#allocation96_spill] sm:$0xff]  ;;  %v10249_v26 = vpack.c.bf16 %v21892_v9, %v21891_v6 }
 0x73e   :  { %v9095_v12 = vpack.c.bf16 %v21882_v19, %v21881_v44  ;;  %v21893_v19 = vld [vmem:[#allocation128_spill] sm:$0xff]  ;;  %v21894_v44 = vld [vmem:[#allocation131_spill] sm:$0xff] }
 0x73f   :  { %v10251_v40 = vpack.c.bf16 %v21894_v44, %v21893_v19  ;;  %v21906_v44 = vld [vmem:[#allocation34_spill] sm:$0xff] }
 0x742   :  { %9090 = vmatpush1.bf16.xpose.msra.mxu0 %v9089_v33  ;;  %v21887_v33 = vld [vmem:[#allocation173_spill] sm:$0xff] }
 0x743   :  { %9092 = vmatprep.subr.bf16.mxu0 %v9091_v24  ;;  %v21888_v24 = vld [vmem:[#allocation209_spill] sm:$0xff] }
 0x744   :  { %10242 = vmatpush1.bf16.xpose.msra.mxu1 %v10241_v48  ;;  %v9097_v48 = vpack.c.bf16 %v21888_v24, %v21887_v33  ;;  %v21899_v24 = vld [vmem:[#allocation207_spill] sm:$0xff]  ;;  %v21900_v33 = vld [vmem:[#allocation180_spill] sm:$0xff] }
 0x745   :  { %10244 = vmatprep.subr.bf16.mxu1 %v10243_v46  ;;  %v21889_v46 = vld [vmem:[#allocation116_spill] sm:$0xff]  ;;  %v10253_v0 = vpack.c.bf16 %v21900_v33, %v21899_v24 }
 0x746   :  { %v9099_v39 = vpack.c.bf16 %v21890_v2, %v21889_v46  ;;  %v21901_v2 = vld [vmem:[#allocation144_spill] sm:$0xff]  ;;  %v21902_v46 = vld [vmem:[#allocation138_spill] sm:$0xff] }
 0x747   :  { %v10255_v9 = vpack.c.bf16 %v21902_v46, %v21901_v2  ;;  %v21914_v46 = vld [vmem:[#allocation82_spill] sm:$0xff] }
 0x74a   :  { %9094 = vmatpush1.bf16.xpose.msra.mxu0 %v9093_v43  ;;  %v21895_v43 = vld [vmem:[#allocation158_spill] sm:$0xff] }
 0x74b   :  { %9096 = vmatprep.subr.bf16.mxu0 %v9095_v12  ;;  %v21896_v12 = vld [vmem:[#allocation167_spill] sm:$0xff] }
 0x74c   :  { %10246 = vmatpush1.bf16.xpose.msra.mxu1 %v10245_v7  ;;  %v9101_v7 = vpack.c.bf16 %v21896_v12, %v21895_v43  ;;  %v21907_v12 = vld [vmem:[#allocation9_spill] sm:$0xff]  ;;  %v21908_v43 = vld [vmem:[#allocation10_spill] sm:$0xff] }
 0x74d   :  { %10248 = vmatprep.subr.bf16.mxu1 %v10247_v8  ;;  %v21897_v8 = vld [vmem:[#allocation126_spill] sm:$0xff]  ;;  %v10257_v6 = vpack.c.bf16 %v21908_v43, %v21907_v12 }
 0x74e   :  { %v9103_v16 = vpack.c.bf16 %v21898_v4, %v21897_v8  ;;  %v21909_v4 = vld [vmem:[#allocation42_spill] sm:$0xff]  ;;  %v21910_v8 = vld [vmem:[#allocation31_spill] sm:$0xff] }
 0x74f   :  { %v10259_v33 = vpack.c.bf16 %v21910_v8, %v21909_v4  ;;  %v21922_v8 = vld [vmem:[#allocation192_spill] sm:$0xff] }
 0x752   :  { %9098 = vmatpush1.bf16.xpose.msra.mxu0 %v9097_v48  ;;  %v21903_v48 = vld [vmem:[#allocation151_spill] sm:$0xff] }
 0x753   :  { %9100 = vmatprep.subr.bf16.mxu0 %v9099_v39  ;;  %v21904_v39 = vld [vmem:[#allocation203_spill] sm:$0xff] }
 0x754   :  { %10250 = vmatpush1.bf16.xpose.msra.mxu1 %v10249_v26  ;;  %v9105_v26 = vpack.c.bf16 %v21904_v39, %v21903_v48  ;;  %v21915_v39 = vld [vmem:[#allocation57_spill] sm:$0xff]  ;;  %v21916_v48 = vld [vmem:[#allocation58_spill] sm:$0xff] }
 0x755   :  { %10252 = vmatprep.subr.bf16.mxu1 %v10251_v40  ;;  %v21905_v40 = vld [vmem:[#allocation33_spill] sm:$0xff]  ;;  %v10261_v24 = vpack.c.bf16 %v21916_v48, %v21915_v39 }
 0x756   :  { %v9107_v19 = vpack.c.bf16 %v21906_v44, %v21905_v40  ;;  %v21917_v44 = vld [vmem:[#allocation118_spill] sm:$0xff]  ;;  %v21918_v40 = vld [vmem:[#allocation79_spill] sm:$0xff] }
 0x757   :  { %v10263_v43 = vpack.c.bf16 %v21918_v40, %v21917_v44  ;;  %v21930_v40 = vld [vmem:[#allocation77_spill] sm:$0xff] }
 0x75a   :  { %9102 = vmatpush1.bf16.xpose.msra.mxu0 %v9101_v7  ;;  %v21911_v7 = vld [vmem:[#allocation48_spill] sm:$0xff] }
 0x75b   :  { %9104 = vmatprep.subr.bf16.mxu0 %v9103_v16  ;;  %v21912_v16 = vld [vmem:[#allocation52_spill] sm:$0xff] }
 0x75c   :  { %10254 = vmatpush1.bf16.xpose.msra.mxu1 %v10253_v0  ;;  %v9109_v0 = vpack.c.bf16 %v21912_v16, %v21911_v7  ;;  %v21923_v16 = vld [vmem:[#allocation135_spill] sm:$0xff]  ;;  %v21924_v7 = vld [vmem:[#allocation136_spill] sm:$0xff] }
 0x75d   :  { %10256 = vmatprep.subr.bf16.mxu1 %v10255_v9  ;;  %v21913_v9 = vld [vmem:[#allocation81_spill] sm:$0xff]  ;;  %v10265_v12 = vpack.c.bf16 %v21924_v7, %v21923_v16 }
 0x75e   :  { %v9111_v2 = vpack.c.bf16 %v21914_v46, %v21913_v9  ;;  %v21925_v46 = vld [vmem:[#allocation14_spill] sm:$0xff]  ;;  %v21926_v9 = vld [vmem:[#allocation196_spill] sm:$0xff] }
 0x75f   :  { %v10267_v48 = vpack.c.bf16 %v21926_v9, %v21925_v46  ;;  %v21938_v9 = vld [vmem:[#allocation217_spill] sm:$0xff] }
 0x762   :  { %9106 = vmatpush1.bf16.xpose.msra.mxu0 %v9105_v26  ;;  %v21919_v26 = vld [vmem:[#allocation121_spill] sm:$0xff] }
 0x763   :  { %9108 = vmatprep.subr.bf16.mxu0 %v9107_v19  ;;  %v21920_v19 = vld [vmem:[#allocation127_spill] sm:$0xff] }
 0x764   :  { %10258 = vmatpush1.bf16.xpose.msra.mxu1 %v10257_v6  ;;  %v9113_v6 = vpack.c.bf16 %v21920_v19, %v21919_v26  ;;  %v21931_v19 = vld [vmem:[#allocation32_spill] sm:$0xff]  ;;  %v21932_v26 = vld [vmem:[#allocation30_spill] sm:$0xff] }
 0x765   :  { %10260 = vmatprep.subr.bf16.mxu1 %v10259_v33  ;;  %v21921_v33 = vld [vmem:[#allocation187_spill] sm:$0xff]  ;;  %v10269_v39 = vpack.c.bf16 %v21932_v26, %v21931_v19 }
 0x766   :  { %v9115_v4 = vpack.c.bf16 %v21922_v8, %v21921_v33  ;;  %v21933_v8 = vld [vmem:[#allocation107_spill] sm:$0xff] }
 0x767   :  { %v21934_v33 = vld [vmem:[#allocation155_spill] sm:$0xff] }
 0x768   :  { %v10271_v7 = vpack.c.bf16 %v21934_v33, %v21933_v8  ;;  %v21946_v33 = vld [vmem:[#allocation232_spill] sm:$0xff] }
 0x76a   :  { %9110 = vmatpush1.bf16.xpose.msra.mxu0 %v9109_v0  ;;  %v21927_v0 = vld [vmem:[#allocation21_spill] sm:$0xff] }
 0x76b   :  { %9112 = vmatprep.subr.bf16.mxu0 %v9111_v2  ;;  %v21928_v2 = vld [vmem:[#allocation27_spill] sm:$0xff] }
 0x76c   :  { %10262 = vmatpush1.bf16.xpose.msra.mxu1 %v10261_v24  ;;  %v9117_v24 = vpack.c.bf16 %v21928_v2, %v21927_v0  ;;  %v21939_v2 = vld [vmem:[#allocation208_spill] sm:$0xff]  ;;  %v21940_v0 = vld [vmem:[#allocation211_spill] sm:$0xff] }
 0x76d   :  { %10264 = vmatprep.subr.bf16.mxu1 %v10263_v43  ;;  %v21929_v43 = vld [vmem:[#allocation80_spill] sm:$0xff]  ;;  %v10273_v16 = vpack.c.bf16 %v21940_v0, %v21939_v2 }
 0x76e   :  { %v9119_v44 = vpack.c.bf16 %v21930_v40, %v21929_v43  ;;  %v21941_v40 = vld [vmem:[#allocation218_spill] sm:$0xff]  ;;  %v21942_v43 = vld [vmem:[#allocation221_spill] sm:$0xff] }
 0x76f   :  { %v10275_v26 = vpack.c.bf16 %v21942_v43, %v21941_v40 }
 0x772   :  { %9114 = vmatpush1.bf16.xpose.msra.mxu0 %v9113_v6  ;;  %v21935_v6 = vld [vmem:[#allocation134_spill] sm:$0xff] }
 0x773   :  { %9116 = vmatprep.subr.bf16.mxu0 %v9115_v4  ;;  %v21936_v4 = vld [vmem:[#allocation179_spill] sm:$0xff] }
 0x774   :  { %10266 = vmatpush1.bf16.xpose.msra.mxu1 %v10265_v12  ;;  %v9121_v12 = vpack.c.bf16 %v21936_v4, %v21935_v6  ;;  %v21947_v4 = vld [vmem:[#allocation224_spill] sm:$0xff]  ;;  %v21948_v6 = vld [vmem:[#allocation225_spill] sm:$0xff] }
 0x775   :  { %10268 = vmatprep.subr.bf16.mxu1 %v10267_v48  ;;  %v21937_v48 = vld [vmem:[#allocation216_spill] sm:$0xff]  ;;  %v10277_v19 = vpack.c.bf16 %v21948_v6, %v21947_v4 }
 0x776   :  { %v9123_v46 = vpack.c.bf16 %v21938_v9, %v21937_v48  ;;  %v21949_v9 = vld [vmem:[#allocation233_spill] sm:$0xff]  ;;  %v21950_v48 = vld [vmem:[#allocation204_spill] sm:$0xff] }
 0x777   :  { %v10279_v0 = vpack.c.bf16 %v21950_v48, %v21949_v9 }
 0x77a   :  { %9118 = vmatpush1.bf16.xpose.msra.mxu0 %v9117_v24  ;;  %v21943_v24 = vld [vmem:[#allocation222_spill] sm:$0xff] }
 0x77b   :  { %9120 = vmatprep.subr.bf16.mxu0 %v9119_v44  ;;  %v21944_v44 = vld [vmem:[#allocation223_spill] sm:$0xff] }
 0x77c   :  { %10270 = vmatpush1.bf16.xpose.msra.mxu1 %v10269_v39  ;;  %v9125_v39 = vpack.c.bf16 %v21944_v44, %v21943_v24 }
 0x77d   :  { %10272 = vmatprep.subr.bf16.mxu1 %v10271_v7  ;;  %v21945_v7 = vld [vmem:[#allocation231_spill] sm:$0xff] }
 0x77e   :  { %v9127_v8 = vpack.c.bf16 %v21946_v33, %v21945_v7 }
 0x782   :  { %9122 = vmatpush1.bf16.xpose.msra.mxu0 %v9121_v12  ;;  %v21951_v12 = vld [vmem:[#allocation39_spill] sm:$0xff] }
 0x783   :  { %9124 = vmatprep.subr.bf16.mxu0 %v9123_v46  ;;  %v9129_v46 = vpack.c.bf16 %v21853_v14, %v21852_v61  ;;  %v10283_v6 = vpack.c.bf16 %v21860_v56, %v21951_v12  ;;  %v21956_v56 = vld [vmem:[#allocation51_spill] sm:$0xff] }
 0x784   :  { %10274 = vmatpush1.bf16.xpose.msra.mxu1 %v10273_v16  ;;  %v9131_v16 = vpack.c.bf16 %v21855_v3, %v21854_v55 }
 0x785   :  { %10276 = vmatprep.subr.bf16.mxu1 %v10275_v26  ;;  %v10281_v26 = vpack.c.bf16 %v21858_v60, %v21857_v11  ;;  %v21954_v60 = vld [vmem:[#allocation55_spill] sm:$0xff] }
 0x78a   :  { %9126 = vmatpush1.bf16.xpose.msra.mxu0 %v9125_v39  ;;  %v21953_v39 = vld [vmem:[#allocation45_spill] sm:$0xff] }
 0x78b   :  { %9128 = vmatprep.subr.bf16.mxu0 %v9127_v8  ;;  %v9133_v8 = vpack.c.bf16 %v15994_v52, %v15989_v17 }
 0x78c   :  { %10278 = vmatpush1.bf16.xpose.msra.mxu1 %v10277_v19  ;;  %v10285_v19 = vpack.c.bf16 %v16013_v50, %v21862_v35  ;;  %v21965_v50 = vld [vmem:[#allocation87_spill] sm:$0xff] }
 0x78d   :  { %10280 = vmatprep.subr.bf16.mxu1 %v10279_v0  ;;  %v21952_v0 = vld [vmem:[#allocation37_spill] sm:$0xff] }
 0x792   :  { %9130 = vmatpush1.bf16.xpose.msra.mxu0 %v9129_v46  ;;  %v21955_v46 = vld [vmem:[#allocation49_spill] sm:$0xff] }
 0x793   :  { %9132 = vmatprep.subr.bf16.mxu0 %v9131_v16  ;;  %v21957_v16 = vld [vmem:[#allocation63_spill] sm:$0xff] }
 0x794   :  { %10282 = vmatpush1.bf16.xpose.msra.mxu1 %v10281_v26  ;;  %v21959_v26 = vld [vmem:[#allocation69_spill] sm:$0xff] }
 0x795   :  { %10284 = vmatprep.subr.bf16.mxu1 %v10283_v6  ;;  %v21958_v6 = vld [vmem:[#allocation64_spill] sm:$0xff] }
 0x79a   :  { %9134 = vmatpush1.bf16.xpose.msra.mxu0 %v9133_v8  ;;  %v21960_v8 = vld [vmem:[#allocation70_spill] sm:$0xff] }
 0x79b   :  { %9136 = vmatprep.subr.bf16.mxu0 %v21952_v0  ;;  %v21963_v0 = vld [vmem:[#allocation73_spill] sm:$0xff] }
 0x79c   :  { %10286 = vmatpush1.bf16.xpose.msra.mxu1 %v10285_v19  ;;  %v21961_v19 = vld [vmem:[#allocation84_spill] sm:$0xff] }
 0x79d   :  { %10288 = vmatprep.subr.bf16.mxu1 %v21953_v39  ;;  %v21962_v39 = vld [vmem:[#allocation85_spill] sm:$0xff] }
 0x7a1   :  { %3722 = vmatmul.mubr.f32.vlgmr.msra.gmra.mrb[0].mxu0 %v21954_v60 }
 0x7a2   :  { %9138 = vmatpush1.bf16.xpose.msra.mxu0 %v21955_v46  ;;  %3859 = vmatprep.mubr.f32.mxu0 %v21956_v56  ;;  %v21964_v46 = vld [vmem:[#allocation75_spill] sm:$0xff] }
 0x7a3   :  { %9140 = vmatprep.subr.bf16.mxu0 %v21957_v16  ;;  %7574 = vmatmul.mubr.f32.vlgmr.msra.gmra.mrb[0].mxu1 %v21954_v60  ;;  %v21966_v16 = vld [vmem:[#allocation88_spill] sm:$0xff]  ;;  %v21967_v60 = vld [vmem:[#allocation109_spill] sm:$0xff] }
 0x7a4   :  { %10290 = vmatpush1.bf16.xpose.msra.mxu1 %v21958_v6  ;;  %7711 = vmatprep.mubr.f32.mxu1 %v21956_v56  ;;  %v21968_v6 = vld [vmem:[#allocation112_spill] sm:$0xff] }
 0x7a5   :  { %10292 = vmatprep.subr.bf16.mxu1 %v21959_v26  ;;  %v21969_v56 = vld [vmem:[#allocation172_spill] sm:$0xff]  ;;  %v21970_v26 = vld [vmem:[#allocation177_spill] sm:$0xff] }
 0x7aa   :  { %9142 = vmatpush1.bf16.xpose.msra.mxu0 %v21960_v8  ;;  %v21971_v8 = vld [vmem:[#allocation124_spill] sm:$0xff] }
 0x7ab   :  { %9144 = vmatprep.subr.bf16.mxu0 %v21961_v19  ;;  %v21972_v19 = vld [vmem:[#allocation130_spill] sm:$0xff] }
 0x7ac   :  { %10294 = vmatpush1.bf16.xpose.msra.mxu1 %v21962_v39  ;;  %v21973_v39 = vld [vmem:[#allocation174_spill] sm:$0xff] }
 0x7ad   :  { %10296 = vmatprep.subr.bf16.mxu1 %v21963_v0  ;;  %v21974_v0 = vld [vmem:[#allocation175_spill] sm:$0xff] }
 0x7b2   :  { %9146 = vmatpush1.bf16.xpose.msra.mxu0 %v21964_v46  ;;  %v21975_v46 = vld [vmem:[#allocation197_spill] sm:$0xff] }
 0x7b3   :  { %9148 = vmatprep.subr.bf16.mxu0 %v21965_v50  ;;  %v21976_v50 = vld [vmem:[#allocation199_spill] sm:$0xff] }
 0x7b4   :  { %10298 = vmatpush1.bf16.xpose.msra.mxu1 %v21966_v16  ;;  %v21977_v16 = vld [vmem:[#allocation148_spill] sm:$0xff] }
 0x7b5   :  { %10300 = vmatprep.subr.bf16.mxu1 %v21967_v60  ;;  %v21978_v60 = vld [vmem:[#allocation169_spill] sm:$0xff] }
 0x7ba   :  { %9150 = vmatpush1.bf16.xpose.msra.mxu0 %v21968_v6  ;;  %v21979_v6 = vld [vmem:[#allocation94_spill] sm:$0xff] }
 0x7bb   :  { %9152 = vmatprep.subr.bf16.mxu0 %v21969_v56  ;;  %v21980_v56 = vld [vmem:[#allocation163_spill] sm:$0xff] }
 0x7bc   :  { %10302 = vmatpush1.bf16.xpose.msra.mxu1 %v21970_v26  ;;  %v21981_v26 = vld [vmem:[#allocation111_spill] sm:$0xff] }
 0x7bd   :  { %10304 = vmatprep.subr.bf16.mxu1 %v21971_v8  ;;  %v21982_v8 = vld [vmem:[#allocation90_spill] sm:$0xff] }
 0x7c2   :  { %9154 = vmatpush1.bf16.xpose.msra.mxu0 %v21972_v19  ;;  %v21983_v19 = vld [vmem:[#allocation201_spill] sm:$0xff] }
 0x7c3   :  { %9156 = vmatprep.subr.bf16.mxu0 %v21973_v39  ;;  %v21984_v39 = vld [vmem:[#allocation93_spill] sm:$0xff] }
 0x7c4   :  { %10306 = vmatpush1.bf16.xpose.msra.mxu1 %v21974_v0  ;;  %v21985_v0 = vld [vmem:[#allocation91_spill] sm:$0xff] }
 0x7c5   :  { %10308 = vmatprep.subr.bf16.mxu1 %v21975_v46  ;;  %v21986_v46 = vld [vmem:[#allocation106_spill] sm:$0xff] }
 0x7ca   :  { %9158 = vmatpush1.bf16.xpose.msra.mxu0 %v21976_v50  ;;  %v21987_v50 = vld [vmem:[#allocation102_spill] sm:$0xff] }
 0x7cb   :  { %9160 = vmatprep.subr.bf16.mxu0 %v21977_v16  ;;  %v21988_v16 = vld [vmem:[#allocation176_spill] sm:$0xff] }
 0x7cc   :  { %10310 = vmatpush1.bf16.xpose.msra.mxu1 %v21978_v60  ;;  %v21989_v60 = vld [vmem:[#allocation191_spill] sm:$0xff] }
 0x7cd   :  { %10312 = vmatprep.subr.bf16.mxu1 %v21979_v6  ;;  %v21990_v6 = vld [vmem:[#allocation100_spill] sm:$0xff] }
 0x7d2   :  { %9162 = vmatpush1.bf16.xpose.msra.mxu0 %v21980_v56  ;;  %v21991_v56 = vld [vmem:[#allocation105_spill] sm:$0xff] }
 0x7d3   :  { %9164 = vmatprep.subr.bf16.mxu0 %v21981_v26  ;;  %v21992_v26 = vld [vmem:[#allocation103_spill] sm:$0xff] }
 0x7d4   :  { %10314 = vmatpush1.bf16.xpose.msra.mxu1 %v21982_v8  ;;  %v21993_v8 = vld [vmem:[#allocation83_spill] sm:$0xff] }
 0x7d5   :  { %10316 = vmatprep.subr.bf16.mxu1 %v21983_v19  ;;  %v21994_v19 = vld [vmem:[#allocation213_spill] sm:$0xff] }
 0x7da   :  { %9166 = vmatpush1.bf16.xpose.msra.mxu0 %v21984_v39  ;;  %v21995_v39 = vld [vmem:[#allocation190_spill] sm:$0xff] }
 0x7db   :  { %9168 = vmatprep.subr.bf16.mxu0 %v21985_v0  ;;  %v21996_v0 = vld [vmem:[#allocation125_spill] sm:$0xff] }
 0x7dc   :  { %10318 = vmatpush1.bf16.xpose.msra.mxu1 %v21986_v46  ;;  %v21997_v46 = vld [vmem:[#allocation149_spill] sm:$0xff] }
 0x7dd   :  { %10320 = vmatprep.subr.bf16.mxu1 %v21987_v50  ;;  %v21998_v50 = vld [vmem:[#allocation200_spill] sm:$0xff] }
 0x7e2   :  { %9170 = vmatpush1.bf16.xpose.msra.mxu0 %v21988_v16  ;;  %v21999_v16 = vld [vmem:[#allocation189_spill] sm:$0xff] }
 0x7e3   :  { %9172 = vmatprep.subr.bf16.mxu0 %v21989_v60  ;;  %v22000_v60 = vld [vmem:[#allocation210_spill] sm:$0xff] }
 0x7e4   :  { %10322 = vmatpush1.bf16.xpose.msra.mxu1 %v21990_v6  ;;  %v22001_v6 = vld [vmem:[#allocation123_spill] sm:$0xff] }
 0x7e5   :  { %10324 = vmatprep.subr.bf16.mxu1 %v21991_v56  ;;  %v22002_v56 = vld [vmem:[#allocation18_spill] sm:$0xff] }
 0x7ea   :  { %9174 = vmatpush1.bf16.xpose.msra.mxu0 %v21992_v26  ;;  %v22003_v26 = vld [vmem:[#allocation19_spill] sm:$0xff] }
 0x7eb   :  { %9176 = vmatprep.subr.bf16.mxu0 %v21993_v8  ;;  %v22004_v8 = vld [vmem:[#allocation153_spill] sm:$0xff] }
 0x7ec   :  { %10326 = vmatpush1.bf16.xpose.msra.mxu1 %v21994_v19  ;;  %v22005_v19 = vld [vmem:[#allocation139_spill] sm:$0xff] }
 0x7ed   :  { %10328 = vmatprep.subr.bf16.mxu1 %v21995_v39  ;;  %v22006_v39 = vld [vmem:[#allocation11_spill] sm:$0xff] }
 0x7f2   :  { %9178 = vmatpush1.bf16.xpose.msra.mxu0 %v21996_v0  ;;  %v22007_v0 = vld [vmem:[#allocation13_spill] sm:$0xff] }
 0x7f3   :  { %9180 = vmatprep.subr.bf16.mxu0 %v21997_v46  ;;  %v22008_v46 = vld [vmem:[#allocation24_spill] sm:$0xff] }
 0x7f4   :  { %10330 = vmatpush1.bf16.xpose.msra.mxu1 %v21998_v50  ;;  %v22009_v50 = vld [vmem:[#allocation28_spill] sm:$0xff] }
 0x7f5   :  { %10332 = vmatprep.subr.bf16.mxu1 %v21999_v16  ;;  %v22010_v16 = vld [vmem:[#allocation66_spill] sm:$0xff] }
 0x7fa   :  { %9182 = vmatpush1.bf16.xpose.msra.mxu0 %v22000_v60  ;;  %v22011_v60 = vld [vmem:[#allocation67_spill] sm:$0xff] }
 0x7fb   :  { %9184 = vmatprep.subr.bf16.mxu0 %v22001_v6  ;;  %v22012_v6 = vld [vmem:[#allocation29_spill] sm:$0xff] }
 0x7fc   :  { %10334 = vmatpush1.bf16.xpose.msra.mxu1 %v22002_v56  ;;  %v22013_v56 = vld [vmem:[#allocation54_spill] sm:$0xff] }
 0x7fd   :  { %10336 = vmatprep.subr.bf16.mxu1 %v22003_v26  ;;  %v22014_v26 = vld [vmem:[#allocation72_spill] sm:$0xff] }
 0x802   :  { %9186 = vmatpush1.bf16.xpose.msra.mxu0 %v22004_v8  ;;  %v22015_v8 = vld [vmem:[#allocation76_spill] sm:$0xff] }
 0x803   :  { %9188 = vmatprep.subr.bf16.mxu0 %v22005_v19 }
 0x804   :  { %10338 = vmatpush1.bf16.xpose.msra.mxu1 %v22006_v39  ;;  %v22016_v39 = vand.u32 4294901760, %v21656_v27  ;;  %v22024_v27 = vand.u32 4294901760, %v21685_v51  ;;  %v22033_v51 = vand.u32 4294901760, %v21707_v15 }
 0x805   :  { %10340 = vmatprep.subr.bf16.mxu1 %v22007_v0  ;;  %v22017_v0 = vand.u32 4294901760, %v21657_v37  ;;  %v22025_v37 = vand.u32 4294901760, %v21686_v25  ;;  %v22032_v25 = vand.u32 4294901760, %v21706_v62  ;;  %v22040_v62 = vand.u32 4294901760, %v21719_v21 }
 0x806   :  { %v22049_v21 = vand.u32 4294901760, %v21864_v59 }
 0x807   :  { %v9199_v19 = vpack.c.bf16 %v22017_v0, %v22016_v39  ;;  %v9203_v0 = vpack.c.bf16 %v22025_v37, %v22024_v27  ;;  %v22026_v39 = vld [vmem:[#allocation181_spill] sm:$0xff]  ;;  %v22039_v27 = vand.u32 4294901760, %v21713_v20  ;;  %v22046_v20 = vand.u32 4294901760, %v21729_v42 }
 0x808   :  { %v22053_v42 = vand.u32 4294901760, %v21868_v13 }
 0x80a   :  { %9190 = vmatpush1.bf16.xpose.msra.mxu0 %v22008_v46  ;;  %v22018_v46 = vld [vmem:[#allocation183_spill] sm:$0xff] }
 0x80b   :  { %9192 = vmatprep.subr.bf16.mxu0 %v22009_v50  ;;  %v22019_v50 = vand.u32 4294901760, %v21659_v41  ;;  %v22027_v41 = vand.u32 4294901760, %v21690_v34  ;;  %v22034_v34 = vand.u32 4294901760, %v21708_v53  ;;  %v22041_v53 = vand.u32 4294901760, %v21722_v38 }
 0x80c   :  { %10342 = vmatpush1.bf16.xpose.msra.mxu1 %v22010_v16  ;;  %v22020_v16 = vand.u32 4294901760, %v21660_v31  ;;  %v22048_v38 = vand.u32 4294901760, %v21863_v63  ;;  %v22058_v63 = vld [vmem:[#allocation145_spill] sm:$0xff] }
 0x80d   :  { %10344 = vmatprep.subr.bf16.mxu1 %v22011_v60  ;;  %v9209_v15 = vpack.c.bf16 %v22041_v53, %v22040_v62  ;;  %v22059_v59 = vand.u32 4294901760, %v22058_v63  ;;  %v22072_v53 = vld [vmem:[#allocation159_spill] sm:$0xff]  ;;  %v22092_v63 = vld [vmem:[#allocation209_spill] sm:$0xff] }
 0x80e   :  { %v10351_v60 = vpack.c.bf16 %v22020_v16, %v22019_v50  ;;  %v22028_v50 = vand.u32 4294901760, %v21691_v32  ;;  %v22029_v16 = vand.u32 4294901760, %v21695_v18  ;;  %v9205_v32 = vpack.c.bf16 %v22033_v51, %v22032_v25 }
 0x80f   :  { %v22035_v18 = vand.u32 4294901760, %v21709_v36  ;;  %v22042_v36 = vand.u32 4294901760, %v21723_v29  ;;  %v22050_v29 = vand.u32 4294901760, %v21865_v58  ;;  %v22060_v58 = vld [vmem:[#allocation147_spill] sm:$0xff] }
 0x810   :  { %v10353_v31 = vpack.c.bf16 %v22028_v50, %v22027_v41  ;;  %v22047_v41 = vand.u32 4294901760, %v21730_v5  ;;  %v22054_v5 = vld [vmem:[#allocation182_spill] sm:$0xff] }
 0x812   :  { %9194 = vmatpush1.bf16.xpose.msra.mxu0 %v22012_v6  ;;  %v22021_v6 = vld [vmem:[#allocation115_spill] sm:$0xff]  ;;  %v10363_v50 = vpack.c.bf16 %v22047_v41, %v22046_v20  ;;  %v22078_v20 = vld [vmem:[#allocation96_spill] sm:$0xff] }
 0x813   :  { %9196 = vmatprep.subr.bf16.mxu0 %v22013_v56  ;;  %v22079_v41 = vand.u32 4294901760, %v22078_v20  ;;  %v22112_v20 = vld [vmem:[#allocation132_spill] sm:$0xff] }
 0x814   :  { %10346 = vmatpush1.bf16.xpose.msra.mxu1 %v22014_v26  ;;  %v22022_v26 = vand.u32 4294901760, %v21672_v54  ;;  %v22030_v54 = vand.u32 4294901760, %v21696_v57  ;;  %v9207_v57 = vpack.c.bf16 %v22035_v18, %v22034_v34  ;;  %v22062_v34 = vld [vmem:[#allocation154_spill] sm:$0xff] }
 0x815   :  { %10348 = vmatprep.subr.bf16.mxu1 %v22015_v8  ;;  %v22023_v8 = vand.u32 4294901760, %v21673_v10  ;;  %v22031_v10 = vld [vmem:[#allocation46_spill] sm:$0xff]  ;;  %v22063_v18 = vand.u32 4294901760, %v22062_v34 }
 0x816   :  { %v22096_v34 = vld [vmem:[#allocation122_spill] sm:$0xff] }
 0x817   :  { %v9201_v56 = vpack.c.bf16 %v22023_v8, %v22022_v26  ;;  %v22036_v26 = vand.u32 4294901760, %v21710_v28  ;;  %v22037_v8 = vand.u32 4294901760, %v21711_v49  ;;  %v22043_v28 = vand.u32 4294901760, %v21724_v1 }
 0x818   :  { %v9213_v1 = vpack.c.bf16 %v22049_v21, %v22048_v38 }
 0x819   :  { %v9211_v49 = vpack.c.bf16 %v22043_v28, %v22042_v36  ;;  %v22074_v28 = vld [vmem:[#allocation160_spill] sm:$0xff] }
 0x81a   :  { %9198 = vmatpush1.bf16.xpose.msra.mxu0 %v22018_v46 }
 0x81b   :  { %9200 = vmatprep.subr.bf16.mxu0 %v9199_v19  ;;  %v10355_v19 = vpack.c.bf16 %v22030_v54, %v22029_v16  ;;  %v22055_v54 = vand.u32 4294901760, %v22054_v5  ;;  %v22088_v5 = vld [vmem:[#allocation206_spill] sm:$0xff] }
 0x81c   :  { %10350 = vmatpush1.bf16.xpose.msra.mxu1 %v22021_v6 }
 0x81d   :  { %10352 = vmatprep.subr.bf16.mxu1 %v10351_v60  ;;  %v10357_v60 = vpack.c.bf16 %v22037_v8, %v22036_v26  ;;  %v22066_v26 = vld [vmem:[#allocation108_spill] sm:$0xff] }
 0x81e   :  { %v22067_v8 = vand.u32 4294901760, %v22066_v26  ;;  %v22100_v26 = vld [vmem:[#allocation99_spill] sm:$0xff] }
 0x821   :  { %3863 = vmatmul.mubr.f32.vlgmr.msra.gmra.mrb[0].mxu0 %v22026_v39 }
 0x822   :  { %9202 = vmatpush1.bf16.xpose.msra.mxu0 %v9201_v56  ;;  %4126 = vmatprep.mubr.f32.mxu0 %v22031_v10  ;;  %v22038_v56 = vand.u32 4294901760, %v21712_v22  ;;  %v22045_v22 = vand.u32 4294901760, %v21728_v47 }
 0x823   :  { %9204 = vmatprep.subr.bf16.mxu0 %v9203_v0  ;;  %7715 = vmatmul.mubr.f32.vlgmr.msra.gmra.mrb[0].mxu1 %v22026_v39  ;;  %v22044_v0 = vand.u32 4294901760, %v21726_v30  ;;  %v22051_v30 = vand.u32 4294901760, %v21866_v23 }
 0x824   :  { %10354 = vmatpush1.bf16.xpose.msra.mxu1 %v10353_v31  ;;  %7978 = vmatprep.mubr.f32.mxu1 %v22031_v10  ;;  %v10359_v37 = vpack.c.bf16 %v22039_v27, %v22038_v56  ;;  %v22052_v31 = vand.u32 4294901760, %v21867_v45  ;;  %v22064_v45 = vld [vmem:[#allocation156_spill] sm:$0xff] }
 0x825   :  { %10356 = vmatprep.subr.bf16.mxu1 %v10355_v19  ;;  %v10361_v39 = vpack.c.bf16 %v22045_v22, %v22044_v0  ;;  %v9215_v47 = vpack.c.bf16 %v22051_v30, %v22050_v29  ;;  %v22056_v19 = vld [vmem:[#allocation188_spill] sm:$0xff]  ;;  %v22076_v0 = vld [vmem:[#allocation165_spill] sm:$0xff] }
 0x826   :  { %v10365_v16 = vpack.c.bf16 %v22053_v42, %v22052_v31  ;;  %v22057_v25 = vand.u32 4294901760, %v22056_v19  ;;  %v22077_v22 = vand.u32 4294901760, %v22076_v0  ;;  %v22084_v30 = vld [vmem:[#allocation168_spill] sm:$0xff]  ;;  %v22086_v42 = vld [vmem:[#allocation170_spill] sm:$0xff] }
 0x828   :  { %v10367_v51 = vpack.c.bf16 %v22057_v25, %v22055_v54  ;;  %v22089_v54 = vand.u32 4294901760, %v22088_v5  ;;  %v22090_v25 = vld [vmem:[#allocation173_spill] sm:$0xff] }
 0x82a   :  { %9206 = vmatpush1.bf16.xpose.msra.mxu0 %v9205_v32  ;;  %v22061_v32 = vand.u32 4294901760, %v22060_v58 }
 0x82b   :  { %9208 = vmatprep.subr.bf16.mxu0 %v9207_v57  ;;  %v22065_v57 = vand.u32 4294901760, %v22064_v45 }
 0x82c   :  { %10358 = vmatpush1.bf16.xpose.msra.mxu1 %v10357_v60  ;;  %v9217_v23 = vpack.c.bf16 %v22061_v32, %v22059_v59  ;;  %v22068_v60 = vld [vmem:[#allocation141_spill] sm:$0xff]  ;;  %v22093_v59 = vand.u32 4294901760, %v22092_v63  ;;  %v22094_v32 = vld [vmem:[#allocation116_spill] sm:$0xff] }
 0x82d   :  { %10360 = vmatprep.subr.bf16.mxu1 %v10359_v37  ;;  %v9219_v13 = vpack.c.bf16 %v22065_v57, %v22063_v18  ;;  %v22069_v56 = vand.u32 4294901760, %v22068_v60  ;;  %v22070_v37 = vld [vmem:[#allocation157_spill] sm:$0xff]  ;;  %v22097_v18 = vand.u32 4294901760, %v22096_v34  ;;  %v22098_v57 = vld [vmem:[#allocation198_spill] sm:$0xff] }
 0x82e   :  { %v22071_v62 = vand.u32 4294901760, %v22070_v37  ;;  %v22104_v37 = vld [vmem:[#allocation131_spill] sm:$0xff] }
 0x82f   :  { %v10369_v27 = vpack.c.bf16 %v22069_v56, %v22067_v8  ;;  %v22101_v8 = vand.u32 4294901760, %v22100_v26  ;;  %v22102_v56 = vld [vmem:[#allocation128_spill] sm:$0xff] }
 0x832   :  { %9210 = vmatpush1.bf16.xpose.msra.mxu0 %v9209_v15  ;;  %v22073_v15 = vand.u32 4294901760, %v22072_v53 }
 0x833   :  { %9212 = vmatprep.subr.bf16.mxu0 %v9211_v49  ;;  %v22075_v49 = vand.u32 4294901760, %v22074_v28  ;;  %v22108_v28 = vld [vmem:[#allocation167_spill] sm:$0xff] }
 0x834   :  { %10362 = vmatpush1.bf16.xpose.msra.mxu1 %v10361_v39  ;;  %v10371_v36 = vpack.c.bf16 %v22073_v15, %v22071_v62  ;;  %v22105_v62 = vand.u32 4294901760, %v22104_v37  ;;  %v22106_v15 = vld [vmem:[#allocation158_spill] sm:$0xff] }
 0x835   :  { %10364 = vmatprep.subr.bf16.mxu1 %v10363_v50  ;;  %v9221_v39 = vpack.c.bf16 %v22077_v22, %v22075_v49  ;;  %v22080_v50 = vld [vmem:[#allocation97_spill] sm:$0xff]  ;;  %v22109_v49 = vand.u32 4294901760, %v22108_v28  ;;  %v22110_v22 = vld [vmem:[#allocation126_spill] sm:$0xff] }
 0x836   :  { %v22081_v38 = vand.u32 4294901760, %v22080_v50 }
 0x838   :  { %v9223_v21 = vpack.c.bf16 %v22081_v38, %v22079_v41  ;;  %v22113_v41 = vand.u32 4294901760, %v22112_v20  ;;  %v22114_v38 = vld [vmem:[#allocation207_spill] sm:$0xff] }
 0x83a   :  { %9214 = vmatpush1.bf16.xpose.msra.mxu0 %v9213_v1  ;;  %v22082_v1 = vld [vmem:[#allocation166_spill] sm:$0xff] }
 0x83b   :  { %9216 = vmatprep.subr.bf16.mxu0 %v9215_v47  ;;  %v22083_v29 = vand.u32 4294901760, %v22082_v1  ;;  %v22085_v47 = vand.u32 4294901760, %v22084_v30  ;;  %v22116_v1 = vld [vmem:[#allocation180_spill] sm:$0xff] }
 0x83c   :  { %10366 = vmatpush1.bf16.xpose.msra.mxu1 %v10365_v16  ;;  %v22087_v16 = vand.u32 4294901760, %v22086_v42  ;;  %v22120_v42 = vld [vmem:[#allocation138_spill] sm:$0xff] }
 0x83d   :  { %10368 = vmatprep.subr.bf16.mxu1 %v10367_v51  ;;  %v10373_v31 = vpack.c.bf16 %v22085_v47, %v22083_v29  ;;  %v22091_v51 = vand.u32 4294901760, %v22090_v25  ;;  %v22117_v29 = vand.u32 4294901760, %v22116_v1  ;;  %v22118_v47 = vld [vmem:[#allocation144_spill] sm:$0xff]  ;;  %v22124_v25 = vld [vmem:[#allocation203_spill] sm:$0xff] }
 0x83e   :  { %v10375_v19 = vpack.c.bf16 %v22089_v54, %v22087_v16  ;;  %v22121_v16 = vand.u32 4294901760, %v22120_v42  ;;  %v22122_v54 = vld [vmem:[#allocation151_spill] sm:$0xff] }
 0x83f   :  { %v9225_v58 = vpack.c.bf16 %v22093_v59, %v22091_v51  ;;  %v22125_v51 = vand.u32 4294901760, %v22124_v25  ;;  %v22126_v59 = vld [vmem:[#allocation33_spill] sm:$0xff] }
 0x842   :  { %9218 = vmatpush1.bf16.xpose.msra.mxu0 %v9217_v23  ;;  %v22095_v23 = vand.u32 4294901760, %v22094_v32  ;;  %v22128_v32 = vld [vmem:[#allocation34_spill] sm:$0xff] }
 0x843   :  { %9220 = vmatprep.subr.bf16.mxu0 %v9219_v13  ;;  %v22099_v13 = vand.u32 4294901760, %v22098_v57  ;;  %v22132_v57 = vld [vmem:[#allocation10_spill] sm:$0xff] }
 0x844   :  { %10370 = vmatpush1.bf16.xpose.msra.mxu1 %v10369_v27  ;;  %v9227_v45 = vpack.c.bf16 %v22097_v18, %v22095_v23  ;;  %v22103_v27 = vand.u32 4294901760, %v22102_v56  ;;  %v22129_v23 = vand.u32 4294901760, %v22128_v32  ;;  %v22130_v18 = vld [vmem:[#allocation9_spill] sm:$0xff]  ;;  %v22136_v56 = vld [vmem:[#allocation31_spill] sm:$0xff] }
 0x845   :  { %10372 = vmatprep.subr.bf16.mxu1 %v10371_v36  ;;  %v10377_v60 = vpack.c.bf16 %v22101_v8, %v22099_v13  ;;  %v22107_v36 = vand.u32 4294901760, %v22106_v15  ;;  %v22133_v13 = vand.u32 4294901760, %v22132_v57  ;;  %v22134_v8 = vld [vmem:[#allocation42_spill] sm:$0xff]  ;;  %v22140_v15 = vld [vmem:[#allocation52_spill] sm:$0xff] }
 0x846   :  { %v10379_v53 = vpack.c.bf16 %v22105_v62, %v22103_v27  ;;  %v22137_v27 = vand.u32 4294901760, %v22136_v56  ;;  %v22138_v62 = vld [vmem:[#allocation48_spill] sm:$0xff] }
 0x847   :  { %v9229_v0 = vpack.c.bf16 %v22109_v49, %v22107_v36  ;;  %v22141_v36 = vand.u32 4294901760, %v22140_v15  ;;  %v22142_v49 = vld [vmem:[#allocation81_spill] sm:$0xff] }
 0x84a   :  { %9222 = vmatpush1.bf16.xpose.msra.mxu0 %v9221_v39  ;;  %v22111_v39 = vand.u32 4294901760, %v22110_v22  ;;  %v22144_v22 = vld [vmem:[#allocation82_spill] sm:$0xff] }
 0x84b   :  { %9224 = vmatprep.subr.bf16.mxu0 %v9223_v21  ;;  %v22115_v21 = vand.u32 4294901760, %v22114_v38  ;;  %v22148_v38 = vld [vmem:[#allocation58_spill] sm:$0xff] }
 0x84c   :  { %10374 = vmatpush1.bf16.xpose.msra.mxu1 %v10373_v31  ;;  %v9231_v50 = vpack.c.bf16 %v22113_v41, %v22111_v39  ;;  %v22119_v31 = vand.u32 4294901760, %v22118_v47  ;;  %v22145_v39 = vand.u32 4294901760, %v22144_v22  ;;  %v22146_v41 = vld [vmem:[#allocation57_spill] sm:$0xff]  ;;  %v22152_v47 = vld [vmem:[#allocation79_spill] sm:$0xff] }
 0x84d   :  { %10376 = vmatprep.subr.bf16.mxu1 %v10375_v19  ;;  %v10381_v30 = vpack.c.bf16 %v22117_v29, %v22115_v21  ;;  %v22123_v19 = vand.u32 4294901760, %v22122_v54  ;;  %v22149_v21 = vand.u32 4294901760, %v22148_v38  ;;  %v22150_v29 = vld [vmem:[#allocation118_spill] sm:$0xff]  ;;  %v22156_v54 = vld [vmem:[#allocation127_spill] sm:$0xff] }
 0x84e   :  { %v10383_v5 = vpack.c.bf16 %v22121_v16, %v22119_v31  ;;  %v22153_v31 = vand.u32 4294901760, %v22152_v47  ;;  %v22154_v16 = vld [vmem:[#allocation121_spill] sm:$0xff] }
 0x84f   :  { %v9233_v63 = vpack.c.bf16 %v22125_v51, %v22123_v19  ;;  %v22157_v19 = vand.u32 4294901760, %v22156_v54  ;;  %v22158_v51 = vld [vmem:[#allocation187_spill] sm:$0xff] }
 0x852   :  { %9226 = vmatpush1.bf16.xpose.msra.mxu0 %v9225_v58  ;;  %v22127_v58 = vand.u32 4294901760, %v22126_v59  ;;  %v22160_v59 = vld [vmem:[#allocation192_spill] sm:$0xff] }
 0x853   :  { %9228 = vmatprep.subr.bf16.mxu0 %v9227_v45  ;;  %v22131_v45 = vand.u32 4294901760, %v22130_v18  ;;  %v22164_v18 = vld [vmem:[#allocation136_spill] sm:$0xff] }
 0x854   :  { %10378 = vmatpush1.bf16.xpose.msra.mxu1 %v10377_v60  ;;  %v9235_v34 = vpack.c.bf16 %v22129_v23, %v22127_v58  ;;  %v22135_v60 = vand.u32 4294901760, %v22134_v8  ;;  %v22161_v58 = vand.u32 4294901760, %v22160_v59  ;;  %v22162_v23 = vld [vmem:[#allocation135_spill] sm:$0xff]  ;;  %v22168_v8 = vld [vmem:[#allocation196_spill] sm:$0xff] }
 0x855   :  { %10380 = vmatprep.subr.bf16.mxu1 %v10379_v53  ;;  %v10385_v26 = vpack.c.bf16 %v22133_v13, %v22131_v45  ;;  %v22139_v53 = vand.u32 4294901760, %v22138_v62  ;;  %v22165_v45 = vand.u32 4294901760, %v22164_v18  ;;  %v22166_v13 = vld [vmem:[#allocation14_spill] sm:$0xff]  ;;  %v22172_v62 = vld [vmem:[#allocation27_spill] sm:$0xff]  ;;  %v22197_v18 = vand.u32 4294901760, %v21941_v40 }
 0x856   :  { %v10387_v37 = vpack.c.bf16 %v22137_v27, %v22135_v60  ;;  %v22169_v60 = vand.u32 4294901760, %v22168_v8  ;;  %v22170_v27 = vld [vmem:[#allocation21_spill] sm:$0xff] }
 0x857   :  { %v9237_v28 = vpack.c.bf16 %v22141_v36, %v22139_v53  ;;  %v22173_v53 = vand.u32 4294901760, %v22172_v62  ;;  %v22174_v36 = vld [vmem:[#allocation80_spill] sm:$0xff] }
 0x85a   :  { %9230 = vmatpush1.bf16.xpose.msra.mxu0 %v9229_v0  ;;  %v22143_v0 = vand.u32 4294901760, %v22142_v49  ;;  %v22176_v49 = vld [vmem:[#allocation77_spill] sm:$0xff] }
 0x85b   :  { %9232 = vmatprep.subr.bf16.mxu0 %v9231_v50  ;;  %v22147_v50 = vand.u32 4294901760, %v22146_v41  ;;  %v22180_v41 = vld [vmem:[#allocation30_spill] sm:$0xff] }
 0x85c   :  { %10382 = vmatpush1.bf16.xpose.msra.mxu1 %v10381_v30  ;;  %v9239_v20 = vpack.c.bf16 %v22145_v39, %v22143_v0  ;;  %v22151_v30 = vand.u32 4294901760, %v22150_v29  ;;  %v22177_v0 = vand.u32 4294901760, %v22176_v49  ;;  %v22178_v39 = vld [vmem:[#allocation32_spill] sm:$0xff]  ;;  %v22184_v29 = vld [vmem:[#allocation155_spill] sm:$0xff]  ;;  %v22213_v49 = vld [vmem:[#allocation205_spill] sm:$0xff] }
 0x85d   :  { %10384 = vmatprep.subr.bf16.mxu1 %v10383_v5  ;;  %v10389_v1 = vpack.c.bf16 %v22149_v21, %v22147_v50  ;;  %v22155_v5 = vand.u32 4294901760, %v22154_v16  ;;  %v22181_v50 = vand.u32 4294901760, %v22180_v41  ;;  %v22182_v21 = vld [vmem:[#allocation107_spill] sm:$0xff] }
 0x85e   :  { %v10391_v42 = vpack.c.bf16 %v22153_v31, %v22151_v30  ;;  %v22185_v30 = vand.u32 4294901760, %v22184_v29  ;;  %v22186_v31 = vld [vmem:[#allocation134_spill] sm:$0xff]  ;;  %v22188_v16 = vld [vmem:[#allocation179_spill] sm:$0xff] }
 0x85f   :  { %v9241_v25 = vpack.c.bf16 %v22157_v19, %v22155_v5  ;;  %v22189_v5 = vand.u32 4294901760, %v22188_v16  ;;  %v22190_v19 = vld [vmem:[#allocation216_spill] sm:$0xff]  ;;  %v22230_v29 = vld [vmem:[#allocation70_spill] sm:$0xff]  ;;  %v22235_v16 = vld [vmem:[#allocation87_spill] sm:$0xff] }
 0x862   :  { %9234 = vmatpush1.bf16.xpose.msra.mxu0 %v9233_v63  ;;  %v22159_v63 = vand.u32 4294901760, %v22158_v51  ;;  %v22192_v51 = vld [vmem:[#allocation217_spill] sm:$0xff] }
 0x863   :  { %9236 = vmatprep.subr.bf16.mxu0 %v9235_v34  ;;  %v22163_v34 = vand.u32 4294901760, %v22162_v23 }
 0x864   :  { %10386 = vmatpush1.bf16.xpose.msra.mxu1 %v10385_v26  ;;  %v9243_v32 = vpack.c.bf16 %v22161_v58, %v22159_v63  ;;  %v22167_v26 = vand.u32 4294901760, %v22166_v13  ;;  %v22193_v63 = vand.u32 4294901760, %v22192_v51  ;;  %v22194_v58 = vand.u32 4294901760, %v21939_v2  ;;  %v22241_v51 = vld [vmem:[#allocation124_spill] sm:$0xff] }
 0x865   :  { %10388 = vmatprep.subr.bf16.mxu1 %v10387_v37  ;;  %v10393_v57 = vpack.c.bf16 %v22165_v45, %v22163_v34  ;;  %v22171_v37 = vand.u32 4294901760, %v22170_v27  ;;  %v22198_v45 = vand.u32 4294901760, %v21942_v43  ;;  %v22199_v13 = vand.u32 4294901760, %v21943_v24 }
 0x866   :  { %v10395_v56 = vpack.c.bf16 %v22169_v60, %v22167_v26  ;;  %v22200_v26 = vand.u32 4294901760, %v21944_v44  ;;  %v22201_v60 = vand.u32 4294901760, %v21945_v7  ;;  %v22202_v2 = vand.u32 4294901760, %v21946_v33 }
 0x867   :  { %v9245_v15 = vpack.c.bf16 %v22173_v53, %v22171_v37  ;;  %v22203_v27 = vand.u32 4294901760, %v21947_v4  ;;  %v22204_v37 = vld [vmem:[#allocation225_spill] sm:$0xff]  ;;  %v22206_v43 = vand.u32 4294901760, %v21949_v9  ;;  %v22207_v53 = vand.u32 4294901760, %v21950_v48 }
 0x868   :  { %v9253_v8 = vpack.c.bf16 %v22200_v26, %v22199_v13  ;;  %v22205_v40 = vand.u32 4294901760, %v22204_v37  ;;  %v22208_v24 = vand.u32 4294901760, %v21852_v61  ;;  %v22209_v44 = vand.u32 4294901760, %v21853_v14  ;;  %v22251_v13 = vld [vmem:[#allocation111_spill] sm:$0xff]  ;;  %v22252_v26 = vld [vmem:[#allocation90_spill] sm:$0xff]  ;;  %v22258_v37 = vld [vmem:[#allocation176_spill] sm:$0xff] }
 0x869   :  { %v22210_v7 = vand.u32 4294901760, %v21854_v55  ;;  %v22211_v4 = vand.u32 4294901760, %v21855_v3  ;;  %v22214_v9 = vand.u32 4294901760, %v22213_v49  ;;  %v22215_v48 = vand.u32 4294901760, %v21951_v12  ;;  %v22224_v12 = vld [vmem:[#allocation45_spill] sm:$0xff]  ;;  %v22271_v49 = vld [vmem:[#allocation123_spill] sm:$0xff] }
 0x86a   :  { %9238 = vmatpush1.bf16.xpose.msra.mxu0 %v9237_v28  ;;  %v22175_v28 = vand.u32 4294901760, %v22174_v36  ;;  %v10405_v62 = vpack.c.bf16 %v22205_v40, %v22203_v27  ;;  %v9257_v33 = vpack.c.bf16 %v22209_v44, %v22208_v24  ;;  %v22218_v61 = vand.u32 4294901760, %v15989_v17  ;;  %v22227_v17 = vld [vmem:[#allocation63_spill] sm:$0xff]  ;;  %v22257_v27 = vld [vmem:[#allocation102_spill] sm:$0xff]  ;;  %v22264_v24 = vld [vmem:[#allocation213_spill] sm:$0xff] }
 0x86b   :  { %9240 = vmatprep.subr.bf16.mxu0 %v9239_v20  ;;  %v22179_v20 = vand.u32 4294901760, %v22178_v39  ;;  %v9259_v36 = vpack.c.bf16 %v22211_v4, %v22210_v7  ;;  %v22219_v55 = vand.u32 4294901760, %v15994_v52  ;;  %v22220_v3 = vand.u32 4294901760, %v21862_v35  ;;  %v22228_v52 = vld [vmem:[#allocation64_spill] sm:$0xff]  ;;  %v22229_v35 = vld [vmem:[#allocation69_spill] sm:$0xff]  ;;  %v22259_v40 = vld [vmem:[#allocation191_spill] sm:$0xff] }
 0x86c   :  { %10390 = vmatpush1.bf16.xpose.msra.mxu1 %v10389_v1  ;;  %v9247_v22 = vpack.c.bf16 %v22177_v0, %v22175_v28  ;;  %v22183_v1 = vand.u32 4294901760, %v22182_v21  ;;  %v22212_v28 = vand.u32 4294901760, %v21857_v11  ;;  %v22221_v11 = vld [vmem:[#allocation61_spill] sm:$0xff]  ;;  %v22225_v21 = vld [vmem:[#allocation43_spill] sm:$0xff]  ;;  %v22265_v44 = vld [vmem:[#allocation190_spill] sm:$0xff] }
 0x86d   :  { %10392 = vmatprep.subr.bf16.mxu1 %v10391_v42  ;;  %v10397_v38 = vpack.c.bf16 %v22181_v50, %v22179_v20  ;;  %v22187_v42 = vand.u32 4294901760, %v22186_v31  ;;  %v9261_v14 = vpack.c.bf16 %v22219_v55, %v22218_v61  ;;  %v22222_v41 = vand.u32 4294901760, %v22221_v11  ;;  %v22233_v31 = vld [vmem:[#allocation73_spill] sm:$0xff]  ;;  %v22268_v4 = vld [vmem:[#allocation200_spill] sm:$0xff] }
 0x86e   :  { %v10399_v47 = vpack.c.bf16 %v22185_v30, %v22183_v1  ;;  %v10409_v0 = vpack.c.bf16 %v22214_v9, %v22212_v28  ;;  %v22226_v1 = vld [vmem:[#allocation49_spill] sm:$0xff]  ;;  %v22231_v30 = vld [vmem:[#allocation84_spill] sm:$0xff]  ;;  %v22270_v28 = vld [vmem:[#allocation210_spill] sm:$0xff] }
 0x86f   :  { %v9249_v54 = vpack.c.bf16 %v22189_v5, %v22187_v42  ;;  %v10413_v50 = vpack.c.bf16 %v22222_v41, %v22220_v3  ;;  %v22234_v42 = vld [vmem:[#allocation75_spill] sm:$0xff]  ;;  %v22236_v5 = vld [vmem:[#allocation88_spill] sm:$0xff]  ;;  %v22267_v7 = vld [vmem:[#allocation149_spill] sm:$0xff] }
 0x870   :  { %v22272_v9 = vld [vmem:[#allocation18_spill] sm:$0xff]  ;;  %v22278_v61 = vld [vmem:[#allocation24_spill] sm:$0xff]  ;;  %v22281_v3 = vld [vmem:[#allocation67_spill] sm:$0xff] }
 0x871   :  { %v22279_v55 = vld [vmem:[#allocation28_spill] sm:$0xff]  ;;  %v22282_v11 = vld [vmem:[#allocation29_spill] sm:$0xff]  ;;  %v22283_v41 = vld [vmem:[#allocation54_spill] sm:$0xff] }
 0x872   :  { %9242 = vmatpush1.bf16.xpose.msra.mxu0 %v9241_v25  ;;  %v22191_v25 = vand.u32 4294901760, %v22190_v19  ;;  %v22238_v19 = vld [vmem:[#allocation112_spill] sm:$0xff] }
 0x873   :  { %9244 = vmatprep.subr.bf16.mxu0 %v9243_v32  ;;  %v22195_v32 = vld [vmem:[#allocation211_spill] sm:$0xff] }
 0x874   :  { %10394 = vmatpush1.bf16.xpose.msra.mxu1 %v10393_v57  ;;  %v9251_v59 = vpack.c.bf16 %v22193_v63, %v22191_v25  ;;  %v22196_v23 = vand.u32 4294901760, %v22195_v32  ;;  %v10403_v57 = vpack.c.bf16 %v22198_v45, %v22197_v18  ;;  %v22240_v25 = vld [vmem:[#allocation177_spill] sm:$0xff]  ;;  %v22242_v63 = vld [vmem:[#allocation130_spill] sm:$0xff] }
 0x875   :  { %10396 = vmatprep.subr.bf16.mxu1 %v10395_v56  ;;  %v9255_v56 = vpack.c.bf16 %v22202_v2, %v22201_v60  ;;  %v22245_v32 = vld [vmem:[#allocation197_spill] sm:$0xff]  ;;  %v22249_v45 = vld [vmem:[#allocation94_spill] sm:$0xff]  ;;  %v22255_v2 = vld [vmem:[#allocation91_spill] sm:$0xff] }
 0x876   :  { %v10401_v34 = vpack.c.bf16 %v22196_v23, %v22194_v58  ;;  %v22244_v58 = vld [vmem:[#allocation175_spill] sm:$0xff]  ;;  %v22248_v18 = vld [vmem:[#allocation169_spill] sm:$0xff] }
 0x877   :  { %v22246_v23 = vld [vmem:[#allocation199_spill] sm:$0xff]  ;;  %v22254_v60 = vld [vmem:[#allocation93_spill] sm:$0xff] }
 0x87a   :  { %9246 = vmatpush1.bf16.xpose.msra.mxu0 %v9245_v15  ;;  %v10407_v15 = vpack.c.bf16 %v22207_v53, %v22206_v43  ;;  %v22261_v43 = vld [vmem:[#allocation105_spill] sm:$0xff]  ;;  %v22262_v53 = vld [vmem:[#allocation103_spill] sm:$0xff] }
 0x87b   :  { %9248 = vmatprep.subr.bf16.mxu0 %v9247_v22  ;;  %v22216_v22 = vld [vmem:[#allocation40_spill] sm:$0xff] }
 0x87c   :  { %10398 = vmatpush1.bf16.xpose.msra.mxu1 %v10397_v38  ;;  %v22217_v39 = vand.u32 4294901760, %v22216_v22  ;;  %v22223_v38 = vld [vmem:[#allocation37_spill] sm:$0xff]  ;;  %v22275_v22 = vld [vmem:[#allocation139_spill] sm:$0xff] }
 0x87d   :  { %10400 = vmatprep.subr.bf16.mxu1 %v10399_v47  ;;  %v22232_v47 = vld [vmem:[#allocation85_spill] sm:$0xff] }
 0x87e   :  { %v10411_v20 = vpack.c.bf16 %v22217_v39, %v22215_v48  ;;  %v22274_v48 = vld [vmem:[#allocation153_spill] sm:$0xff]  ;;  %v22276_v39 = vld [vmem:[#allocation11_spill] sm:$0xff] }
 0x882   :  { %9250 = vmatpush1.bf16.xpose.msra.mxu0 %v9249_v54  ;;  %v22237_v54 = vld [vmem:[#allocation109_spill] sm:$0xff] }
 0x883   :  { %9252 = vmatprep.subr.bf16.mxu0 %v9251_v59  ;;  %v22243_v59 = vld [vmem:[#allocation174_spill] sm:$0xff] }
 0x884   :  { %10402 = vmatpush1.bf16.xpose.msra.mxu1 %v10401_v34  ;;  %v22247_v34 = vld [vmem:[#allocation148_spill] sm:$0xff] }
 0x885   :  { %10404 = vmatprep.subr.bf16.mxu1 %v10403_v57  ;;  %v22250_v57 = vld [vmem:[#allocation163_spill] sm:$0xff] }
 0x88a   :  { %9254 = vmatpush1.bf16.xpose.msra.mxu0 %v9253_v8  ;;  %v22253_v8 = vld [vmem:[#allocation201_spill] sm:$0xff] }
 0x88b   :  { %9256 = vmatprep.subr.bf16.mxu0 %v9255_v56  ;;  %v22256_v56 = vld [vmem:[#allocation106_spill] sm:$0xff] }
 0x88c   :  { %10406 = vmatpush1.bf16.xpose.msra.mxu1 %v10405_v62  ;;  %v22260_v62 = vld [vmem:[#allocation100_spill] sm:$0xff] }
 0x88d   :  { %10408 = vmatprep.subr.bf16.mxu1 %v10407_v15  ;;  %v22263_v15 = vld [vmem:[#allocation83_spill] sm:$0xff] }
 0x892   :  { %9258 = vmatpush1.bf16.xpose.msra.mxu0 %v9257_v33  ;;  %v22266_v33 = vld [vmem:[#allocation125_spill] sm:$0xff] }
 0x893   :  { %9260 = vmatprep.subr.bf16.mxu0 %v9259_v36  ;;  %v22269_v36 = vld [vmem:[#allocation189_spill] sm:$0xff] }
 0x894   :  { %10410 = vmatpush1.bf16.xpose.msra.mxu1 %v10409_v0  ;;  %v22273_v0 = vld [vmem:[#allocation19_spill] sm:$0xff] }
 0x895   :  { %10412 = vmatprep.subr.bf16.mxu1 %v10411_v20  ;;  %v22277_v20 = vld [vmem:[#allocation13_spill] sm:$0xff] }
 0x89a   :  { %9262 = vmatpush1.bf16.xpose.msra.mxu0 %v9261_v14  ;;  %v22280_v14 = vld [vmem:[#allocation66_spill] sm:$0xff] }
 0x89b   :  { %9264 = vmatprep.subr.bf16.mxu0 %v22223_v38  ;;  %v22285_v38 = vld [vmem:[#allocation76_spill] sm:$0xff] }
 0x89c   :  { %10414 = vmatpush1.bf16.xpose.msra.mxu1 %v10413_v50  ;;  %v22284_v50 = vld [vmem:[#allocation72_spill] sm:$0xff] }
 0x89d   :  { %10416 = vmatprep.subr.bf16.mxu1 %v22224_v12  ;;  %v8123_v12 = vld [vmem:[%s17540_s2] sm:$0xff] }
 0x8a1   :  { %4128 = vmatmul.mubr.f32.vlgmr.msra.gmra.mrb[0].mxu0 %v22225_v21 }
 0x8a2   :  { %9266 = vmatpush1.bf16.xpose.msra.mxu0 %v22226_v1  ;;  %4263 = vmatprep.mubr.f32.mxu0 %v22031_v10  ;;  %v8124_v1 = vld [vmem:[%s17540_s2 + $0x8] sm:$0xff] }
 0x8a3   :  { %9268 = vmatprep.subr.bf16.mxu0 %v22227_v17  ;;  %7980 = vmatmul.mubr.f32.vlgmr.msra.gmra.mrb[0].mxu1 %v22225_v21 }
 0x8a4   :  { %10418 = vmatpush1.bf16.xpose.msra.mxu1 %v22228_v52  ;;  %8115 = vmatprep.mubr.f32.mxu1 %v22031_v10  ;;  %v22239_v10 = vld [vmem:[#allocation172_spill] sm:$0xff] }
 0x8a5   :  { %10420 = vmatprep.subr.bf16.mxu1 %v22229_v35 }
 0x8aa   :  { %9270 = vmatpush1.bf16.xpose.msra.mxu0 %v22230_v29 }
 0x8ab   :  { %9272 = vmatprep.subr.bf16.mxu0 %v22231_v30 }
 0x8ac   :  { %10422 = vmatpush1.bf16.xpose.msra.mxu1 %v22232_v47 }
 0x8ad   :  { %10424 = vmatprep.subr.bf16.mxu1 %v22233_v31 }
 0x8b2   :  { %9274 = vmatpush1.bf16.xpose.msra.mxu0 %v22234_v42 }
 0x8b3   :  { %9276 = vmatprep.subr.bf16.mxu0 %v22235_v16 }
 0x8b4   :  { %10426 = vmatpush1.bf16.xpose.msra.mxu1 %v22236_v5 }
 0x8b5   :  { %10428 = vmatprep.subr.bf16.mxu1 %v22237_v54 }
 0x8ba   :  { %9278 = vmatpush1.bf16.xpose.msra.mxu0 %v22238_v19 }
 0x8bb   :  { %9280 = vmatprep.subr.bf16.mxu0 %v22239_v10 }
 0x8bc   :  { %10430 = vmatpush1.bf16.xpose.msra.mxu1 %v22240_v25 }
 0x8bd   :  { %10432 = vmatprep.subr.bf16.mxu1 %v22241_v51 }
 0x8c2   :  { %9282 = vmatpush1.bf16.xpose.msra.mxu0 %v22242_v63 }
 0x8c3   :  { %9284 = vmatprep.subr.bf16.mxu0 %v22243_v59 }
 0x8c4   :  { %10434 = vmatpush1.bf16.xpose.msra.mxu1 %v22244_v58 }
 0x8c5   :  { %10436 = vmatprep.subr.bf16.mxu1 %v22245_v32 }
 0x8ca   :  { %9286 = vmatpush1.bf16.xpose.msra.mxu0 %v22246_v23 }
 0x8cb   :  { %9288 = vmatprep.subr.bf16.mxu0 %v22247_v34 }
 0x8cc   :  { %10438 = vmatpush1.bf16.xpose.msra.mxu1 %v22248_v18 }
 0x8cd   :  { %10440 = vmatprep.subr.bf16.mxu1 %v22249_v45 }
 0x8d2   :  { %9290 = vmatpush1.bf16.xpose.msra.mxu0 %v22250_v57 }
 0x8d3   :  { %9292 = vmatprep.subr.bf16.mxu0 %v22251_v13 }
 0x8d4   :  { %10442 = vmatpush1.bf16.xpose.msra.mxu1 %v22252_v26 }
 0x8d5   :  { %10444 = vmatprep.subr.bf16.mxu1 %v22253_v8 }
 0x8da   :  { %9294 = vmatpush1.bf16.xpose.msra.mxu0 %v22254_v60 }
 0x8db   :  { %9296 = vmatprep.subr.bf16.mxu0 %v22255_v2 }
 0x8dc   :  { %10446 = vmatpush1.bf16.xpose.msra.mxu1 %v22256_v56 }
 0x8dd   :  { %10448 = vmatprep.subr.bf16.mxu1 %v22257_v27 }
 0x8e2   :  { %9298 = vmatpush1.bf16.xpose.msra.mxu0 %v22258_v37 }
 0x8e3   :  { %9300 = vmatprep.subr.bf16.mxu0 %v22259_v40 }
 0x8e4   :  { %10450 = vmatpush1.bf16.xpose.msra.mxu1 %v22260_v62 }
 0x8e5   :  { %10452 = vmatprep.subr.bf16.mxu1 %v22261_v43 }
 0x8ea   :  { %9302 = vmatpush1.bf16.xpose.msra.mxu0 %v22262_v53 }
 0x8eb   :  { %9304 = vmatprep.subr.bf16.mxu0 %v22263_v15 }
 0x8ec   :  { %10454 = vmatpush1.bf16.xpose.msra.mxu1 %v22264_v24 }
 0x8ed   :  { %10456 = vmatprep.subr.bf16.mxu1 %v22265_v44 }
 0x8f2   :  { %9306 = vmatpush1.bf16.xpose.msra.mxu0 %v22266_v33 }
 0x8f3   :  { %9308 = vmatprep.subr.bf16.mxu0 %v22267_v7 }
 0x8f4   :  { %10458 = vmatpush1.bf16.xpose.msra.mxu1 %v22268_v4 }
 0x8f5   :  { %10460 = vmatprep.subr.bf16.mxu1 %v22269_v36 }
 0x8fa   :  { %9310 = vmatpush1.bf16.xpose.msra.mxu0 %v22270_v28 }
 0x8fb   :  { %9312 = vmatprep.subr.bf16.mxu0 %v22271_v49 }
 0x8fc   :  { %10462 = vmatpush1.bf16.xpose.msra.mxu1 %v22272_v9 }
 0x8fd   :  { %10464 = vmatprep.subr.bf16.mxu1 %v22273_v0 }
 0x902   :  { %9314 = vmatpush1.bf16.xpose.msra.mxu0 %v22274_v48 }
 0x903   :  { %9316 = vmatprep.subr.bf16.mxu0 %v22275_v22 }
 0x904   :  { %10466 = vmatpush1.bf16.xpose.msra.mxu1 %v22276_v39 }
 0x905   :  { %10468 = vmatprep.subr.bf16.mxu1 %v22277_v20 }
 0x90a   :  { %9318 = vmatpush1.bf16.xpose.msra.mxu0 %v22278_v61 }
 0x90b   :  { %9320 = vmatprep.subr.bf16.mxu0 %v22279_v55 }
 0x90c   :  { %10470 = vmatpush1.bf16.xpose.msra.mxu1 %v22280_v14 }
 0x90d   :  { %10472 = vmatprep.subr.bf16.mxu1 %v22281_v3 }
 0x912   :  { %9322 = vmatpush1.bf16.xpose.msra.mxu0 %v22282_v11 }
 0x913   :  { %9324 = vmatprep.subr.bf16.mxu0 %v22283_v41 }
 0x914   :  { %10474 = vmatpush1.bf16.xpose.msra.mxu1 %v22284_v50 }
 0x915   :  { %10476 = vmatprep.subr.bf16.mxu1 %v22285_v38 }
 0x91a   :  { %9326 = vmatpush1.bf16.xpose.msra.mxu0 %v22018_v46  ;;  %v8125_v46 = vld [vmem:[%s17540_s2 + $0x10] sm:$0xff] }
 0x91c   :  { %10478 = vmatpush1.bf16.xpose.msra.mxu1 %v22021_v6 }
 0x921   :  { %4265 = vmatmul.mubr.f32.vlgmr.msra.gmra.mrb[0].mxu0 %v22225_v21 }
 0x923   :  { %8117 = vmatmul.mubr.f32.vlgmr.msra.gmra.mrb[0].mxu1 %v22225_v21  ;;  %v8126_v21 = vld [vmem:[%s17540_s2 + $0x18] sm:$0xff]  ;;  %s10573_s2 = scalar_lea.vmem %s8167_s18, 16 }
 0x924   :  { %p10574_p8 = scmp.ne.s32.totalorder %s8167_s18, %s10573_s2  ;;  %p10579_p10 = scmp.lt.s32.totalorder %s10577_s19, %s10573_s2 }
 0x926   :  { %p10580_p11 = por %p10579_p10, %p10578_p9 }
 0x928   :  { %p10581_p12 = pnand %p10580_p11, %p10574_p8 }
 0x9f4   :  { %v4266_v17 = vpop.f32.mrb[0].mxu0 }
 0x9f5   :  { %v8127_v52 = vsub.f32 %v4266_v17, %v8123_v12  ;;  %v4268_v35 = vpop.f32.mrb[1].mxu0 }
 0x9f6   :  { %v8128_v6 = vsub.f32 %v4268_v35, %v8124_v1  ;;  %v8118_v30 = vpop.f32.mrb[0].mxu1 }
 0x9f7   :  { %v8143_v29 = vmul.f32 %v8127_v52, %v8127_v52  ;;  %v8129_v47 = vsub.f32 %v8118_v30, %v8125_v46  ;;  %v8120_v42 = vpop.f32.mrb[1].mxu1 }
 0x9f8   :  { %v8144_v31 = vmul.f32 %v8128_v6, %v8128_v6  ;;  %v8130_v16 = vsub.f32 %v8120_v42, %v8126_v21 }
 0x9f9   :  { %v8145_v5 = vmul.f32 %v8129_v47, %v8129_v47 }
 0x9fa   :  { %v8147_v54 = vadd.f32 %v8144_v31, %v8143_v29  ;;  %v8146_v19 = vmul.f32 %v8130_v16, %v8130_v16 }
 0x9fc   :  { %v8148_v10 = vadd.f32 %v8147_v54, %v8145_v5 }
 0x9fe   :  { %v8149_v25 = vadd.f32 %v8148_v10, %v8146_v19 }
 0xa00   :  { %8150 = vadd.xlane.f32.xlu0 %v8149_v25 }
 0xa8d   :  { %v8151_v51 = vpop.xlane.xlu0 %8150 }
 0xa8e   :  { %v8152_v63 = vrot.slane %v8151_v51, 4 }
 0xa90   :  { %v8153_v59 = vadd.f32 %v8152_v63, %v8151_v51 }
 0xa92   :  { %v8154_v58 = vrot.slane %v8153_v59, 2 }
 0xa94   :  { %v8155_v32 = vadd.f32 %v8154_v58, %v8153_v59 }
 0xa96   :  { %v8156_v23 = vrot.slane %v8155_v32, 1 }
 0xa98   :  { %v8157_v34 = vadd.f32 %v8156_v23, %v8155_v32 }
 0xa9a   :  { %8159 = vst.msk [vmem:[#allocation5] sm:$0x1] %vm8158_vm0, %v8157_v34 }
 0xa9b   :  { %10584 = shalt.err (!%p10581_p12)
}
 0xa9c   :  { %s10585_s22 = scalar_lea.hbm %s17541_s3, 16 }
 0xa9d   :  { %p10586_p13 = scmp.ne.s32.totalorder %s17541_s3, %s10585_s22  ;;  %p10589_p0 = scmp.lt.u32.totalorder %s10585_s22, %s17541_s3 }
 0xa9f   :  { %p10591_p1 = pnand %p10589_p0, %p10586_p13 }
 0xaa1   :  { %10594 = shalt.err (!%p10591_p1)
}
 0xaa2   :  { %8169 = dma.vmem_to_hbm [thread:$0]  %s8167_s18, 16, %s17541_s3, [#allocation4]  }
 0xaa3   :  { %10597 = dma.done.wait [#allocation4], 16  }
 0xaa4   :  { %10598 = vsyncadd [#allocation4], 4294967280 }
 0xaa5   :  { %8173 = vsyncpa [#allocation3], 1 }
 0xaa6   :  { %8174 = vsyncpa [#allocation4], 1 }

</bundles_post_ra>
